<compile_context>
chip_gen: v6e
topology: v6e:2x2x1
jax: 0.10.0
libtpu: 0.0.40
codegen_flags: <defaults>
</compile_context>

<pallas_src>
import numpy as np
import jax
import jax.numpy as jnp
from jax.experimental import pallas as pl
from jax.experimental.pallas import tpu as pltpu


# ----------------------------- in-kernel helpers ---------------------------

def _mm(w_bf16, a):
    # weight (pre-cast bf16) @ activation, bf16 MXU operands, fp32 accumulation.
    return jnp.dot(w_bf16, a.astype(jnp.bfloat16), preferred_element_type=jnp.float32)


def _erf(x):
    # Abramowitz & Stegun 7.1.26 (|err| < 1.5e-7) -- keeps nn.GELU()'s exact erf
    # form with only exp/mul/add/select; the 1/(1+p|x|) uses the EUP via
    # pl.reciprocal(approx=True) (review: VALU is the contended unit here).
    a1, a2, a3, a4, a5 = 0.254829592, -0.284496736, 1.421413741, -1.453152027, 1.061405429
    p = 0.3275911
    ax = jnp.abs(x)
    t = pl.reciprocal(1.0 + p * ax, approx=True)
    poly = ((((a5 * t + a4) * t + a3) * t + a2) * t + a1) * t
    y = 1.0 - poly * jnp.exp(-ax * ax)
    return jnp.where(x < 0.0, -y, y)


def _gelu(x):
    return 0.5 * x * (1.0 + _erf(x * 0.7071067811865476))


def _instance_norm(z, eps=1e-5):
    # nn.InstanceNorm1d (affine=False): per-channel (row) normalization over the
    # spatial (lane) axis.  Single sweep: sum and sum-of-squares together.
    n = z.shape[1]
    inv_n = 1.0 / n
    s1 = jnp.sum(z, axis=1, keepdims=True)
    s2 = jnp.sum(z * z, axis=1, keepdims=True)
    mu = s1 * inv_n
    var = jnp.maximum(s2 * inv_n - mu * mu, 0.0)
    return (z - mu) * jax.lax.rsqrt(var + eps)


# ----------------------------- fused LNO kernel ----------------------------

def _lno_kernel(x_ref, pinv_ref, evec_ref,
                enc_w_ref, enc_b_ref,
                wr_ref, c1w_ref, c1b_ref, c2w_ref, c2b_ref, ww_ref, wb_ref,
                d1w_ref, d1b_ref, d2w_ref, d2b_ref,
                o_ref):
    n_blocks = wr_ref.shape[0]          # 4 Laplace blocks
    c0 = x_ref.shape[1]                 # start_channels

    # ---- encoder: C0 broadcast-FMAs on the VPU (C0 is tiny; an MXU matmul
    # ---- would waste ~97% of the contraction dim).  h: [W, N]
    x = x_ref[0]                                            # [C0, N]
    h = enc_w_ref[0] * x[0:1, :] + enc_b_ref[...]
    for c in range(1, c0):
        h = h + enc_w_ref[c] * x[c:c + 1, :]

    pinv_k = pinv_ref[...]                                  # [N, K] fp32
    evec_k = evec_ref[...]                                  # [K, N] fp32

    for i in range(n_blocks):                               # unrolled
        # -------- LaplaceConvolution(norm(h)) --------
        xn = _instance_norm(h)                              # [W, N]
        # spectral projection (contracts over full N -> kept fp32)
        xs = jnp.dot(xn, pinv_k, preferred_element_type=jnp.float32)    # [W, K]
        # per-mode channel mixing on the VPU (transpose-free):
        #   om[o, k] = sum_i xs[i, k] * Wr[i, o, k]
        om = jnp.sum(xs[:, None, :] * wr_ref[i], axis=0)    # [W_out, K]
        # inverse spectral transform
        xl = jnp.dot(om, evec_k, preferred_element_type=jnp.float32)    # [W, N]

        # -------- norm -> DecoderLaplace (form_i) --------
        x1 = _instance_norm(xl)
        x1 = _gelu(_mm(c1w_ref[i], x1) + c1b_ref[i])        # [W, N]
        x1 = _mm(c2w_ref[i], x1) + c2b_ref[i]

        # -------- 1x1-conv skip + add + GELU (fused epilogue) --------
        x2 = _mm(ww_ref[i], h) + wb_ref[i]
        h = _gelu(x1 + x2)

    # ---- decoder: W -> 2W -> out_channels, already lane-dense [out_c, N] ----
    y = _gelu(_mm(d1w_ref[...], h) + d1b_ref[...])          # [2W, N]
    o_ref[0] = _mm(d2w_ref[...], y) + d2b_ref[...]          # [out_c, N]


def _vmem_limit_bytes():
    # ~3/4 of physical VMEM: 96 MiB on v5e/v6e (128 MiB), 48 MiB on v7x (64 MiB).
    try:
        cap = int(getattr(pltpu.get_tpu_info(), "vmem_capacity_bytes",
                          128 * 1024 * 1024))
    except Exception:
        cap = 128 * 1024 * 1024
    return (cap * 3) // 4


def _lno_pallas_call(x, pinv_k, evec_k, p):
    B, C0, N = x.shape
    out_c = p['d2w'].shape[0]

    def resident(a):
        # full-array block, same block index every grid step -> stays in VMEM.
        return pl.BlockSpec(a.shape, lambda b, _nd=a.ndim: (0,) * _nd)

    args = (x, pinv_k, evec_k,
            p['enc_w'], p['enc_b'],
            p['wr'], p['c1w'], p['c1b'], p['c2w'], p['c2b'], p['ww'], p['wb'],
            p['d1w'], p['d1b'], p['d2w'], p['d2b'])

    in_specs = [pl.BlockSpec((1, C0, N), lambda b: (b, 0, 0))]
    in_specs += [resident(a) for a in args[1:]]

    return pl.pallas_call(
        _lno_kernel,
        grid=(B,),
        in_specs=in_specs,
        out_specs=pl.BlockSpec((1, out_c, N), lambda b: (b, 0, 0)),
        out_shape=jax.ShapeDtypeStruct((B, out_c, N), jnp.float32),
        compiler_params=pltpu.CompilerParams(
            dimension_semantics=("parallel",),
            vmem_limit_bytes=_vmem_limit_bytes()),
    )(*args)


# ----------------------------- host-side setup -----------------------------

def laplace_spectral_basis(n, coord_dist, modes):
    # LNO.laplacian_computation, hoisted to init time (the reference recomputes
    # an O(N^3) eigh + Gram inverse every forward call).
    # TODO(synk): eigh has no Pallas/TPU-kernel equivalent; done once on host.
    off = np.ones(n - 1)
    lap = (np.diag(off, -1) - 2.0 * np.diag(np.ones(n), 0)
           + np.diag(off, 1)) / (coord_dist ** 2)
    _, evecs = np.linalg.eigh(lap)
    # eigh's eigenvectors are orthonormal => inv(evecs.T@evecs)@evecs.T == evecs.T
    # (avoids the ill-conditioned fp32 Gram inverse of the reference).
    # The reference then consumes pinv[:, :modes] and, implicitly, evecs[:modes, :]
    # (first `modes` ROWS) -- kept faithful to that behavior.
    pinv_k = np.ascontiguousarray(evecs.T[:, :modes])       # [N, K]
    evec_k = np.ascontiguousarray(evecs[:modes, :])         # [K, N]
    return jnp.asarray(pinv_k, jnp.float32), jnp.asarray(evec_k, jnp.float32)


def lno_forward(x, params, pinv_k, evec_k):
    # x: [B, start_channels, N] -> [B, out_channels, N]; no wrapper-side
    # transposes: the kernel consumes and produces the PyTorch layout directly.
    return _lno_pallas_call(x.astype(jnp.float32), pinv_k, evec_k, params)


def init_params(key, start_channels, out_channels, modes, width, n_blocks=4):
    ks = iter(jax.random.split(key, 64))

    def unif(shape, bound):
        return jax.random.uniform(next(ks), shape, jnp.float32, -bound, bound)

    def conv_wb(cin, cout):
        # nn.Linear / nn.Conv1d(k=1) init: U(-1/sqrt(cin), 1/sqrt(cin)).
        # Weight stored [out, in] for the in-kernel  W @ x  layout.
        bound = 1.0 / float(cin) ** 0.5
        return unif((cout, cin), bound), unif((cout, 1), bound)

    p = {}
    # encoder Linear(C0 -> W): stored [C0, W, 1] for the in-kernel VPU FMAs.
    ew, eb = conv_wb(start_channels, width)
    p['enc_w'] = jnp.transpose(ew, (1, 0))[:, :, None]      # [C0, W, 1] fp32
    p['enc_b'] = eb                                         # [W, 1] fp32

    # LaplaceConvolution weights: real part of scale*rand(in, out, modes, cfloat)
    # (the imaginary part never reaches the real-valued output).  Stored
    # [block, in, out, modes] so the mode mix is a transpose-free VPU reduce.
    scale = 1.0 / (width + width)
    p['wr'] = scale * jax.random.uniform(next(ks), (n_blocks, width, width, modes),
                                         jnp.float32)

    def stack_blocks(cin, cout):
        w_l, b_l = [], []
        for _ in range(n_blocks):
            w_, b_ = conv_wb(cin, cout)
            w_l.append(w_); b_l.append(b_)
        return jnp.stack(w_l).astype(jnp.bfloat16), jnp.stack(b_l)

    p['c1w'], p['c1b'] = stack_blocks(width, width)          # form_i.conv1
    p['c2w'], p['c2b'] = stack_blocks(width, width)          # form_i.conv2
    p['ww'],  p['wb']  = stack_blocks(width, width)          # w_i (1x1 skip)

    d1w, d1b = conv_wb(width, 2 * width)                     # decoder.conv1
    d2w, d2b = conv_wb(2 * width, out_channels)              # decoder.conv2
    p['d1w'], p['d1b'] = d1w.astype(jnp.bfloat16), d1b
    p['d2w'], p['d2b'] = d2w.astype(jnp.bfloat16), d2b
    return p


if __name__ == "__main__":
    key = jax.random.PRNGKey(0)
    B, start_channels, N = 2, 4, 16
    width, modes, out_channels = 32, 8, 4

    pkey, xkey = jax.random.split(key)
    params = init_params(pkey, start_channels, out_channels, modes, width)
    x = jax.random.normal(xkey, (B, start_channels, N), jnp.float32)

    # Spectral basis depends only on (N, coord_dist, modes): computed once here.
    pinv_k, evec_k = laplace_spectral_basis(N, 0.2, modes)

    fwd = jax.jit(lno_forward)
    out = fwd(x, params, pinv_k, evec_k)
    jax.block_until_ready(out)
    assert out.shape == (B, out_channels, N), out.shape
    assert bool(jnp.all(jnp.isfinite(out)))
    print("KERNEL_OK")
</pallas_src>

<mosaic_0001>
module attributes {stable_mosaic.version = 11 : i64} {
  func.func @_lno_kernel(%arg0: i32, %arg1: memref<1x4x16xf32, #tpu.memory_space<vmem>>, %arg2: memref<16x8xf32, #tpu.memory_space<vmem>>, %arg3: memref<8x16xf32, #tpu.memory_space<vmem>>, %arg4: memref<4x32x1xf32, #tpu.memory_space<vmem>>, %arg5: memref<32x1xf32, #tpu.memory_space<vmem>>, %arg6: memref<4x32x32x8xf32, #tpu.memory_space<vmem>>, %arg7: memref<4x32x32xbf16, #tpu.memory_space<vmem>>, %arg8: memref<4x32x1xf32, #tpu.memory_space<vmem>>, %arg9: memref<4x32x32xbf16, #tpu.memory_space<vmem>>, %arg10: memref<4x32x1xf32, #tpu.memory_space<vmem>>, %arg11: memref<4x32x32xbf16, #tpu.memory_space<vmem>>, %arg12: memref<4x32x1xf32, #tpu.memory_space<vmem>>, %arg13: memref<64x32xbf16, #tpu.memory_space<vmem>>, %arg14: memref<64x1xf32, #tpu.memory_space<vmem>>, %arg15: memref<4x64xbf16, #tpu.memory_space<vmem>>, %arg16: memref<4x1xf32, #tpu.memory_space<vmem>>, %arg17: memref<1x4x16xf32, #tpu.memory_space<vmem>>) attributes {dimension_semantics = [#tpu.dimension_semantics<parallel>], iteration_bounds = array<i64: 2>, scalar_prefetch = 0 : i64, scratch_operands = 0 : i64, tpu.core_type = #tpu.core_type<tc>, window_params = [{transform_indices = @transform_0, window_bounds = array<i64: 1, 4, 16>}, {pipeline_mode = #tpu.pipeline_mode<synchronous>, transform_indices = @transform_1, window_bounds = array<i64: 16, 8>}, {pipeline_mode = #tpu.pipeline_mode<synchronous>, transform_indices = @transform_2, window_bounds = array<i64: 8, 16>}, {pipeline_mode = #tpu.pipeline_mode<synchronous>, transform_indices = @transform_3, window_bounds = array<i64: 4, 32, 1>}, {pipeline_mode = #tpu.pipeline_mode<synchronous>, transform_indices = @transform_4, window_bounds = array<i64: 32, 1>}, {pipeline_mode = #tpu.pipeline_mode<synchronous>, transform_indices = @transform_5, window_bounds = array<i64: 4, 32, 32, 8>}, {pipeline_mode = #tpu.pipeline_mode<synchronous>, transform_indices = @transform_6, window_bounds = array<i64: 4, 32, 32>}, {pipeline_mode = #tpu.pipeline_mode<synchronous>, transform_indices = @transform_7, window_bounds = array<i64: 4, 32, 1>}, {pipeline_mode = #tpu.pipeline_mode<synchronous>, transform_indices = @transform_8, window_bounds = array<i64: 4, 32, 32>}, {pipeline_mode = #tpu.pipeline_mode<synchronous>, transform_indices = @transform_9, window_bounds = array<i64: 4, 32, 1>}, {pipeline_mode = #tpu.pipeline_mode<synchronous>, transform_indices = @transform_10, window_bounds = array<i64: 4, 32, 32>}, {pipeline_mode = #tpu.pipeline_mode<synchronous>, transform_indices = @transform_11, window_bounds = array<i64: 4, 32, 1>}, {pipeline_mode = #tpu.pipeline_mode<synchronous>, transform_indices = @transform_12, window_bounds = array<i64: 64, 32>}, {pipeline_mode = #tpu.pipeline_mode<synchronous>, transform_indices = @transform_13, window_bounds = array<i64: 64, 1>}, {pipeline_mode = #tpu.pipeline_mode<synchronous>, transform_indices = @transform_14, window_bounds = array<i64: 4, 64>}, {pipeline_mode = #tpu.pipeline_mode<synchronous>, transform_indices = @transform_15, window_bounds = array<i64: 4, 1>}, {transform_indices = @transform_16, window_bounds = array<i64: 1, 4, 16>}]} {
    %c0 = arith.constant 0 : index
    %c0_0 = arith.constant 0 : index
    %c0_1 = arith.constant 0 : index
    %0 = vector.load %arg1[%c0, %c0_0, %c0_1] : memref<1x4x16xf32, #tpu.memory_space<vmem>>, vector<1x4x16xf32>
    %1 = vector.shape_cast %0 : vector<1x4x16xf32> to vector<4x16xf32>
    %c0_2 = arith.constant 0 : index
    %c0_3 = arith.constant 0 : index
    %c0_4 = arith.constant 0 : index
    %2 = vector.load %arg4[%c0_2, %c0_3, %c0_4] : memref<4x32x1xf32, #tpu.memory_space<vmem>>, vector<1x32x1xf32>
    %3 = vector.shape_cast %2 : vector<1x32x1xf32> to vector<32x1xf32>
    %4 = vector.extract_strided_slice %1 {offsets = [0, 0], sizes = [1, 16], strides = [1, 1]} : vector<4x16xf32> to vector<1x16xf32>
    %5 = vector.broadcast %3 : vector<32x1xf32> to vector<32x16xf32>
    %6 = vector.broadcast %4 : vector<1x16xf32> to vector<32x16xf32>
    %7 = arith.mulf %5, %6 : vector<32x16xf32>
    %c0_5 = arith.constant 0 : index
    %c0_6 = arith.constant 0 : index
    %8 = vector.load %arg5[%c0_5, %c0_6] : memref<32x1xf32, #tpu.memory_space<vmem>>, vector<32x1xf32>
    %9 = vector.broadcast %8 : vector<32x1xf32> to vector<32x16xf32>
    %10 = arith.addf %7, %9 : vector<32x16xf32>
    %c1 = arith.constant 1 : index
    %c0_7 = arith.constant 0 : index
    %c0_8 = arith.constant 0 : index
    %11 = vector.load %arg4[%c1, %c0_7, %c0_8] : memref<4x32x1xf32, #tpu.memory_space<vmem>>, vector<1x32x1xf32>
    %12 = vector.shape_cast %11 : vector<1x32x1xf32> to vector<32x1xf32>
    %13 = vector.extract_strided_slice %1 {offsets = [1, 0], sizes = [1, 16], strides = [1, 1]} : vector<4x16xf32> to vector<1x16xf32>
    %14 = vector.broadcast %12 : vector<32x1xf32> to vector<32x16xf32>
    %15 = vector.broadcast %13 : vector<1x16xf32> to vector<32x16xf32>
    %16 = arith.mulf %14, %15 : vector<32x16xf32>
    %17 = arith.addf %10, %16 : vector<32x16xf32>
    %c2 = arith.constant 2 : index
    %c0_9 = arith.constant 0 : index
    %c0_10 = arith.constant 0 : index
    %18 = vector.load %arg4[%c2, %c0_9, %c0_10] : memref<4x32x1xf32, #tpu.memory_space<vmem>>, vector<1x32x1xf32>
    %19 = vector.shape_cast %18 : vector<1x32x1xf32> to vector<32x1xf32>
    %20 = vector.extract_strided_slice %1 {offsets = [2, 0], sizes = [1, 16], strides = [1, 1]} : vector<4x16xf32> to vector<1x16xf32>
    %21 = vector.broadcast %19 : vector<32x1xf32> to vector<32x16xf32>
    %22 = vector.broadcast %20 : vector<1x16xf32> to vector<32x16xf32>
    %23 = arith.mulf %21, %22 : vector<32x16xf32>
    %24 = arith.addf %17, %23 : vector<32x16xf32>
    %c3 = arith.constant 3 : index
    %c0_11 = arith.constant 0 : index
    %c0_12 = arith.constant 0 : index
    %25 = vector.load %arg4[%c3, %c0_11, %c0_12] : memref<4x32x1xf32, #tpu.memory_space<vmem>>, vector<1x32x1xf32>
    %26 = vector.shape_cast %25 : vector<1x32x1xf32> to vector<32x1xf32>
    %27 = vector.extract_strided_slice %1 {offsets = [3, 0], sizes = [1, 16], strides = [1, 1]} : vector<4x16xf32> to vector<1x16xf32>
    %28 = vector.broadcast %26 : vector<32x1xf32> to vector<32x16xf32>
    %29 = vector.broadcast %27 : vector<1x16xf32> to vector<32x16xf32>
    %30 = arith.mulf %28, %29 : vector<32x16xf32>
    %31 = arith.addf %24, %30 : vector<32x16xf32>
    %c0_13 = arith.constant 0 : index
    %c0_14 = arith.constant 0 : index
    %32 = vector.load %arg2[%c0_13, %c0_14] : memref<16x8xf32, #tpu.memory_space<vmem>>, vector<16x8xf32>
    %c0_15 = arith.constant 0 : index
    %c0_16 = arith.constant 0 : index
    %33 = vector.load %arg3[%c0_15, %c0_16] : memref<8x16xf32, #tpu.memory_space<vmem>>, vector<8x16xf32>
    %cst = arith.constant dense<0.000000e+00> : vector<32xf32>
    %34 = vector.multi_reduction <add>, %31, %cst [1] : vector<32x16xf32> to vector<32xf32>
    %35 = vector.shape_cast %34 : vector<32xf32> to vector<32x1xf32>
    %36 = arith.mulf %31, %31 : vector<32x16xf32>
    %cst_17 = arith.constant dense<0.000000e+00> : vector<32xf32>
    %37 = vector.multi_reduction <add>, %36, %cst_17 [1] : vector<32x16xf32> to vector<32xf32>
    %38 = vector.shape_cast %37 : vector<32xf32> to vector<32x1xf32>
    %cst_18 = arith.constant 6.250000e-02 : f32
    %39 = vector.broadcast %cst_18 : f32 to vector<32x1xf32>
    %40 = arith.mulf %35, %39 : vector<32x1xf32>
    %cst_19 = arith.constant 6.250000e-02 : f32
    %41 = vector.broadcast %cst_19 : f32 to vector<32x1xf32>
    %42 = arith.mulf %38, %41 : vector<32x1xf32>
    %43 = arith.mulf %40, %40 : vector<32x1xf32>
    %44 = arith.subf %42, %43 : vector<32x1xf32>
    %cst_20 = arith.constant 0.000000e+00 : f32
    %45 = vector.broadcast %cst_20 : f32 to vector<32x1xf32>
    %46 = arith.maximumf %44, %45 : vector<32x1xf32>
    %47 = vector.broadcast %40 : vector<32x1xf32> to vector<32x16xf32>
    %48 = arith.subf %31, %47 : vector<32x16xf32>
    %cst_21 = arith.constant 9.99999974E-6 : f32
    %49 = vector.broadcast %cst_21 : f32 to vector<32x1xf32>
    %50 = arith.addf %46, %49 : vector<32x1xf32>
    %51 = math.rsqrt %50 : vector<32x1xf32>
    %52 = vector.broadcast %51 : vector<32x1xf32> to vector<32x16xf32>
    %53 = arith.mulf %48, %52 : vector<32x16xf32>
    %cst_22 = arith.constant dense<0.000000e+00> : vector<32x8xf32>
    %54 = tpu.matmul %53, %32, %cst_22 {dimension_numbers = #tpu.dot_dimension_numbers<[1], [0], [0], [1], [0, 0, 1, 1], [], []>} : vector<32x16xf32>, vector<16x8xf32>, vector<32x8xf32> -> vector<32x8xf32>
    %55 = vector.shape_cast %54 : vector<32x8xf32> to vector<32x1x8xf32>
    %c0_23 = arith.constant 0 : index
    %c0_24 = arith.constant 0 : index
    %c0_25 = arith.constant 0 : index
    %c0_26 = arith.constant 0 : index
    %56 = vector.load %arg6[%c0_23, %c0_24, %c0_25, %c0_26] : memref<4x32x32x8xf32, #tpu.memory_space<vmem>>, vector<1x32x32x8xf32>
    %57 = vector.shape_cast %56 : vector<1x32x32x8xf32> to vector<32x32x8xf32>
    %58 = vector.broadcast %55 : vector<32x1x8xf32> to vector<32x32x8xf32>
    %59 = arith.mulf %58, %57 : vector<32x32x8xf32>
    %cst_27 = arith.constant dense<0.000000e+00> : vector<32x8xf32>
    %60 = vector.multi_reduction <add>, %59, %cst_27 [0] : vector<32x32x8xf32> to vector<32x8xf32>
    %cst_28 = arith.constant dense<0.000000e+00> : vector<32x16xf32>
    %61 = tpu.matmul %60, %33, %cst_28 {dimension_numbers = #tpu.dot_dimension_numbers<[1], [0], [0], [1], [0, 0, 1, 1], [], []>} : vector<32x8xf32>, vector<8x16xf32>, vector<32x16xf32> -> vector<32x16xf32>
    %cst_29 = arith.constant dense<0.000000e+00> : vector<32xf32>
    %62 = vector.multi_reduction <add>, %61, %cst_29 [1] : vector<32x16xf32> to vector<32xf32>
    %63 = vector.shape_cast %62 : vector<32xf32> to vector<32x1xf32>
    %64 = arith.mulf %61, %61 : vector<32x16xf32>
    %cst_30 = arith.constant dense<0.000000e+00> : vector<32xf32>
    %65 = vector.multi_reduction <add>, %64, %cst_30 [1] : vector<32x16xf32> to vector<32xf32>
    %66 = vector.shape_cast %65 : vector<32xf32> to vector<32x1xf32>
    %cst_31 = arith.constant 6.250000e-02 : f32
    %67 = vector.broadcast %cst_31 : f32 to vector<32x1xf32>
    %68 = arith.mulf %63, %67 : vector<32x1xf32>
    %cst_32 = arith.constant 6.250000e-02 : f32
    %69 = vector.broadcast %cst_32 : f32 to vector<32x1xf32>
    %70 = arith.mulf %66, %69 : vector<32x1xf32>
    %71 = arith.mulf %68, %68 : vector<32x1xf32>
    %72 = arith.subf %70, %71 : vector<32x1xf32>
    %cst_33 = arith.constant 0.000000e+00 : f32
    %73 = vector.broadcast %cst_33 : f32 to vector<32x1xf32>
    %74 = arith.maximumf %72, %73 : vector<32x1xf32>
    %75 = vector.broadcast %68 : vector<32x1xf32> to vector<32x16xf32>
    %76 = arith.subf %61, %75 : vector<32x16xf32>
    %cst_34 = arith.constant 9.99999974E-6 : f32
    %77 = vector.broadcast %cst_34 : f32 to vector<32x1xf32>
    %78 = arith.addf %74, %77 : vector<32x1xf32>
    %79 = math.rsqrt %78 : vector<32x1xf32>
    %80 = vector.broadcast %79 : vector<32x1xf32> to vector<32x16xf32>
    %81 = arith.mulf %76, %80 : vector<32x16xf32>
    %c0_35 = arith.constant 0 : index
    %c0_36 = arith.constant 0 : index
    %c0_37 = arith.constant 0 : index
    %82 = vector.load %arg7[%c0_35, %c0_36, %c0_37] : memref<4x32x32xbf16, #tpu.memory_space<vmem>>, vector<1x32x32xbf16>
    %83 = vector.shape_cast %82 : vector<1x32x32xbf16> to vector<32x32xbf16>
    %84 = arith.truncf %81 : vector<32x16xf32> to vector<32x16xbf16>
    %cst_38 = arith.constant dense<0.000000e+00> : vector<32x16xf32>
    %85 = tpu.matmul %83, %84, %cst_38 {dimension_numbers = #tpu.dot_dimension_numbers<[1], [0], [0], [1], [0, 0, 1, 1], [], []>} : vector<32x32xbf16>, vector<32x16xbf16>, vector<32x16xf32> -> vector<32x16xf32>
    %c0_39 = arith.constant 0 : index
    %c0_40 = arith.constant 0 : index
    %c0_41 = arith.constant 0 : index
    %86 = vector.load %arg8[%c0_39, %c0_40, %c0_41] : memref<4x32x1xf32, #tpu.memory_space<vmem>>, vector<1x32x1xf32>
    %87 = vector.shape_cast %86 : vector<1x32x1xf32> to vector<32x1xf32>
    %88 = vector.broadcast %87 : vector<32x1xf32> to vector<32x16xf32>
    %89 = arith.addf %85, %88 : vector<32x16xf32>
    %cst_42 = arith.constant 5.000000e-01 : f32
    %90 = vector.broadcast %cst_42 : f32 to vector<32x16xf32>
    %91 = arith.mulf %90, %89 : vector<32x16xf32>
    %cst_43 = arith.constant 0.707106769 : f32
    %92 = vector.broadcast %cst_43 : f32 to vector<32x16xf32>
    %93 = arith.mulf %89, %92 : vector<32x16xf32>
    %94 = math.absf %93 : vector<32x16xf32>
    %cst_44 = arith.constant 0.327591091 : f32
    %95 = vector.broadcast %cst_44 : f32 to vector<32x16xf32>
    %96 = arith.mulf %95, %94 : vector<32x16xf32>
    %cst_45 = arith.constant 1.000000e+00 : f32
    %97 = vector.broadcast %cst_45 : f32 to vector<32x16xf32>
    %98 = arith.addf %97, %96 : vector<32x16xf32>
    %99 = tpu.reciprocal %98 {approx = true} : vector<32x16xf32> -> vector<32x16xf32>
    %cst_46 = arith.constant 1.06140542 : f32
    %100 = vector.broadcast %cst_46 : f32 to vector<32x16xf32>
    %101 = arith.mulf %100, %99 : vector<32x16xf32>
    %cst_47 = arith.constant -1.45315206 : f32
    %102 = vector.broadcast %cst_47 : f32 to vector<32x16xf32>
    %103 = arith.addf %101, %102 : vector<32x16xf32>
    %104 = arith.mulf %103, %99 : vector<32x16xf32>
    %cst_48 = arith.constant 1.42141378 : f32
    %105 = vector.broadcast %cst_48 : f32 to vector<32x16xf32>
    %106 = arith.addf %104, %105 : vector<32x16xf32>
    %107 = arith.mulf %106, %99 : vector<32x16xf32>
    %cst_49 = arith.constant -0.284496725 : f32
    %108 = vector.broadcast %cst_49 : f32 to vector<32x16xf32>
    %109 = arith.addf %107, %108 : vector<32x16xf32>
    %110 = arith.mulf %109, %99 : vector<32x16xf32>
    %cst_50 = arith.constant 0.254829586 : f32
    %111 = vector.broadcast %cst_50 : f32 to vector<32x16xf32>
    %112 = arith.addf %110, %111 : vector<32x16xf32>
    %113 = arith.mulf %112, %99 : vector<32x16xf32>
    %cst_51 = arith.constant 0.000000e+00 : f32
    %114 = vector.broadcast %cst_51 : f32 to vector<32x16xf32>
    %115 = arith.subf %114, %94 : vector<32x16xf32>
    %116 = arith.mulf %115, %94 : vector<32x16xf32>
    %117 = math.exp %116 : vector<32x16xf32>
    %118 = arith.mulf %113, %117 : vector<32x16xf32>
    %cst_52 = arith.constant 1.000000e+00 : f32
    %119 = vector.broadcast %cst_52 : f32 to vector<32x16xf32>
    %120 = arith.subf %119, %118 : vector<32x16xf32>
    %cst_53 = arith.constant 0.000000e+00 : f32
    %121 = vector.broadcast %cst_53 : f32 to vector<32x16xf32>
    %122 = arith.cmpf olt, %93, %121 : vector<32x16xf32>
    %cst_54 = arith.constant 0.000000e+00 : f32
    %123 = vector.broadcast %cst_54 : f32 to vector<32x16xf32>
    %124 = arith.subf %123, %120 : vector<32x16xf32>
    %125 = arith.select %122, %124, %120 : vector<32x16xi1>, vector<32x16xf32>
    %cst_55 = arith.constant 1.000000e+00 : f32
    %126 = vector.broadcast %cst_55 : f32 to vector<32x16xf32>
    %127 = arith.addf %126, %125 : vector<32x16xf32>
    %128 = arith.mulf %91, %127 : vector<32x16xf32>
    %c0_56 = arith.constant 0 : index
    %c0_57 = arith.constant 0 : index
    %c0_58 = arith.constant 0 : index
    %129 = vector.load %arg9[%c0_56, %c0_57, %c0_58] : memref<4x32x32xbf16, #tpu.memory_space<vmem>>, vector<1x32x32xbf16>
    %130 = vector.shape_cast %129 : vector<1x32x32xbf16> to vector<32x32xbf16>
    %131 = arith.truncf %128 : vector<32x16xf32> to vector<32x16xbf16>
    %cst_59 = arith.constant dense<0.000000e+00> : vector<32x16xf32>
    %132 = tpu.matmul %130, %131, %cst_59 {dimension_numbers = #tpu.dot_dimension_numbers<[1], [0], [0], [1], [0, 0, 1, 1], [], []>} : vector<32x32xbf16>, vector<32x16xbf16>, vector<32x16xf32> -> vector<32x16xf32>
    %c0_60 = arith.constant 0 : index
    %c0_61 = arith.constant 0 : index
    %c0_62 = arith.constant 0 : index
    %133 = vector.load %arg10[%c0_60, %c0_61, %c0_62] : memref<4x32x1xf32, #tpu.memory_space<vmem>>, vector<1x32x1xf32>
    %134 = vector.shape_cast %133 : vector<1x32x1xf32> to vector<32x1xf32>
    %135 = vector.broadcast %134 : vector<32x1xf32> to vector<32x16xf32>
    %136 = arith.addf %132, %135 : vector<32x16xf32>
    %c0_63 = arith.constant 0 : index
    %c0_64 = arith.constant 0 : index
    %c0_65 = arith.constant 0 : index
    %137 = vector.load %arg11[%c0_63, %c0_64, %c0_65] : memref<4x32x32xbf16, #tpu.memory_space<vmem>>, vector<1x32x32xbf16>
    %138 = vector.shape_cast %137 : vector<1x32x32xbf16> to vector<32x32xbf16>
    %139 = arith.truncf %31 : vector<32x16xf32> to vector<32x16xbf16>
    %cst_66 = arith.constant dense<0.000000e+00> : vector<32x16xf32>
    %140 = tpu.matmul %138, %139, %cst_66 {dimension_numbers = #tpu.dot_dimension_numbers<[1], [0], [0], [1], [0, 0, 1, 1], [], []>} : vector<32x32xbf16>, vector<32x16xbf16>, vector<32x16xf32> -> vector<32x16xf32>
    %c0_67 = arith.constant 0 : index
    %c0_68 = arith.constant 0 : index
    %c0_69 = arith.constant 0 : index
    %141 = vector.load %arg12[%c0_67, %c0_68, %c0_69] : memref<4x32x1xf32, #tpu.memory_space<vmem>>, vector<1x32x1xf32>
    %142 = vector.shape_cast %141 : vector<1x32x1xf32> to vector<32x1xf32>
    %143 = vector.broadcast %142 : vector<32x1xf32> to vector<32x16xf32>
    %144 = arith.addf %140, %143 : vector<32x16xf32>
    %145 = arith.addf %136, %144 : vector<32x16xf32>
    %cst_70 = arith.constant 5.000000e-01 : f32
    %146 = vector.broadcast %cst_70 : f32 to vector<32x16xf32>
    %147 = arith.mulf %146, %145 : vector<32x16xf32>
    %cst_71 = arith.constant 0.707106769 : f32
    %148 = vector.broadcast %cst_71 : f32 to vector<32x16xf32>
    %149 = arith.mulf %145, %148 : vector<32x16xf32>
    %150 = math.absf %149 : vector<32x16xf32>
    %cst_72 = arith.constant 0.327591091 : f32
    %151 = vector.broadcast %cst_72 : f32 to vector<32x16xf32>
    %152 = arith.mulf %151, %150 : vector<32x16xf32>
    %cst_73 = arith.constant 1.000000e+00 : f32
    %153 = vector.broadcast %cst_73 : f32 to vector<32x16xf32>
    %154 = arith.addf %153, %152 : vector<32x16xf32>
    %155 = tpu.reciprocal %154 {approx = true} : vector<32x16xf32> -> vector<32x16xf32>
    %cst_74 = arith.constant 1.06140542 : f32
    %156 = vector.broadcast %cst_74 : f32 to vector<32x16xf32>
    %157 = arith.mulf %156, %155 : vector<32x16xf32>
    %cst_75 = arith.constant -1.45315206 : f32
    %158 = vector.broadcast %cst_75 : f32 to vector<32x16xf32>
    %159 = arith.addf %157, %158 : vector<32x16xf32>
    %160 = arith.mulf %159, %155 : vector<32x16xf32>
    %cst_76 = arith.constant 1.42141378 : f32
    %161 = vector.broadcast %cst_76 : f32 to vector<32x16xf32>
    %162 = arith.addf %160, %161 : vector<32x16xf32>
    %163 = arith.mulf %162, %155 : vector<32x16xf32>
    %cst_77 = arith.constant -0.284496725 : f32
    %164 = vector.broadcast %cst_77 : f32 to vector<32x16xf32>
    %165 = arith.addf %163, %164 : vector<32x16xf32>
    %166 = arith.mulf %165, %155 : vector<32x16xf32>
    %cst_78 = arith.constant 0.254829586 : f32
    %167 = vector.broadcast %cst_78 : f32 to vector<32x16xf32>
    %168 = arith.addf %166, %167 : vector<32x16xf32>
    %169 = arith.mulf %168, %155 : vector<32x16xf32>
    %cst_79 = arith.constant 0.000000e+00 : f32
    %170 = vector.broadcast %cst_79 : f32 to vector<32x16xf32>
    %171 = arith.subf %170, %150 : vector<32x16xf32>
    %172 = arith.mulf %171, %150 : vector<32x16xf32>
    %173 = math.exp %172 : vector<32x16xf32>
    %174 = arith.mulf %169, %173 : vector<32x16xf32>
    %cst_80 = arith.constant 1.000000e+00 : f32
    %175 = vector.broadcast %cst_80 : f32 to vector<32x16xf32>
    %176 = arith.subf %175, %174 : vector<32x16xf32>
    %cst_81 = arith.constant 0.000000e+00 : f32
    %177 = vector.broadcast %cst_81 : f32 to vector<32x16xf32>
    %178 = arith.cmpf olt, %149, %177 : vector<32x16xf32>
    %cst_82 = arith.constant 0.000000e+00 : f32
    %179 = vector.broadcast %cst_82 : f32 to vector<32x16xf32>
    %180 = arith.subf %179, %176 : vector<32x16xf32>
    %181 = arith.select %178, %180, %176 : vector<32x16xi1>, vector<32x16xf32>
    %cst_83 = arith.constant 1.000000e+00 : f32
    %182 = vector.broadcast %cst_83 : f32 to vector<32x16xf32>
    %183 = arith.addf %182, %181 : vector<32x16xf32>
    %184 = arith.mulf %147, %183 : vector<32x16xf32>
    %cst_84 = arith.constant dense<0.000000e+00> : vector<32xf32>
    %185 = vector.multi_reduction <add>, %184, %cst_84 [1] : vector<32x16xf32> to vector<32xf32>
    %186 = vector.shape_cast %185 : vector<32xf32> to vector<32x1xf32>
    %187 = arith.mulf %184, %184 : vector<32x16xf32>
    %cst_85 = arith.constant dense<0.000000e+00> : vector<32xf32>
    %188 = vector.multi_reduction <add>, %187, %cst_85 [1] : vector<32x16xf32> to vector<32xf32>
    %189 = vector.shape_cast %188 : vector<32xf32> to vector<32x1xf32>
    %cst_86 = arith.constant 6.250000e-02 : f32
    %190 = vector.broadcast %cst_86 : f32 to vector<32x1xf32>
    %191 = arith.mulf %186, %190 : vector<32x1xf32>
    %cst_87 = arith.constant 6.250000e-02 : f32
    %192 = vector.broadcast %cst_87 : f32 to vector<32x1xf32>
    %193 = arith.mulf %189, %192 : vector<32x1xf32>
    %194 = arith.mulf %191, %191 : vector<32x1xf32>
    %195 = arith.subf %193, %194 : vector<32x1xf32>
    %cst_88 = arith.constant 0.000000e+00 : f32
    %196 = vector.broadcast %cst_88 : f32 to vector<32x1xf32>
    %197 = arith.maximumf %195, %196 : vector<32x1xf32>
    %198 = vector.broadcast %191 : vector<32x1xf32> to vector<32x16xf32>
    %199 = arith.subf %184, %198 : vector<32x16xf32>
    %cst_89 = arith.constant 9.99999974E-6 : f32
    %200 = vector.broadcast %cst_89 : f32 to vector<32x1xf32>
    %201 = arith.addf %197, %200 : vector<32x1xf32>
    %202 = math.rsqrt %201 : vector<32x1xf32>
    %203 = vector.broadcast %202 : vector<32x1xf32> to vector<32x16xf32>
    %204 = arith.mulf %199, %203 : vector<32x16xf32>
    %cst_90 = arith.constant dense<0.000000e+00> : vector<32x8xf32>
    %205 = tpu.matmul %204, %32, %cst_90 {dimension_numbers = #tpu.dot_dimension_numbers<[1], [0], [0], [1], [0, 0, 1, 1], [], []>} : vector<32x16xf32>, vector<16x8xf32>, vector<32x8xf32> -> vector<32x8xf32>
    %206 = vector.shape_cast %205 : vector<32x8xf32> to vector<32x1x8xf32>
    %c1_91 = arith.constant 1 : index
    %c0_92 = arith.constant 0 : index
    %c0_93 = arith.constant 0 : index
    %c0_94 = arith.constant 0 : index
    %207 = vector.load %arg6[%c1_91, %c0_92, %c0_93, %c0_94] : memref<4x32x32x8xf32, #tpu.memory_space<vmem>>, vector<1x32x32x8xf32>
    %208 = vector.shape_cast %207 : vector<1x32x32x8xf32> to vector<32x32x8xf32>
    %209 = vector.broadcast %206 : vector<32x1x8xf32> to vector<32x32x8xf32>
    %210 = arith.mulf %209, %208 : vector<32x32x8xf32>
    %cst_95 = arith.constant dense<0.000000e+00> : vector<32x8xf32>
    %211 = vector.multi_reduction <add>, %210, %cst_95 [0] : vector<32x32x8xf32> to vector<32x8xf32>
    %cst_96 = arith.constant dense<0.000000e+00> : vector<32x16xf32>
    %212 = tpu.matmul %211, %33, %cst_96 {dimension_numbers = #tpu.dot_dimension_numbers<[1], [0], [0], [1], [0, 0, 1, 1], [], []>} : vector<32x8xf32>, vector<8x16xf32>, vector<32x16xf32> -> vector<32x16xf32>
    %cst_97 = arith.constant dense<0.000000e+00> : vector<32xf32>
    %213 = vector.multi_reduction <add>, %212, %cst_97 [1] : vector<32x16xf32> to vector<32xf32>
    %214 = vector.shape_cast %213 : vector<32xf32> to vector<32x1xf32>
    %215 = arith.mulf %212, %212 : vector<32x16xf32>
    %cst_98 = arith.constant dense<0.000000e+00> : vector<32xf32>
    %216 = vector.multi_reduction <add>, %215, %cst_98 [1] : vector<32x16xf32> to vector<32xf32>
    %217 = vector.shape_cast %216 : vector<32xf32> to vector<32x1xf32>
    %cst_99 = arith.constant 6.250000e-02 : f32
    %218 = vector.broadcast %cst_99 : f32 to vector<32x1xf32>
    %219 = arith.mulf %214, %218 : vector<32x1xf32>
    %cst_100 = arith.constant 6.250000e-02 : f32
    %220 = vector.broadcast %cst_100 : f32 to vector<32x1xf32>
    %221 = arith.mulf %217, %220 : vector<32x1xf32>
    %222 = arith.mulf %219, %219 : vector<32x1xf32>
    %223 = arith.subf %221, %222 : vector<32x1xf32>
    %cst_101 = arith.constant 0.000000e+00 : f32
    %224 = vector.broadcast %cst_101 : f32 to vector<32x1xf32>
    %225 = arith.maximumf %223, %224 : vector<32x1xf32>
    %226 = vector.broadcast %219 : vector<32x1xf32> to vector<32x16xf32>
    %227 = arith.subf %212, %226 : vector<32x16xf32>
    %cst_102 = arith.constant 9.99999974E-6 : f32
    %228 = vector.broadcast %cst_102 : f32 to vector<32x1xf32>
    %229 = arith.addf %225, %228 : vector<32x1xf32>
    %230 = math.rsqrt %229 : vector<32x1xf32>
    %231 = vector.broadcast %230 : vector<32x1xf32> to vector<32x16xf32>
    %232 = arith.mulf %227, %231 : vector<32x16xf32>
    %c1_103 = arith.constant 1 : index
    %c0_104 = arith.constant 0 : index
    %c0_105 = arith.constant 0 : index
    %233 = vector.load %arg7[%c1_103, %c0_104, %c0_105] : memref<4x32x32xbf16, #tpu.memory_space<vmem>>, vector<1x32x32xbf16>
    %234 = vector.shape_cast %233 : vector<1x32x32xbf16> to vector<32x32xbf16>
    %235 = arith.truncf %232 : vector<32x16xf32> to vector<32x16xbf16>
    %cst_106 = arith.constant dense<0.000000e+00> : vector<32x16xf32>
    %236 = tpu.matmul %234, %235, %cst_106 {dimension_numbers = #tpu.dot_dimension_numbers<[1], [0], [0], [1], [0, 0, 1, 1], [], []>} : vector<32x32xbf16>, vector<32x16xbf16>, vector<32x16xf32> -> vector<32x16xf32>
    %c1_107 = arith.constant 1 : index
    %c0_108 = arith.constant 0 : index
    %c0_109 = arith.constant 0 : index
    %237 = vector.load %arg8[%c1_107, %c0_108, %c0_109] : memref<4x32x1xf32, #tpu.memory_space<vmem>>, vector<1x32x1xf32>
    %238 = vector.shape_cast %237 : vector<1x32x1xf32> to vector<32x1xf32>
    %239 = vector.broadcast %238 : vector<32x1xf32> to vector<32x16xf32>
    %240 = arith.addf %236, %239 : vector<32x16xf32>
    %cst_110 = arith.constant 5.000000e-01 : f32
    %241 = vector.broadcast %cst_110 : f32 to vector<32x16xf32>
    %242 = arith.mulf %241, %240 : vector<32x16xf32>
    %cst_111 = arith.constant 0.707106769 : f32
    %243 = vector.broadcast %cst_111 : f32 to vector<32x16xf32>
    %244 = arith.mulf %240, %243 : vector<32x16xf32>
    %245 = math.absf %244 : vector<32x16xf32>
    %cst_112 = arith.constant 0.327591091 : f32
    %246 = vector.broadcast %cst_112 : f32 to vector<32x16xf32>
    %247 = arith.mulf %246, %245 : vector<32x16xf32>
    %cst_113 = arith.constant 1.000000e+00 : f32
    %248 = vector.broadcast %cst_113 : f32 to vector<32x16xf32>
    %249 = arith.addf %248, %247 : vector<32x16xf32>
    %250 = tpu.reciprocal %249 {approx = true} : vector<32x16xf32> -> vector<32x16xf32>
    %cst_114 = arith.constant 1.06140542 : f32
    %251 = vector.broadcast %cst_114 : f32 to vector<32x16xf32>
    %252 = arith.mulf %251, %250 : vector<32x16xf32>
    %cst_115 = arith.constant -1.45315206 : f32
    %253 = vector.broadcast %cst_115 : f32 to vector<32x16xf32>
    %254 = arith.addf %252, %253 : vector<32x16xf32>
    %255 = arith.mulf %254, %250 : vector<32x16xf32>
    %cst_116 = arith.constant 1.42141378 : f32
    %256 = vector.broadcast %cst_116 : f32 to vector<32x16xf32>
    %257 = arith.addf %255, %256 : vector<32x16xf32>
    %258 = arith.mulf %257, %250 : vector<32x16xf32>
    %cst_117 = arith.constant -0.284496725 : f32
    %259 = vector.broadcast %cst_117 : f32 to vector<32x16xf32>
    %260 = arith.addf %258, %259 : vector<32x16xf32>
    %261 = arith.mulf %260, %250 : vector<32x16xf32>
    %cst_118 = arith.constant 0.254829586 : f32
    %262 = vector.broadcast %cst_118 : f32 to vector<32x16xf32>
    %263 = arith.addf %261, %262 : vector<32x16xf32>
    %264 = arith.mulf %263, %250 : vector<32x16xf32>
    %cst_119 = arith.constant 0.000000e+00 : f32
    %265 = vector.broadcast %cst_119 : f32 to vector<32x16xf32>
    %266 = arith.subf %265, %245 : vector<32x16xf32>
    %267 = arith.mulf %266, %245 : vector<32x16xf32>
    %268 = math.exp %267 : vector<32x16xf32>
    %269 = arith.mulf %264, %268 : vector<32x16xf32>
    %cst_120 = arith.constant 1.000000e+00 : f32
    %270 = vector.broadcast %cst_120 : f32 to vector<32x16xf32>
    %271 = arith.subf %270, %269 : vector<32x16xf32>
    %cst_121 = arith.constant 0.000000e+00 : f32
    %272 = vector.broadcast %cst_121 : f32 to vector<32x16xf32>
    %273 = arith.cmpf olt, %244, %272 : vector<32x16xf32>
    %cst_122 = arith.constant 0.000000e+00 : f32
    %274 = vector.broadcast %cst_122 : f32 to vector<32x16xf32>
    %275 = arith.subf %274, %271 : vector<32x16xf32>
    %276 = arith.select %273, %275, %271 : vector<32x16xi1>, vector<32x16xf32>
    %cst_123 = arith.constant 1.000000e+00 : f32
    %277 = vector.broadcast %cst_123 : f32 to vector<32x16xf32>
    %278 = arith.addf %277, %276 : vector<32x16xf32>
    %279 = arith.mulf %242, %278 : vector<32x16xf32>
    %c1_124 = arith.constant 1 : index
    %c0_125 = arith.constant 0 : index
    %c0_126 = arith.constant 0 : index
    %280 = vector.load %arg9[%c1_124, %c0_125, %c0_126] : memref<4x32x32xbf16, #tpu.memory_space<vmem>>, vector<1x32x32xbf16>
    %281 = vector.shape_cast %280 : vector<1x32x32xbf16> to vector<32x32xbf16>
    %282 = arith.truncf %279 : vector<32x16xf32> to vector<32x16xbf16>
    %cst_127 = arith.constant dense<0.000000e+00> : vector<32x16xf32>
    %283 = tpu.matmul %281, %282, %cst_127 {dimension_numbers = #tpu.dot_dimension_numbers<[1], [0], [0], [1], [0, 0, 1, 1], [], []>} : vector<32x32xbf16>, vector<32x16xbf16>, vector<32x16xf32> -> vector<32x16xf32>
    %c1_128 = arith.constant 1 : index
    %c0_129 = arith.constant 0 : index
    %c0_130 = arith.constant 0 : index
    %284 = vector.load %arg10[%c1_128, %c0_129, %c0_130] : memref<4x32x1xf32, #tpu.memory_space<vmem>>, vector<1x32x1xf32>
    %285 = vector.shape_cast %284 : vector<1x32x1xf32> to vector<32x1xf32>
    %286 = vector.broadcast %285 : vector<32x1xf32> to vector<32x16xf32>
    %287 = arith.addf %283, %286 : vector<32x16xf32>
    %c1_131 = arith.constant 1 : index
    %c0_132 = arith.constant 0 : index
    %c0_133 = arith.constant 0 : index
    %288 = vector.load %arg11[%c1_131, %c0_132, %c0_133] : memref<4x32x32xbf16, #tpu.memory_space<vmem>>, vector<1x32x32xbf16>
    %289 = vector.shape_cast %288 : vector<1x32x32xbf16> to vector<32x32xbf16>
    %290 = arith.truncf %184 : vector<32x16xf32> to vector<32x16xbf16>
    %cst_134 = arith.constant dense<0.000000e+00> : vector<32x16xf32>
    %291 = tpu.matmul %289, %290, %cst_134 {dimension_numbers = #tpu.dot_dimension_numbers<[1], [0], [0], [1], [0, 0, 1, 1], [], []>} : vector<32x32xbf16>, vector<32x16xbf16>, vector<32x16xf32> -> vector<32x16xf32>
    %c1_135 = arith.constant 1 : index
    %c0_136 = arith.constant 0 : index
    %c0_137 = arith.constant 0 : index
    %292 = vector.load %arg12[%c1_135, %c0_136, %c0_137] : memref<4x32x1xf32, #tpu.memory_space<vmem>>, vector<1x32x1xf32>
    %293 = vector.shape_cast %292 : vector<1x32x1xf32> to vector<32x1xf32>
    %294 = vector.broadcast %293 : vector<32x1xf32> to vector<32x16xf32>
    %295 = arith.addf %291, %294 : vector<32x16xf32>
    %296 = arith.addf %287, %295 : vector<32x16xf32>
    %cst_138 = arith.constant 5.000000e-01 : f32
    %297 = vector.broadcast %cst_138 : f32 to vector<32x16xf32>
    %298 = arith.mulf %297, %296 : vector<32x16xf32>
    %cst_139 = arith.constant 0.707106769 : f32
    %299 = vector.broadcast %cst_139 : f32 to vector<32x16xf32>
    %300 = arith.mulf %296, %299 : vector<32x16xf32>
    %301 = math.absf %300 : vector<32x16xf32>
    %cst_140 = arith.constant 0.327591091 : f32
    %302 = vector.broadcast %cst_140 : f32 to vector<32x16xf32>
    %303 = arith.mulf %302, %301 : vector<32x16xf32>
    %cst_141 = arith.constant 1.000000e+00 : f32
    %304 = vector.broadcast %cst_141 : f32 to vector<32x16xf32>
    %305 = arith.addf %304, %303 : vector<32x16xf32>
    %306 = tpu.reciprocal %305 {approx = true} : vector<32x16xf32> -> vector<32x16xf32>
    %cst_142 = arith.constant 1.06140542 : f32
    %307 = vector.broadcast %cst_142 : f32 to vector<32x16xf32>
    %308 = arith.mulf %307, %306 : vector<32x16xf32>
    %cst_143 = arith.constant -1.45315206 : f32
    %309 = vector.broadcast %cst_143 : f32 to vector<32x16xf32>
    %310 = arith.addf %308, %309 : vector<32x16xf32>
    %311 = arith.mulf %310, %306 : vector<32x16xf32>
    %cst_144 = arith.constant 1.42141378 : f32
    %312 = vector.broadcast %cst_144 : f32 to vector<32x16xf32>
    %313 = arith.addf %311, %312 : vector<32x16xf32>
    %314 = arith.mulf %313, %306 : vector<32x16xf32>
    %cst_145 = arith.constant -0.284496725 : f32
    %315 = vector.broadcast %cst_145 : f32 to vector<32x16xf32>
    %316 = arith.addf %314, %315 : vector<32x16xf32>
    %317 = arith.mulf %316, %306 : vector<32x16xf32>
    %cst_146 = arith.constant 0.254829586 : f32
    %318 = vector.broadcast %cst_146 : f32 to vector<32x16xf32>
    %319 = arith.addf %317, %318 : vector<32x16xf32>
    %320 = arith.mulf %319, %306 : vector<32x16xf32>
    %cst_147 = arith.constant 0.000000e+00 : f32
    %321 = vector.broadcast %cst_147 : f32 to vector<32x16xf32>
    %322 = arith.subf %321, %301 : vector<32x16xf32>
    %323 = arith.mulf %322, %301 : vector<32x16xf32>
    %324 = math.exp %323 : vector<32x16xf32>
    %325 = arith.mulf %320, %324 : vector<32x16xf32>
    %cst_148 = arith.constant 1.000000e+00 : f32
    %326 = vector.broadcast %cst_148 : f32 to vector<32x16xf32>
    %327 = arith.subf %326, %325 : vector<32x16xf32>
    %cst_149 = arith.constant 0.000000e+00 : f32
    %328 = vector.broadcast %cst_149 : f32 to vector<32x16xf32>
    %329 = arith.cmpf olt, %300, %328 : vector<32x16xf32>
    %cst_150 = arith.constant 0.000000e+00 : f32
    %330 = vector.broadcast %cst_150 : f32 to vector<32x16xf32>
    %331 = arith.subf %330, %327 : vector<32x16xf32>
    %332 = arith.select %329, %331, %327 : vector<32x16xi1>, vector<32x16xf32>
    %cst_151 = arith.constant 1.000000e+00 : f32
    %333 = vector.broadcast %cst_151 : f32 to vector<32x16xf32>
    %334 = arith.addf %333, %332 : vector<32x16xf32>
    %335 = arith.mulf %298, %334 : vector<32x16xf32>
    %cst_152 = arith.constant dense<0.000000e+00> : vector<32xf32>
    %336 = vector.multi_reduction <add>, %335, %cst_152 [1] : vector<32x16xf32> to vector<32xf32>
    %337 = vector.shape_cast %336 : vector<32xf32> to vector<32x1xf32>
    %338 = arith.mulf %335, %335 : vector<32x16xf32>
    %cst_153 = arith.constant dense<0.000000e+00> : vector<32xf32>
    %339 = vector.multi_reduction <add>, %338, %cst_153 [1] : vector<32x16xf32> to vector<32xf32>
    %340 = vector.shape_cast %339 : vector<32xf32> to vector<32x1xf32>
    %cst_154 = arith.constant 6.250000e-02 : f32
    %341 = vector.broadcast %cst_154 : f32 to vector<32x1xf32>
    %342 = arith.mulf %337, %341 : vector<32x1xf32>
    %cst_155 = arith.constant 6.250000e-02 : f32
    %343 = vector.broadcast %cst_155 : f32 to vector<32x1xf32>
    %344 = arith.mulf %340, %343 : vector<32x1xf32>
    %345 = arith.mulf %342, %342 : vector<32x1xf32>
    %346 = arith.subf %344, %345 : vector<32x1xf32>
    %cst_156 = arith.constant 0.000000e+00 : f32
    %347 = vector.broadcast %cst_156 : f32 to vector<32x1xf32>
    %348 = arith.maximumf %346, %347 : vector<32x1xf32>
    %349 = vector.broadcast %342 : vector<32x1xf32> to vector<32x16xf32>
    %350 = arith.subf %335, %349 : vector<32x16xf32>
    %cst_157 = arith.constant 9.99999974E-6 : f32
    %351 = vector.broadcast %cst_157 : f32 to vector<32x1xf32>
    %352 = arith.addf %348, %351 : vector<32x1xf32>
    %353 = math.rsqrt %352 : vector<32x1xf32>
    %354 = vector.broadcast %353 : vector<32x1xf32> to vector<32x16xf32>
    %355 = arith.mulf %350, %354 : vector<32x16xf32>
    %cst_158 = arith.constant dense<0.000000e+00> : vector<32x8xf32>
    %356 = tpu.matmul %355, %32, %cst_158 {dimension_numbers = #tpu.dot_dimension_numbers<[1], [0], [0], [1], [0, 0, 1, 1], [], []>} : vector<32x16xf32>, vector<16x8xf32>, vector<32x8xf32> -> vector<32x8xf32>
    %357 = vector.shape_cast %356 : vector<32x8xf32> to vector<32x1x8xf32>
    %c2_159 = arith.constant 2 : index
    %c0_160 = arith.constant 0 : index
    %c0_161 = arith.constant 0 : index
    %c0_162 = arith.constant 0 : index
    %358 = vector.load %arg6[%c2_159, %c0_160, %c0_161, %c0_162] : memref<4x32x32x8xf32, #tpu.memory_space<vmem>>, vector<1x32x32x8xf32>
    %359 = vector.shape_cast %358 : vector<1x32x32x8xf32> to vector<32x32x8xf32>
    %360 = vector.broadcast %357 : vector<32x1x8xf32> to vector<32x32x8xf32>
    %361 = arith.mulf %360, %359 : vector<32x32x8xf32>
    %cst_163 = arith.constant dense<0.000000e+00> : vector<32x8xf32>
    %362 = vector.multi_reduction <add>, %361, %cst_163 [0] : vector<32x32x8xf32> to vector<32x8xf32>
    %cst_164 = arith.constant dense<0.000000e+00> : vector<32x16xf32>
    %363 = tpu.matmul %362, %33, %cst_164 {dimension_numbers = #tpu.dot_dimension_numbers<[1], [0], [0], [1], [0, 0, 1, 1], [], []>} : vector<32x8xf32>, vector<8x16xf32>, vector<32x16xf32> -> vector<32x16xf32>
    %cst_165 = arith.constant dense<0.000000e+00> : vector<32xf32>
    %364 = vector.multi_reduction <add>, %363, %cst_165 [1] : vector<32x16xf32> to vector<32xf32>
    %365 = vector.shape_cast %364 : vector<32xf32> to vector<32x1xf32>
    %366 = arith.mulf %363, %363 : vector<32x16xf32>
    %cst_166 = arith.constant dense<0.000000e+00> : vector<32xf32>
    %367 = vector.multi_reduction <add>, %366, %cst_166 [1] : vector<32x16xf32> to vector<32xf32>
    %368 = vector.shape_cast %367 : vector<32xf32> to vector<32x1xf32>
    %cst_167 = arith.constant 6.250000e-02 : f32
    %369 = vector.broadcast %cst_167 : f32 to vector<32x1xf32>
    %370 = arith.mulf %365, %369 : vector<32x1xf32>
    %cst_168 = arith.constant 6.250000e-02 : f32
    %371 = vector.broadcast %cst_168 : f32 to vector<32x1xf32>
    %372 = arith.mulf %368, %371 : vector<32x1xf32>
    %373 = arith.mulf %370, %370 : vector<32x1xf32>
    %374 = arith.subf %372, %373 : vector<32x1xf32>
    %cst_169 = arith.constant 0.000000e+00 : f32
    %375 = vector.broadcast %cst_169 : f32 to vector<32x1xf32>
    %376 = arith.maximumf %374, %375 : vector<32x1xf32>
    %377 = vector.broadcast %370 : vector<32x1xf32> to vector<32x16xf32>
    %378 = arith.subf %363, %377 : vector<32x16xf32>
    %cst_170 = arith.constant 9.99999974E-6 : f32
    %379 = vector.broadcast %cst_170 : f32 to vector<32x1xf32>
    %380 = arith.addf %376, %379 : vector<32x1xf32>
    %381 = math.rsqrt %380 : vector<32x1xf32>
    %382 = vector.broadcast %381 : vector<32x1xf32> to vector<32x16xf32>
    %383 = arith.mulf %378, %382 : vector<32x16xf32>
    %c2_171 = arith.constant 2 : index
    %c0_172 = arith.constant 0 : index
    %c0_173 = arith.constant 0 : index
    %384 = vector.load %arg7[%c2_171, %c0_172, %c0_173] : memref<4x32x32xbf16, #tpu.memory_space<vmem>>, vector<1x32x32xbf16>
    %385 = vector.shape_cast %384 : vector<1x32x32xbf16> to vector<32x32xbf16>
    %386 = arith.truncf %383 : vector<32x16xf32> to vector<32x16xbf16>
    %cst_174 = arith.constant dense<0.000000e+00> : vector<32x16xf32>
    %387 = tpu.matmul %385, %386, %cst_174 {dimension_numbers = #tpu.dot_dimension_numbers<[1], [0], [0], [1], [0, 0, 1, 1], [], []>} : vector<32x32xbf16>, vector<32x16xbf16>, vector<32x16xf32> -> vector<32x16xf32>
    %c2_175 = arith.constant 2 : index
    %c0_176 = arith.constant 0 : index
    %c0_177 = arith.constant 0 : index
    %388 = vector.load %arg8[%c2_175, %c0_176, %c0_177] : memref<4x32x1xf32, #tpu.memory_space<vmem>>, vector<1x32x1xf32>
    %389 = vector.shape_cast %388 : vector<1x32x1xf32> to vector<32x1xf32>
    %390 = vector.broadcast %389 : vector<32x1xf32> to vector<32x16xf32>
    %391 = arith.addf %387, %390 : vector<32x16xf32>
    %cst_178 = arith.constant 5.000000e-01 : f32
    %392 = vector.broadcast %cst_178 : f32 to vector<32x16xf32>
    %393 = arith.mulf %392, %391 : vector<32x16xf32>
    %cst_179 = arith.constant 0.707106769 : f32
    %394 = vector.broadcast %cst_179 : f32 to vector<32x16xf32>
    %395 = arith.mulf %391, %394 : vector<32x16xf32>
    %396 = math.absf %395 : vector<32x16xf32>
    %cst_180 = arith.constant 0.327591091 : f32
    %397 = vector.broadcast %cst_180 : f32 to vector<32x16xf32>
    %398 = arith.mulf %397, %396 : vector<32x16xf32>
    %cst_181 = arith.constant 1.000000e+00 : f32
    %399 = vector.broadcast %cst_181 : f32 to vector<32x16xf32>
    %400 = arith.addf %399, %398 : vector<32x16xf32>
    %401 = tpu.reciprocal %400 {approx = true} : vector<32x16xf32> -> vector<32x16xf32>
    %cst_182 = arith.constant 1.06140542 : f32
    %402 = vector.broadcast %cst_182 : f32 to vector<32x16xf32>
    %403 = arith.mulf %402, %401 : vector<32x16xf32>
    %cst_183 = arith.constant -1.45315206 : f32
    %404 = vector.broadcast %cst_183 : f32 to vector<32x16xf32>
    %405 = arith.addf %403, %404 : vector<32x16xf32>
    %406 = arith.mulf %405, %401 : vector<32x16xf32>
    %cst_184 = arith.constant 1.42141378 : f32
    %407 = vector.broadcast %cst_184 : f32 to vector<32x16xf32>
    %408 = arith.addf %406, %407 : vector<32x16xf32>
    %409 = arith.mulf %408, %401 : vector<32x16xf32>
    %cst_185 = arith.constant -0.284496725 : f32
    %410 = vector.broadcast %cst_185 : f32 to vector<32x16xf32>
    %411 = arith.addf %409, %410 : vector<32x16xf32>
    %412 = arith.mulf %411, %401 : vector<32x16xf32>
    %cst_186 = arith.constant 0.254829586 : f32
    %413 = vector.broadcast %cst_186 : f32 to vector<32x16xf32>
    %414 = arith.addf %412, %413 : vector<32x16xf32>
    %415 = arith.mulf %414, %401 : vector<32x16xf32>
    %cst_187 = arith.constant 0.000000e+00 : f32
    %416 = vector.broadcast %cst_187 : f32 to vector<32x16xf32>
    %417 = arith.subf %416, %396 : vector<32x16xf32>
    %418 = arith.mulf %417, %396 : vector<32x16xf32>
    %419 = math.exp %418 : vector<32x16xf32>
    %420 = arith.mulf %415, %419 : vector<32x16xf32>
    %cst_188 = arith.constant 1.000000e+00 : f32
    %421 = vector.broadcast %cst_188 : f32 to vector<32x16xf32>
    %422 = arith.subf %421, %420 : vector<32x16xf32>
    %cst_189 = arith.constant 0.000000e+00 : f32
    %423 = vector.broadcast %cst_189 : f32 to vector<32x16xf32>
    %424 = arith.cmpf olt, %395, %423 : vector<32x16xf32>
    %cst_190 = arith.constant 0.000000e+00 : f32
    %425 = vector.broadcast %cst_190 : f32 to vector<32x16xf32>
    %426 = arith.subf %425, %422 : vector<32x16xf32>
    %427 = arith.select %424, %426, %422 : vector<32x16xi1>, vector<32x16xf32>
    %cst_191 = arith.constant 1.000000e+00 : f32
    %428 = vector.broadcast %cst_191 : f32 to vector<32x16xf32>
    %429 = arith.addf %428, %427 : vector<32x16xf32>
    %430 = arith.mulf %393, %429 : vector<32x16xf32>
    %c2_192 = arith.constant 2 : index
    %c0_193 = arith.constant 0 : index
    %c0_194 = arith.constant 0 : index
    %431 = vector.load %arg9[%c2_192, %c0_193, %c0_194] : memref<4x32x32xbf16, #tpu.memory_space<vmem>>, vector<1x32x32xbf16>
    %432 = vector.shape_cast %431 : vector<1x32x32xbf16> to vector<32x32xbf16>
    %433 = arith.truncf %430 : vector<32x16xf32> to vector<32x16xbf16>
    %cst_195 = arith.constant dense<0.000000e+00> : vector<32x16xf32>
    %434 = tpu.matmul %432, %433, %cst_195 {dimension_numbers = #tpu.dot_dimension_numbers<[1], [0], [0], [1], [0, 0, 1, 1], [], []>} : vector<32x32xbf16>, vector<32x16xbf16>, vector<32x16xf32> -> vector<32x16xf32>
    %c2_196 = arith.constant 2 : index
    %c0_197 = arith.constant 0 : index
    %c0_198 = arith.constant 0 : index
    %435 = vector.load %arg10[%c2_196, %c0_197, %c0_198] : memref<4x32x1xf32, #tpu.memory_space<vmem>>, vector<1x32x1xf32>
    %436 = vector.shape_cast %435 : vector<1x32x1xf32> to vector<32x1xf32>
    %437 = vector.broadcast %436 : vector<32x1xf32> to vector<32x16xf32>
    %438 = arith.addf %434, %437 : vector<32x16xf32>
    %c2_199 = arith.constant 2 : index
    %c0_200 = arith.constant 0 : index
    %c0_201 = arith.constant 0 : index
    %439 = vector.load %arg11[%c2_199, %c0_200, %c0_201] : memref<4x32x32xbf16, #tpu.memory_space<vmem>>, vector<1x32x32xbf16>
    %440 = vector.shape_cast %439 : vector<1x32x32xbf16> to vector<32x32xbf16>
    %441 = arith.truncf %335 : vector<32x16xf32> to vector<32x16xbf16>
    %cst_202 = arith.constant dense<0.000000e+00> : vector<32x16xf32>
    %442 = tpu.matmul %440, %441, %cst_202 {dimension_numbers = #tpu.dot_dimension_numbers<[1], [0], [0], [1], [0, 0, 1, 1], [], []>} : vector<32x32xbf16>, vector<32x16xbf16>, vector<32x16xf32> -> vector<32x16xf32>
    %c2_203 = arith.constant 2 : index
    %c0_204 = arith.constant 0 : index
    %c0_205 = arith.constant 0 : index
    %443 = vector.load %arg12[%c2_203, %c0_204, %c0_205] : memref<4x32x1xf32, #tpu.memory_space<vmem>>, vector<1x32x1xf32>
    %444 = vector.shape_cast %443 : vector<1x32x1xf32> to vector<32x1xf32>
    %445 = vector.broadcast %444 : vector<32x1xf32> to vector<32x16xf32>
    %446 = arith.addf %442, %445 : vector<32x16xf32>
    %447 = arith.addf %438, %446 : vector<32x16xf32>
    %cst_206 = arith.constant 5.000000e-01 : f32
    %448 = vector.broadcast %cst_206 : f32 to vector<32x16xf32>
    %449 = arith.mulf %448, %447 : vector<32x16xf32>
    %cst_207 = arith.constant 0.707106769 : f32
    %450 = vector.broadcast %cst_207 : f32 to vector<32x16xf32>
    %451 = arith.mulf %447, %450 : vector<32x16xf32>
    %452 = math.absf %451 : vector<32x16xf32>
    %cst_208 = arith.constant 0.327591091 : f32
    %453 = vector.broadcast %cst_208 : f32 to vector<32x16xf32>
    %454 = arith.mulf %453, %452 : vector<32x16xf32>
    %cst_209 = arith.constant 1.000000e+00 : f32
    %455 = vector.broadcast %cst_209 : f32 to vector<32x16xf32>
    %456 = arith.addf %455, %454 : vector<32x16xf32>
    %457 = tpu.reciprocal %456 {approx = true} : vector<32x16xf32> -> vector<32x16xf32>
    %cst_210 = arith.constant 1.06140542 : f32
    %458 = vector.broadcast %cst_210 : f32 to vector<32x16xf32>
    %459 = arith.mulf %458, %457 : vector<32x16xf32>
    %cst_211 = arith.constant -1.45315206 : f32
    %460 = vector.broadcast %cst_211 : f32 to vector<32x16xf32>
    %461 = arith.addf %459, %460 : vector<32x16xf32>
    %462 = arith.mulf %461, %457 : vector<32x16xf32>
    %cst_212 = arith.constant 1.42141378 : f32
    %463 = vector.broadcast %cst_212 : f32 to vector<32x16xf32>
    %464 = arith.addf %462, %463 : vector<32x16xf32>
    %465 = arith.mulf %464, %457 : vector<32x16xf32>
    %cst_213 = arith.constant -0.284496725 : f32
    %466 = vector.broadcast %cst_213 : f32 to vector<32x16xf32>
    %467 = arith.addf %465, %466 : vector<32x16xf32>
    %468 = arith.mulf %467, %457 : vector<32x16xf32>
    %cst_214 = arith.constant 0.254829586 : f32
    %469 = vector.broadcast %cst_214 : f32 to vector<32x16xf32>
    %470 = arith.addf %468, %469 : vector<32x16xf32>
    %471 = arith.mulf %470, %457 : vector<32x16xf32>
    %cst_215 = arith.constant 0.000000e+00 : f32
    %472 = vector.broadcast %cst_215 : f32 to vector<32x16xf32>
    %473 = arith.subf %472, %452 : vector<32x16xf32>
    %474 = arith.mulf %473, %452 : vector<32x16xf32>
    %475 = math.exp %474 : vector<32x16xf32>
    %476 = arith.mulf %471, %475 : vector<32x16xf32>
    %cst_216 = arith.constant 1.000000e+00 : f32
    %477 = vector.broadcast %cst_216 : f32 to vector<32x16xf32>
    %478 = arith.subf %477, %476 : vector<32x16xf32>
    %cst_217 = arith.constant 0.000000e+00 : f32
    %479 = vector.broadcast %cst_217 : f32 to vector<32x16xf32>
    %480 = arith.cmpf olt, %451, %479 : vector<32x16xf32>
    %cst_218 = arith.constant 0.000000e+00 : f32
    %481 = vector.broadcast %cst_218 : f32 to vector<32x16xf32>
    %482 = arith.subf %481, %478 : vector<32x16xf32>
    %483 = arith.select %480, %482, %478 : vector<32x16xi1>, vector<32x16xf32>
    %cst_219 = arith.constant 1.000000e+00 : f32
    %484 = vector.broadcast %cst_219 : f32 to vector<32x16xf32>
    %485 = arith.addf %484, %483 : vector<32x16xf32>
    %486 = arith.mulf %449, %485 : vector<32x16xf32>
    %cst_220 = arith.constant dense<0.000000e+00> : vector<32xf32>
    %487 = vector.multi_reduction <add>, %486, %cst_220 [1] : vector<32x16xf32> to vector<32xf32>
    %488 = vector.shape_cast %487 : vector<32xf32> to vector<32x1xf32>
    %489 = arith.mulf %486, %486 : vector<32x16xf32>
    %cst_221 = arith.constant dense<0.000000e+00> : vector<32xf32>
    %490 = vector.multi_reduction <add>, %489, %cst_221 [1] : vector<32x16xf32> to vector<32xf32>
    %491 = vector.shape_cast %490 : vector<32xf32> to vector<32x1xf32>
    %cst_222 = arith.constant 6.250000e-02 : f32
    %492 = vector.broadcast %cst_222 : f32 to vector<32x1xf32>
    %493 = arith.mulf %488, %492 : vector<32x1xf32>
    %cst_223 = arith.constant 6.250000e-02 : f32
    %494 = vector.broadcast %cst_223 : f32 to vector<32x1xf32>
    %495 = arith.mulf %491, %494 : vector<32x1xf32>
    %496 = arith.mulf %493, %493 : vector<32x1xf32>
    %497 = arith.subf %495, %496 : vector<32x1xf32>
    %cst_224 = arith.constant 0.000000e+00 : f32
    %498 = vector.broadcast %cst_224 : f32 to vector<32x1xf32>
    %499 = arith.maximumf %497, %498 : vector<32x1xf32>
    %500 = vector.broadcast %493 : vector<32x1xf32> to vector<32x16xf32>
    %501 = arith.subf %486, %500 : vector<32x16xf32>
    %cst_225 = arith.constant 9.99999974E-6 : f32
    %502 = vector.broadcast %cst_225 : f32 to vector<32x1xf32>
    %503 = arith.addf %499, %502 : vector<32x1xf32>
    %504 = math.rsqrt %503 : vector<32x1xf32>
    %505 = vector.broadcast %504 : vector<32x1xf32> to vector<32x16xf32>
    %506 = arith.mulf %501, %505 : vector<32x16xf32>
    %cst_226 = arith.constant dense<0.000000e+00> : vector<32x8xf32>
    %507 = tpu.matmul %506, %32, %cst_226 {dimension_numbers = #tpu.dot_dimension_numbers<[1], [0], [0], [1], [0, 0, 1, 1], [], []>} : vector<32x16xf32>, vector<16x8xf32>, vector<32x8xf32> -> vector<32x8xf32>
    %508 = vector.shape_cast %507 : vector<32x8xf32> to vector<32x1x8xf32>
    %c3_227 = arith.constant 3 : index
    %c0_228 = arith.constant 0 : index
    %c0_229 = arith.constant 0 : index
    %c0_230 = arith.constant 0 : index
    %509 = vector.load %arg6[%c3_227, %c0_228, %c0_229, %c0_230] : memref<4x32x32x8xf32, #tpu.memory_space<vmem>>, vector<1x32x32x8xf32>
    %510 = vector.shape_cast %509 : vector<1x32x32x8xf32> to vector<32x32x8xf32>
    %511 = vector.broadcast %508 : vector<32x1x8xf32> to vector<32x32x8xf32>
    %512 = arith.mulf %511, %510 : vector<32x32x8xf32>
    %cst_231 = arith.constant dense<0.000000e+00> : vector<32x8xf32>
    %513 = vector.multi_reduction <add>, %512, %cst_231 [0] : vector<32x32x8xf32> to vector<32x8xf32>
    %cst_232 = arith.constant dense<0.000000e+00> : vector<32x16xf32>
    %514 = tpu.matmul %513, %33, %cst_232 {dimension_numbers = #tpu.dot_dimension_numbers<[1], [0], [0], [1], [0, 0, 1, 1], [], []>} : vector<32x8xf32>, vector<8x16xf32>, vector<32x16xf32> -> vector<32x16xf32>
    %cst_233 = arith.constant dense<0.000000e+00> : vector<32xf32>
    %515 = vector.multi_reduction <add>, %514, %cst_233 [1] : vector<32x16xf32> to vector<32xf32>
    %516 = vector.shape_cast %515 : vector<32xf32> to vector<32x1xf32>
    %517 = arith.mulf %514, %514 : vector<32x16xf32>
    %cst_234 = arith.constant dense<0.000000e+00> : vector<32xf32>
    %518 = vector.multi_reduction <add>, %517, %cst_234 [1] : vector<32x16xf32> to vector<32xf32>
    %519 = vector.shape_cast %518 : vector<32xf32> to vector<32x1xf32>
    %cst_235 = arith.constant 6.250000e-02 : f32
    %520 = vector.broadcast %cst_235 : f32 to vector<32x1xf32>
    %521 = arith.mulf %516, %520 : vector<32x1xf32>
    %cst_236 = arith.constant 6.250000e-02 : f32
    %522 = vector.broadcast %cst_236 : f32 to vector<32x1xf32>
    %523 = arith.mulf %519, %522 : vector<32x1xf32>
    %524 = arith.mulf %521, %521 : vector<32x1xf32>
    %525 = arith.subf %523, %524 : vector<32x1xf32>
    %cst_237 = arith.constant 0.000000e+00 : f32
    %526 = vector.broadcast %cst_237 : f32 to vector<32x1xf32>
    %527 = arith.maximumf %525, %526 : vector<32x1xf32>
    %528 = vector.broadcast %521 : vector<32x1xf32> to vector<32x16xf32>
    %529 = arith.subf %514, %528 : vector<32x16xf32>
    %cst_238 = arith.constant 9.99999974E-6 : f32
    %530 = vector.broadcast %cst_238 : f32 to vector<32x1xf32>
    %531 = arith.addf %527, %530 : vector<32x1xf32>
    %532 = math.rsqrt %531 : vector<32x1xf32>
    %533 = vector.broadcast %532 : vector<32x1xf32> to vector<32x16xf32>
    %534 = arith.mulf %529, %533 : vector<32x16xf32>
    %c3_239 = arith.constant 3 : index
    %c0_240 = arith.constant 0 : index
    %c0_241 = arith.constant 0 : index
    %535 = vector.load %arg7[%c3_239, %c0_240, %c0_241] : memref<4x32x32xbf16, #tpu.memory_space<vmem>>, vector<1x32x32xbf16>
    %536 = vector.shape_cast %535 : vector<1x32x32xbf16> to vector<32x32xbf16>
    %537 = arith.truncf %534 : vector<32x16xf32> to vector<32x16xbf16>
    %cst_242 = arith.constant dense<0.000000e+00> : vector<32x16xf32>
    %538 = tpu.matmul %536, %537, %cst_242 {dimension_numbers = #tpu.dot_dimension_numbers<[1], [0], [0], [1], [0, 0, 1, 1], [], []>} : vector<32x32xbf16>, vector<32x16xbf16>, vector<32x16xf32> -> vector<32x16xf32>
    %c3_243 = arith.constant 3 : index
    %c0_244 = arith.constant 0 : index
    %c0_245 = arith.constant 0 : index
    %539 = vector.load %arg8[%c3_243, %c0_244, %c0_245] : memref<4x32x1xf32, #tpu.memory_space<vmem>>, vector<1x32x1xf32>
    %540 = vector.shape_cast %539 : vector<1x32x1xf32> to vector<32x1xf32>
    %541 = vector.broadcast %540 : vector<32x1xf32> to vector<32x16xf32>
    %542 = arith.addf %538, %541 : vector<32x16xf32>
    %cst_246 = arith.constant 5.000000e-01 : f32
    %543 = vector.broadcast %cst_246 : f32 to vector<32x16xf32>
    %544 = arith.mulf %543, %542 : vector<32x16xf32>
    %cst_247 = arith.constant 0.707106769 : f32
    %545 = vector.broadcast %cst_247 : f32 to vector<32x16xf32>
    %546 = arith.mulf %542, %545 : vector<32x16xf32>
    %547 = math.absf %546 : vector<32x16xf32>
    %cst_248 = arith.constant 0.327591091 : f32
    %548 = vector.broadcast %cst_248 : f32 to vector<32x16xf32>
    %549 = arith.mulf %548, %547 : vector<32x16xf32>
    %cst_249 = arith.constant 1.000000e+00 : f32
    %550 = vector.broadcast %cst_249 : f32 to vector<32x16xf32>
    %551 = arith.addf %550, %549 : vector<32x16xf32>
    %552 = tpu.reciprocal %551 {approx = true} : vector<32x16xf32> -> vector<32x16xf32>
    %cst_250 = arith.constant 1.06140542 : f32
    %553 = vector.broadcast %cst_250 : f32 to vector<32x16xf32>
    %554 = arith.mulf %553, %552 : vector<32x16xf32>
    %cst_251 = arith.constant -1.45315206 : f32
    %555 = vector.broadcast %cst_251 : f32 to vector<32x16xf32>
    %556 = arith.addf %554, %555 : vector<32x16xf32>
    %557 = arith.mulf %556, %552 : vector<32x16xf32>
    %cst_252 = arith.constant 1.42141378 : f32
    %558 = vector.broadcast %cst_252 : f32 to vector<32x16xf32>
    %559 = arith.addf %557, %558 : vector<32x16xf32>
    %560 = arith.mulf %559, %552 : vector<32x16xf32>
    %cst_253 = arith.constant -0.284496725 : f32
    %561 = vector.broadcast %cst_253 : f32 to vector<32x16xf32>
    %562 = arith.addf %560, %561 : vector<32x16xf32>
    %563 = arith.mulf %562, %552 : vector<32x16xf32>
    %cst_254 = arith.constant 0.254829586 : f32
    %564 = vector.broadcast %cst_254 : f32 to vector<32x16xf32>
    %565 = arith.addf %563, %564 : vector<32x16xf32>
    %566 = arith.mulf %565, %552 : vector<32x16xf32>
    %cst_255 = arith.constant 0.000000e+00 : f32
    %567 = vector.broadcast %cst_255 : f32 to vector<32x16xf32>
    %568 = arith.subf %567, %547 : vector<32x16xf32>
    %569 = arith.mulf %568, %547 : vector<32x16xf32>
    %570 = math.exp %569 : vector<32x16xf32>
    %571 = arith.mulf %566, %570 : vector<32x16xf32>
    %cst_256 = arith.constant 1.000000e+00 : f32
    %572 = vector.broadcast %cst_256 : f32 to vector<32x16xf32>
    %573 = arith.subf %572, %571 : vector<32x16xf32>
    %cst_257 = arith.constant 0.000000e+00 : f32
    %574 = vector.broadcast %cst_257 : f32 to vector<32x16xf32>
    %575 = arith.cmpf olt, %546, %574 : vector<32x16xf32>
    %cst_258 = arith.constant 0.000000e+00 : f32
    %576 = vector.broadcast %cst_258 : f32 to vector<32x16xf32>
    %577 = arith.subf %576, %573 : vector<32x16xf32>
    %578 = arith.select %575, %577, %573 : vector<32x16xi1>, vector<32x16xf32>
    %cst_259 = arith.constant 1.000000e+00 : f32
    %579 = vector.broadcast %cst_259 : f32 to vector<32x16xf32>
    %580 = arith.addf %579, %578 : vector<32x16xf32>
    %581 = arith.mulf %544, %580 : vector<32x16xf32>
    %c3_260 = arith.constant 3 : index
    %c0_261 = arith.constant 0 : index
    %c0_262 = arith.constant 0 : index
    %582 = vector.load %arg9[%c3_260, %c0_261, %c0_262] : memref<4x32x32xbf16, #tpu.memory_space<vmem>>, vector<1x32x32xbf16>
    %583 = vector.shape_cast %582 : vector<1x32x32xbf16> to vector<32x32xbf16>
    %584 = arith.truncf %581 : vector<32x16xf32> to vector<32x16xbf16>
    %cst_263 = arith.constant dense<0.000000e+00> : vector<32x16xf32>
    %585 = tpu.matmul %583, %584, %cst_263 {dimension_numbers = #tpu.dot_dimension_numbers<[1], [0], [0], [1], [0, 0, 1, 1], [], []>} : vector<32x32xbf16>, vector<32x16xbf16>, vector<32x16xf32> -> vector<32x16xf32>
    %c3_264 = arith.constant 3 : index
    %c0_265 = arith.constant 0 : index
    %c0_266 = arith.constant 0 : index
    %586 = vector.load %arg10[%c3_264, %c0_265, %c0_266] : memref<4x32x1xf32, #tpu.memory_space<vmem>>, vector<1x32x1xf32>
    %587 = vector.shape_cast %586 : vector<1x32x1xf32> to vector<32x1xf32>
    %588 = vector.broadcast %587 : vector<32x1xf32> to vector<32x16xf32>
    %589 = arith.addf %585, %588 : vector<32x16xf32>
    %c3_267 = arith.constant 3 : index
    %c0_268 = arith.constant 0 : index
    %c0_269 = arith.constant 0 : index
    %590 = vector.load %arg11[%c3_267, %c0_268, %c0_269] : memref<4x32x32xbf16, #tpu.memory_space<vmem>>, vector<1x32x32xbf16>
    %591 = vector.shape_cast %590 : vector<1x32x32xbf16> to vector<32x32xbf16>
    %592 = arith.truncf %486 : vector<32x16xf32> to vector<32x16xbf16>
    %cst_270 = arith.constant dense<0.000000e+00> : vector<32x16xf32>
    %593 = tpu.matmul %591, %592, %cst_270 {dimension_numbers = #tpu.dot_dimension_numbers<[1], [0], [0], [1], [0, 0, 1, 1], [], []>} : vector<32x32xbf16>, vector<32x16xbf16>, vector<32x16xf32> -> vector<32x16xf32>
    %c3_271 = arith.constant 3 : index
    %c0_272 = arith.constant 0 : index
    %c0_273 = arith.constant 0 : index
    %594 = vector.load %arg12[%c3_271, %c0_272, %c0_273] : memref<4x32x1xf32, #tpu.memory_space<vmem>>, vector<1x32x1xf32>
    %595 = vector.shape_cast %594 : vector<1x32x1xf32> to vector<32x1xf32>
    %596 = vector.broadcast %595 : vector<32x1xf32> to vector<32x16xf32>
    %597 = arith.addf %593, %596 : vector<32x16xf32>
    %598 = arith.addf %589, %597 : vector<32x16xf32>
    %cst_274 = arith.constant 5.000000e-01 : f32
    %599 = vector.broadcast %cst_274 : f32 to vector<32x16xf32>
    %600 = arith.mulf %599, %598 : vector<32x16xf32>
    %cst_275 = arith.constant 0.707106769 : f32
    %601 = vector.broadcast %cst_275 : f32 to vector<32x16xf32>
    %602 = arith.mulf %598, %601 : vector<32x16xf32>
    %603 = math.absf %602 : vector<32x16xf32>
    %cst_276 = arith.constant 0.327591091 : f32
    %604 = vector.broadcast %cst_276 : f32 to vector<32x16xf32>
    %605 = arith.mulf %604, %603 : vector<32x16xf32>
    %cst_277 = arith.constant 1.000000e+00 : f32
    %606 = vector.broadcast %cst_277 : f32 to vector<32x16xf32>
    %607 = arith.addf %606, %605 : vector<32x16xf32>
    %608 = tpu.reciprocal %607 {approx = true} : vector<32x16xf32> -> vector<32x16xf32>
    %cst_278 = arith.constant 1.06140542 : f32
    %609 = vector.broadcast %cst_278 : f32 to vector<32x16xf32>
    %610 = arith.mulf %609, %608 : vector<32x16xf32>
    %cst_279 = arith.constant -1.45315206 : f32
    %611 = vector.broadcast %cst_279 : f32 to vector<32x16xf32>
    %612 = arith.addf %610, %611 : vector<32x16xf32>
    %613 = arith.mulf %612, %608 : vector<32x16xf32>
    %cst_280 = arith.constant 1.42141378 : f32
    %614 = vector.broadcast %cst_280 : f32 to vector<32x16xf32>
    %615 = arith.addf %613, %614 : vector<32x16xf32>
    %616 = arith.mulf %615, %608 : vector<32x16xf32>
    %cst_281 = arith.constant -0.284496725 : f32
    %617 = vector.broadcast %cst_281 : f32 to vector<32x16xf32>
    %618 = arith.addf %616, %617 : vector<32x16xf32>
    %619 = arith.mulf %618, %608 : vector<32x16xf32>
    %cst_282 = arith.constant 0.254829586 : f32
    %620 = vector.broadcast %cst_282 : f32 to vector<32x16xf32>
    %621 = arith.addf %619, %620 : vector<32x16xf32>
    %622 = arith.mulf %621, %608 : vector<32x16xf32>
    %cst_283 = arith.constant 0.000000e+00 : f32
    %623 = vector.broadcast %cst_283 : f32 to vector<32x16xf32>
    %624 = arith.subf %623, %603 : vector<32x16xf32>
    %625 = arith.mulf %624, %603 : vector<32x16xf32>
    %626 = math.exp %625 : vector<32x16xf32>
    %627 = arith.mulf %622, %626 : vector<32x16xf32>
    %cst_284 = arith.constant 1.000000e+00 : f32
    %628 = vector.broadcast %cst_284 : f32 to vector<32x16xf32>
    %629 = arith.subf %628, %627 : vector<32x16xf32>
    %cst_285 = arith.constant 0.000000e+00 : f32
    %630 = vector.broadcast %cst_285 : f32 to vector<32x16xf32>
    %631 = arith.cmpf olt, %602, %630 : vector<32x16xf32>
    %cst_286 = arith.constant 0.000000e+00 : f32
    %632 = vector.broadcast %cst_286 : f32 to vector<32x16xf32>
    %633 = arith.subf %632, %629 : vector<32x16xf32>
    %634 = arith.select %631, %633, %629 : vector<32x16xi1>, vector<32x16xf32>
    %cst_287 = arith.constant 1.000000e+00 : f32
    %635 = vector.broadcast %cst_287 : f32 to vector<32x16xf32>
    %636 = arith.addf %635, %634 : vector<32x16xf32>
    %637 = arith.mulf %600, %636 : vector<32x16xf32>
    %c0_288 = arith.constant 0 : index
    %c0_289 = arith.constant 0 : index
    %638 = vector.load %arg13[%c0_288, %c0_289] : memref<64x32xbf16, #tpu.memory_space<vmem>>, vector<64x32xbf16>
    %639 = arith.truncf %637 : vector<32x16xf32> to vector<32x16xbf16>
    %cst_290 = arith.constant dense<0.000000e+00> : vector<64x16xf32>
    %640 = tpu.matmul %638, %639, %cst_290 {dimension_numbers = #tpu.dot_dimension_numbers<[1], [0], [0], [1], [0, 0, 1, 1], [], []>} : vector<64x32xbf16>, vector<32x16xbf16>, vector<64x16xf32> -> vector<64x16xf32>
    %c0_291 = arith.constant 0 : index
    %c0_292 = arith.constant 0 : index
    %641 = vector.load %arg14[%c0_291, %c0_292] : memref<64x1xf32, #tpu.memory_space<vmem>>, vector<64x1xf32>
    %642 = vector.broadcast %641 : vector<64x1xf32> to vector<64x16xf32>
    %643 = arith.addf %640, %642 : vector<64x16xf32>
    %cst_293 = arith.constant 5.000000e-01 : f32
    %644 = vector.broadcast %cst_293 : f32 to vector<64x16xf32>
    %645 = arith.mulf %644, %643 : vector<64x16xf32>
    %cst_294 = arith.constant 0.707106769 : f32
    %646 = vector.broadcast %cst_294 : f32 to vector<64x16xf32>
    %647 = arith.mulf %643, %646 : vector<64x16xf32>
    %648 = math.absf %647 : vector<64x16xf32>
    %cst_295 = arith.constant 0.327591091 : f32
    %649 = vector.broadcast %cst_295 : f32 to vector<64x16xf32>
    %650 = arith.mulf %649, %648 : vector<64x16xf32>
    %cst_296 = arith.constant 1.000000e+00 : f32
    %651 = vector.broadcast %cst_296 : f32 to vector<64x16xf32>
    %652 = arith.addf %651, %650 : vector<64x16xf32>
    %653 = tpu.reciprocal %652 {approx = true} : vector<64x16xf32> -> vector<64x16xf32>
    %cst_297 = arith.constant 1.06140542 : f32
    %654 = vector.broadcast %cst_297 : f32 to vector<64x16xf32>
    %655 = arith.mulf %654, %653 : vector<64x16xf32>
    %cst_298 = arith.constant -1.45315206 : f32
    %656 = vector.broadcast %cst_298 : f32 to vector<64x16xf32>
    %657 = arith.addf %655, %656 : vector<64x16xf32>
    %658 = arith.mulf %657, %653 : vector<64x16xf32>
    %cst_299 = arith.constant 1.42141378 : f32
    %659 = vector.broadcast %cst_299 : f32 to vector<64x16xf32>
    %660 = arith.addf %658, %659 : vector<64x16xf32>
    %661 = arith.mulf %660, %653 : vector<64x16xf32>
    %cst_300 = arith.constant -0.284496725 : f32
    %662 = vector.broadcast %cst_300 : f32 to vector<64x16xf32>
    %663 = arith.addf %661, %662 : vector<64x16xf32>
    %664 = arith.mulf %663, %653 : vector<64x16xf32>
    %cst_301 = arith.constant 0.254829586 : f32
    %665 = vector.broadcast %cst_301 : f32 to vector<64x16xf32>
    %666 = arith.addf %664, %665 : vector<64x16xf32>
    %667 = arith.mulf %666, %653 : vector<64x16xf32>
    %cst_302 = arith.constant 0.000000e+00 : f32
    %668 = vector.broadcast %cst_302 : f32 to vector<64x16xf32>
    %669 = arith.subf %668, %648 : vector<64x16xf32>
    %670 = arith.mulf %669, %648 : vector<64x16xf32>
    %671 = math.exp %670 : vector<64x16xf32>
    %672 = arith.mulf %667, %671 : vector<64x16xf32>
    %cst_303 = arith.constant 1.000000e+00 : f32
    %673 = vector.broadcast %cst_303 : f32 to vector<64x16xf32>
    %674 = arith.subf %673, %672 : vector<64x16xf32>
    %cst_304 = arith.constant 0.000000e+00 : f32
    %675 = vector.broadcast %cst_304 : f32 to vector<64x16xf32>
    %676 = arith.cmpf olt, %647, %675 : vector<64x16xf32>
    %cst_305 = arith.constant 0.000000e+00 : f32
    %677 = vector.broadcast %cst_305 : f32 to vector<64x16xf32>
    %678 = arith.subf %677, %674 : vector<64x16xf32>
    %679 = arith.select %676, %678, %674 : vector<64x16xi1>, vector<64x16xf32>
    %cst_306 = arith.constant 1.000000e+00 : f32
    %680 = vector.broadcast %cst_306 : f32 to vector<64x16xf32>
    %681 = arith.addf %680, %679 : vector<64x16xf32>
    %682 = arith.mulf %645, %681 : vector<64x16xf32>
    %c0_307 = arith.constant 0 : index
    %c0_308 = arith.constant 0 : index
    %683 = vector.load %arg15[%c0_307, %c0_308] : memref<4x64xbf16, #tpu.memory_space<vmem>>, vector<4x64xbf16>
    %684 = arith.truncf %682 : vector<64x16xf32> to vector<64x16xbf16>
    %cst_309 = arith.constant dense<0.000000e+00> : vector<4x16xf32>
    %685 = tpu.matmul %683, %684, %cst_309 {dimension_numbers = #tpu.dot_dimension_numbers<[1], [0], [0], [1], [0, 0, 1, 1], [], []>} : vector<4x64xbf16>, vector<64x16xbf16>, vector<4x16xf32> -> vector<4x16xf32>
    %c0_310 = arith.constant 0 : index
    %c0_311 = arith.constant 0 : index
    %686 = vector.load %arg16[%c0_310, %c0_311] : memref<4x1xf32, #tpu.memory_space<vmem>>, vector<4x1xf32>
    %687 = vector.broadcast %686 : vector<4x1xf32> to vector<4x16xf32>
    %688 = arith.addf %685, %687 : vector<4x16xf32>
    %c0_312 = arith.constant 0 : index
    %c0_313 = arith.constant 0 : index
    %c0_314 = arith.constant 0 : index
    %689 = vector.load %arg17[%c0_312, %c0_313, %c0_314] : memref<1x4x16xf32, #tpu.memory_space<vmem>>, vector<1x4x16xf32>
    %690 = vector.shape_cast %689 : vector<1x4x16xf32> to vector<4x16xf32>
    %691 = vector.shape_cast %688 : vector<4x16xf32> to vector<1x4x16xf32>
    tpu.vector_store %arg17[%c0_312, %c0_313, %c0_314], %691 {strides = array<i32>} : memref<1x4x16xf32, #tpu.memory_space<vmem>>, vector<1x4x16xf32>,
    return
  }
  func.func @transform_0(%arg0: i32) -> (i32, i32, i32) {
    %c0_i32 = arith.constant 0 : i32
    %c0_i32_0 = arith.constant 0 : i32
    %c0_i32_1 = arith.constant 0 : i32
    return %arg0, %c0_i32, %c0_i32_0 : i32, i32, i32
  }
  func.func @transform_1(%arg0: i32) -> (i32, i32) {
    %c0_i32 = arith.constant 0 : i32
    %c0_i32_0 = arith.constant 0 : i32
    %c0_i32_1 = arith.constant 0 : i32
    return %c0_i32, %c0_i32_0 : i32, i32
  }
  func.func @transform_2(%arg0: i32) -> (i32, i32) {
    %c0_i32 = arith.constant 0 : i32
    %c0_i32_0 = arith.constant 0 : i32
    %c0_i32_1 = arith.constant 0 : i32
    return %c0_i32, %c0_i32_0 : i32, i32
  }
  func.func @transform_3(%arg0: i32) -> (i32, i32, i32) {
    %c0_i32 = arith.constant 0 : i32
    %c0_i32_0 = arith.constant 0 : i32
    %c0_i32_1 = arith.constant 0 : i32
    %c0_i32_2 = arith.constant 0 : i32
    return %c0_i32, %c0_i32_0, %c0_i32_1 : i32, i32, i32
  }
  func.func @transform_4(%arg0: i32) -> (i32, i32) {
    %c0_i32 = arith.constant 0 : i32
    %c0_i32_0 = arith.constant 0 : i32
    %c0_i32_1 = arith.constant 0 : i32
    return %c0_i32, %c0_i32_0 : i32, i32
  }
  func.func @transform_5(%arg0: i32) -> (i32, i32, i32, i32) {
    %c0_i32 = arith.constant 0 : i32
    %c0_i32_0 = arith.constant 0 : i32
    %c0_i32_1 = arith.constant 0 : i32
    %c0_i32_2 = arith.constant 0 : i32
    %c0_i32_3 = arith.constant 0 : i32
    return %c0_i32, %c0_i32_0, %c0_i32_1, %c0_i32_2 : i32, i32, i32, i32
  }
  func.func @transform_6(%arg0: i32) -> (i32, i32, i32) {
    %c0_i32 = arith.constant 0 : i32
    %c0_i32_0 = arith.constant 0 : i32
    %c0_i32_1 = arith.constant 0 : i32
    %c0_i32_2 = arith.constant 0 : i32
    return %c0_i32, %c0_i32_0, %c0_i32_1 : i32, i32, i32
  }
  func.func @transform_7(%arg0: i32) -> (i32, i32, i32) {
    %c0_i32 = arith.constant 0 : i32
    %c0_i32_0 = arith.constant 0 : i32
    %c0_i32_1 = arith.constant 0 : i32
    %c0_i32_2 = arith.constant 0 : i32
    return %c0_i32, %c0_i32_0, %c0_i32_1 : i32, i32, i32
  }
  func.func @transform_8(%arg0: i32) -> (i32, i32, i32) {
    %c0_i32 = arith.constant 0 : i32
    %c0_i32_0 = arith.constant 0 : i32
    %c0_i32_1 = arith.constant 0 : i32
    %c0_i32_2 = arith.constant 0 : i32
    return %c0_i32, %c0_i32_0, %c0_i32_1 : i32, i32, i32
  }
  func.func @transform_9(%arg0: i32) -> (i32, i32, i32) {
    %c0_i32 = arith.constant 0 : i32
    %c0_i32_0 = arith.constant 0 : i32
    %c0_i32_1 = arith.constant 0 : i32
    %c0_i32_2 = arith.constant 0 : i32
    return %c0_i32, %c0_i32_0, %c0_i32_1 : i32, i32, i32
  }
  func.func @transform_10(%arg0: i32) -> (i32, i32, i32) {
    %c0_i32 = arith.constant 0 : i32
    %c0_i32_0 = arith.constant 0 : i32
    %c0_i32_1 = arith.constant 0 : i32
    %c0_i32_2 = arith.constant 0 : i32
    return %c0_i32, %c0_i32_0, %c0_i32_1 : i32, i32, i32
  }
  func.func @transform_11(%arg0: i32) -> (i32, i32, i32) {
    %c0_i32 = arith.constant 0 : i32
    %c0_i32_0 = arith.constant 0 : i32
    %c0_i32_1 = arith.constant 0 : i32
    %c0_i32_2 = arith.constant 0 : i32
    return %c0_i32, %c0_i32_0, %c0_i32_1 : i32, i32, i32
  }
  func.func @transform_12(%arg0: i32) -> (i32, i32) {
    %c0_i32 = arith.constant 0 : i32
    %c0_i32_0 = arith.constant 0 : i32
    %c0_i32_1 = arith.constant 0 : i32
    return %c0_i32, %c0_i32_0 : i32, i32
  }
  func.func @transform_13(%arg0: i32) -> (i32, i32) {
    %c0_i32 = arith.constant 0 : i32
    %c0_i32_0 = arith.constant 0 : i32
    %c0_i32_1 = arith.constant 0 : i32
    return %c0_i32, %c0_i32_0 : i32, i32
  }
  func.func @transform_14(%arg0: i32) -> (i32, i32) {
    %c0_i32 = arith.constant 0 : i32
    %c0_i32_0 = arith.constant 0 : i32
    %c0_i32_1 = arith.constant 0 : i32
    return %c0_i32, %c0_i32_0 : i32, i32
  }
  func.func @transform_15(%arg0: i32) -> (i32, i32) {
    %c0_i32 = arith.constant 0 : i32
    %c0_i32_0 = arith.constant 0 : i32
    %c0_i32_1 = arith.constant 0 : i32
    return %c0_i32, %c0_i32_0 : i32, i32
  }
  func.func @transform_16(%arg0: i32) -> (i32, i32, i32) {
    %c0_i32 = arith.constant 0 : i32
    %c0_i32_0 = arith.constant 0 : i32
    %c0_i32_1 = arith.constant 0 : i32
    return %arg0, %c0_i32, %c0_i32_0 : i32, i32, i32
  }
}

</mosaic_0001>

<bundles_post_ra>
// kernel: lno_forward.1
= control target key start
LH: loop header
LB: loop body
LE: loop exit
PB: predicated region body
PF: predicated region fallthrough
CT: control target
= control target key end

     0   :  { %s14081_s0 = inlined_call_operand.vmem [shape: f32[2,4,16], index: 0, kind: input, shape index: {}]   ;;  %s14082_s1 = inlined_call_operand.vmem [shape: f32[16,8], index: 1, kind: input, shape index: {}]   ;;  %s14083_s2 = inlined_call_operand.vmem [shape: f32[8,16], index: 2, kind: input, shape index: {}]   ;;  %s14084_s3 = inlined_call_operand.vmem [shape: f32[4,32,1], index: 3, kind: input, shape index: {}]   ;;  %s14085_s4 = inlined_call_operand.vmem [shape: f32[32,1], index: 4, kind: input, shape index: {}]   ;;  %s14086_s5 = inlined_call_operand.vmem [shape: f32[4,32,32,8], index: 5, kind: input, shape index: {}]   ;;  %s14087_s6 = inlined_call_operand.vmem [shape: bf16[4,32,32], index: 6, kind: input, shape index: {}]   ;;  %s14088_s7 = inlined_call_operand.vmem [shape: f32[4,32,1], index: 7, kind: input, shape index: {}]   ;;  %s14089_s8 = inlined_call_operand.vmem [shape: bf16[4,32,32], index: 8, kind: input, shape index: {}]   ;;  %s14090_s9 = inlined_call_operand.vmem [shape: f32[4,32,1], index: 9, kind: input, shape index: {}]   ;;  %s14091_s10 = inlined_call_operand.vmem [shape: bf16[4,32,32], index: 10, kind: input, shape index: {}]   ;;  %s14092_s11 = inlined_call_operand.vmem [shape: f32[4,32,1], index: 11, kind: input, shape index: {}]   ;;  %s14093_s12 = inlined_call_operand.vmem [shape: bf16[64,32], index: 12, kind: input, shape index: {}]   ;;  %s14094_s13 = inlined_call_operand.vmem [shape: f32[64,1], index: 13, kind: input, shape index: {}]   ;;  %s14095_s14 = inlined_call_operand.vmem [shape: bf16[4,64], index: 14, kind: input, shape index: {}]   ;;  %s14096_s15 = inlined_call_operand.vmem [shape: f32[4,1], index: 15, kind: input, shape index: {}]   ;;  %s14097_s16 = inlined_call_operand.hbm [shape: f32[2,4,16], index: 16, kind: output, shape index: {}]  }
   0x1   :  { %14131 = sst [smem:[#allocation44_spill]] %s14081_s0 }
   0x2   :  { %14132 = sst [smem:[#allocation45_spill]] %s14084_s3 }
   0x3   :  { %21 = vsyncpa [#allocation3], 0 }
   0x4   :  { %23 = vsyncpa [#allocation3 + $0x1], 0  ;;  %s9278_s21 = smov 0   ;;  %s9280_s22 = smov 0  }
   0x5   :  { %s9282_s23 = smov 0   ;;  %s9284_s24 = smov 0  }
   0x6 LB: > { %14133 = sst [smem:[#allocation5_spill]] %s9182_s23  ;;  %s9299_s25 = sadd.s32 4294967295, %s9186_s24   ;;  %s9186_s24 = sphi %s9284_s24, %s14370_s24   ;;  %s9182_s23 = sphi %s9282_s23, %s14372_s23   ;;  %s9178_s22 = sphi %s9280_s22, %s14374_s22   ;;  %s9174_s21 = sphi %s9278_s21, %s14373_s21  }
   0x7   : > { %s7958_s26 = sadd.s32 4294967294, %s9186_s24   ;;  %s9303_s27 = sadd.s32 1, %s9186_s24  }
   0x8   : > { %14134 = sst [smem:[#allocation6_spill]] %s9303_s27  ;;  %s377_s28 = sadd.s32 1, %s9182_s23 }
   0x9   : > { %s374_s29 = ssub.s32 %s9186_s24, %s9303_s27  ;;  %p387_p0 = scmp.ne.s32.totalorder %s9182_s23, %s9178_s22 }
   0xa   : > { %p375_p1 = scmp.eq.s32.totalorder %s374_s29, 0  ;;  %p388_p2 = scmp.eq.s32.totalorder %s9299_s25, 1 }
   0xb   : > { %p393_p3 = scmp.ne.s32.totalorder %s9178_s22, %s9174_s21  ;;  %p394_p4 = scmp.eq.s32.totalorder %s7958_s26, 1 }
   0xc   : > { %s9314_s30 = scalar_select %p375_p1, %s9182_s23, %s377_s28  }
   0xd   : > { %p9316_p5 = por %p388_p2, %p387_p0  ;;  %p9320_p6 = por %p394_p4, %p393_p3 }
   0xe   : > { %14135 = sst [smem:[#allocation7_spill]] %s9314_s30  ;;  %p7961_p7 = scmp.ge.s32.totalorder %s9186_s24, 1 }
   0xf   : > { %s14137_s17 = scalar_select %p9320_p6, 1, 0 }
  0x10   : > { %p464_p8 = scmp.lt.s32.totalorder %s9186_s24, 3 }
  0x11   : > { %14138 = sst [smem:[#allocation8_spill]] %s14137_s17 }
  0x12   : > { %p465_p9 = pnand %p7961_p7, %p464_p8 }
  0x14   : > { %468 = sbr.rel (%p465_p9) target bundleno = 6157 (0x180d), region = 84 }
  0x19   : > { %v551_v0 = vld [vmem:[%s14085_s4] sm:$0xff]  ;;  %s14139_s3 = sld [smem:[#allocation45_spill]]  ;;  %v9188_v2 = vmov 0   ;;  %v552_v6 = vld [vmem:[%s14085_s4 + $0x8] sm:$0xff]  ;;  %v553_v14 = vld [vmem:[%s14085_s4 + $0x10] sm:$0xff]  ;;  %p513_p10 = scmp.lt.s32.totalorder %s9299_s25, 1  ;;  %v543_v21 = vlaneseq }
  0x1a   : > { %8864 = vset.pattern.permute.xlu1 %v9188_v2  ;;  %8863 = vset.pattern.permute.xlu0 %v9188_v2  ;;  %v554_v16 = vld [vmem:[%s14085_s4 + $0x18] sm:$0xff]  ;;  %s14140_s28 = sld [smem:[#allocation44_spill]]  ;;  %vm693_vm0 = vcmask 130048   ;;  %vm1471_vm1 = vcmask 64512   ;;  %vm1925_vm2 = vcmask 261120   ;;  %s510_s23 = sand.u32 1, %s9178_s22  }
  0x1b   : > { %557 = vperm.xlu1 %8864, %v551_v0   ;;  %s514_s20 = scalar_select %p513_p10, %s9299_s25, 1  ;;  %v9388_v22 = vshrl.u32 %v543_v21, 7 }
  0x1c   : > { %s7962_s30 = sshll.u32 %s510_s23, 2  ;;  %s8522_s18 = sshll.u32 %s9299_s25, 6 }
  0x1d   : > { %s7963_s26 = sshll.u32 %s514_s20, 2  ;;  %v9394_v25 = vsub.s32 0, %v9388_v22  ;;  %v606_v27 = vsub.s32 1, %v9388_v22  ;;  %v643_v31 = vsub.s32 2, %v9388_v22  ;;  %v680_v38 = vsub.s32 3, %v9388_v22  ;;  %s512_s19 = scalar_lea.vmem [#allocation2], %s7962_s30 }
  0x1e   : > { %s7899_s20 = sshll.u32 %s512_s19, 4  ;;  %s14040_s17 = scalar_lea.hbm %s14097_s16, %s8522_s18  ;;  %s14042_s20 = int_to_ptr.vmem [resolvable:$true] %s7899_s20 }
  0x1f   : > { %v519_v1 = vld [vmem:[%s14139_s3] sm:$0xff]  ;;  %v520_v4 = vld [vmem:[%s14139_s3 + $0x8] sm:$0xff]  ;;  %v522_v11 = vld [vmem:[%s14139_s3 + $0x18] sm:$0xff]  ;;  %14141 = vst [vmem:[#allocation9_spill] sm:$0xff] %v9394_v25  ;;  %s7886_s25 = scalar_lea.sflag [#allocation3], %s510_s23 }
  0x20   : > { %525 = vperm.xlu0 %8863, %v519_v1   ;;  %v7964_v3 = vld [vmem:[%s14139_s3 + $0x20] sm:$0xff]  ;;  %v7965_v5 = vld [vmem:[%s14139_s3 + $0x28] sm:$0xff]  ;;  %v521_v12 = vld [vmem:[%s14139_s3 + $0x10] sm:$0xff]  ;;  %s516_s29 = scalar_lea.vmem %s14140_s28, %s7963_s26  ;;  %s9126_s28 = scalar_lea.vmem %s14042_s20, 64 }
  0x21   : > { %586 = vperm.xlu1 %8864, %v7964_v3   ;;  %v7969_v7 = vld [vmem:[%s14139_s3 + $0x48] sm:$0xff]  ;;  %v7968_v8 = vld [vmem:[%s14139_s3 + $0x40] sm:$0xff]  ;;  %v7966_v13 = vld [vmem:[%s14139_s3 + $0x30] sm:$0xff]  ;;  %p9127_p11 = scmp.ne.s32.totalorder %s14042_s20, %s9126_s28 }
  0x22   : > { %v7973_v9 = vld [vmem:[%s14139_s3 + $0x68] sm:$0xff]  ;;  %v7972_v10 = vld [vmem:[%s14139_s3 + $0x60] sm:$0xff]  ;;  %v7967_v15 = vld [vmem:[%s14139_s3 + $0x38] sm:$0xff] }
  0x23   : > { %v7971_v17 = vld [vmem:[%s14139_s3 + $0x58] sm:$0xff]  ;;  %v7970_v18 = vld [vmem:[%s14139_s3 + $0x50] sm:$0xff]  ;;  %v518_v26 = vld [vmem:[%s516_s29] sm:$0xf]  ;;  %p9128_p12 = pnand %p9127_p11, %p9316_p5 }
  0x24   : > { %530 = vperm.xlu0 %8863, %v520_v4   ;;  %v7975_v19 = vld [vmem:[%s14139_s3 + $0x78] sm:$0xff]  ;;  %v7974_v20 = vld [vmem:[%s14139_s3 + $0x70] sm:$0xff]  ;;  %v546_v30 = vrot.slane %v518_v26, %v9394_v25  ;;  %v607_v32 = vrot.slane %v518_v26, %v606_v27  ;;  %v644_v37 = vrot.slane %v518_v26, %v643_v31  ;;  %v681_v47 = vrot.slane %v518_v26, %v680_v38  ;;  %s9192_s3 = smov [#allocation2]  }
  0x25   : > { %591 = vperm.xlu1 %8864, %v7965_v5   ;;  %p9129_p13 = pneg %p9128_p12  ;;  %s9130_s29 = sshll.u32 %s9192_s3, 4  ;;  %s9131_s29 = int_to_ptr.vmem [resolvable:$false] %s9130_s29 }
  0x26   : > { %s9132_s30 = scalar_lea.vmem %s9131_s29, 128  ;;  %p9133_p0 = scmp.lt.s32.totalorder %s14042_s20, %s9131_s29 }
  0x27   : > { %p9134_p1 = scmp.lt.s32.totalorder %s9132_s30, %s9126_s28 }
  0x28   : > { %562 = vperm.xlu0 %8863, %v552_v6  }
  0x29   : > { %628 = vperm.xlu1 %8864, %v7969_v7   ;;  %p9135_p2 = por %p9134_p1, %p9133_p0 }
  0x2b   : > { %p9136_p3 = pnand %p9135_p2, %p9129_p13 }
  0x2c   : > { %623 = vperm.xlu0 %8863, %v7968_v8  }
  0x2d   : > { %665 = vperm.xlu1 %8864, %v7973_v9  }
  0x30   : > { %660 = vperm.xlu0 %8863, %v7972_v10  }
  0x31   : > { %540 = vperm.xlu1 %8864, %v522_v11  }
  0x34   : > { %535 = vperm.xlu0 %8863, %v521_v12  }
  0x35   : > { %596 = vperm.xlu1 %8864, %v7966_v13  }
  0x38   : > { %567 = vperm.xlu0 %8863, %v553_v14  }
  0x39   : > { %601 = vperm.xlu1 %8864, %v7967_v15  }
  0x3c   : > { %572 = vperm.xlu0 %8863, %v554_v16  }
  0x3d   : > { %638 = vperm.xlu1 %8864, %v7971_v17  }
  0x40   : > { %633 = vperm.xlu0 %8863, %v7970_v18  }
  0x41   : > { %675 = vperm.xlu1 %8864, %v7975_v19  }
  0x44   : > { %670 = vperm.xlu0 %8863, %v7974_v20  }
  0x96   : > { %v558_v23 = vpop.permute.xlu1 %557 }
  0x9b   : > { %v526_v24 = vpop.permute.xlu0 %525 }
  0x9c   : > { %v587_v28 = vpop.permute.xlu1 %586  ;;  %v547_v35 = vmul.f32 %v546_v30, %v526_v24 }
  0x9d   : > { %v608_v39 = vmul.f32 %v607_v32, %v587_v28 }
  0x9e   : > { %v575_v44 = vadd.f32 %v558_v23, %v547_v35  ;;  %v690_v35 = vld [vmem:[%s14082_s1] sm:$0xff] }
  0x9f   : > { %v531_v29 = vpop.permute.xlu0 %530 }
  0xa0   : > { %v592_v33 = vpop.permute.xlu1 %591  ;;  %v548_v36 = vmul.f32 %v546_v30, %v531_v29  ;;  %v612_v48 = vadd.f32 %v608_v39, %v575_v44 }
  0xa1   : > { %v609_v40 = vmul.f32 %v607_v32, %v592_v33 }
  0xa3   : > { %v563_v34 = vpop.permute.xlu0 %562 }
  0xa4   : > { %v576_v41 = vadd.f32 %v563_v34, %v548_v36  ;;  %v629_v42 = vpop.permute.xlu1 %628  ;;  %v691_v34 = vld [vmem:[%s14082_s1 + $0x8] sm:$0xff] }
  0xa5   : > { %v646_v45 = vmul.f32 %v644_v37, %v629_v42  ;;  %8628 = vmatprep.subr.mxu0 %v691_v34 }
  0xa6   : > { %v613_v49 = vadd.f32 %v609_v40, %v576_v41  ;;  %8629 = vmatpush3.msra.mxu0 %v691_v34 }
  0xa7   : > { %v624_v43 = vpop.permute.xlu0 %623  ;;  %8630 = vmatprep.subr.mxu0 %v690_v35 }
  0xa8   : > { %v645_v46 = vmul.f32 %v644_v37, %v624_v43  ;;  %v666_v50 = vpop.permute.xlu1 %665  ;;  %v650_v52 = vadd.f32 %v646_v45, %v613_v49  ;;  %8631 = vmatpush3.msra.mxu0 %v690_v35 }
  0xa9   : > { %v683_v54 = vmul.f32 %v681_v47, %v666_v50 }
  0xaa   : > { %v649_v53 = vadd.f32 %v645_v46, %v612_v48 }
  0xab   : > { %v661_v51 = vpop.permute.xlu0 %660  ;;  %v9400_v56 = vadd.f32 %v683_v54, %v650_v52 }
  0xac   : > { %v682_v55 = vmul.f32 %v681_v47, %v661_v51  ;;  %v541_v58 = vpop.permute.xlu1 %540 }
  0xad   : > { %14142 = vst [vmem:[#allocation10_spill] sm:$0xff] %v9400_v56  ;;  %v697_v60 = vsel %vm693_vm0, %v9400_v56, 0.0  ;;  %v707_v2 = vmul.f32 %v9400_v56, %v9400_v56  ;;  %v550_v5 = vmul.f32 %v546_v30, %v541_v58 }
  0xae   : > { %v9402_v57 = vadd.f32 %v682_v55, %v649_v53  ;;  %698 = vadd.xlane.f32.xlu1 %v697_v60 }
  0xaf   : > { %v536_v59 = vpop.permute.xlu0 %535  ;;  %v713_v7 = vsel %vm693_vm0, %v707_v2, 0.0 }
  0xb0   : > { %14143 = vst [vmem:[#allocation11_spill] sm:$0xff] %v9402_v57  ;;  %v694_v61 = vsel %vm693_vm0, %v9402_v57, 0.0  ;;  %v706_v62 = vmul.f32 %v9402_v57, %v9402_v57  ;;  %v597_v63 = vpop.permute.xlu1 %596  ;;  %v549_v6 = vmul.f32 %v546_v30, %v536_v59 }
  0xb1   : > { %695 = vadd.xlane.f32.xlu0 %v694_v61  ;;  %v610_v8 = vmul.f32 %v607_v32, %v597_v63 }
  0xb2   : > { %v710_v1 = vsel %vm693_vm0, %v706_v62, 0.0 }
  0xb3   : > { %v568_v0 = vpop.permute.xlu0 %567 }
  0xb4   : > { %v602_v3 = vpop.permute.xlu1 %601  ;;  %v577_v9 = vadd.f32 %v568_v0, %v549_v6 }
  0xb5   : > { %711 = vadd.xlane.f32.xlu0 %v710_v1  ;;  %v611_v10 = vmul.f32 %v607_v32, %v602_v3 }
  0xb6   : > { %v614_v16 = vadd.f32 %v610_v8, %v577_v9 }
  0xb7   : > { %v573_v4 = vpop.permute.xlu0 %572 }
  0xb8   : > { %v578_v11 = vadd.f32 %v573_v4, %v550_v5  ;;  %v639_v12 = vpop.permute.xlu1 %638 }
  0xb9   : > { %714 = vadd.xlane.f32.xlu0 %v713_v7  ;;  %v648_v14 = vmul.f32 %v644_v37, %v639_v12 }
  0xba   : > { %v615_v17 = vadd.f32 %v611_v10, %v578_v11 }
  0xbb   : > { %v634_v13 = vpop.permute.xlu0 %633 }
  0xbc   : > { %v647_v15 = vmul.f32 %v644_v37, %v634_v13  ;;  %v676_v18 = vpop.permute.xlu1 %675  ;;  %v652_v20 = vadd.f32 %v648_v14, %v615_v17 }
  0xbd   : > { %v685_v23 = vmul.f32 %v681_v47, %v676_v18  ;;  %v692_v18 = vld [vmem:[%s14083_s2] sm:$0xff] }
  0xbe   : > { %v651_v21 = vadd.f32 %v647_v15, %v614_v16  ;;  %8638 = vmatprep.subr.mxu1 %v692_v18 }
  0xbf   : > { %v671_v19 = vpop.permute.xlu0 %670  ;;  %v9414_v26 = vadd.f32 %v685_v23, %v652_v20  ;;  %8639 = vmatpush3.msra.mxu1 %v692_v18 }
  0xc0   : > { %v684_v24 = vmul.f32 %v681_v47, %v671_v19  ;;  %v9189_v19 = vmov 1966171168  }
  0xc1   : > { %14144 = vst [vmem:[#allocation12_spill] sm:$0xff] %v9414_v26  ;;  %v703_v29 = vsel %vm693_vm0, %v9414_v26, 0.0  ;;  %v709_v31 = vmul.f32 %v9414_v26, %v9414_v26  ;;  %v861_v20 = vunpack.c.l.s4 %v9189_v19  ;;  %v1108_v19 = vld [vmem:[%s14086_s5 + $0x1a8] sm:$0xff] }
  0xc2   : > { %v9416_v27 = vadd.f32 %v684_v24, %v651_v21  ;;  %704 = vadd.xlane.f32.xlu0 %v703_v29 }
  0xc3   : > { %v719_v33 = vsel %vm693_vm0, %v709_v31, 0.0  ;;  %v862_v21 = vunpack.c.0.s8 %v861_v20  ;;  %v1109_v20 = vld [vmem:[%s14086_s5 + $0x1b0] sm:$0xff] }
  0xc4   : > { %14145 = vst [vmem:[#allocation13_spill] sm:$0xff] %v9416_v27  ;;  %v700_v28 = vsel %vm693_vm0, %v9416_v27, 0.0  ;;  %v708_v30 = vmul.f32 %v9416_v27, %v9416_v27 }
  0xc5   : > { %701 = vadd.xlane.f32.xlu1 %v700_v28  ;;  %v9446_v23 = vsub.s32 %v862_v21, %v9388_v22  ;;  %v1110_v21 = vld [vmem:[%s14086_s5 + $0x1b8] sm:$0xff] }
  0xc6   : > { %v716_v32 = vsel %vm693_vm0, %v708_v30, 0.0  ;;  %720 = vadd.xlane.f32.xlu0 %v719_v33 }
  0xc7   : > { %14146 = vst [vmem:[#allocation14_spill] sm:$0xff] %v9446_v23 }
  0xc9   : > { %717 = vadd.xlane.f32.xlu1 %v716_v32 }
 0x137   : > { %v699_v38 = vpop.xlane.xlu1 %698 }
 0x138   : > { %v723_v40 = vmul.f32 0.0625, %v699_v38 }
 0x13a   : > { %v696_v36 = vpop.xlane.xlu0 %695  ;;  %v731_v45 = vmul.f32 %v723_v40, %v723_v40  ;;  %v743_v5 = vsub.f32 %v9400_v56, %v723_v40 }
 0x13b   : > { %v722_v37 = vmul.f32 0.0625, %v696_v36 }
 0x13d   : > { %v730_v41 = vmul.f32 %v722_v37, %v722_v37  ;;  %v742_v60 = vsub.f32 %v9402_v57, %v722_v37  ;;  %v1068_v57 = vld [vmem:[%s14086_s5 + $0x68] sm:$0xff] }
 0x13e   : > { %v712_v39 = vpop.xlane.xlu0 %711 }
 0x13f   : > { %v726_v42 = vmul.f32 0.0625, %v712_v39 }
 0x141   : > { %v734_v43 = vsub.f32 %v726_v42, %v730_v41  ;;  %v1087_v41 = vld [vmem:[%s14086_s5 + $0x100] sm:$0xff]  ;;  %v1088_v42 = vld [vmem:[%s14086_s5 + $0x108] sm:$0xff] }
 0x142   : > { %v715_v44 = vpop.xlane.xlu0 %714 }
 0x143   : > { %v738_v46 = vmax.f32 %v734_v43, 0.0  ;;  %v727_v47 = vmul.f32 0.0625, %v715_v44  ;;  %v1089_v43 = vld [vmem:[%s14086_s5 + $0x110] sm:$0xff] }
 0x145   : > { %v746_v48 = vadd.f32 1e-05, %v738_v46  ;;  %v735_v49 = vsub.f32 %v727_v47, %v731_v45  ;;  %v1090_v46 = vld [vmem:[%s14086_s5 + $0x118] sm:$0xff]  ;;  %v1091_v47 = vld [vmem:[%s14086_s5 + $0x120] sm:$0xff] }
 0x147   : > { %8893 = vrsqrt.f32 %v746_v48  ;;  %v739_v50 = vmax.f32 %v735_v49, 0.0  ;;  %v1092_v48 = vld [vmem:[%s14086_s5 + $0x128] sm:$0xff] }
 0x149   : > { %v747_v51 = vadd.f32 1e-05, %v739_v50  ;;  %v1093_v50 = vld [vmem:[%s14086_s5 + $0x130] sm:$0xff] }
 0x14b   : > { %8895 = vrsqrt.f32 %v747_v51  ;;  %v705_v53 = vpop.xlane.xlu0 %704  ;;  %v1094_v51 = vld [vmem:[%s14086_s5 + $0x138] sm:$0xff] }
 0x14c   : > { %v725_v55 = vmul.f32 0.0625, %v705_v53 }
 0x14e   : > { %v702_v52 = vpop.xlane.xlu1 %701  ;;  %v733_v62 = vmul.f32 %v725_v55, %v725_v55  ;;  %v745_v14 = vsub.f32 %v9414_v26, %v725_v55  ;;  %v1097_v55 = vld [vmem:[%s14086_s5 + $0x150] sm:$0xff] }
 0x14f   : > { %v724_v54 = vmul.f32 0.0625, %v702_v52  ;;  %v721_v59 = vpop.xlane.xlu0 %720  ;;  %v1095_v52 = vld [vmem:[%s14086_s5 + $0x140] sm:$0xff]  ;;  %v1069_v26 = vld [vmem:[%s14086_s5 + $0x70] sm:$0xff] }
 0x150   : > { %v729_v0 = vmul.f32 0.0625, %v721_v59 }
 0x151   : > { %v732_v61 = vmul.f32 %v724_v54, %v724_v54  ;;  %v744_v12 = vsub.f32 %v9416_v27, %v724_v54  ;;  %v1096_v54 = vld [vmem:[%s14086_s5 + $0x148] sm:$0xff] }
 0x152   : > { %v718_v58 = vpop.xlane.xlu1 %717  ;;  %v737_v3 = vsub.f32 %v729_v0, %v733_v62  ;;  %v1099_v62 = vld [vmem:[%s14086_s5 + $0x160] sm:$0xff]  ;;  %v1101_v0 = vld [vmem:[%s14086_s5 + $0x170] sm:$0xff] }
 0x153   : > { %v728_v63 = vmul.f32 0.0625, %v718_v58  ;;  %v1098_v58 = vld [vmem:[%s14086_s5 + $0x158] sm:$0xff] }
 0x154   : > { %v8894_v1 = vpop.eup %8893  ;;  %v741_v7 = vmax.f32 %v737_v3, 0.0 }
 0x155   : > { %v736_v2 = vsub.f32 %v728_v63, %v732_v61  ;;  %v754_v4 = vmul.f32 %v8894_v1, %v742_v60  ;;  %v1100_v63 = vld [vmem:[%s14086_s5 + $0x168] sm:$0xff] }
 0x156   : > { %v749_v10 = vadd.f32 1e-05, %v741_v7  ;;  %v1104_v7 = vld [vmem:[%s14086_s5 + $0x188] sm:$0xff] }
 0x157   : > { %v740_v6 = vmax.f32 %v736_v2, 0.0  ;;  %8632 = vmatprep.mubr.msk.f32.mxu0 %vm693_vm0, %v754_v4 }
 0x158   : > { %v8896_v8 = vpop.eup %8895 }
 0x159   : > { %v748_v9 = vadd.f32 1e-05, %v740_v6  ;;  %v755_v11 = vmul.f32 %v8896_v8, %v743_v5  ;;  %v1102_v5 = vld [vmem:[%s14086_s5 + $0x178] sm:$0xff]  ;;  %v1103_v6 = vld [vmem:[%s14086_s5 + $0x180] sm:$0xff] }
 0x15b   : > { %8897 = vrsqrt.f32 %v748_v9  ;;  %8633 = vmatmul.mubr.msk.f32.vlgmr.msra.gmra.mxu0 %vm693_vm0, %v755_v11 }
 0x15c   : > { %8899 = vrsqrt.f32 %v749_v10 }
 0x168   : > { %v8898_v13 = vpop.eup %8897 }
 0x169   : > { %v8900_v15 = vpop.eup %8899  ;;  %v756_v16 = vmul.f32 %v8898_v13, %v744_v12  ;;  %v1105_v12 = vld [vmem:[%s14086_s5 + $0x190] sm:$0xff]  ;;  %v1106_v13 = vld [vmem:[%s14086_s5 + $0x198] sm:$0xff] }
 0x16a   : > { %v757_v17 = vmul.f32 %v8900_v15, %v745_v14  ;;  %v1107_v14 = vld [vmem:[%s14086_s5 + $0x1a0] sm:$0xff] }
 0x16b   : > { %8635 = vmatprep.mubr.msk.f32.mxu0 %vm693_vm0, %v756_v16 }
 0x16c   : > { %8636 = vmatmul.mubr.msk.f32.gmra.mxu0 %vm693_vm0, %v757_v17 }
 0x21b   : > { %v8634_v24 = vpop.f32.mrf.mxu0 }
 0x21c   : > { %v908_v28 = vcombine.high %v8634_v24, %v8634_v24  ;;  %v915_v29 = vrot.slane %v8634_v24, %v9446_v23 }
 0x21d   : > { %v836_v35 = vpop.f32.mrf.mxu0 }
 0x21e   : > { %v922_v30 = vrot.slane %v908_v28, %v9446_v23  ;;  %v923_v31 = vcombine.high %v915_v29, %v915_v29  ;;  %v931_v33 = vrot.slane %v915_v29, %v9446_v23  ;;  %v859_v22 = vcombine.high %v836_v35, %v836_v35 }
 0x21f   : > { %v9455_v39 = vrot.slane %v836_v35, %v9446_v23 }
 0x220   : > { %v924_v32 = vcombine.high %v922_v30, %v922_v30  ;;  %v945_v34 = vrot.slane %v923_v31, %v9446_v23  ;;  %v938_v36 = vrot.slane %v922_v30, %v9446_v23  ;;  %v953_v38 = vcombine.high %v931_v33, %v931_v33  ;;  %v1111_v31 = vld [vmem:[%s14086_s5 + $0x1c0] sm:$0xff] }
 0x221   : > { %v1218_v44 = vrot.slane %v931_v33, %v9394_v25  ;;  %v9497_v60 = vrot.slane %v859_v22, %v9446_v23  ;;  %v874_v61 = vcombine.high %v9455_v39, %v9455_v39  ;;  %v9514_v4 = vrot.slane %v9455_v39, %v9446_v23  ;;  %v1113_v33 = vld [vmem:[%s14086_s5 + $0x1d0] sm:$0xff]  ;;  %v1115_v22 = vld [vmem:[%s14086_s5 + $0x1e0] sm:$0xff] }
 0x222   : > { %v952_v37 = vrot.slane %v924_v32, %v9446_v23  ;;  %v955_v40 = vcombine.high %v945_v34, %v945_v34  ;;  %v954_v45 = vcombine.high %v938_v36, %v938_v36  ;;  %v1222_v53 = vrot.slane %v945_v34, %v9394_v25  ;;  %v1112_v32 = vld [vmem:[%s14086_s5 + $0x1c8] sm:$0xff] }
 0x223   : > { %v1226_v59 = vrot.slane %v953_v38, %v9394_v25  ;;  %v1234_v2 = vrot.slane %v938_v36, %v9394_v25  ;;  %v1375_v3 = vmul.f32 %v1218_v44, %v1087_v41  ;;  %v1376_v10 = vmul.f32 %v1218_v44, %v1088_v42  ;;  %v1114_v38 = vld [vmem:[%s14086_s5 + $0x1d8] sm:$0xff] }
 0x224   : > { %v956_v49 = vcombine.high %v952_v37, %v952_v37  ;;  %v1230_v1 = vrot.slane %v955_v40, %v9394_v25  ;;  %v1238_v8 = vrot.slane %v952_v37, %v9394_v25  ;;  %v1242_v9 = vrot.slane %v954_v45, %v9394_v25  ;;  %v1116_v40 = vld [vmem:[%s14086_s5 + $0x1e8] sm:$0xff]  ;;  %v1117_v45 = vld [vmem:[%s14086_s5 + $0x1f0] sm:$0xff] }
 0x225   : > { %v9527_v11 = vmul.f32 %v1218_v44, %v1089_v43  ;;  %v9539_v16 = vmul.f32 %v1218_v44, %v1090_v46  ;;  %v1379_v17 = vmul.f32 %v1222_v53, %v1091_v47  ;;  %v1380_v18 = vmul.f32 %v1222_v53, %v1092_v48  ;;  %v1118_v46 = vld [vmem:[%s14086_s5 + $0x1f8] sm:$0xff] }
 0x226   : > { %v1246_v15 = vrot.slane %v956_v49, %v9394_v25  ;;  %v1381_v24 = vmul.f32 %v1222_v53, %v1093_v50  ;;  %v9550_v28 = vmul.f32 %v1222_v53, %v1094_v51  ;;  %v1383_v29 = vmul.f32 %v1226_v59, %v1095_v52 }
 0x227   : > { %v1384_v30 = vmul.f32 %v1226_v59, %v1096_v54  ;;  %v1385_v34 = vmul.f32 %v1226_v59, %v1097_v55  ;;  %v9561_v35 = vmul.f32 %v1226_v59, %v1098_v58  ;;  %v1387_v36 = vmul.f32 %v1230_v1, %v1099_v62 }
 0x228   : > { %v1388_v37 = vmul.f32 %v1230_v1, %v1100_v63  ;;  %v1389_v41 = vmul.f32 %v1230_v1, %v1101_v0  ;;  %v9572_v42 = vmul.f32 %v1230_v1, %v1102_v5  ;;  %v1391_v43 = vmul.f32 %v1234_v2, %v1103_v6 }
 0x229   : > { %v1392_v44 = vmul.f32 %v1234_v2, %v1104_v7  ;;  %v1393_v47 = vmul.f32 %v1234_v2, %v1105_v12  ;;  %v9580_v48 = vmul.f32 %v1234_v2, %v1106_v13  ;;  %v1395_v49 = vmul.f32 %v1238_v8, %v1107_v14 }
 0x22a   : > { %v1396_v50 = vmul.f32 %v1238_v8, %v1108_v19  ;;  %v9582_v51 = vmul.f32 %v1238_v8, %v1109_v20  ;;  %v9584_v52 = vmul.f32 %v1238_v8, %v1110_v21  ;;  %v1399_v53 = vmul.f32 %v1242_v9, %v1111_v31 }
 0x22b   : > { %v1400_v54 = vmul.f32 %v1242_v9, %v1112_v32  ;;  %v9586_v55 = vmul.f32 %v1242_v9, %v1113_v33  ;;  %v9588_v58 = vmul.f32 %v1242_v9, %v1114_v38  ;;  %v9590_v59 = vmul.f32 %v1246_v15, %v1115_v22  ;;  %v1056_v38 = vld [vmem:[%s14086_s5 + $0x8] sm:$0xff]  ;;  %v1059_v22 = vld [vmem:[%s14086_s5 + $0x20] sm:$0xff] }
 0x22c   : > { %v9592_v62 = vmul.f32 %v1246_v15, %v1116_v40  ;;  %v9594_v63 = vmul.f32 %v1246_v15, %v1117_v45  ;;  %v9596_v0 = vmul.f32 %v1246_v15, %v1118_v46  ;;  %v9599_v1 = vsel %vm1471_vm1, %v1375_v3, 0.0  ;;  %v9654_v31 = vpop.f32.mrf.mxu0  ;;  %v1061_v45 = vld [vmem:[%s14086_s5 + $0x30] sm:$0xff]  ;;  %v1063_v46 = vld [vmem:[%s14086_s5 + $0x40] sm:$0xff] }
 0x22d   : > { %14147 = vst [vmem:[#allocation15_spill] sm:$0xff] %v9590_v59  ;;  %v875_v2 = vcombine.high %v9497_v60, %v9497_v60  ;;  %v9604_v5 = vsel %vm1471_vm1, %v1379_v17, 0.0  ;;  %v9607_v6 = vsel %vm1471_vm1, %v1383_v29, 0.0  ;;  %v889_v7 = vrot.slane %v9497_v60, %v9446_v23 }
 0x22e   : > { %14148 = vst [vmem:[#allocation16_spill] sm:$0xff] %v9592_v62  ;;  %14149 = vst [vmem:[#allocation17_spill] sm:$0xff] %v9594_v63  ;;  %v896_v8 = vrot.slane %v874_v61, %v9446_v23  ;;  %v9616_v3 = vsel %vm1471_vm1, %v1387_v36, 0.0  ;;  %v9619_v9 = vsel %vm1471_vm1, %v1391_v43, 0.0  ;;  %v9622_v12 = vsel %vm1471_vm1, %v1395_v49, 0.0  ;;  %v1058_v43 = vld [vmem:[%s14086_s5 + $0x18] sm:$0xff] }
 0x22f   : > { %14150 = vst [vmem:[#allocation18_spill] sm:$0xff] %v9596_v0  ;;  %14151 = vst [vmem:[#allocation19_spill] sm:$0xff] %v9619_v9  ;;  %v903_v13 = vrot.slane %v875_v2, %v9446_v23  ;;  %v9626_v14 = vsel %vm1471_vm1, %v1399_v53, 0.0  ;;  %v9629_v60 = vsel %vm1471_vm1, %v1376_v10, 0.0  ;;  %v9632_v39 = vsel %vm1471_vm1, %v1380_v18, 0.0  ;;  %v1055_v18 = vld [vmem:[%s14086_s5] sm:$0xff] }
 0x230   : > { %14152 = vst [vmem:[#allocation20_spill] sm:$0xff] %v9622_v12  ;;  %14153 = vst [vmem:[#allocation21_spill] sm:$0xff] %v9626_v14  ;;  %v904_v61 = vcombine.high %v9514_v4, %v9514_v4  ;;  %v9637_v15 = vsel %vm1471_vm1, %v1384_v30, 0.0  ;;  %v9640_v17 = vsel %vm1471_vm1, %v1388_v37, 0.0  ;;  %v9643_v19 = vsel %vm1471_vm1, %v1392_v44, 0.0  ;;  %v1060_v44 = vld [vmem:[%s14086_s5 + $0x28] sm:$0xff] }
 0x231   : > { %14154 = vst [vmem:[#allocation22_spill] sm:$0xff] %v9640_v17  ;;  %14155 = vst [vmem:[#allocation23_spill] sm:$0xff] %v9643_v19  ;;  %v906_v20 = vcombine.high %v896_v8, %v896_v8  ;;  %v9646_v21 = vsel %vm1471_vm1, %v1396_v50, 0.0  ;;  %v905_v10 = vcombine.high %v889_v7, %v889_v7  ;;  %v1186_v29 = vrot.slane %v9514_v4, %v9394_v25  ;;  %v1057_v4 = vld [vmem:[%s14086_s5 + $0x10] sm:$0xff] }
 0x232   : > { %14156 = vst [vmem:[#allocation24_spill] sm:$0xff] %v9646_v21  ;;  %v1190_v30 = vrot.slane %v896_v8, %v9394_v25  ;;  %v9657_v32 = vsel %vm1471_vm1, %v1400_v54, 0.0  ;;  %v9661_v33 = vsel %vm1471_vm1, %v9527_v11, 0.0  ;;  %v9664_v36 = vsel %vm1471_vm1, %v1381_v24, 0.0  ;;  %v1065_v2 = vld [vmem:[%s14086_s5 + $0x50] sm:$0xff]  ;;  %v1066_v8 = vld [vmem:[%s14086_s5 + $0x58] sm:$0xff] }
 0x233   : > { %14157 = vst [vmem:[#allocation25_spill] sm:$0xff] %v9657_v32  ;;  %v907_v37 = vcombine.high %v903_v13, %v903_v13  ;;  %v9676_v40 = vsel %vm1471_vm1, %v1385_v34, 0.0  ;;  %v9679_v11 = vsel %vm1471_vm1, %v1389_v41, 0.0  ;;  %v9682_v24 = vsel %vm1471_vm1, %v1393_v47, 0.0  ;;  %v1062_v41 = vld [vmem:[%s14086_s5 + $0x38] sm:$0xff]  ;;  %v1064_v47 = vld [vmem:[%s14086_s5 + $0x48] sm:$0xff] }
 0x234   : > { %14158 = vst [vmem:[#allocation26_spill] sm:$0xff] %v9676_v40  ;;  %14159 = vst [vmem:[#allocation27_spill] sm:$0xff] %v9679_v11  ;;  %v1194_v34 = vrot.slane %v904_v61, %v9394_v25  ;;  %v1198_v49 = vrot.slane %v906_v20, %v9394_v25  ;;  %v1202_v50 = vrot.slane %v889_v7, %v9394_v25  ;;  %v1067_v61 = vld [vmem:[%s14086_s5 + $0x60] sm:$0xff]  ;;  %v1077_v12 = vld [vmem:[%s14086_s5 + $0xb0] sm:$0xff] }
 0x235   : > { %14160 = vst [vmem:[#allocation28_spill] sm:$0xff] %v9682_v24  ;;  %v9709_v54 = vrot.slane %v9654_v31, %v9446_v23  ;;  %v1206_v7 = vrot.slane %v903_v13, %v9394_v25  ;;  %v9722_v20 = vrot.slane %v905_v10, %v9394_v25  ;;  %v1343_v53 = vmul.f32 %v1186_v29, %v1055_v18  ;;  %v1070_v13 = vld [vmem:[%s14086_s5 + $0x78] sm:$0xff]  ;;  %v1071_v10 = vld [vmem:[%s14086_s5 + $0x80] sm:$0xff]  ;;  %v1072_v18 = vld [vmem:[%s14086_s5 + $0x88] sm:$0xff] }
 0x236   : > { %v1347_v56 = vmul.f32 %v1190_v30, %v1059_v22  ;;  %v9731_v27 = vrot.slane %v907_v37, %v9394_v25  ;;  %v1344_v0 = vmul.f32 %v1186_v29, %v1056_v38  ;;  %v1345_v63 = vmul.f32 %v1186_v29, %v1057_v4  ;;  %v1074_v38 = vld [vmem:[%s14086_s5 + $0x98] sm:$0xff]  ;;  %v1075_v4 = vld [vmem:[%s14086_s5 + $0xa0] sm:$0xff] }
 0x237   : > { %v1346_v24 = vmul.f32 %v1186_v29, %v1058_v43  ;;  %v1348_v22 = vmul.f32 %v1190_v30, %v1060_v44  ;;  %v1349_v32 = vmul.f32 %v1190_v30, %v1061_v45  ;;  %v1350_v11 = vmul.f32 %v1190_v30, %v1062_v41  ;;  %v1073_v29 = vld [vmem:[%s14086_s5 + $0x90] sm:$0xff]  ;;  %v1076_v30 = vld [vmem:[%s14086_s5 + $0xa8] sm:$0xff] }
 0x238   : > { %v1351_v37 = vmul.f32 %v1194_v34, %v1063_v46  ;;  %v1352_v43 = vmul.f32 %v1194_v34, %v1064_v47  ;;  %v1353_v21 = vmul.f32 %v1194_v34, %v1065_v2  ;;  %v1354_v14 = vmul.f32 %v1194_v34, %v1066_v8  ;;  %v1078_v47 = vld [vmem:[%s14086_s5 + $0xb8] sm:$0xff] }
 0x239   : > { %v1355_v19 = vmul.f32 %v1198_v49, %v1067_v61  ;;  %v1356_v44 = vmul.f32 %v1198_v49, %v1068_v57  ;;  %v1357_v45 = vmul.f32 %v1198_v49, %v1069_v26  ;;  %v1472_v41 = vsel %vm1471_vm1, %v1343_v53, 0.0 }
 0x23a   : > { %v1473_v46 = vsel %vm1471_vm1, %v1347_v56, 0.0  ;;  %v1358_v34 = vmul.f32 %v1198_v49, %v1070_v13  ;;  %v1359_v2 = vmul.f32 %v1202_v50, %v1071_v10  ;;  %v1360_v8 = vmul.f32 %v1202_v50, %v1072_v18  ;;  %v1079_v56 = vld [vmem:[%s14086_s5 + $0xc0] sm:$0xff]  ;;  %v1080_v49 = vld [vmem:[%s14086_s5 + $0xc8] sm:$0xff] }
 0x23b   : > { %v1474_v61 = vadd.f32 %v1473_v46, %v1472_v41  ;;  %v1361_v9 = vmul.f32 %v1202_v50, %v1073_v29  ;;  %v1362_v40 = vmul.f32 %v1202_v50, %v1074_v38  ;;  %v1363_v57 = vmul.f32 %v1206_v7, %v1075_v4 }
 0x23c   : > { %v1475_v26 = vsel %vm1471_vm1, %v1351_v37, 0.0  ;;  %v1364_v53 = vmul.f32 %v1206_v7, %v1076_v30  ;;  %v1535_v62 = vsel %vm1471_vm1, %v1344_v0, 0.0  ;;  %v1536_v59 = vsel %vm1471_vm1, %v1348_v22, 0.0  ;;  %v1081_v37 = vld [vmem:[%s14086_s5 + $0xd0] sm:$0xff] }
 0x23d   : > { %v1476_v17 = vadd.f32 %v1475_v26, %v1474_v61  ;;  %v1365_v13 = vmul.f32 %v1206_v7, %v1077_v12  ;;  %v1366_v10 = vmul.f32 %v1206_v7, %v1078_v47  ;;  %v1477_v50 = vsel %vm1471_vm1, %v1355_v19, 0.0 }
 0x23e   : > { %v1537_v18 = vadd.f32 %v1536_v59, %v1535_v62  ;;  %v1538_v38 = vsel %vm1471_vm1, %v1352_v43, 0.0  ;;  %v1598_v0 = vsel %vm1471_vm1, %v1345_v63, 0.0  ;;  %v1599_v22 = vsel %vm1471_vm1, %v1349_v32, 0.0 }
 0x23f   : > { %v1478_v29 = vadd.f32 %v1477_v50, %v1476_v17  ;;  %v1367_v4 = vmul.f32 %v9722_v20, %v1079_v56  ;;  %v1479_v30 = vsel %vm1471_vm1, %v1359_v2, 0.0  ;;  %v1600_v7 = vadd.f32 %v1599_v22, %v1598_v0  ;;  %v1083_v17 = vld [vmem:[%s14086_s5 + $0xe0] sm:$0xff]  ;;  %v1085_v0 = vld [vmem:[%s14086_s5 + $0xf0] sm:$0xff] }
 0x240   : > { %v1539_v12 = vadd.f32 %v1538_v38, %v1537_v18  ;;  %v1368_v19 = vmul.f32 %v9722_v20, %v1080_v49  ;;  %v1540_v62 = vsel %vm1471_vm1, %v1356_v44, 0.0  ;;  %v1601_v41 = vsel %vm1471_vm1, %v1353_v21, 0.0  ;;  %v1084_v21 = vld [vmem:[%s14086_s5 + $0xe8] sm:$0xff] }
 0x241   : > { %v1480_v59 = vadd.f32 %v1479_v30, %v1478_v29  ;;  %v1369_v63 = vmul.f32 %v9722_v20, %v1081_v37  ;;  %v1481_v32 = vsel %vm1471_vm1, %v1363_v57, 0.0  ;;  %v1602_v46 = vadd.f32 %v1601_v41, %v1600_v7  ;;  %v1082_v30 = vld [vmem:[%s14086_s5 + $0xd8] sm:$0xff] }
 0x242   : > { %v1541_v43 = vadd.f32 %v1540_v62, %v1539_v12  ;;  %v1542_v47 = vsel %vm1471_vm1, %v1360_v8, 0.0  ;;  %v1603_v2 = vsel %vm1471_vm1, %v1357_v45, 0.0  ;;  %v1661_v61 = vsel %vm1471_vm1, %v1346_v24, 0.0 }
 0x243   : > { %v1662_v44 = vsel %vm1471_vm1, %v1350_v11, 0.0  ;;  %v1482_v26 = vadd.f32 %v1481_v32, %v1480_v59  ;;  %v1604_v49 = vadd.f32 %v1603_v2, %v1602_v46  ;;  %v1371_v57 = vmul.f32 %v9731_v27, %v1083_v17 }
 0x244   : > { %v1543_v56 = vadd.f32 %v1542_v47, %v1541_v43  ;;  %v1663_v50 = vadd.f32 %v1662_v44, %v1661_v61  ;;  %v1544_v18 = vsel %vm1471_vm1, %v1364_v53, 0.0  ;;  %v1605_v8 = vsel %vm1471_vm1, %v1361_v9, 0.0 }
 0x245   : > { %v1664_v45 = vsel %vm1471_vm1, %v1354_v14, 0.0  ;;  %v1606_v24 = vadd.f32 %v1605_v8, %v1604_v49  ;;  %v14161_v11 = vcombine.high %v9654_v31, %v9654_v31  ;;  %v1372_v22 = vmul.f32 %v9731_v27, %v1084_v21 }
 0x246   : > { %v1545_v37 = vadd.f32 %v1544_v18, %v1543_v56  ;;  %v1665_v29 = vadd.f32 %v1664_v45, %v1663_v50  ;;  %v1483_v53 = vsel %vm1471_vm1, %v1367_v4, 0.0  ;;  %v1607_v9 = vsel %vm1471_vm1, %v1365_v13, 0.0 }
 0x247   : > { %v1020_v38 = vrot.slane %v14161_v11, %v9446_v23  ;;  %v1666_v14 = vsel %vm1471_vm1, %v1358_v34, 0.0  ;;  %v1484_v12 = vadd.f32 %v1483_v53, %v1482_v26  ;;  %v1546_v31 = vsel %vm1471_vm1, %v1368_v19, 0.0 }
 0x248   : > { %v1608_v7 = vadd.f32 %v1607_v9, %v1606_v24  ;;  %v1667_v59 = vadd.f32 %v1666_v14, %v1665_v29  ;;  %v9816_v62 = vsel %vm1471_vm1, %v9582_v51, 0.0  ;;  %v1547_v41 = vadd.f32 %v1546_v31, %v1545_v37  ;;  %v846_v24 = vpop.f32.mrf.mxu0 }
 0x249   : > { %v1668_v4 = vsel %vm1471_vm1, %v1362_v40, 0.0  ;;  %v1021_v13 = vcombine.high %v9709_v54, %v9709_v54  ;;  %v1373_v34 = vmul.f32 %v9731_v27, %v1085_v0  ;;  %v1609_v17 = vsel %vm1471_vm1, %v1369_v63, 0.0  ;;  %v1086_v40 = vld [vmem:[%s14086_s5 + $0xf8] sm:$0xff] }
 0x24a   : > { %v1669_v32 = vadd.f32 %v1668_v4, %v1667_v59  ;;  %v1022_v43 = vcombine.high %v1020_v38, %v1020_v38  ;;  %v1370_v19 = vmul.f32 %v9722_v20, %v1082_v30  ;;  %v1485_v46 = vsel %vm1471_vm1, %v1371_v57, 0.0  ;;  %v1156_v59 = vld [vmem:[%s14086_s5 + $0x328] sm:$0xff] }
 0x24b   : > { %v1610_v47 = vadd.f32 %v1609_v17, %v1608_v7  ;;  %v1670_v51 = vsel %vm1471_vm1, %v1366_v10, 0.0  ;;  %v1486_v2 = vadd.f32 %v1485_v46, %v1484_v12  ;;  %v1548_v61 = vsel %vm1471_vm1, %v1372_v22, 0.0  ;;  %v1154_v7 = vld [vmem:[%s14086_s5 + $0x318] sm:$0xff]  ;;  %v1160_v17 = vld [vmem:[%s14086_s5 + $0x348] sm:$0xff] }
 0x24c   : > { %v1671_v44 = vadd.f32 %v1670_v51, %v1669_v32  ;;  %v1029_v63 = vrot.slane %v9709_v54, %v9446_v23  ;;  %v9834_v21 = vsel %vm1471_vm1, %v9586_v55, 0.0  ;;  %v1676_v20 = vsel %vm1471_vm1, %v9539_v16, 0.0  ;;  %v1161_v51 = vld [vmem:[%s14086_s5 + $0x350] sm:$0xff] }
 0x24d   : > { %v1549_v26 = vadd.f32 %v1548_v61, %v1547_v41  ;;  %v1043_v10 = vrot.slane %v1021_v13, %v9446_v23  ;;  %v9841_v56 = vsel %vm1471_vm1, %v9550_v28, 0.0  ;;  %v1611_v49 = vsel %vm1471_vm1, %v1373_v34, 0.0  ;;  %v1157_v13 = vld [vmem:[%s14086_s5 + $0x330] sm:$0xff]  ;;  %v1158_v34 = vld [vmem:[%s14086_s5 + $0x338] sm:$0xff] }
 0x24e   : > { %v1036_v50 = vrot.slane %v1020_v38, %v9446_v23  ;;  %v1050_v54 = vrot.slane %v1022_v43, %v9446_v23  ;;  %v9848_v55 = vsel %vm1471_vm1, %v9561_v35, 0.0  ;;  %v1374_v57 = vmul.f32 %v9731_v27, %v1086_v40  ;;  %v1162_v40 = vld [vmem:[%s14086_s5 + $0x358] sm:$0xff] }
 0x24f   : > { %v1612_v16 = vadd.f32 %v1611_v49, %v1610_v47  ;;  %v1672_v18 = vsel %vm1471_vm1, %v1370_v19, 0.0  ;;  %v9854_v8 = vsel %vm1471_vm1, %v9572_v42, 0.0  ;;  %v1488_v28 = vadd.f32 %v9599_v1, %v1486_v2  ;;  %v1164_v2 = vld [vmem:[%s14086_s5 + $0x368] sm:$0xff] }
 0x250   : > { %v1673_v45 = vadd.f32 %v1672_v18, %v1671_v44  ;;  %v1051_v37 = vcombine.high %v1029_v63, %v1029_v63  ;;  %v9859_v29 = vsel %vm1471_vm1, %v9580_v48, 0.0  ;;  %v9863_v35 = vsel %vm1471_vm1, %v9584_v52, 0.0  ;;  %v1151_v52 = vld [vmem:[%s14086_s5 + $0x300] sm:$0xff]  ;;  %v1168_v49 = vld [vmem:[%s14086_s5 + $0x388] sm:$0xff] }
 0x251   : > { %v1551_v27 = vadd.f32 %v9629_v60, %v1549_v26  ;;  %v1053_v11 = vcombine.high %v1043_v10, %v1043_v10  ;;  %v9868_v42 = vsel %vm1471_vm1, %v9588_v58, 0.0  ;;  %v1052_v38 = vcombine.high %v1036_v50, %v1036_v50  ;;  %v1152_v60 = vld [vmem:[%s14086_s5 + $0x308] sm:$0xff] }
 0x252   : > { %v1054_v1 = vcombine.high %v1050_v54, %v1050_v54  ;;  %v1282_v0 = vrot.slane %v1029_v63, %v9394_v25  ;;  %v1614_v22 = vadd.f32 %v9661_v33, %v1612_v16  ;;  %v1674_v48 = vsel %vm1471_vm1, %v1374_v57, 0.0  ;;  %v1153_v33 = vld [vmem:[%s14086_s5 + $0x310] sm:$0xff] }
 0x253   : > { %v957_v53 = vcombine.high %v846_v24, %v846_v24  ;;  %v964_v58 = vrot.slane %v846_v24, %v9446_v23  ;;  %v1490_v9 = vadd.f32 %v9604_v5, %v1488_v28  ;;  %v1675_v14 = vadd.f32 %v1674_v48, %v1673_v45  ;;  %v1155_v5 = vld [vmem:[%s14086_s5 + $0x320] sm:$0xff] }
 0x254   : > { %v1286_v30 = vrot.slane %v1043_v10, %v9394_v25  ;;  %v9886_v12 = vrot.slane %v1051_v37, %v9394_v25  ;;  %v1553_v31 = vadd.f32 %v9632_v39, %v1551_v27  ;;  %v9899_v41 = vrot.slane %v1053_v11, %v9394_v25  ;;  %v1166_v10 = vld [vmem:[%s14086_s5 + $0x378] sm:$0xff] }
 0x255   : > { %v9902_v4 = vrot.slane %v1036_v50, %v9394_v25  ;;  %v9905_v39 = vrot.slane %v1050_v54, %v9394_v25  ;;  %v9917_v32 = vrot.slane %v1052_v38, %v9394_v25  ;;  %v9920_v43 = vrot.slane %v1054_v1, %v9394_v25 }
 0x256   : > { %v1439_v19 = vmul.f32 %v1282_v0, %v1151_v52  ;;  %v1440_v46 = vmul.f32 %v1282_v0, %v1152_v60  ;;  %v1616_v47 = vadd.f32 %v9664_v36, %v1614_v22  ;;  %v1441_v61 = vmul.f32 %v1282_v0, %v1153_v33  ;;  %v1165_v36 = vld [vmem:[%s14086_s5 + $0x370] sm:$0xff] }
 0x257   : > { %14162 = vst [vmem:[#allocation29_spill] sm:$0xff] %v9917_v32  ;;  %14163 = vst [vmem:[#allocation30_spill] sm:$0xff] %v9920_v43  ;;  %v971_v44 = vrot.slane %v957_v53, %v9446_v23  ;;  %v972_v63 = vcombine.high %v964_v58, %v964_v58  ;;  %v1677_v26 = vadd.f32 %v1676_v20, %v1675_v14  ;;  %v1169_v20 = vld [vmem:[%s14086_s5 + $0x390] sm:$0xff]  ;;  %v14184_v43 = vld [vmem:[#allocation21_spill] sm:$0xff] }
 0x258   : > { %v1442_v50 = vmul.f32 %v1282_v0, %v1154_v7  ;;  %v9942_v54 = vmul.f32 %v1286_v30, %v1155_v5  ;;  %v1444_v57 = vmul.f32 %v1286_v30, %v1156_v59  ;;  %v1445_v16 = vmul.f32 %v1286_v30, %v1157_v13  ;;  %v1148_v32 = vld [vmem:[%s14086_s5 + $0x2e8] sm:$0xff] }
 0x259   : > { %v1446_v18 = vmul.f32 %v1286_v30, %v1158_v34  ;;  %v1448_v28 = vmul.f32 %v9886_v12, %v1160_v17  ;;  %v973_v45 = vcombine.high %v971_v44, %v971_v44  ;;  %v1449_v37 = vmul.f32 %v9886_v12, %v1161_v51 }
 0x25a   : > { %v9950_v24 = vmul.f32 %v9886_v12, %v1162_v40  ;;  %v9953_v27 = vmul.f32 %v9899_v41, %v1164_v2  ;;  %v980_v11 = vrot.slane %v964_v58, %v9446_v23  ;;  %v9957_v38 = vmul.f32 %v9899_v41, %v1165_v36  ;;  %v1121_v2 = vld [vmem:[%s14086_s5 + $0x210] sm:$0xff] }
 0x25b   : > { %v9960_v1 = vmul.f32 %v9899_v41, %v1166_v10  ;;  %v9963_v0 = vmul.f32 %v9902_v4, %v1168_v49  ;;  %v994_v22 = vrot.slane %v972_v63, %v9446_v23  ;;  %v9967_v48 = vadd.f32 %v9841_v56, %v1677_v26  ;;  %v14177_v26 = vld [vmem:[#allocation15_spill] sm:$0xff]  ;;  %v14178_v10 = vld [vmem:[#allocation16_spill] sm:$0xff] }
 0x25c   : > { %14164 = vst [vmem:[#allocation31_spill] sm:$0xff] %v9950_v24  ;;  %14165 = vst [vmem:[#allocation32_spill] sm:$0xff] %v9953_v27  ;;  %v9970_v52 = vmul.f32 %v9902_v4, %v1169_v20  ;;  %v9973_v60 = vsel %vm1471_vm1, %v1439_v19, 0.0  ;;  %v987_v53 = vrot.slane %v971_v44, %v9446_v23  ;;  %v9977_v58 = vsel %vm1471_vm1, %v1440_v46, 0.0  ;;  %v1123_v44 = vld [vmem:[%s14086_s5 + $0x220] sm:$0xff] }
 0x25d   : > { %14166 = vst [vmem:[#allocation33_spill] sm:$0xff] %v9957_v38  ;;  %14167 = vst [vmem:[#allocation34_spill] sm:$0xff] %v9960_v1  ;;  %v9980_v14 = vsel %vm1471_vm1, %v1444_v57, 0.0  ;;  %v1001_v33 = vrot.slane %v973_v45, %v9446_v23  ;;  %v1492_v30 = vadd.f32 %v9607_v6, %v1490_v9  ;;  %v9985_v56 = vsel %vm1471_vm1, %v1448_v28, 0.0  ;;  %v1125_v57 = vld [vmem:[%s14086_s5 + $0x230] sm:$0xff]  ;;  %v1134_v23 = vld [vmem:[%s14086_s5 + $0x278] sm:$0xff] }
 0x25e   : > { %14168 = vst [vmem:[#allocation35_spill] sm:$0xff] %v9963_v0  ;;  %14169 = vst [vmem:[#allocation36_spill] sm:$0xff] %v9970_v52  ;;  %v9988_v7 = vsel %vm1471_vm1, %v1441_v61, 0.0  ;;  %v1002_v5 = vcombine.high %v980_v11, %v980_v11  ;;  %v1555_v59 = vadd.f32 %v9637_v15, %v1553_v31  ;;  %v9992_v13 = vsel %vm1471_vm1, %v1445_v16, 0.0  ;;  %v1119_v15 = vld [vmem:[%s14086_s5 + $0x200] sm:$0xff]  ;;  %v1120_v31 = vld [vmem:[%s14086_s5 + $0x208] sm:$0xff] }
 0x25f   : > { %14170 = vst [vmem:[#allocation37_spill] sm:$0xff] %v9980_v14  ;;  %14171 = vst [vmem:[#allocation38_spill] sm:$0xff] %v9985_v56  ;;  %v9995_v34 = vsel %vm1471_vm1, %v1449_v37, 0.0  ;;  %v1004_v17 = vcombine.high %v994_v22, %v994_v22  ;;  %v1250_v19 = vrot.slane %v980_v11, %v9394_v25  ;;  %v9999_v6 = vsel %vm1471_vm1, %v1442_v50, 0.0  ;;  %v1122_v61 = vld [vmem:[%s14086_s5 + $0x218] sm:$0xff]  ;;  %v1124_v50 = vld [vmem:[%s14086_s5 + $0x228] sm:$0xff] }
 0x260   : > { %14172 = vst [vmem:[#allocation39_spill] sm:$0xff] %v9988_v7  ;;  %14173 = vst [vmem:[#allocation40_spill] sm:$0xff] %v9992_v13  ;;  %v10002_v9 = vsel %vm1471_vm1, %v1446_v18, 0.0  ;;  %v1003_v46 = vcombine.high %v987_v53, %v987_v53  ;;  %v1254_v51 = vrot.slane %v994_v22, %v9394_v25  ;;  %v1005_v40 = vcombine.high %v1001_v33, %v1001_v33  ;;  %v14179_v18 = vld [vmem:[#allocation22_spill] sm:$0xff]  ;;  %v1127_v11 = vld [vmem:[%s14086_s5 + $0x240] sm:$0xff] }
 0x261   : > { %14174 = vst [vmem:[#allocation41_spill] sm:$0xff] %v9995_v34  ;;  %14175 = vst [vmem:[#allocation42_spill] sm:$0xff] %v9999_v6  ;;  %v1494_v63 = vadd.f32 %v9616_v3, %v1492_v30  ;;  %v10023_v36 = vsel %vm1471_vm1, %v14177_v26, 0.0  ;;  %v10027_v49 = vsel %vm1471_vm1, %v14178_v10, 0.0  ;;  %v1126_v3 = vld [vmem:[%s14086_s5 + $0x238] sm:$0xff]  ;;  %v1258_v20 = vrot.slane %v1002_v5, %v9394_v25  ;;  %v14180_v45 = vld [vmem:[#allocation26_spill] sm:$0xff] }
 0x262   : > { %14176 = vst [vmem:[#allocation43_spill] sm:$0xff] %v10002_v9  ;;  %v1266_v16 = vrot.slane %v987_v53, %v9394_v25  ;;  %v1557_v28 = vadd.f32 %v14179_v18, %v1555_v59  ;;  %v1618_v37 = vadd.f32 %v14180_v45, %v1616_v47  ;;  %v1128_v22 = vld [vmem:[%s14086_s5 + $0x248] sm:$0xff]  ;;  %v1129_v30 = vld [vmem:[%s14086_s5 + $0x250] sm:$0xff]  ;;  %v1262_v5 = vrot.slane %v1004_v17, %v9394_v25  ;;  %v1130_v47 = vld [vmem:[%s14086_s5 + $0x258] sm:$0xff] }
 0x263   : > { %v1270_v53 = vrot.slane %v1001_v33, %v9394_v25  ;;  %v1407_v26 = vmul.f32 %v1250_v19, %v1119_v15  ;;  %v10053_v59 = vmul.f32 %v1250_v19, %v1120_v31  ;;  %v1131_v10 = vld [vmem:[%s14086_s5 + $0x260] sm:$0xff]  ;;  %v1132_v18 = vld [vmem:[%s14086_s5 + $0x268] sm:$0xff]  ;;  %v1274_v45 = vrot.slane %v1003_v46, %v9394_v25  ;;  %v1133_v31 = vld [vmem:[%s14086_s5 + $0x270] sm:$0xff] }
 0x264   : > { %v10065_v17 = vmul.f32 %v1250_v19, %v1121_v2  ;;  %v10067_v33 = vmul.f32 %v1250_v19, %v1122_v61  ;;  %v1411_v15 = vmul.f32 %v1254_v51, %v1123_v44  ;;  %v1135_v1 = vld [vmem:[%s14086_s5 + $0x280] sm:$0xff]  ;;  %v10079_v24 = vrot.slane %v1005_v40, %v9394_v25  ;;  %v14181_v2 = vld [vmem:[#allocation19_spill] sm:$0xff]  ;;  %v1136_v44 = vld [vmem:[%s14086_s5 + $0x288] sm:$0xff] }
 0x265   : > { %v10081_v46 = vmul.f32 %v1254_v51, %v1124_v50  ;;  %v10083_v19 = vmul.f32 %v1254_v51, %v1125_v57  ;;  %v1496_v61 = vadd.f32 %v14181_v2, %v1494_v63  ;;  %v1137_v9 = vld [vmem:[%s14086_s5 + $0x290] sm:$0xff]  ;;  %v1138_v52 = vld [vmem:[%s14086_s5 + $0x298] sm:$0xff]  ;;  %v10095_v40 = vmul.f32 %v1254_v51, %v1126_v3  ;;  %v1139_v63 = vld [vmem:[%s14086_s5 + $0x2a0] sm:$0xff] }
 0x266   : > { %v1415_v50 = vmul.f32 %v1258_v20, %v1127_v11  ;;  %v10097_v25 = vmul.f32 %v1258_v20, %v1128_v22  ;;  %v10099_v57 = vmul.f32 %v1258_v20, %v1129_v30  ;;  %v1140_v2 = vld [vmem:[%s14086_s5 + $0x2a8] sm:$0xff]  ;;  %v10107_v6 = vmul.f32 %v1258_v20, %v1130_v47  ;;  %v14182_v51 = vld [vmem:[#allocation20_spill] sm:$0xff]  ;;  %v1141_v11 = vld [vmem:[%s14086_s5 + $0x2b0] sm:$0xff] }
 0x267   : > { %v1419_v38 = vmul.f32 %v1262_v5, %v1131_v10  ;;  %v10109_v34 = vmul.f32 %v1262_v5, %v1132_v18  ;;  %v1498_v3 = vadd.f32 %v14182_v51, %v1496_v61  ;;  %v1142_v22 = vld [vmem:[%s14086_s5 + $0x2b8] sm:$0xff]  ;;  %v1143_v30 = vld [vmem:[%s14086_s5 + $0x2c0] sm:$0xff]  ;;  %v10121_v0 = vmul.f32 %v1262_v5, %v1133_v31  ;;  %v1144_v61 = vld [vmem:[%s14086_s5 + $0x2c8] sm:$0xff] }
 0x268   : > { %v10123_v20 = vmul.f32 %v1262_v5, %v1134_v23  ;;  %v1423_v47 = vmul.f32 %v1266_v16, %v1135_v1  ;;  %v14183_v10 = vld [vmem:[#allocation23_spill] sm:$0xff]  ;;  %v1424_v51 = vmul.f32 %v1266_v16, %v1136_v44  ;;  %v10129_v13 = vmul.f32 %v1266_v16, %v1137_v9  ;;  %v1145_v31 = vld [vmem:[%s14086_s5 + $0x2d0] sm:$0xff]  ;;  %v1147_v1 = vld [vmem:[%s14086_s5 + $0x2e0] sm:$0xff] }
 0x269   : > { %v1559_v18 = vadd.f32 %v14183_v10, %v1557_v28  ;;  %v10131_v27 = vmul.f32 %v1266_v16, %v1138_v52  ;;  %v1500_v7 = vadd.f32 %v14184_v43, %v1498_v3  ;;  %v1146_v23 = vld [vmem:[%s14086_s5 + $0x2d8] sm:$0xff]  ;;  %v1427_v28 = vmul.f32 %v1270_v53, %v1139_v63  ;;  %v14185_v9 = vld [vmem:[#allocation24_spill] sm:$0xff]  ;;  %v1149_v63 = vld [vmem:[%s14086_s5 + $0x2f0] sm:$0xff] }
 0x26a   : > { %v1428_v5 = vmul.f32 %v1270_v53, %v1140_v2  ;;  %v14186_v52 = vld [vmem:[#allocation27_spill] sm:$0xff]  ;;  %v10145_v10 = vmul.f32 %v1270_v53, %v1141_v11  ;;  %v10147_v43 = vmul.f32 %v1270_v53, %v1142_v22  ;;  %v1431_v3 = vmul.f32 %v1274_v45, %v1143_v30  ;;  %v14188_v11 = vld [vmem:[#allocation28_spill] sm:$0xff] }
 0x26b   : > { %v1561_v44 = vadd.f32 %v14185_v9, %v1559_v18  ;;  %v1620_v16 = vadd.f32 %v14186_v52, %v1618_v37  ;;  %v1502_v56 = vadd.f32 %v10023_v36, %v1500_v7  ;;  %v1432_v2 = vmul.f32 %v1274_v45, %v1144_v61  ;;  %v14187_v9 = vld [vmem:[#allocation25_spill] sm:$0xff]  ;;  %v1150_v30 = vld [vmem:[%s14086_s5 + $0x2f8] sm:$0xff] }
 0x26c   : > { %v1503_v18 = vsel %vm1471_vm1, %v1407_v26, 0.0  ;;  %v10159_v53 = vmul.f32 %v1274_v45, %v1145_v31  ;;  %v10161_v22 = vmul.f32 %v1274_v45, %v1146_v23  ;;  %v1435_v7 = vmul.f32 %v10079_v24, %v1147_v1 }
 0x26d   : > { %v1563_v37 = vadd.f32 %v14187_v9, %v1561_v44  ;;  %v1622_v52 = vadd.f32 %v14188_v11, %v1620_v16  ;;  %v1504_v36 = vadd.f32 %v1503_v18, %v1502_v56  ;;  %v1505_v14 = vsel %vm1471_vm1, %v1411_v15, 0.0 }
 0x26e   : > { %v1681_v44 = vadd.f32 %v9848_v55, %v9967_v48  ;;  %v1436_v31 = vmul.f32 %v10079_v24, %v1148_v32  ;;  %v10174_v45 = vmul.f32 %v10079_v24, %v1149_v63  ;;  %v1566_v56 = vsel %vm1471_vm1, %v10053_v59, 0.0  ;;  %v14189_v48 = vld [vmem:[#allocation17_spill] sm:$0xff] }
 0x26f   : > { %v1565_v61 = vadd.f32 %v10027_v49, %v1563_v37  ;;  %v1624_v26 = vadd.f32 %v9816_v62, %v1622_v52  ;;  %v1506_v23 = vadd.f32 %v1505_v14, %v1504_v36  ;;  %v1507_v1 = vsel %vm1471_vm1, %v1415_v50, 0.0 }
 0x270   : > { %v1683_v49 = vadd.f32 %v9854_v8, %v1681_v44  ;;  %v10182_v62 = vmul.f32 %v10079_v24, %v1150_v30  ;;  %v1568_v32 = vsel %vm1471_vm1, %v10081_v46, 0.0  ;;  %v1627_v14 = vsel %vm1471_vm1, %v14189_v48, 0.0  ;;  %v14190_v44 = vld [vmem:[#allocation18_spill] sm:$0xff] }
 0x271   : > { %v1567_v16 = vadd.f32 %v1566_v56, %v1565_v61  ;;  %v1626_v15 = vadd.f32 %v9834_v21, %v1624_v26  ;;  %v1508_v55 = vadd.f32 %v1507_v1, %v1506_v23  ;;  %v1509_v63 = vsel %vm1471_vm1, %v1419_v38, 0.0 }
 0x272   : > { %v1685_v50 = vadd.f32 %v9859_v29, %v1683_v49  ;;  %v1511_v21 = vsel %vm1471_vm1, %v1423_v47, 0.0  ;;  %v1570_v8 = vsel %vm1471_vm1, %v10097_v25, 0.0  ;;  %v1629_v24 = vsel %vm1471_vm1, %v10065_v17, 0.0 }
 0x273   : > { %v1569_v59 = vadd.f32 %v1568_v32, %v1567_v16  ;;  %v1628_v18 = vadd.f32 %v1627_v14, %v1626_v15  ;;  %v1510_v9 = vadd.f32 %v1509_v63, %v1508_v55  ;;  %v1513_v46 = vsel %vm1471_vm1, %v1427_v28, 0.0 }
 0x274   : > { %v1687_v52 = vadd.f32 %v9863_v35, %v1685_v50  ;;  %v1515_v36 = vsel %vm1471_vm1, %v1431_v3, 0.0  ;;  %v1572_v29 = vsel %vm1471_vm1, %v10109_v34, 0.0  ;;  %v1631_v47 = vsel %vm1471_vm1, %v10083_v19, 0.0 }
 0x275   : > { %v1571_v37 = vadd.f32 %v1570_v8, %v1569_v59  ;;  %v1630_v11 = vadd.f32 %v1629_v24, %v1628_v18  ;;  %v1512_v38 = vadd.f32 %v1511_v21, %v1510_v9  ;;  %v1574_v25 = vsel %vm1471_vm1, %v1424_v51, 0.0  ;;  %v1167_v59 = vld [vmem:[%s14086_s5 + $0x380] sm:$0xff] }
 0x276   : > { %v1689_v17 = vadd.f32 %v9868_v42, %v1687_v52  ;;  %v1576_v26 = vsel %vm1471_vm1, %v1428_v5, 0.0  ;;  %v1633_v35 = vsel %vm1471_vm1, %v10099_v57, 0.0  ;;  %v1690_v3 = vsel %vm1471_vm1, %v14190_v44, 0.0  ;;  %v1159_v57 = vld [vmem:[%s14086_s5 + $0x340] sm:$0xff] }
 0x277   : > { %v1573_v30 = vadd.f32 %v1572_v29, %v1571_v37  ;;  %v1632_v61 = vadd.f32 %v1631_v47, %v1630_v11  ;;  %v1514_v28 = vadd.f32 %v1513_v46, %v1512_v38  ;;  %v1578_v34 = vsel %vm1471_vm1, %v1432_v2, 0.0  ;;  %v1163_v2 = vld [vmem:[%s14086_s5 + $0x360] sm:$0xff] }
 0x278   : > { %v1691_v19 = vadd.f32 %v1690_v3, %v1689_v17  ;;  %v1580_v1 = vsel %vm1471_vm1, %v1436_v31, 0.0  ;;  %v1635_v51 = vsel %vm1471_vm1, %v10121_v0, 0.0  ;;  %v1692_v42 = vsel %vm1471_vm1, %v10067_v33, 0.0  ;;  %v1171_v8 = vld [vmem:[%s14086_s5 + $0x3a0] sm:$0xff]  ;;  %v14192_v17 = vld [vmem:[#allocation29_spill] sm:$0xff] }
 0x279   : > { %v1575_v23 = vadd.f32 %v1574_v25, %v1573_v30  ;;  %v1634_v56 = vadd.f32 %v1633_v35, %v1632_v61  ;;  %v1516_v5 = vadd.f32 %v1515_v36, %v1514_v28  ;;  %v1517_v31 = vsel %vm1471_vm1, %v1435_v7, 0.0  ;;  %v1175_v37 = vld [vmem:[%s14086_s5 + $0x3c0] sm:$0xff]  ;;  %v14191_v25 = vld [vmem:[#allocation37_spill] sm:$0xff] }
 0x27a   : > { %v1693_v49 = vadd.f32 %v1692_v42, %v1691_v19  ;;  %v1637_v0 = vsel %vm1471_vm1, %v10129_v13, 0.0  ;;  %v1639_v33 = vsel %vm1471_vm1, %v10145_v10, 0.0  ;;  %v1694_v55 = vsel %vm1471_vm1, %v10095_v40, 0.0  ;;  %v1179_v47 = vld [vmem:[%s14086_s5 + $0x3e0] sm:$0xff]  ;;  %v1176_v3 = vld [vmem:[%s14086_s5 + $0x3c8] sm:$0xff] }
 0x27b   : > { %v1577_v16 = vadd.f32 %v1576_v26, %v1575_v23  ;;  %v1636_v15 = vadd.f32 %v1635_v51, %v1634_v56  ;;  %v1518_v32 = vadd.f32 %v1517_v31, %v1516_v5  ;;  %v1447_v18 = vmul.f32 %v9886_v12, %v1159_v57  ;;  %v14193_v23 = vld [vmem:[#allocation38_spill] sm:$0xff]  ;;  %v14194_v56 = vld [vmem:[#allocation39_spill] sm:$0xff]  ;;  %v14196_v57 = vld [vmem:[#allocation32_spill] sm:$0xff] }
 0x27c   : > { %v1695_v63 = vadd.f32 %v1694_v55, %v1693_v49  ;;  %v1641_v7 = vsel %vm1471_vm1, %v10159_v53, 0.0  ;;  %v1696_v13 = vsel %vm1471_vm1, %v10107_v6, 0.0  ;;  %v1451_v10 = vmul.f32 %v9899_v41, %v1163_v2  ;;  %v1173_v2 = vld [vmem:[%s14086_s5 + $0x3b0] sm:$0xff]  ;;  %v14197_v31 = vld [vmem:[#allocation40_spill] sm:$0xff] }
 0x27d   : > { %v1579_v48 = vadd.f32 %v1578_v34, %v1577_v16  ;;  %v1638_v14 = vadd.f32 %v1637_v0, %v1636_v15  ;;  %v1520_v40 = vadd.f32 %v9973_v60, %v1518_v32  ;;  %v1521_v12 = vsel %vm1471_vm1, %v9942_v54, 0.0 }
 0x27e   : > { %v1697_v21 = vadd.f32 %v1696_v13, %v1695_v63  ;;  %v1643_v53 = vsel %vm1471_vm1, %v10174_v45, 0.0  ;;  %v1698_v6 = vsel %vm1471_vm1, %v10123_v20, 0.0  ;;  %v1455_v41 = vmul.f32 %v9902_v4, %v1167_v59  ;;  %v14199_v13 = vld [vmem:[#allocation41_spill] sm:$0xff] }
 0x27f   : > { %v1581_v50 = vadd.f32 %v1580_v1, %v1579_v48  ;;  %v1640_v9 = vadd.f32 %v1639_v33, %v1638_v14  ;;  %v1522_v24 = vadd.f32 %v1521_v12, %v1520_v40  ;;  %v1523_v11 = vsel %vm1471_vm1, %v1447_v18, 0.0  ;;  %v14195_v1 = vld [vmem:[#allocation30_spill] sm:$0xff]  ;;  %v14198_v48 = vld [vmem:[#allocation35_spill] sm:$0xff] }
 0x280   : > { %v1699_v46 = vadd.f32 %v1698_v6, %v1697_v21  ;;  %v1700_v54 = vsel %vm1471_vm1, %v10131_v27, 0.0  ;;  %v1702_v45 = vsel %vm1471_vm1, %v10147_v43, 0.0  ;;  %v1459_v20 = vmul.f32 %v9905_v39, %v1171_v8  ;;  %v1170_v40 = vld [vmem:[%s14086_s5 + $0x398] sm:$0xff]  ;;  %v14200_v8 = vld [vmem:[#allocation33_spill] sm:$0xff] }
 0x281   : > { %v1642_v60 = vadd.f32 %v1641_v7, %v1640_v9  ;;  %v1583_v52 = vadd.f32 %v9977_v58, %v1581_v50  ;;  %v1524_v38 = vadd.f32 %v1523_v11, %v1522_v24  ;;  %v1525_v30 = vsel %vm1471_vm1, %v1451_v10, 0.0  ;;  %v1172_v58 = vld [vmem:[%s14086_s5 + $0x3a8] sm:$0xff]  ;;  %v1177_v7 = vld [vmem:[%s14086_s5 + $0x3d0] sm:$0xff] }
 0x282   : > { %v1701_v29 = vadd.f32 %v1700_v54, %v1699_v46  ;;  %v1704_v43 = vsel %vm1471_vm1, %v10161_v22, 0.0  ;;  %v1706_v61 = vsel %vm1471_vm1, %v10182_v62, 0.0  ;;  %v1463_v28 = vmul.f32 %v14192_v17, %v1175_v37  ;;  %v1180_v62 = vld [vmem:[%s14086_s5 + $0x3e8] sm:$0xff]  ;;  %v14202_v54 = vld [vmem:[#allocation36_spill] sm:$0xff] }
 0x283   : > { %v1644_v36 = vadd.f32 %v1643_v53, %v1642_v60  ;;  %v1585_v27 = vadd.f32 %v14191_v25, %v1583_v52  ;;  %v1526_v26 = vadd.f32 %v1525_v30, %v1524_v38  ;;  %v1527_v44 = vsel %vm1471_vm1, %v1455_v41, 0.0  ;;  %v1181_v41 = vld [vmem:[%s14086_s5 + $0x3f0] sm:$0xff] }
 0x284   : > { %v1703_v35 = vadd.f32 %v1702_v45, %v1701_v29  ;;  %v1467_v51 = vmul.f32 %v14195_v1, %v1179_v47  ;;  %v1460_v42 = vmul.f32 %v9905_v39, %v1172_v58  ;;  %v1588_v5 = vsel %vm1471_vm1, %v14196_v57, 0.0  ;;  %v14201_v60 = vld [vmem:[#allocation42_spill] sm:$0xff]  ;;  %v1174_v29 = vld [vmem:[%s14086_s5 + $0x3b8] sm:$0xff] }
 0x285   : > { %v1587_v34 = vadd.f32 %v14193_v23, %v1585_v27  ;;  %v1646_v19 = vadd.f32 %v14194_v56, %v1644_v36  ;;  %v1528_v22 = vadd.f32 %v1527_v44, %v1526_v26  ;;  %v1529_v15 = vsel %vm1471_vm1, %v1459_v20, 0.0  ;;  %v14203_v47 = vld [vmem:[#allocation43_spill] sm:$0xff]  ;;  %v14205_v23 = vld [vmem:[#allocation34_spill] sm:$0xff] }
 0x286   : > { %v1705_v16 = vadd.f32 %v1704_v43, %v1703_v35  ;;  %v1531_v55 = vsel %vm1471_vm1, %v1463_v28, 0.0  ;;  %v1464_v32 = vmul.f32 %v14192_v17, %v1176_v3  ;;  %v1590_v14 = vsel %vm1471_vm1, %v14198_v48, 0.0  ;;  %v14204_v58 = vld [vmem:[#allocation31_spill] sm:$0xff] }
 0x287   : > { %v1589_v49 = vadd.f32 %v1588_v5, %v1587_v34  ;;  %v1648_v0 = vadd.f32 %v14197_v31, %v1646_v19  ;;  %v1530_v33 = vadd.f32 %v1529_v15, %v1528_v22  ;;  %v1468_v59 = vmul.f32 %v14195_v1, %v1180_v62  ;;  %v1178_v26 = vld [vmem:[%s14086_s5 + $0x3d8] sm:$0xff] }
 0x288   : > { %v1707_v63 = vadd.f32 %v1706_v61, %v1705_v16  ;;  %v1592_v9 = vsel %vm1471_vm1, %v1460_v42, 0.0  ;;  %v1461_v21 = vmul.f32 %v9905_v39, %v1173_v2  ;;  %v1651_v12 = vsel %vm1471_vm1, %v14200_v8, 0.0  ;;  %v1182_v19 = vld [vmem:[%s14086_s5 + $0x3f8] sm:$0xff] }
 0x289   : > { %v1591_v18 = vadd.f32 %v1590_v14, %v1589_v49  ;;  %v1650_v10 = vadd.f32 %v14199_v13, %v1648_v0  ;;  %v1532_v50 = vadd.f32 %v1531_v55, %v1530_v33  ;;  %v1533_v53 = vsel %vm1471_vm1, %v1467_v51, 0.0  ;;  %v1894_v8 = vld [vmem:[%s14088_s7 + $0x18] sm:$0xff] }
 0x28a   : > { %v1709_v46 = vadd.f32 %v14201_v60, %v1707_v63  ;;  %v1594_v11 = vsel %vm1471_vm1, %v1464_v32, 0.0  ;;  %v1465_v52 = vmul.f32 %v14192_v17, %v1177_v7  ;;  %v1653_v45 = vsel %vm1471_vm1, %v14202_v54, 0.0  ;;  %v2093_v60 = vld [vmem:[%s14090_s9 + $0x10] sm:$0xff]  ;;  %v8865_v54 = vld [vmem:[%s14087_s6] sm:$0xff]  }
 0x28b   : > { %v1593_v6 = vadd.f32 %v1592_v9, %v1591_v18  ;;  %v1652_v24 = vadd.f32 %v1651_v12, %v1650_v10  ;;  %v1534_v37 = vadd.f32 %v1533_v53, %v1532_v50  ;;  %v1458_v20 = vmul.f32 %v9902_v4, %v1170_v40  ;;  %v1891_v12 = vld [vmem:[%s14088_s7] sm:$0xff] }
 0x28c   : > { %v1711_v30 = vadd.f32 %v14203_v47, %v1709_v46  ;;  %v1712_v25 = vsel %vm1471_vm1, %v14204_v58, 0.0  ;;  %v1596_v27 = vsel %vm1471_vm1, %v1468_v59, 0.0  ;;  %v1469_v43 = vmul.f32 %v14195_v1, %v1181_v41  ;;  %v2091_v53 = vld [vmem:[%s14090_s9] sm:$0xff]  ;;  %v2092_v41 = vld [vmem:[%s14090_s9 + $0x8] sm:$0xff] }
 0x28d   : > { %v1595_v38 = vadd.f32 %v1594_v11, %v1593_v6  ;;  %v1654_v36 = vadd.f32 %v1653_v45, %v1652_v24  ;;  %8640 = vmatprep.mubr.msk.f32.mxu1 %vm1471_vm1, %v1534_v37  ;;  %v1655_v61 = vsel %vm1471_vm1, %v1461_v21, 0.0  ;;  %v1657_v44 = vsel %vm1471_vm1, %v1465_v52, 0.0  ;;  %v1893_v21 = vld [vmem:[%s14088_s7 + $0x10] sm:$0xff]  ;;  %v1892_v6 = vld [vmem:[%s14088_s7 + $0x8] sm:$0xff]  ;;  %v2186_v24 = vld [vmem:[%s14092_s11] sm:$0xff] }
 0x28e   : > { %v1713_v35 = vadd.f32 %v1712_v25, %v1711_v30  ;;  %v1462_v3 = vmul.f32 %v9905_v39, %v1174_v29  ;;  %v1714_v34 = vsel %vm1471_vm1, %v14205_v23, 0.0  ;;  %v1659_v22 = vsel %vm1471_vm1, %v1469_v43, 0.0  ;;  %v2187_v46 = vld [vmem:[%s14092_s11 + $0x8] sm:$0xff]  ;;  %v2094_v37 = vld [vmem:[%s14090_s9 + $0x18] sm:$0xff]  ;;  %v2188_v11 = vld [vmem:[%s14092_s11 + $0x10] sm:$0xff] }
 0x28f   : > { %v1597_v4 = vadd.f32 %v1596_v27, %v1595_v38  ;;  %v1656_v28 = vadd.f32 %v1655_v61, %v1654_v36  ;;  %v1466_v62 = vmul.f32 %v14192_v17, %v1178_v26  ;;  %v1716_v42 = vsel %vm1471_vm1, %v1458_v20, 0.0  ;;  %v2189_v52 = vld [vmem:[%s14092_s11 + $0x18] sm:$0xff] }
 0x290   : > { %v1715_v51 = vadd.f32 %v1714_v34, %v1713_v35  ;;  %v1470_v39 = vmul.f32 %v14195_v1, %v1182_v19  ;;  %v1718_v16 = vsel %vm1471_vm1, %v1462_v3, 0.0 }
 0x291   : > { %8641 = vmatmul.mubr.msk.f32.vlgmr.msra.gmra.mxu1 %vm1471_vm1, %v1597_v4  ;;  %v1658_v56 = vadd.f32 %v1657_v44, %v1656_v28  ;;  %v1720_v49 = vsel %vm1471_vm1, %v1466_v62, 0.0 }
 0x292   : > { %v1717_v5 = vadd.f32 %v1716_v42, %v1715_v51  ;;  %v1722_v31 = vsel %vm1471_vm1, %v1470_v39, 0.0 }
 0x293   : > { %v1660_v57 = vadd.f32 %v1659_v22, %v1658_v56 }
 0x294   : > { %v1719_v15 = vadd.f32 %v1718_v16, %v1717_v5 }
 0x295   : > { %8643 = vmatprep.mubr.msk.f32.mxu1 %vm1471_vm1, %v1660_v57 }
 0x296   : > { %v1721_v2 = vadd.f32 %v1720_v49, %v1719_v15 }
 0x298   : > { %v1723_v0 = vadd.f32 %v1722_v31, %v1721_v2 }
 0x29a   : > { %8644 = vmatmul.mubr.msk.f32.gmra.mxu1 %vm1471_vm1, %v1723_v0 }
 0x29b   : > { %8650 = vmatprep.mubr.msk.bf16.mxu1 %vm1925_vm2, %v8865_v54 }
 0x351   : > { %v10345_v17 = vpop.f32.mrf.mxu1 }
 0x352   : > { %v1824_v33 = vsel %vm693_vm0, %v10345_v17, 0.0  ;;  %v1834_v13 = vmul.f32 %v10345_v17, %v10345_v17 }
 0x353   : > { %1825 = vadd.xlane.f32.xlu0 %v1824_v33  ;;  %v10349_v1 = vpop.f32.mrf.mxu1 }
 0x354   : > { %v1821_v55 = vsel %vm693_vm0, %v10349_v1, 0.0  ;;  %v1833_v40 = vmul.f32 %v10349_v1, %v10349_v1  ;;  %v1840_v50 = vsel %vm693_vm0, %v1834_v13, 0.0 }
 0x355   : > { %1822 = vadd.xlane.f32.xlu1 %v1821_v55 }
 0x356   : > { %v1837_v9 = vsel %vm693_vm0, %v1833_v40, 0.0 }
 0x35a   : > { %v10353_v32 = vpop.f32.mrf.mxu1 }
 0x35b   : > { %v1830_v48 = vsel %vm693_vm0, %v10353_v32, 0.0  ;;  %v1836_v14 = vmul.f32 %v10353_v32, %v10353_v32 }
 0x35c   : > { %1831 = vadd.xlane.f32.xlu0 %v1830_v48  ;;  %v10359_v63 = vpop.f32.mrf.mxu1 }
 0x35d   : > { %v1827_v59 = vsel %vm693_vm0, %v10359_v63, 0.0  ;;  %v1835_v18 = vmul.f32 %v10359_v63, %v10359_v63  ;;  %v1846_v7 = vsel %vm693_vm0, %v1836_v14, 0.0 }
 0x35e   : > { %1828 = vadd.xlane.f32.xlu1 %v1827_v59 }
 0x35f   : > { %v1843_v10 = vsel %vm693_vm0, %v1835_v18, 0.0 }
 0x360   : > { %1847 = vadd.xlane.f32.xlu0 %v1846_v7 }
 0x362   : > { %1844 = vadd.xlane.f32.xlu1 %v1843_v10 }
 0x364   : > { %1841 = vadd.xlane.f32.xlu0 %v1840_v50 }
 0x366   : > { %1838 = vadd.xlane.f32.xlu1 %v1837_v9  ;;  %v14206_v9 = vld [vmem:[#allocation13_spill] sm:$0xff] }
 0x377   : > { %1907 = vperm.xlu1 %8864, %v1893_v21  }
 0x37a   : > { %1912 = vperm.xlu0 %8863, %v1894_v8   ;;  %v14209_v8 = vld [vmem:[#allocation10_spill] sm:$0xff] }
 0x37b   : > { %1897 = vperm.xlu1 %8864, %v1891_v12  }
 0x37e   : > { %2097 = vperm.xlu0 %8863, %v2091_v53   ;;  %v8868_v53 = vld [vmem:[%s14091_s10 + $0x8] sm:$0xff]  }
 0x37f   : > { %1902 = vperm.xlu1 %8864, %v1892_v6   ;;  %v9117_v6 = vld [vmem:[%s14083_s2] sm:$0xff] }
 0x382   : > { %2102 = vperm.xlu0 %8863, %v2092_v41   ;;  %v8869_v41 = vld [vmem:[%s14089_s8] sm:$0xff]  }
 0x383   : > { %2192 = vperm.xlu1 %8864, %v2186_v24   ;;  %8658 = vmatprep.mubr.msk.bf16.mxu0 %vm1925_vm2, %v8869_v41 }
 0x386   : > { %2107 = vperm.xlu0 %8863, %v2093_v60  }
 0x387   : > { %2197 = vperm.xlu1 %8864, %v2187_v46  }
 0x38a   : > { %2112 = vperm.xlu0 %8863, %v2094_v37  }
 0x38b   : > { %2202 = vperm.xlu1 %8864, %v2188_v11  }
 0x38f   : > { %2207 = vperm.xlu1 %8864, %v2189_v52  }
 0x3dc   : > { %v1826_v45 = vpop.xlane.xlu0 %1825 }
 0x3dd   : > { %v1850_v58 = vmul.f32 0.0625, %v1826_v45 }
 0x3de   : > { %v1823_v20 = vpop.xlane.xlu1 %1822 }
 0x3df   : > { %v1849_v43 = vmul.f32 0.0625, %v1823_v20  ;;  %v1858_v44 = vmul.f32 %v1850_v58, %v1850_v58  ;;  %v1870_v59 = vsub.f32 %v10345_v17, %v1850_v58  ;;  %v8867_v17 = vld [vmem:[%s14091_s10] sm:$0xff]  }
 0x3e1   : > { %v1857_v56 = vmul.f32 %v1849_v43, %v1849_v43  ;;  %v1869_v18 = vsub.f32 %v10349_v1, %v1849_v43  ;;  %v14208_v1 = vld [vmem:[#allocation11_spill] sm:$0xff] }
 0x3e2   : > { %v2184_v12 = vpack.c.bf16 %v14209_v8, %v14208_v1 }
 0x3e5   : > { %v1832_v38 = vpop.xlane.xlu0 %1831 }
 0x3e6   : > { %v1852_v36 = vmul.f32 0.0625, %v1832_v38 }
 0x3e7   : > { %v1829_v29 = vpop.xlane.xlu1 %1828 }
 0x3e8   : > { %v1851_v47 = vmul.f32 0.0625, %v1829_v29  ;;  %v1860_v25 = vmul.f32 %v1852_v36, %v1852_v36  ;;  %v1872_v31 = vsub.f32 %v10353_v32, %v1852_v36  ;;  %v14207_v32 = vld [vmem:[#allocation12_spill] sm:$0xff] }
 0x3e9   : > { %v1848_v30 = vpop.xlane.xlu0 %1847  ;;  %v2185_v21 = vpack.c.bf16 %v14207_v32, %v14206_v9 }
 0x3ea   : > { %v1856_v27 = vmul.f32 0.0625, %v1848_v30  ;;  %v1859_v4 = vmul.f32 %v1851_v47, %v1851_v47  ;;  %v1871_v0 = vsub.f32 %v10359_v63, %v1851_v47  ;;  %v8866_v63 = vld [vmem:[%s14087_s6 + $0x8] sm:$0xff]  }
 0x3eb   : > { %v1845_v61 = vpop.xlane.xlu1 %1844 }
 0x3ec   : > { %v1864_v28 = vsub.f32 %v1856_v27, %v1860_v25  ;;  %v1855_v26 = vmul.f32 0.0625, %v1845_v61 }
 0x3ed   : > { %v1842_v35 = vpop.xlane.xlu0 %1841 }
 0x3ee   : > { %v1868_v3 = vmax.f32 %v1864_v28, 0.0  ;;  %v1863_v23 = vsub.f32 %v1855_v26, %v1859_v4  ;;  %v1854_v34 = vmul.f32 0.0625, %v1842_v35 }
 0x3ef   : > { %v1839_v19 = vpop.xlane.xlu1 %1838 }
 0x3f0   : > { %v1876_v51 = vadd.f32 1e-05, %v1868_v3  ;;  %v1867_v22 = vmax.f32 %v1863_v23, 0.0  ;;  %v1862_v62 = vsub.f32 %v1854_v34, %v1858_v44  ;;  %v1853_v42 = vmul.f32 0.0625, %v1839_v19 }
 0x3f2   : > { %8901 = vrsqrt.f32 %v1876_v51  ;;  %v1875_v57 = vadd.f32 1e-05, %v1867_v22  ;;  %v1866_v5 = vmax.f32 %v1862_v62, 0.0  ;;  %v1861_v39 = vsub.f32 %v1853_v42, %v1857_v56 }
 0x3f3   : > { %v1908_v24 = vpop.permute.xlu1 %1907 }
 0x3f4   : > { %8903 = vrsqrt.f32 %v1875_v57  ;;  %v1874_v16 = vadd.f32 1e-05, %v1866_v5  ;;  %v1865_v15 = vmax.f32 %v1861_v39, 0.0 }
 0x3f5   : > { %v1913_v20 = vpop.permute.xlu0 %1912 }
 0x3f6   : > { %8905 = vrsqrt.f32 %v1874_v16  ;;  %v1873_v49 = vadd.f32 1e-05, %v1865_v15 }
 0x3f7   : > { %v1898_v46 = vpop.permute.xlu1 %1897 }
 0x3f8   : > { %8907 = vrsqrt.f32 %v1873_v49 }
 0x3fb   : > { %v1903_v30 = vpop.permute.xlu1 %1902 }
 0x3ff   : > { %v8902_v2 = vpop.eup %8901 }
 0x400   : > { %v1884_v48 = vmul.f32 %v8902_v2, %v1872_v31 }
 0x401   : > { %v8904_v33 = vpop.eup %8903 }
 0x402   : > { %v1883_v55 = vmul.f32 %v8904_v33, %v1871_v0 }
 0x403   : > { %v8906_v14 = vpop.eup %8905 }
 0x404   : > { %v1890_v7 = vpack.c.bf16 %v1884_v48, %v1883_v55  ;;  %v1882_v40 = vmul.f32 %v8906_v14, %v1870_v59 }
 0x405   : > { %v8908_v13 = vpop.eup %8907 }
 0x406   : > { %8646 = vmatprep.subr.bf16.mxu1 %v1890_v7  ;;  %v1881_v10 = vmul.f32 %v8908_v13, %v1869_v18 }
 0x407   : > { %8647 = vmatpush3.bf16.msra.mxu1 %v1890_v7 }
 0x408   : > { %v1889_v50 = vpack.c.bf16 %v1882_v40, %v1881_v10 }
 0x40a   : > { %8648 = vmatprep.subr.bf16.mxu1 %v1889_v50 }
 0x40b   : > { %8649 = vmatpush3.bf16.msra.mxu1 %v1889_v50 }
 0x40c   : > { %8662 = vmatprep.subr.bf16.mxu1 %v2185_v21 }
 0x40e   : > { %8651 = vmatmul.mubr.msk.bf16.vlgmr.msra.gmra.mxu1 %vm1925_vm2, %v8866_v63 }
 0x40f   : > { %8663 = vmatpush3.bf16.msra.mxu1 %v2185_v21  ;;  %8666 = vmatprep.mubr.msk.bf16.mxu1 %vm1925_vm2, %v8867_v17 }
 0x410   : > { %8664 = vmatprep.subr.bf16.mxu1 %v2184_v12 }
 0x413   : > { %8665 = vmatpush3.bf16.msra.mxu1 %v2184_v12 }
 0x414   : > { %8680 = vmatprep.subr.mxu1 %v9117_v6 }
 0x416   : > { %8667 = vmatmul.mubr.msk.bf16.vlgmr.msra.gmra.mxu1 %vm1925_vm2, %v8868_v53 }
 0x417   : > { %8681 = vmatpush3.msra.mxu1 %v9117_v6 }
 0x4ce   : > { %v8652_v60 = vpop.f32.mrf.mxu1 }
 0x4cf   : > { %v10440_v37 = vadd.f32 %v8652_v60, %v1908_v24 }
 0x4d0   : > { %v1966_v11 = vpop.f32.mrf.mxu1 }
 0x4d1   : > { %v10443_v52 = vmul.f32 0.70710677, %v10440_v37  ;;  %v10445_v54 = vadd.f32 %v1966_v11, %v1898_v46 }
 0x4d2   : > { %v8653_v45 = vpop.f32.mrf.mxu1 }
 0x4d3   : > { %v1991_v38 = vand.u32 2147483647, %v10443_v52  ;;  %v10449_v36 = vmul.f32 0.70710677, %v10445_v54  ;;  %v10451_v29 = vadd.f32 %v8653_v45, %v1913_v20  ;;  %vm2067_vm3 = vcmp.lt.f32.partialorder %v10443_v52, 0.0 }
 0x4d4   : > { %v1969_v47 = vpop.f32.mrf.mxu1 }
 0x4d5   : > { %v1995_v58 = vmul.f32 0.3275911, %v1991_v38  ;;  %v1989_v25 = vand.u32 2147483647, %v10449_v36  ;;  %v10455_v27 = vmul.f32 0.70710677, %v10451_v29  ;;  %v10457_v43 = vadd.f32 %v1969_v47, %v1903_v30 }
 0x4d6   : > { %v2043_v19 = vsub.f32 0.0, %v1991_v38  ;;  %vm2065_vm4 = vcmp.lt.f32.partialorder %v10449_v36, 0.0  ;;  %v1981_v36 = vmul.f32 0.5, %v10445_v54  ;;  %v9119_v54 = vld [vmem:[%s14082_s1] sm:$0xff] }
 0x4d7   : > { %v1999_v61 = vadd.f32 1.0, %v1995_v58  ;;  %v1993_v4 = vmul.f32 0.3275911, %v1989_v25  ;;  %v1992_v28 = vand.u32 2147483647, %v10455_v27  ;;  %v2041_v51 = vsub.f32 0.0, %v1989_v25 }
 0x4d8   : > { %v10461_v26 = vmul.f32 0.70710677, %v10457_v43  ;;  %v2047_v22 = vmul.f32 %v2043_v19, %v1991_v38  ;;  %vm2068_vm5 = vcmp.lt.f32.partialorder %v10455_v27, 0.0 }
 0x4d9   : > { %8909 = vrcp.f32 %v1999_v61  ;;  %v1997_v35 = vadd.f32 1.0, %v1993_v4  ;;  %v1996_v44 = vmul.f32 0.3275911, %v1992_v28  ;;  %v2044_v62 = vsub.f32 0.0, %v1992_v28 }
 0x4da   : > { %v1990_v3 = vand.u32 2147483647, %v10461_v26  ;;  %v2045_v57 = vmul.f32 %v2041_v51, %v1989_v25  ;;  %v2053_v39 = vmul.f32 1.442695, %v2047_v22  ;;  %vm2066_vm6 = vcmp.lt.f32.partialorder %v10461_v26, 0.0  ;;  %v9118_v26 = vld [vmem:[%s14082_s1 + $0x8] sm:$0xff] }
 0x4db   : > { %8911 = vrcp.f32 %v1997_v35  ;;  %v2000_v23 = vadd.f32 1.0, %v1996_v44  ;;  %v2048_v15 = vmul.f32 %v2044_v62, %v1992_v28 }
 0x4dc   : > { %v1994_v34 = vmul.f32 0.3275911, %v1990_v3  ;;  %v2042_v16 = vsub.f32 0.0, %v1990_v3  ;;  %v2049_v0 = vmul.f32 1.442695, %v2045_v57 }
 0x4dd   : > { %8913 = vrcp.f32 %v2000_v23  ;;  %v2055_v18 = vmul.f32 1.442695, %v2048_v15 }
 0x4de   : > { %v1998_v56 = vadd.f32 1.0, %v1994_v34  ;;  %v2046_v48 = vmul.f32 %v2042_v16, %v1990_v3 }
 0x4e0   : > { %8915 = vrcp.f32 %v1998_v56  ;;  %v2051_v32 = vmul.f32 1.442695, %v2046_v48  ;;  %v1984_v48 = vmul.f32 0.5, %v10451_v29  ;;  %v8870_v29 = vld [vmem:[%s14089_s8 + $0x8] sm:$0xff]  }
 0x4e1   : > { %8917 = vpow2.f32 %v2053_v39 }
 0x4e2   : > { %8919 = vpow2.f32 %v2049_v0 }
 0x4e3   : > { %8921 = vpow2.f32 %v2055_v18 }
 0x4e4   : > { %8923 = vpow2.f32 %v2051_v32  ;;  %v2193_v32 = vpop.permute.xlu1 %2192 }
 0x4e6   : > { %v8910_v42 = vpop.eup %8909 }
 0x4e7   : > { %v2007_v5 = vmul.f32 1.0614054, %v8910_v42 }
 0x4e8   : > { %v8912_v49 = vpop.eup %8911 }
 0x4e9   : > { %v2011_v2 = vadd.f32 -1.4531521, %v2007_v5  ;;  %v2005_v31 = vmul.f32 1.0614054, %v8912_v49 }
 0x4ea   : > { %v8914_v33 = vpop.eup %8913 }
 0x4eb   : > { %v2015_v55 = vmul.f32 %v8910_v42, %v2011_v2  ;;  %v2009_v14 = vadd.f32 -1.4531521, %v2005_v31  ;;  %v2008_v59 = vmul.f32 1.0614054, %v8914_v33 }
 0x4ed   : > { %v2019_v7 = vadd.f32 1.4214138, %v2015_v55  ;;  %v8916_v13 = vpop.eup %8915  ;;  %v2013_v10 = vmul.f32 %v8912_v49, %v2009_v14  ;;  %v2012_v40 = vadd.f32 -1.4531521, %v2008_v59  ;;  %v1983_v55 = vmul.f32 0.5, %v10440_v37 }
 0x4ee   : > { %v2006_v9 = vmul.f32 1.0614054, %v8916_v13  ;;  %v8918_v47 = vpop.eup %8917 }
 0x4ef   : > { %v2023_v50 = vmul.f32 %v8910_v42, %v2019_v7  ;;  %v2017_v21 = vadd.f32 1.4214138, %v2013_v10  ;;  %v2016_v63 = vmul.f32 %v8914_v33, %v2012_v40  ;;  %v8920_v35 = vpop.eup %8919  ;;  %v1982_v10 = vmul.f32 0.5, %v10457_v43  ;;  %v2098_v43 = vpop.permute.xlu0 %2097 }
 0x4f0   : > { %v2010_v1 = vadd.f32 -1.4531521, %v2006_v9  ;;  %v8922_v56 = vpop.eup %8921 }
 0x4f1   : > { %v2027_v17 = vadd.f32 -0.28449672, %v2023_v50  ;;  %v2021_v8 = vmul.f32 %v8912_v49, %v2017_v21  ;;  %v2020_v12 = vadd.f32 1.4214138, %v2016_v63  ;;  %v8924_v57 = vpop.eup %8923  ;;  %v2198_v63 = vpop.permute.xlu1 %2197 }
 0x4f2   : > { %v2014_v6 = vmul.f32 %v8916_v13, %v2010_v1 }
 0x4f3   : > { %v2031_v53 = vmul.f32 %v8910_v42, %v2027_v17  ;;  %v2025_v41 = vadd.f32 -0.28449672, %v2021_v8  ;;  %v2024_v24 = vmul.f32 %v8914_v33, %v2020_v12  ;;  %v2103_v21 = vpop.permute.xlu0 %2102  ;;  %v8668_v17 = vpop.f32.mrf.mxu1 }
 0x4f4   : > { %v2018_v46 = vadd.f32 1.4214138, %v2014_v6 }
 0x4f5   : > { %v2035_v60 = vadd.f32 0.2548296, %v2031_v53  ;;  %v2029_v11 = vmul.f32 %v8912_v49, %v2025_v41  ;;  %v2028_v45 = vadd.f32 -0.28449672, %v2024_v24  ;;  %v2260_v1 = vpop.f32.mrf.mxu1  ;;  %v2203_v12 = vpop.permute.xlu1 %2202 }
 0x4f6   : > { %v2022_v38 = vmul.f32 %v8916_v13, %v2018_v46  ;;  %v2269_v6 = vadd.f32 %v8668_v17, %v2203_v12  ;;  %v2261_v46 = vadd.f32 %v2260_v1, %v2193_v32 }
 0x4f7   : > { %v2039_v20 = vmul.f32 %v8910_v42, %v2035_v60  ;;  %v2033_v30 = vadd.f32 0.2548296, %v2029_v11  ;;  %v2032_v58 = vmul.f32 %v8914_v33, %v2028_v45  ;;  %v2108_v8 = vpop.permute.xlu0 %2107  ;;  %v8669_v41 = vpop.f32.mrf.mxu1 }
 0x4f8   : > { %v2026_v61 = vadd.f32 -0.28449672, %v2022_v38 }
 0x4f9   : > { %v2059_v25 = vmul.f32 %v8918_v47, %v2039_v20  ;;  %v2037_v4 = vmul.f32 %v8912_v49, %v2033_v30  ;;  %v2036_v28 = vadd.f32 0.2548296, %v2032_v58  ;;  %v2208_v47 = vpop.permute.xlu1 %2207  ;;  %v2263_v30 = vpop.f32.mrf.mxu1 }
 0x4fa   : > { %v2030_v3 = vmul.f32 %v8916_v13, %v2026_v61 }
 0x4fb   : > { %v2063_v44 = vsub.f32 1.0, %v2059_v25  ;;  %v2057_v23 = vmul.f32 %v8920_v35, %v2037_v4  ;;  %v2040_v34 = vmul.f32 %v8914_v33, %v2036_v28  ;;  %v2113_v20 = vpop.permute.xlu0 %2112  ;;  %v2272_v4 = vadd.f32 %v8669_v41, %v2208_v47 }
 0x4fc   : > { %v2034_v51 = vadd.f32 0.2548296, %v2030_v3  ;;  %v2264_v3 = vadd.f32 %v2263_v30, %v2198_v63 }
 0x4fd   : > { %v2071_v19 = vsub.f32 0.0, %v2063_v44  ;;  %v2061_v22 = vsub.f32 1.0, %v2057_v23  ;;  %v2060_v62 = vmul.f32 %v8922_v56, %v2040_v34 }
 0x4fe   : > { %v2038_v42 = vmul.f32 %v8916_v13, %v2034_v51 }
 0x4ff   : > { %v2075_v5 = vsel %vm2067_vm3, %v2071_v19, %v2063_v44  ;;  %v2069_v39 = vsub.f32 0.0, %v2061_v22  ;;  %v2064_v16 = vsub.f32 1.0, %v2060_v62 }
 0x500   : > { %v2058_v15 = vmul.f32 %v8924_v57, %v2038_v42  ;;  %v2079_v2 = vadd.f32 1.0, %v2075_v5 }
 0x501   : > { %v2072_v49 = vsub.f32 0.0, %v2064_v16  ;;  %v2073_v31 = vsel %vm2065_vm4, %v2069_v39, %v2061_v22 }
 0x502   : > { %v2062_v0 = vsub.f32 1.0, %v2058_v15  ;;  %v2077_v59 = vadd.f32 1.0, %v2073_v31  ;;  %v2083_v18 = vmul.f32 %v2079_v2, %v1983_v55 }
 0x503   : > { %v2076_v33 = vsel %vm2068_vm5, %v2072_v49, %v2064_v16 }
 0x504   : > { %v2080_v52 = vadd.f32 1.0, %v2076_v33  ;;  %v2070_v14 = vsub.f32 0.0, %v2062_v0  ;;  %v2081_v50 = vmul.f32 %v2077_v59, %v1981_v36 }
 0x506   : > { %v2084_v7 = vmul.f32 %v2080_v52, %v1984_v48  ;;  %v2074_v13 = vsel %vm2066_vm6, %v2070_v14, %v2062_v0 }
 0x507   : > { %v2078_v40 = vadd.f32 1.0, %v2074_v13 }
 0x508   : > { %v2090_v27 = vpack.c.bf16 %v2084_v7, %v2083_v18 }
 0x509   : > { %v2082_v9 = vmul.f32 %v2078_v40, %v1982_v10 }
 0x50a   : > { %8654 = vmatprep.subr.bf16.mxu0 %v2090_v27 }
 0x50b   : > { %8655 = vmatpush3.bf16.msra.mxu0 %v2090_v27  ;;  %v2089_v37 = vpack.c.bf16 %v2082_v9, %v2081_v50 }
 0x50d   : > { %8656 = vmatprep.subr.bf16.mxu0 %v2089_v37 }
 0x50f   : > { %8657 = vmatpush3.bf16.msra.mxu0 %v2089_v37 }
 0x510   : > { %8670 = vmatprep.subr.mxu0 %v9118_v26 }
 0x512   : > { %8659 = vmatmul.mubr.msk.bf16.vlgmr.msra.gmra.mxu0 %vm1925_vm2, %v8870_v29 }
 0x513   : > { %8671 = vmatpush3.msra.mxu0 %v9118_v26 }
 0x514   : > { %8672 = vmatprep.subr.mxu0 %v9119_v54 }
 0x515   : > { %8673 = vmatpush3.msra.mxu0 %v9119_v54 }
 0x5d2   : > { %v8660_v53 = vpop.f32.mrf.mxu0 }
 0x5d3   : > { %v2174_v24 = vadd.f32 %v8660_v53, %v2108_v8 }
 0x5d4   : > { %v2165_v60 = vpop.f32.mrf.mxu0 }
 0x5d5   : > { %v10482_v11 = vadd.f32 %v2269_v6, %v2174_v24  ;;  %v2166_v45 = vadd.f32 %v2165_v60, %v2098_v43 }
 0x5d6   : > { %v8661_v38 = vpop.f32.mrf.mxu0 }
 0x5d7   : > { %v10485_v58 = vmul.f32 0.70710677, %v10482_v11  ;;  %v10487_v25 = vadd.f32 %v2261_v46, %v2166_v45  ;;  %v2177_v61 = vadd.f32 %v8661_v38, %v2113_v20 }
 0x5d8   : > { %v2168_v28 = vpop.f32.mrf.mxu0 }
 0x5d9   : > { %v2289_v35 = vand.u32 2147483647, %v10485_v58  ;;  %v10491_v44 = vmul.f32 0.70710677, %v10487_v25  ;;  %v10493_v23 = vadd.f32 %v2272_v4, %v2177_v61  ;;  %v2169_v34 = vadd.f32 %v2168_v28, %v2103_v21 }
 0x5da   : > { %vm2365_vm8 = vcmp.lt.f32.partialorder %v10485_v58, 0.0 }
 0x5db   : > { %v2293_v56 = vmul.f32 0.3275911, %v2289_v35  ;;  %v2287_v19 = vand.u32 2147483647, %v10491_v44  ;;  %v10497_v51 = vmul.f32 0.70710677, %v10493_v23  ;;  %v10499_v22 = vadd.f32 %v2264_v3, %v2169_v34 }
 0x5dc   : > { %v2341_v0 = vsub.f32 0.0, %v2289_v35  ;;  %vm2363_vm7 = vcmp.lt.f32.partialorder %v10491_v44, 0.0 }
 0x5dd   : > { %v2297_v62 = vadd.f32 1.0, %v2293_v56  ;;  %v2291_v42 = vmul.f32 0.3275911, %v2287_v19  ;;  %v2290_v57 = vand.u32 2147483647, %v10497_v51  ;;  %v2339_v33 = vsub.f32 0.0, %v2287_v19 }
 0x5de   : > { %v10503_v5 = vmul.f32 0.70710677, %v10499_v22  ;;  %v2345_v55 = vmul.f32 %v2341_v0, %v2289_v35  ;;  %vm2366_vm10 = vcmp.lt.f32.partialorder %v10497_v51, 0.0  ;;  %v2280_v58 = vmul.f32 0.5, %v10499_v22 }
 0x5df   : > { %8925 = vrcp.f32 %v2297_v62  ;;  %v2295_v39 = vadd.f32 1.0, %v2291_v42  ;;  %v2294_v16 = vmul.f32 0.3275911, %v2290_v57  ;;  %v2342_v48 = vsub.f32 0.0, %v2290_v57 }
 0x5e0   : > { %v2288_v15 = vand.u32 2147483647, %v10503_v5  ;;  %v2343_v14 = vmul.f32 %v2339_v33, %v2287_v19  ;;  %v2351_v18 = vmul.f32 1.442695, %v2345_v55  ;;  %vm2364_vm9 = vcmp.lt.f32.partialorder %v10503_v5, 0.0 }
 0x5e1   : > { %8927 = vrcp.f32 %v2295_v39  ;;  %v2298_v49 = vadd.f32 1.0, %v2294_v16  ;;  %v2346_v13 = vmul.f32 %v2342_v48, %v2290_v57  ;;  %v2282_v22 = vmul.f32 0.5, %v10493_v23 }
 0x5e2   : > { %v2292_v2 = vmul.f32 0.3275911, %v2288_v15  ;;  %v2340_v7 = vsub.f32 0.0, %v2288_v15  ;;  %v2347_v27 = vmul.f32 1.442695, %v2343_v14 }
 0x5e3   : > { %8929 = vrcp.f32 %v2298_v49  ;;  %v2353_v54 = vmul.f32 1.442695, %v2346_v13 }
 0x5e4   : > { %v2296_v31 = vadd.f32 1.0, %v2292_v2  ;;  %v2344_v37 = vmul.f32 %v2340_v7, %v2288_v15 }
 0x5e6   : > { %8931 = vrcp.f32 %v2296_v31  ;;  %v2349_v8 = vmul.f32 1.442695, %v2344_v37 }
 0x5e7   : > { %8933 = vpow2.f32 %v2351_v18 }
 0x5e8   : > { %8935 = vpow2.f32 %v2347_v27 }
 0x5e9   : > { %8937 = vpow2.f32 %v2353_v54 }
 0x5ea   : > { %8939 = vpow2.f32 %v2349_v8 }
 0x5ec   : > { %v8926_v52 = vpop.eup %8925 }
 0x5ed   : > { %v2305_v59 = vmul.f32 1.0614054, %v8926_v52 }
 0x5ee   : > { %v8928_v36 = vpop.eup %8927 }
 0x5ef   : > { %v2309_v10 = vadd.f32 -1.4531521, %v2305_v59  ;;  %v2303_v40 = vmul.f32 1.0614054, %v8928_v36 }
 0x5f0   : > { %v8930_v50 = vpop.eup %8929 }
 0x5f1   : > { %v2313_v9 = vmul.f32 %v8926_v52, %v2309_v10  ;;  %v2307_v29 = vadd.f32 -1.4531521, %v2303_v40  ;;  %v2306_v26 = vmul.f32 1.0614054, %v8930_v50 }
 0x5f3   : > { %v2317_v43 = vadd.f32 1.4214138, %v2313_v9  ;;  %v8932_v32 = vpop.eup %8931  ;;  %v2311_v21 = vmul.f32 %v8928_v36, %v2307_v29  ;;  %v2310_v63 = vadd.f32 -1.4531521, %v2306_v26 }
 0x5f4   : > { %v2304_v1 = vmul.f32 1.0614054, %v8932_v32  ;;  %v8934_v3 = vpop.eup %8933 }
 0x5f5   : > { %v2321_v17 = vmul.f32 %v8926_v52, %v2317_v43  ;;  %v2315_v12 = vadd.f32 1.4214138, %v2311_v21  ;;  %v2314_v53 = vmul.f32 %v8930_v50, %v2310_v63  ;;  %v8936_v39 = vpop.eup %8935 }
 0x5f6   : > { %v2308_v41 = vadd.f32 -1.4531521, %v2304_v1  ;;  %v8938_v2 = vpop.eup %8937 }
 0x5f7   : > { %v2325_v6 = vadd.f32 -0.28449672, %v2321_v17  ;;  %v2319_v24 = vmul.f32 %v8928_v36, %v2315_v12  ;;  %v2318_v60 = vadd.f32 1.4214138, %v2314_v53  ;;  %v8940_v14 = vpop.eup %8939 }
 0x5f8   : > { %v2312_v45 = vmul.f32 %v8932_v32, %v2308_v41 }
 0x5f9   : > { %v2329_v46 = vmul.f32 %v8926_v52, %v2325_v6  ;;  %v2323_v20 = vadd.f32 -0.28449672, %v2319_v24  ;;  %v2322_v38 = vmul.f32 %v8930_v50, %v2318_v60 }
 0x5fa   : > { %v2316_v30 = vadd.f32 1.4214138, %v2312_v45 }
 0x5fb   : > { %v2333_v47 = vadd.f32 0.2548296, %v2329_v46  ;;  %v2327_v61 = vmul.f32 %v8928_v36, %v2323_v20  ;;  %v2326_v4 = vadd.f32 -0.28449672, %v2322_v38 }
 0x5fc   : > { %v2320_v35 = vmul.f32 %v8932_v32, %v2316_v30 }
 0x5fd   : > { %v2337_v28 = vmul.f32 %v8926_v52, %v2333_v47  ;;  %v2331_v34 = vadd.f32 0.2548296, %v2327_v61  ;;  %v2330_v56 = vmul.f32 %v8930_v50, %v2326_v4 }
 0x5fe   : > { %v2324_v62 = vadd.f32 -0.28449672, %v2320_v35 }
 0x5ff   : > { %v2357_v19 = vmul.f32 %v8934_v3, %v2337_v28  ;;  %v2335_v42 = vmul.f32 %v8928_v36, %v2331_v34  ;;  %v2334_v57 = vadd.f32 0.2548296, %v2330_v56  ;;  %v2279_v36 = vmul.f32 0.5, %v10487_v25 }
 0x600   : > { %v2328_v16 = vmul.f32 %v8932_v32, %v2324_v62 }
 0x601   : > { %v2355_v15 = vmul.f32 %v8936_v39, %v2335_v42  ;;  %v2338_v49 = vmul.f32 %v8930_v50, %v2334_v57  ;;  %v2361_v31 = vsub.f32 1.0, %v2357_v19 }
 0x602   : > { %v2332_v0 = vadd.f32 0.2548296, %v2328_v16 }
 0x603   : > { %v2359_v33 = vsub.f32 1.0, %v2355_v15  ;;  %v2358_v55 = vmul.f32 %v8938_v2, %v2338_v49  ;;  %v2369_v18 = vsub.f32 0.0, %v2361_v31 }
 0x604   : > { %v2336_v48 = vmul.f32 %v8932_v32, %v2332_v0  ;;  %v2281_v32 = vmul.f32 0.5, %v10482_v11 }
 0x605   : > { %v2367_v52 = vsub.f32 0.0, %v2359_v33  ;;  %v2362_v59 = vsub.f32 1.0, %v2358_v55  ;;  %v2373_v50 = vsel %vm2365_vm8, %v2369_v18, %v2361_v31 }
 0x606   : > { %v2356_v7 = vmul.f32 %v8940_v14, %v2336_v48  ;;  %v2377_v26 = vadd.f32 1.0, %v2373_v50 }
 0x607   : > { %v2371_v13 = vsel %vm2363_vm7, %v2367_v52, %v2359_v33  ;;  %v2370_v27 = vsub.f32 0.0, %v2362_v59 }
 0x608   : > { %v2375_v10 = vadd.f32 1.0, %v2371_v13  ;;  %v2360_v40 = vsub.f32 1.0, %v2356_v7  ;;  %v10522_v63 = vmul.f32 %v2377_v26, %v2281_v32 }
 0x609   : > { %v2374_v54 = vsel %vm2366_vm10, %v2370_v27, %v2362_v59 }
 0x60a   : > { %v10509_v9 = vmul.f32 %v2375_v10, %v2279_v36  ;;  %v2368_v37 = vsub.f32 0.0, %v2360_v40  ;;  %v2378_v5 = vadd.f32 1.0, %v2374_v54  ;;  %14212 = vst [vmem:[#allocation22_spill] sm:$0xff] %v10522_v63  ;;  %v2389_v12 = vsel %vm693_vm0, %v10522_v63, 0.0 }
 0x60b   : > { %v2397_v53 = vmul.f32 %v10522_v63, %v10522_v63 }
 0x60c   : > { %14210 = vst [vmem:[#allocation15_spill] sm:$0xff] %v10509_v9  ;;  %v2372_v29 = vsel %vm2364_vm9, %v2368_v37, %v2360_v40  ;;  %v2383_v44 = vsel %vm693_vm0, %v10509_v9, 0.0  ;;  %v2395_v25 = vmul.f32 %v10509_v9, %v10509_v9  ;;  %v10529_v8 = vmul.f32 %v2378_v5, %v2282_v22 }
 0x60d   : > { %v2376_v43 = vadd.f32 1.0, %v2372_v29  ;;  %2384 = vadd.xlane.f32.xlu0 %v2383_v44  ;;  %v2405_v23 = vsel %vm693_vm0, %v2397_v53, 0.0 }
 0x60e   : > { %v2399_v51 = vsel %vm693_vm0, %v2395_v25, 0.0  ;;  %14213 = vst [vmem:[#allocation26_spill] sm:$0xff] %v10529_v8  ;;  %v2392_v6 = vsel %vm693_vm0, %v10529_v8, 0.0  ;;  %v2398_v41 = vmul.f32 %v10529_v8, %v10529_v8 }
 0x60f   : > { %v10519_v21 = vmul.f32 %v2376_v43, %v2280_v58  ;;  %v14214_v43 = vld [vmem:[#allocation14_spill] sm:$0xff] }
 0x610   : > { %v2408_v24 = vsel %vm693_vm0, %v2398_v41, 0.0 }
 0x611   : > { %14211 = vst [vmem:[#allocation16_spill] sm:$0xff] %v10519_v21  ;;  %2400 = vadd.xlane.f32.xlu0 %v2399_v51  ;;  %v2386_v17 = vsel %vm693_vm0, %v10519_v21, 0.0  ;;  %v2396_v1 = vmul.f32 %v10519_v21, %v10519_v21 }
 0x612   : > { %2387 = vadd.xlane.f32.xlu1 %v2386_v17 }
 0x613   : > { %v2402_v11 = vsel %vm693_vm0, %v2396_v1, 0.0 }
 0x615   : > { %2403 = vadd.xlane.f32.xlu0 %v2402_v11 }
 0x616   : > { %2390 = vadd.xlane.f32.xlu1 %v2389_v12 }
 0x619   : > { %2393 = vadd.xlane.f32.xlu0 %v2392_v6 }
 0x61a   : > { %2406 = vadd.xlane.f32.xlu1 %v2405_v23 }
 0x61d   : > { %2409 = vadd.xlane.f32.xlu0 %v2408_v24 }
 0x696   : > { %v2385_v60 = vpop.xlane.xlu0 %2384 }
 0x697   : > { %v2411_v46 = vmul.f32 0.0625, %v2385_v60  ;;  %v8032_v60 = vld [vmem:[%s14086_s5 + $0x500] sm:$0xff] }
 0x699   : > { %v2419_v20 = vmul.f32 %v2411_v46, %v2411_v46  ;;  %v2431_v7 = vsub.f32 %v10509_v9, %v2411_v46  ;;  %v8033_v46 = vld [vmem:[%s14086_s5 + $0x508] sm:$0xff] }
 0x69a   : > { %v2401_v45 = vpop.xlane.xlu0 %2400 }
 0x69b   : > { %v2415_v38 = vmul.f32 0.0625, %v2401_v45  ;;  %v2388_v47 = vpop.xlane.xlu1 %2387  ;;  %v8034_v45 = vld [vmem:[%s14086_s5 + $0x510] sm:$0xff] }
 0x69c   : > { %v2412_v30 = vmul.f32 0.0625, %v2388_v47 }
 0x69d   : > { %v2423_v61 = vsub.f32 %v2415_v38, %v2419_v20  ;;  %v14215_v20 = vld [vmem:[#allocation9_spill] sm:$0xff] }
 0x69e   : > { %v2404_v4 = vpop.xlane.xlu0 %2403  ;;  %v2420_v35 = vmul.f32 %v2412_v30, %v2412_v30  ;;  %v2432_v10 = vsub.f32 %v10519_v21, %v2412_v30  ;;  %v8035_v30 = vld [vmem:[%s14086_s5 + $0x518] sm:$0xff] }
 0x69f   : > { %v2427_v28 = vmax.f32 %v2423_v61, 0.0  ;;  %v2416_v3 = vmul.f32 0.0625, %v2404_v4  ;;  %v2391_v34 = vpop.xlane.xlu1 %2390  ;;  %v8036_v61 = vld [vmem:[%s14086_s5 + $0x520] sm:$0xff]  ;;  %v8037_v4 = vld [vmem:[%s14086_s5 + $0x528] sm:$0xff]  ;;  %v8011_v21 = vld [vmem:[%s14086_s5 + $0x458] sm:$0xff] }
 0x6a0   : > { %v2413_v56 = vmul.f32 0.0625, %v2391_v34  ;;  %v8039_v34 = vld [vmem:[%s14086_s5 + $0x538] sm:$0xff] }
 0x6a1   : > { %v2435_v19 = vadd.f32 1e-05, %v2427_v28  ;;  %v2424_v62 = vsub.f32 %v2416_v3, %v2420_v35  ;;  %v8038_v3 = vld [vmem:[%s14086_s5 + $0x530] sm:$0xff] }
 0x6a2   : > { %v2394_v42 = vpop.xlane.xlu0 %2393  ;;  %v2421_v15 = vmul.f32 %v2413_v56, %v2413_v56  ;;  %v2433_v50 = vsub.f32 %v10522_v63, %v2413_v56  ;;  %v8040_v56 = vld [vmem:[%s14086_s5 + $0x540] sm:$0xff] }
 0x6a3   : > { %8941 = vrsqrt.f32 %v2435_v19  ;;  %v2428_v57 = vmax.f32 %v2424_v62, 0.0  ;;  %v2414_v39 = vmul.f32 0.0625, %v2394_v42  ;;  %v2407_v16 = vpop.xlane.xlu1 %2406  ;;  %v8041_v62 = vld [vmem:[%s14086_s5 + $0x548] sm:$0xff]  ;;  %v8042_v42 = vld [vmem:[%s14086_s5 + $0x550] sm:$0xff] }
 0x6a4   : > { %v2417_v49 = vmul.f32 0.0625, %v2407_v16 }
 0x6a5   : > { %v2436_v2 = vadd.f32 1e-05, %v2428_v57  ;;  %v2422_v33 = vmul.f32 %v2414_v39, %v2414_v39  ;;  %v2434_v44 = vsub.f32 %v10529_v8, %v2414_v39  ;;  %v8043_v57 = vld [vmem:[%s14086_s5 + $0x558] sm:$0xff] }
 0x6a6   : > { %v2425_v31 = vsub.f32 %v2417_v49, %v2421_v15  ;;  %v2410_v0 = vpop.xlane.xlu0 %2409 }
 0x6a7   : > { %8943 = vrsqrt.f32 %v2436_v2  ;;  %v2418_v55 = vmul.f32 0.0625, %v2410_v0  ;;  %v8044_v2 = vld [vmem:[%s14086_s5 + $0x560] sm:$0xff]  ;;  %v8046_v0 = vld [vmem:[%s14086_s5 + $0x570] sm:$0xff] }
 0x6a8   : > { %v2429_v48 = vmax.f32 %v2425_v31, 0.0  ;;  %v8045_v31 = vld [vmem:[%s14086_s5 + $0x568] sm:$0xff] }
 0x6a9   : > { %v2426_v14 = vsub.f32 %v2418_v55, %v2422_v33 }
 0x6aa   : > { %v2437_v52 = vadd.f32 1e-05, %v2429_v48 }
 0x6ab   : > { %v2430_v59 = vmax.f32 %v2426_v14, 0.0 }
 0x6ac   : > { %8945 = vrsqrt.f32 %v2437_v52  ;;  %v8047_v52 = vld [vmem:[%s14086_s5 + $0x578] sm:$0xff] }
 0x6ad   : > { %v2438_v18 = vadd.f32 1e-05, %v2430_v59  ;;  %v8048_v59 = vld [vmem:[%s14086_s5 + $0x580] sm:$0xff] }
 0x6af   : > { %8947 = vrsqrt.f32 %v2438_v18  ;;  %v8049_v18 = vld [vmem:[%s14086_s5 + $0x588] sm:$0xff] }
 0x6b0   : > { %v8942_v13 = vpop.eup %8941 }
 0x6b1   : > { %v2443_v36 = vmul.f32 %v8942_v13, %v2431_v7 }
 0x6b3   : > { %8674 = vmatprep.mubr.msk.f32.mxu0 %vm693_vm0, %v2443_v36 }
 0x6b4   : > { %v8944_v40 = vpop.eup %8943 }
 0x6b5   : > { %v2444_v27 = vmul.f32 %v8944_v40, %v2432_v10  ;;  %v8050_v40 = vld [vmem:[%s14086_s5 + $0x590] sm:$0xff] }
 0x6b7   : > { %8675 = vmatmul.mubr.msk.f32.vlgmr.msra.gmra.mxu0 %vm693_vm0, %v2444_v27  ;;  %v8051_v27 = vld [vmem:[%s14086_s5 + $0x598] sm:$0xff] }
 0x6b9   : > { %v8946_v37 = vpop.eup %8945 }
 0x6ba   : > { %v2445_v29 = vmul.f32 %v8946_v37, %v2433_v50  ;;  %v8052_v50 = vld [vmem:[%s14086_s5 + $0x5a0] sm:$0xff] }
 0x6bc   : > { %v8948_v25 = vpop.eup %8947  ;;  %8677 = vmatprep.mubr.msk.f32.mxu0 %vm693_vm0, %v2445_v29 }
 0x6bd   : > { %v2446_v26 = vmul.f32 %v8948_v25, %v2434_v44 }
 0x6bf   : > { %8678 = vmatmul.mubr.msk.f32.gmra.mxu0 %vm693_vm0, %v2446_v26  ;;  %v8053_v26 = vld [vmem:[%s14086_s5 + $0x5a8] sm:$0xff] }
 0x777   : > { %v8676_v54 = vpop.f32.mrf.mxu0 }
 0x778   : > { %v2597_v58 = vcombine.high %v8676_v54, %v8676_v54  ;;  %v2604_v32 = vrot.slane %v8676_v54, %v14214_v43  ;;  %v8054_v54 = vld [vmem:[%s14086_s5 + $0x5b0] sm:$0xff] }
 0x779   : > { %v2525_v22 = vpop.f32.mrf.mxu0 }
 0x77a   : > { %v2611_v5 = vrot.slane %v2597_v58, %v14214_v43  ;;  %v2612_v51 = vcombine.high %v2604_v32, %v2604_v32  ;;  %v2620_v1 = vrot.slane %v2604_v32, %v14214_v43  ;;  %v2548_v6 = vcombine.high %v2525_v22, %v2525_v22  ;;  %v8055_v58 = vld [vmem:[%s14086_s5 + $0x5b8] sm:$0xff] }
 0x77b   : > { %v10557_v23 = vrot.slane %v2525_v22, %v14214_v43  ;;  %v8057_v22 = vld [vmem:[%s14086_s5 + $0x5c8] sm:$0xff] }
 0x77c   : > { %v2613_v17 = vcombine.high %v2611_v5, %v2611_v5  ;;  %v2634_v11 = vrot.slane %v2612_v51, %v14214_v43  ;;  %v2627_v12 = vrot.slane %v2611_v5, %v14214_v43  ;;  %v2642_v41 = vcombine.high %v2620_v1, %v2620_v1 }
 0x77d   : > { %v2908_v38 = vrot.slane %v2620_v1, %v14215_v20  ;;  %v10589_v19 = vrot.slane %v2548_v6, %v14214_v43  ;;  %v2563_v15 = vcombine.high %v10557_v23, %v10557_v23  ;;  %v10606_v49 = vrot.slane %v10557_v23, %v14214_v43  ;;  %v8056_v1 = vld [vmem:[%s14086_s5 + $0x5c0] sm:$0xff]  ;;  %v8059_v23 = vld [vmem:[%s14086_s5 + $0x5d8] sm:$0xff] }
 0x77e   : > { %v2641_v53 = vrot.slane %v2613_v17, %v14214_v43  ;;  %v2644_v24 = vcombine.high %v2634_v11, %v2634_v11  ;;  %v2643_v47 = vcombine.high %v2627_v12, %v2627_v12  ;;  %v2912_v28 = vrot.slane %v2634_v11, %v14215_v20  ;;  %v8058_v11 = vld [vmem:[%s14086_s5 + $0x5d0] sm:$0xff] }
 0x77f   : > { %v2916_v39 = vrot.slane %v2642_v41, %v14215_v20  ;;  %v2924_v16 = vrot.slane %v2627_v12, %v14215_v20  ;;  %v3065_v48 = vmul.f32 %v8032_v60, %v2908_v38  ;;  %v10619_v14 = vmul.f32 %v8033_v46, %v2908_v38  ;;  %v8061_v60 = vld [vmem:[%s14086_s5 + $0x5e8] sm:$0xff] }
 0x780   : > { %v2645_v35 = vcombine.high %v2641_v53, %v2641_v53  ;;  %v2920_v33 = vrot.slane %v2644_v24, %v14215_v20  ;;  %v2928_v55 = vrot.slane %v2641_v53, %v14215_v20  ;;  %v2932_v7 = vrot.slane %v2643_v47, %v14215_v20  ;;  %v8060_v24 = vld [vmem:[%s14086_s5 + $0x5e0] sm:$0xff] }
 0x781   : > { %v10631_v13 = vmul.f32 %v8034_v45, %v2908_v38  ;;  %v10633_v36 = vmul.f32 %v8035_v30, %v2908_v38  ;;  %v3069_v10 = vmul.f32 %v8036_v61, %v2912_v28  ;;  %v3070_v29 = vmul.f32 %v8037_v4, %v2912_v28  ;;  %v8062_v30 = vld [vmem:[%s14086_s5 + $0x5f0] sm:$0xff]  ;;  %v8063_v61 = vld [vmem:[%s14086_s5 + $0x5f8] sm:$0xff] }
 0x782   : > { %v2936_v37 = vrot.slane %v2645_v35, %v14215_v20  ;;  %v10645_v44 = vmul.f32 %v8038_v3, %v2912_v28  ;;  %v10647_v25 = vmul.f32 %v8039_v34, %v2912_v28  ;;  %v3073_v32 = vmul.f32 %v8040_v56, %v2916_v39 }
 0x783   : > { %v3074_v5 = vmul.f32 %v8041_v62, %v2916_v39  ;;  %v10658_v51 = vmul.f32 %v8042_v42, %v2916_v39  ;;  %v10660_v17 = vmul.f32 %v8043_v57, %v2916_v39  ;;  %v3077_v12 = vmul.f32 %v8044_v2, %v2920_v33 }
 0x784   : > { %v3078_v53 = vmul.f32 %v8045_v31, %v2920_v33  ;;  %v10671_v6 = vmul.f32 %v8046_v0, %v2920_v33  ;;  %v10673_v41 = vmul.f32 %v8047_v52, %v2920_v33  ;;  %v3081_v46 = vmul.f32 %v8048_v59, %v2924_v16 }
 0x785   : > { %v3082_v45 = vmul.f32 %v8049_v18, %v2924_v16  ;;  %v10684_v38 = vmul.f32 %v8050_v40, %v2924_v16  ;;  %v10686_v47 = vmul.f32 %v8051_v27, %v2924_v16  ;;  %v3085_v4 = vmul.f32 %v8052_v50, %v2928_v55 }
 0x786   : > { %v3086_v28 = vmul.f32 %v8053_v26, %v2928_v55  ;;  %v10694_v35 = vmul.f32 %v8054_v54, %v2928_v55  ;;  %v2564_v3 = vcombine.high %v10589_v19, %v10589_v19  ;;  %v10698_v34 = vmul.f32 %v8055_v58, %v2928_v55  ;;  %v8000_v26 = vld [vmem:[%s14086_s5 + $0x400] sm:$0xff] }
 0x787   : > { %v3089_v56 = vmul.f32 %v8056_v1, %v2932_v7  ;;  %v3090_v62 = vmul.f32 %v8057_v22, %v2932_v7  ;;  %v2585_v42 = vrot.slane %v2563_v15, %v14214_v43  ;;  %v10701_v57 = vmul.f32 %v8058_v11, %v2932_v7  ;;  %v10759_v22 = vpop.f32.mrf.mxu0 }
 0x788   : > { %v10703_v39 = vmul.f32 %v8059_v23, %v2932_v7  ;;  %v10705_v16 = vmul.f32 %v8060_v24, %v2936_v37  ;;  %v10707_v2 = vmul.f32 %v8061_v60, %v2936_v37  ;;  %v10709_v31 = vmul.f32 %v8062_v30, %v2936_v37  ;;  %v8001_v24 = vld [vmem:[%s14086_s5 + $0x408] sm:$0xff] }
 0x789   : > { %v10711_v0 = vmul.f32 %v8063_v61, %v2936_v37  ;;  %v2578_v33 = vrot.slane %v10589_v19, %v14214_v43  ;;  %v2593_v55 = vcombine.high %v10606_v49, %v10606_v49  ;;  %v10718_v15 = vsel %vm1471_vm1, %v3065_v48, 0.0  ;;  %v8005_v60 = vld [vmem:[%s14086_s5 + $0x428] sm:$0xff] }
 0x78a   : > { %14216 = vst [vmem:[#allocation19_spill] sm:$0xff] %v10709_v31  ;;  %v10721_v52 = vsel %vm1471_vm1, %v3069_v10, 0.0  ;;  %v10724_v59 = vsel %vm1471_vm1, %v3073_v32, 0.0  ;;  %v2592_v18 = vrot.slane %v2564_v3, %v14214_v43  ;;  %v10728_v7 = vsel %vm1471_vm1, %v3077_v12, 0.0  ;;  %v8012_v3 = vld [vmem:[%s14086_s5 + $0x460] sm:$0xff] }
 0x78b   : > { %14217 = vst [vmem:[#allocation20_spill] sm:$0xff] %v10711_v0  ;;  %v2595_v40 = vcombine.high %v2585_v42, %v2585_v42  ;;  %v2876_v19 = vrot.slane %v10606_v49, %v14215_v20  ;;  %v2880_v27 = vrot.slane %v2585_v42, %v14215_v20  ;;  %v10734_v48 = vsel %vm1471_vm1, %v3081_v46, 0.0  ;;  %v8004_v49 = vld [vmem:[%s14086_s5 + $0x420] sm:$0xff]  ;;  %v8009_v42 = vld [vmem:[%s14086_s5 + $0x448] sm:$0xff] }
 0x78c   : > { %14218 = vst [vmem:[#allocation23_spill] sm:$0xff] %v10734_v48  ;;  %v10737_v10 = vsel %vm1471_vm1, %v3085_v4, 0.0  ;;  %v10740_v50 = vsel %vm1471_vm1, %v3089_v56, 0.0  ;;  %v10744_v37 = vsel %vm1471_vm1, %v10619_v14, 0.0  ;;  %v10753_v54 = vsel %vm1471_vm1, %v3070_v29, 0.0  ;;  %v8008_v29 = vld [vmem:[%s14086_s5 + $0x440] sm:$0xff] }
 0x78d   : > { %14219 = vst [vmem:[#allocation21_spill] sm:$0xff] %v10737_v10  ;;  %14220 = vst [vmem:[#allocation24_spill] sm:$0xff] %v10740_v50  ;;  %v10756_v58 = vsel %vm1471_vm1, %v3074_v5, 0.0  ;;  %v2594_v32 = vcombine.high %v2578_v33, %v2578_v33  ;;  %v2884_v1 = vrot.slane %v2593_v55, %v14215_v20  ;;  %v10762_v14 = vsel %vm1471_vm1, %v3078_v53, 0.0  ;;  %v8002_v53 = vld [vmem:[%s14086_s5 + $0x410] sm:$0xff] }
 0x78e   : > { %v10765_v11 = vsel %vm1471_vm1, %v3082_v45, 0.0  ;;  %v10768_v12 = vsel %vm1471_vm1, %v3086_v28, 0.0  ;;  %v2596_v23 = vcombine.high %v2592_v18, %v2592_v18  ;;  %v10774_v5 = vsel %vm1471_vm1, %v3090_v62, 0.0  ;;  %v8003_v28 = vld [vmem:[%s14086_s5 + $0x418] sm:$0xff]  ;;  %v8010_v56 = vld [vmem:[%s14086_s5 + $0x450] sm:$0xff] }
 0x78f   : > { %14221 = vst [vmem:[#allocation27_spill] sm:$0xff] %v10765_v11  ;;  %14222 = vst [vmem:[#allocation25_spill] sm:$0xff] %v10768_v12  ;;  %v2888_v46 = vrot.slane %v2595_v40, %v14215_v20  ;;  %v3033_v45 = vmul.f32 %v8000_v26, %v2876_v19  ;;  %v3037_v30 = vmul.f32 %v8004_v49, %v2880_v27  ;;  %v10788_v61 = vsel %vm1471_vm1, %v10631_v13, 0.0  ;;  %v8006_v13 = vld [vmem:[%s14086_s5 + $0x430] sm:$0xff]  ;;  %v8016_v12 = vld [vmem:[%s14086_s5 + $0x480] sm:$0xff] }
 0x790   : > { %14223 = vst [vmem:[#allocation28_spill] sm:$0xff] %v10774_v5  ;;  %v10792_v4 = vsel %vm1471_vm1, %v10645_v44, 0.0  ;;  %v10804_v62 = vrot.slane %v10759_v22, %v14214_v43  ;;  %v8007_v44 = vld [vmem:[%s14086_s5 + $0x438] sm:$0xff]  ;;  %v10816_v55 = vrot.slane %v2578_v33, %v14215_v20  ;;  %v10819_v40 = vrot.slane %v2592_v18, %v14215_v20  ;;  %v8013_v33 = vld [vmem:[%s14086_s5 + $0x468] sm:$0xff] }
 0x791   : > { %v10822_v26 = vrot.slane %v2594_v32, %v14215_v20  ;;  %v3041_v49 = vmul.f32 %v8008_v29, %v2884_v1  ;;  %v10834_v9 = vrot.slane %v2596_v23, %v14215_v20  ;;  %v3034_v18 = vmul.f32 %v8001_v24, %v2876_v19  ;;  %v8014_v29 = vld [vmem:[%s14086_s5 + $0x470] sm:$0xff]  ;;  %v8017_v23 = vld [vmem:[%s14086_s5 + $0x488] sm:$0xff] }
 0x792   : > { %v3035_v8 = vmul.f32 %v8002_v53, %v2876_v19  ;;  %v3038_v32 = vmul.f32 %v8005_v60, %v2880_v27  ;;  %v3036_v63 = vmul.f32 %v8003_v28, %v2876_v19  ;;  %v3045_v0 = vmul.f32 %v8012_v3, %v2888_v46 }
 0x793   : > { %v3161_v31 = vsel %vm1471_vm1, %v3033_v45, 0.0  ;;  %v3162_v5 = vsel %vm1471_vm1, %v3037_v30, 0.0  ;;  %v3039_v24 = vmul.f32 %v8006_v13, %v2880_v27  ;;  %v3040_v53 = vmul.f32 %v8007_v44, %v2880_v27  ;;  %v8015_v45 = vld [vmem:[%s14086_s5 + $0x478] sm:$0xff]  ;;  %v8018_v30 = vld [vmem:[%s14086_s5 + $0x490] sm:$0xff] }
 0x794   : > { %v3042_v60 = vmul.f32 %v8009_v42, %v2884_v1  ;;  %v3163_v50 = vadd.f32 %v3162_v5, %v3161_v31  ;;  %v3043_v11 = vmul.f32 %v8010_v56, %v2884_v1  ;;  %v3044_v10 = vmul.f32 %v8011_v21, %v2884_v1  ;;  %v8020_v21 = vld [vmem:[%s14086_s5 + $0x4a0] sm:$0xff]  ;;  %v8021_v31 = vld [vmem:[%s14086_s5 + $0x4a8] sm:$0xff] }
 0x795   : > { %v3046_v19 = vmul.f32 %v8013_v33, %v2888_v46  ;;  %v3164_v28 = vsel %vm1471_vm1, %v3041_v49, 0.0  ;;  %v3047_v3 = vmul.f32 %v8014_v29, %v2888_v46  ;;  %v3224_v13 = vsel %vm1471_vm1, %v3034_v18, 0.0 }
 0x796   : > { %v3165_v48 = vadd.f32 %v3164_v28, %v3163_v50  ;;  %v3225_v27 = vsel %vm1471_vm1, %v3038_v32, 0.0  ;;  %v3049_v1 = vmul.f32 %v8016_v12, %v10816_v55  ;;  %v3050_v5 = vmul.f32 %v8017_v23, %v10816_v55  ;;  %v8022_v12 = vld [vmem:[%s14086_s5 + $0x4b0] sm:$0xff] }
 0x797   : > { %v3166_v56 = vsel %vm1471_vm1, %v3045_v0, 0.0  ;;  %v3226_v44 = vadd.f32 %v3225_v27, %v3224_v13  ;;  %v3227_v42 = vsel %vm1471_vm1, %v3042_v60, 0.0  ;;  %v3287_v49 = vsel %vm1471_vm1, %v3035_v8, 0.0  ;;  %v8019_v8 = vld [vmem:[%s14086_s5 + $0x498] sm:$0xff] }
 0x798   : > { %v3167_v50 = vadd.f32 %v3166_v56, %v3165_v48  ;;  %v3288_v33 = vsel %vm1471_vm1, %v3039_v24, 0.0  ;;  %v3048_v18 = vmul.f32 %v8015_v45, %v2888_v46  ;;  %v3051_v32 = vmul.f32 %v8018_v30, %v10816_v55  ;;  %v8024_v46 = vld [vmem:[%s14086_s5 + $0x4c0] sm:$0xff]  ;;  %v8026_v56 = vld [vmem:[%s14086_s5 + $0x4d0] sm:$0xff] }
 0x799   : > { %v3228_v29 = vadd.f32 %v3227_v42, %v3226_v44  ;;  %v3289_v28 = vadd.f32 %v3288_v33, %v3287_v49  ;;  %v3053_v23 = vmul.f32 %v8020_v21, %v10819_v40  ;;  %v3054_v0 = vmul.f32 %v8021_v31, %v10819_v40 }
 0x79a   : > { %v3229_v48 = vsel %vm1471_vm1, %v3046_v19, 0.0  ;;  %v3290_v60 = vsel %vm1471_vm1, %v3043_v11, 0.0  ;;  %v3168_v24 = vsel %vm1471_vm1, %v3049_v1, 0.0  ;;  %v3231_v30 = vsel %vm1471_vm1, %v3050_v5, 0.0  ;;  %v8025_v19 = vld [vmem:[%s14086_s5 + $0x4c8] sm:$0xff] }
 0x79b   : > { %v3230_v45 = vadd.f32 %v3229_v48, %v3228_v29  ;;  %v3291_v13 = vadd.f32 %v3290_v60, %v3289_v28  ;;  %v3169_v27 = vadd.f32 %v3168_v24, %v3167_v50  ;;  %v3292_v11 = vsel %vm1471_vm1, %v3047_v3, 0.0 }
 0x79c   : > { %v3350_v21 = vsel %vm1471_vm1, %v3036_v63, 0.0  ;;  %v3351_v31 = vsel %vm1471_vm1, %v3040_v53, 0.0  ;;  %v3055_v1 = vmul.f32 %v8022_v12, %v10819_v40  ;;  %v3052_v49 = vmul.f32 %v8019_v8, %v10816_v55  ;;  %v8023_v63 = vld [vmem:[%s14086_s5 + $0x4b8] sm:$0xff]  ;;  %v8028_v55 = vld [vmem:[%s14086_s5 + $0x4e0] sm:$0xff]  ;;  %v8029_v8 = vld [vmem:[%s14086_s5 + $0x4e8] sm:$0xff] }
 0x79d   : > { %v3232_v44 = vadd.f32 %v3231_v30, %v3230_v45  ;;  %v3293_v5 = vadd.f32 %v3292_v11, %v3291_v13  ;;  %v3352_v42 = vadd.f32 %v3351_v31, %v3350_v21  ;;  %v3057_v33 = vmul.f32 %v8024_v46, %v10822_v26 }
 0x79e   : > { %v3294_v50 = vsel %vm1471_vm1, %v3051_v32, 0.0  ;;  %v3353_v3 = vsel %vm1471_vm1, %v3044_v10, 0.0  ;;  %v3058_v53 = vmul.f32 %v8025_v19, %v10822_v26  ;;  %v3170_v29 = vsel %vm1471_vm1, %v3053_v23, 0.0 }
 0x79f   : > { %v3295_v28 = vadd.f32 %v3294_v50, %v3293_v5  ;;  %v3354_v12 = vadd.f32 %v3353_v3, %v3352_v42  ;;  %v3059_v48 = vmul.f32 %v8026_v56, %v10822_v26  ;;  %v3171_v60 = vadd.f32 %v3170_v29, %v3169_v27 }
 0x7a0   : > { %v3233_v32 = vsel %vm1471_vm1, %v3054_v0, 0.0  ;;  %v3355_v10 = vsel %vm1471_vm1, %v3048_v18, 0.0  ;;  %v3296_v23 = vsel %vm1471_vm1, %v3055_v1, 0.0  ;;  %v14224_v45 = vcombine.high %v10759_v22, %v10759_v22  ;;  %v8030_v18 = vld [vmem:[%s14086_s5 + $0x4f0] sm:$0xff]  ;;  %v8027_v22 = vld [vmem:[%s14086_s5 + $0x4d8] sm:$0xff] }
 0x7a1   : > { %v3234_v46 = vadd.f32 %v3233_v32, %v3232_v44  ;;  %v3356_v24 = vadd.f32 %v3355_v10, %v3354_v12  ;;  %v10919_v13 = vsel %vm1471_vm1, %v10658_v51, 0.0  ;;  %v3056_v0 = vmul.f32 %v8023_v63, %v10819_v40 }
 0x7a2   : > { %v2709_v30 = vrot.slane %v14224_v45, %v14214_v43  ;;  %v3297_v19 = vadd.f32 %v3296_v23, %v3295_v28  ;;  %v3357_v27 = vsel %vm1471_vm1, %v3052_v49, 0.0  ;;  %v10928_v11 = vsel %vm1471_vm1, %v10671_v6, 0.0  ;;  %v8031_v28 = vld [vmem:[%s14086_s5 + $0x4f8] sm:$0xff] }
 0x7a3   : > { %v3061_v51 = vmul.f32 %v8028_v55, %v10834_v9  ;;  %v3172_v21 = vsel %vm1471_vm1, %v3057_v33, 0.0  ;;  %v3358_v31 = vadd.f32 %v3357_v27, %v3356_v24  ;;  %v3062_v56 = vmul.f32 %v8029_v8, %v10834_v9 }
 0x7a4   : > { %v3173_v1 = vadd.f32 %v3172_v21, %v3171_v60  ;;  %v3235_v40 = vsel %vm1471_vm1, %v3058_v53, 0.0  ;;  %v2710_v44 = vcombine.high %v10804_v62, %v10804_v62  ;;  %v3063_v6 = vmul.f32 %v8030_v18, %v10834_v9 }
 0x7a5   : > { %v3236_v5 = vadd.f32 %v3235_v40, %v3234_v46  ;;  %v3298_v42 = vsel %vm1471_vm1, %v3059_v48, 0.0  ;;  %v2711_v49 = vcombine.high %v2709_v30, %v2709_v30  ;;  %v10943_v50 = vsel %vm1471_vm1, %v10684_v38, 0.0 }
 0x7a6   : > { %v3060_v33 = vmul.f32 %v8027_v22, %v10822_v26  ;;  %v3299_v3 = vadd.f32 %v3298_v42, %v3297_v19  ;;  %v3359_v63 = vsel %vm1471_vm1, %v3056_v0, 0.0  ;;  %v10949_v53 = vsel %vm1471_vm1, %v10694_v35, 0.0  ;;  %v2535_v0 = vpop.f32.mrf.mxu0 }
 0x7a7   : > { %v10953_v29 = vsel %vm1471_vm1, %v10701_v57, 0.0  ;;  %v3174_v38 = vsel %vm1471_vm1, %v3061_v51, 0.0  ;;  %v3360_v12 = vadd.f32 %v3359_v63, %v3358_v31  ;;  %v3237_v26 = vsel %vm1471_vm1, %v3062_v56, 0.0  ;;  %v8103_v63 = vld [vmem:[%s14086_s5 + $0x738] sm:$0xff] }
 0x7a8   : > { %v3175_v55 = vadd.f32 %v3174_v38, %v3173_v1  ;;  %v2718_v48 = vrot.slane %v10804_v62, %v14214_v43  ;;  %v2732_v35 = vrot.slane %v2710_v44, %v14214_v43  ;;  %v3238_v60 = vadd.f32 %v3237_v26, %v3236_v5  ;;  %v8099_v44 = vld [vmem:[%s14086_s5 + $0x718] sm:$0xff]  ;;  %v8101_v5 = vld [vmem:[%s14086_s5 + $0x728] sm:$0xff] }
 0x7a9   : > { %v3300_v32 = vsel %vm1471_vm1, %v3063_v6, 0.0  ;;  %v2725_v57 = vrot.slane %v2709_v30, %v14214_v43  ;;  %v2739_v10 = vrot.slane %v2711_v49, %v14214_v43  ;;  %v3365_v8 = vsel %vm1471_vm1, %v10633_v36, 0.0  ;;  %v8100_v6 = vld [vmem:[%s14086_s5 + $0x720] sm:$0xff]  ;;  %v8105_v26 = vld [vmem:[%s14086_s5 + $0x748] sm:$0xff] }
 0x7aa   : > { %v3064_v46 = vmul.f32 %v8031_v28, %v10834_v9  ;;  %v3301_v23 = vadd.f32 %v3300_v32, %v3299_v3  ;;  %v3361_v24 = vsel %vm1471_vm1, %v3060_v33, 0.0  ;;  %v10972_v62 = vsel %vm1471_vm1, %v10647_v25, 0.0  ;;  %v8102_v3 = vld [vmem:[%s14086_s5 + $0x730] sm:$0xff]  ;;  %v8104_v28 = vld [vmem:[%s14086_s5 + $0x740] sm:$0xff] }
 0x7ab   : > { %v10976_v45 = vsel %vm1471_vm1, %v10660_v17, 0.0  ;;  %v10980_v30 = vsel %vm1471_vm1, %v10673_v41, 0.0  ;;  %v3362_v18 = vadd.f32 %v3361_v24, %v3360_v12  ;;  %v10984_v9 = vsel %vm1471_vm1, %v10686_v47, 0.0 }
 0x7ac   : > { %v3177_v36 = vadd.f32 %v10718_v15, %v3175_v55  ;;  %v2740_v19 = vcombine.high %v2718_v48, %v2718_v48  ;;  %v2742_v27 = vcombine.high %v2732_v35, %v2732_v35  ;;  %v10989_v25 = vsel %vm1471_vm1, %v10698_v34, 0.0  ;;  %v8096_v34 = vld [vmem:[%s14086_s5 + $0x700] sm:$0xff] }
 0x7ad   : > { %v3240_v17 = vadd.f32 %v10744_v37, %v3238_v60  ;;  %v2741_v22 = vcombine.high %v2725_v57, %v2725_v57  ;;  %v2743_v51 = vcombine.high %v2739_v10, %v2739_v10  ;;  %v3303_v41 = vadd.f32 %v10788_v61, %v3301_v23  ;;  %v8097_v37 = vld [vmem:[%s14086_s5 + $0x708] sm:$0xff]  ;;  %v8098_v61 = vld [vmem:[%s14086_s5 + $0x710] sm:$0xff] }
 0x7ae   : > { %v3363_v21 = vsel %vm1471_vm1, %v3064_v46, 0.0  ;;  %v2972_v31 = vrot.slane %v2718_v48, %v14215_v20  ;;  %v2646_v47 = vcombine.high %v2535_v0, %v2535_v0  ;;  %v10997_v15 = vsel %vm1471_vm1, %v10703_v39, 0.0  ;;  %v8106_v48 = vld [vmem:[%s14086_s5 + $0x750] sm:$0xff]  ;;  %v8109_v46 = vld [vmem:[%s14086_s5 + $0x768] sm:$0xff] }
 0x7af   : > { %v3364_v56 = vadd.f32 %v3363_v21, %v3362_v18  ;;  %v2976_v1 = vrot.slane %v2732_v35, %v14215_v20  ;;  %v2653_v40 = vrot.slane %v2535_v0, %v14214_v43  ;;  %v3179_v39 = vadd.f32 %v10721_v52, %v3177_v36  ;;  %v8107_v35 = vld [vmem:[%s14086_s5 + $0x758] sm:$0xff]  ;;  %v8110_v23 = vld [vmem:[%s14086_s5 + $0x770] sm:$0xff]  ;;  %v8112_v36 = vld [vmem:[%s14086_s5 + $0x780] sm:$0xff] }
 0x7b0   : > { %v2980_v42 = vrot.slane %v2740_v19, %v14215_v20  ;;  %v2984_v49 = vrot.slane %v2742_v27, %v14215_v20  ;;  %v11023_v33 = vrot.slane %v2725_v57, %v14215_v20  ;;  %v3242_v52 = vadd.f32 %v10753_v54, %v3240_v17 }
 0x7b1   : > { %v11036_v38 = vrot.slane %v2739_v10, %v14215_v20  ;;  %v11039_v12 = vrot.slane %v2741_v22, %v14215_v20  ;;  %v11042_v54 = vrot.slane %v2743_v51, %v14215_v20  ;;  %v11045_v55 = vadd.f32 %v10792_v4, %v3303_v41  ;;  %v8108_v4 = vld [vmem:[%s14086_s5 + $0x760] sm:$0xff]  ;;  %v8113_v51 = vld [vmem:[%s14086_s5 + $0x788] sm:$0xff]  ;;  %v8114_v41 = vld [vmem:[%s14086_s5 + $0x790] sm:$0xff] }
 0x7b2   : > { %14225 = vst [vmem:[#allocation17_spill] sm:$0xff] %v11023_v33  ;;  %v3129_v60 = vmul.f32 %v8096_v34, %v2972_v31  ;;  %v3130_v32 = vmul.f32 %v8097_v37, %v2972_v31  ;;  %v2660_v57 = vrot.slane %v2646_v47, %v14214_v43  ;;  %v3366_v10 = vadd.f32 %v3365_v8, %v3364_v56  ;;  %v8111_v8 = vld [vmem:[%s14086_s5 + $0x778] sm:$0xff]  ;;  %v8117_v34 = vld [vmem:[%s14086_s5 + $0x7a8] sm:$0xff] }
 0x7b3   : > { %v3131_v24 = vmul.f32 %v8098_v61, %v2972_v31  ;;  %v11066_v18 = vmul.f32 %v8099_v44, %v2972_v31  ;;  %v3133_v0 = vmul.f32 %v8100_v6, %v2976_v1  ;;  %v3134_v19 = vmul.f32 %v8101_v5, %v2976_v1 }
 0x7b4   : > { %v3135_v27 = vmul.f32 %v8102_v3, %v2976_v1  ;;  %v11074_v17 = vmul.f32 %v8103_v63, %v2976_v1  ;;  %v2661_v22 = vcombine.high %v2653_v40, %v2653_v40  ;;  %v3137_v21 = vmul.f32 %v8104_v28, %v2980_v42 }
 0x7b5   : > { %14226 = vst [vmem:[#allocation18_spill] sm:$0xff] %v11066_v18  ;;  %v3138_v31 = vmul.f32 %v8105_v26, %v2980_v42  ;;  %v11082_v47 = vmul.f32 %v8106_v48, %v2980_v42  ;;  %v11084_v56 = vmul.f32 %v8107_v35, %v2980_v42  ;;  %v11089_v37 = vmul.f32 %v8108_v4, %v2984_v49  ;;  %v14241_v18 = vld [vmem:[#allocation24_spill] sm:$0xff] }
 0x7b6   : > { %14227 = vst [vmem:[#allocation37_spill] sm:$0xff] %v11074_v17  ;;  %v3142_v61 = vmul.f32 %v8109_v46, %v2984_v49  ;;  %v11091_v1 = vmul.f32 %v8110_v23, %v2984_v49  ;;  %v2662_v44 = vcombine.high %v2660_v57, %v2660_v57  ;;  %v11094_v6 = vadd.f32 %v10972_v62, %v3366_v10 }
 0x7b7   : > { %14228 = vst [vmem:[#allocation29_spill] sm:$0xff] %v11082_v47  ;;  %14229 = vst [vmem:[#allocation38_spill] sm:$0xff] %v11084_v56  ;;  %v11096_v5 = vmul.f32 %v8111_v8, %v2984_v49  ;;  %v11099_v3 = vmul.f32 %v8112_v36, %v11023_v33  ;;  %v2669_v42 = vrot.slane %v2653_v40, %v14214_v43  ;;  %v11112_v62 = vsel %vm1471_vm1, %v3129_v60, 0.0  ;;  %v8076_v56 = vld [vmem:[%s14086_s5 + $0x660] sm:$0xff] }
 0x7b8   : > { %14230 = vst [vmem:[#allocation39_spill] sm:$0xff] %v11091_v1  ;;  %v3146_v63 = vmul.f32 %v8113_v51, %v11023_v33  ;;  %v11104_v28 = vmul.f32 %v8114_v41, %v11023_v33  ;;  %v2683_v26 = vrot.slane %v2661_v22, %v14214_v43  ;;  %v3181_v48 = vadd.f32 %v10724_v59, %v3179_v39  ;;  %v8065_v51 = vld [vmem:[%s14086_s5 + $0x608] sm:$0xff]  ;;  %v8078_v33 = vld [vmem:[%s14086_s5 + $0x670] sm:$0xff]  ;;  %v8088_v47 = vld [vmem:[%s14086_s5 + $0x6c0] sm:$0xff] }
 0x7b9   : > { %14231 = vst [vmem:[#allocation30_spill] sm:$0xff] %v11096_v5  ;;  %v11109_v35 = vmul.f32 %v8117_v34, %v11036_v38  ;;  %v11115_v49 = vsel %vm1471_vm1, %v3133_v0, 0.0  ;;  %v2676_v40 = vrot.slane %v2660_v57, %v14214_v43  ;;  %v11119_v10 = vsel %vm1471_vm1, %v3137_v21, 0.0  ;;  %v8075_v5 = vld [vmem:[%s14086_s5 + $0x658] sm:$0xff]  ;;  %v8081_v1 = vld [vmem:[%s14086_s5 + $0x688] sm:$0xff] }
 0x7ba   : > { %14232 = vst [vmem:[#allocation32_spill] sm:$0xff] %v11104_v28  ;;  %v11122_v4 = vsel %vm1471_vm1, %v3130_v32, 0.0  ;;  %v2690_v46 = vrot.slane %v2662_v44, %v14214_v43  ;;  %v3244_v59 = vadd.f32 %v10756_v58, %v3242_v52  ;;  %v11127_v39 = vsel %vm1471_vm1, %v3134_v19, 0.0  ;;  %v8064_v58 = vld [vmem:[%s14086_s5 + $0x600] sm:$0xff]  ;;  %v8069_v44 = vld [vmem:[%s14086_s5 + $0x628] sm:$0xff]  ;;  %v14238_v43 = vld [vmem:[#allocation23_spill] sm:$0xff] }
 0x7bb   : > { %14233 = vst [vmem:[#allocation40_spill] sm:$0xff] %v11109_v35  ;;  %v11130_v60 = vsel %vm1471_vm1, %v3138_v31, 0.0  ;;  %v2691_v23 = vcombine.high %v2669_v42, %v2669_v42  ;;  %v2940_v0 = vrot.slane %v2669_v42, %v14215_v20  ;;  %v11134_v57 = vsel %vm1471_vm1, %v3142_v61, 0.0  ;;  %v8066_v31 = vld [vmem:[%s14086_s5 + $0x610] sm:$0xff]  ;;  %v8079_v28 = vld [vmem:[%s14086_s5 + $0x678] sm:$0xff] }
 0x7bc   : > { %14234 = vst [vmem:[#allocation35_spill] sm:$0xff] %v11134_v57  ;;  %v11137_v8 = vsel %vm1471_vm1, %v3146_v63, 0.0  ;;  %v2693_v32 = vcombine.high %v2683_v26, %v2683_v26  ;;  %v3183_v52 = vadd.f32 %v10728_v7, %v3181_v48  ;;  %v11144_v36 = vsel %vm1471_vm1, %v3131_v24, 0.0  ;;  %v8067_v7 = vld [vmem:[%s14086_s5 + $0x618] sm:$0xff]  ;;  %v8068_v24 = vld [vmem:[%s14086_s5 + $0x620] sm:$0xff]  ;;  %v8070_v42 = vld [vmem:[%s14086_s5 + $0x630] sm:$0xff] }
 0x7bd   : > { %14235 = vst [vmem:[#allocation41_spill] sm:$0xff] %v11137_v8  ;;  %14236 = vst [vmem:[#allocation33_spill] sm:$0xff] %v11144_v36  ;;  %v11147_v19 = vsel %vm1471_vm1, %v3135_v27, 0.0  ;;  %v2692_v22 = vcombine.high %v2676_v40, %v2676_v40  ;;  %v2944_v41 = vrot.slane %v2683_v26, %v14215_v20  ;;  %v2694_v21 = vcombine.high %v2690_v46, %v2690_v46  ;;  %v14240_v57 = vld [vmem:[#allocation27_spill] sm:$0xff] }
 0x7be   : > { %14237 = vst [vmem:[#allocation42_spill] sm:$0xff] %v11147_v19  ;;  %v3190_v27 = vsel %vm1471_vm1, %v10705_v16, 0.0  ;;  %v3246_v34 = vadd.f32 %v10762_v14, %v3244_v59  ;;  %v11167_v61 = vsel %vm1471_vm1, %v10707_v2, 0.0  ;;  %v2948_v63 = vrot.slane %v2691_v23, %v14215_v20  ;;  %v8071_v2 = vld [vmem:[%s14086_s5 + $0x638] sm:$0xff]  ;;  %v8072_v14 = vld [vmem:[%s14086_s5 + $0x640] sm:$0xff]  ;;  %v8073_v59 = vld [vmem:[%s14086_s5 + $0x648] sm:$0xff] }
 0x7bf   : > { %v2956_v26 = vrot.slane %v2676_v40, %v14215_v20  ;;  %v3097_v48 = vmul.f32 %v8064_v58, %v2940_v0  ;;  %v3307_v16 = vadd.f32 %v10919_v13, %v11045_v55  ;;  %v2952_v23 = vrot.slane %v2693_v32, %v14215_v20  ;;  %v8074_v55 = vld [vmem:[%s14086_s5 + $0x650] sm:$0xff] }
 0x7c0   : > { %v11190_v40 = vrot.slane %v2690_v46, %v14215_v20  ;;  %v3098_v58 = vmul.f32 %v8065_v51, %v2940_v0  ;;  %v3185_v13 = vadd.f32 %v14238_v43, %v3183_v52  ;;  %v11203_v32 = vrot.slane %v2692_v22, %v14215_v20  ;;  %v8077_v52 = vld [vmem:[%s14086_s5 + $0x668] sm:$0xff] }
 0x7c1   : > { %v11205_v46 = vmul.f32 %v8066_v31, %v2940_v0  ;;  %v11207_v51 = vmul.f32 %v8067_v7, %v2940_v0  ;;  %v3101_v43 = vmul.f32 %v8068_v24, %v2944_v41  ;;  %v11219_v22 = vrot.slane %v2694_v21, %v14215_v20  ;;  %v14239_v0 = vld [vmem:[#allocation21_spill] sm:$0xff]  ;;  %v8080_v24 = vld [vmem:[%s14086_s5 + $0x680] sm:$0xff] }
 0x7c2   : > { %v3102_v31 = vmul.f32 %v8069_v44, %v2944_v41  ;;  %v11221_v17 = vmul.f32 %v8070_v42, %v2944_v41  ;;  %v3187_v7 = vadd.f32 %v14239_v0, %v3185_v13  ;;  %v11230_v35 = vmul.f32 %v8071_v2, %v2944_v41  ;;  %v8082_v44 = vld [vmem:[%s14086_s5 + $0x690] sm:$0xff]  ;;  %v8083_v42 = vld [vmem:[%s14086_s5 + $0x698] sm:$0xff]  ;;  %v8084_v2 = vld [vmem:[%s14086_s5 + $0x6a0] sm:$0xff] }
 0x7c3   : > { %v3105_v8 = vmul.f32 %v8072_v14, %v2948_v63  ;;  %v3106_v19 = vmul.f32 %v8073_v59, %v2948_v63  ;;  %v3248_v21 = vadd.f32 %v14240_v57, %v3246_v34  ;;  %v11239_v13 = vmul.f32 %v8074_v55, %v2948_v63  ;;  %v8085_v57 = vld [vmem:[%s14086_s5 + $0x6a8] sm:$0xff] }
 0x7c4   : > { %v11241_v0 = vmul.f32 %v8075_v5, %v2948_v63  ;;  %v3109_v20 = vmul.f32 %v8076_v56, %v2952_v23  ;;  %v3189_v41 = vadd.f32 %v14241_v18, %v3187_v7  ;;  %v3110_v34 = vmul.f32 %v8077_v52, %v2952_v23  ;;  %v14242_v55 = vld [vmem:[#allocation25_spill] sm:$0xff]  ;;  %v8086_v56 = vld [vmem:[%s14086_s5 + $0x6b0] sm:$0xff] }
 0x7c5   : > { %v11250_v14 = vmul.f32 %v8078_v33, %v2952_v23  ;;  %v11252_v59 = vmul.f32 %v8079_v28, %v2952_v23  ;;  %v3250_v36 = vadd.f32 %v14242_v55, %v3248_v21  ;;  %v3113_v18 = vmul.f32 %v8080_v24, %v2956_v26  ;;  %v14243_v23 = vld [vmem:[#allocation28_spill] sm:$0xff]  ;;  %v8089_v24 = vld [vmem:[%s14086_s5 + $0x6c8] sm:$0xff] }
 0x7c6   : > { %v3114_v5 = vmul.f32 %v8081_v1, %v2956_v26  ;;  %v3191_v63 = vadd.f32 %v3190_v27, %v3189_v41  ;;  %v3309_v7 = vadd.f32 %v10928_v11, %v3307_v16  ;;  %v11262_v52 = vmul.f32 %v8082_v44, %v2956_v26  ;;  %v8092_v55 = vld [vmem:[%s14086_s5 + $0x6e0] sm:$0xff] }
 0x7c7   : > { %v11264_v33 = vmul.f32 %v8083_v42, %v2956_v26  ;;  %v3192_v28 = vsel %vm1471_vm1, %v3097_v48, 0.0  ;;  %v3252_v21 = vadd.f32 %v14243_v23, %v3250_v36  ;;  %v3117_v1 = vmul.f32 %v8084_v2, %v11190_v40  ;;  %v8090_v26 = vld [vmem:[%s14086_s5 + $0x6d0] sm:$0xff]  ;;  %v14244_v23 = vld [vmem:[#allocation19_spill] sm:$0xff] }
 0x7c8   : > { %v3118_v11 = vmul.f32 %v8085_v57, %v11190_v40  ;;  %v3193_v27 = vadd.f32 %v3192_v28, %v3191_v63  ;;  %v3311_v16 = vadd.f32 %v10943_v50, %v3309_v7  ;;  %v11278_v44 = vmul.f32 %v8086_v56, %v11190_v40 }
 0x7c9   : > { %v3194_v36 = vsel %vm1471_vm1, %v3101_v43, 0.0  ;;  %v3254_v48 = vadd.f32 %v11167_v61, %v3252_v21  ;;  %v3370_v42 = vadd.f32 %v10976_v45, %v11094_v6  ;;  %v3121_v41 = vmul.f32 %v8088_v47, %v11203_v32 }
 0x7ca   : > { %v3195_v2 = vadd.f32 %v3194_v36, %v3193_v27  ;;  %v3255_v57 = vsel %vm1471_vm1, %v3098_v58, 0.0  ;;  %v3313_v50 = vadd.f32 %v10949_v53, %v3311_v16  ;;  %v3122_v56 = vmul.f32 %v8089_v24, %v11203_v32  ;;  %v8093_v53 = vld [vmem:[%s14086_s5 + $0x6e8] sm:$0xff] }
 0x7cb   : > { %v3196_v43 = vsel %vm1471_vm1, %v3105_v8, 0.0  ;;  %v3256_v63 = vadd.f32 %v3255_v57, %v3254_v48  ;;  %v3372_v61 = vadd.f32 %v10980_v30, %v3370_v42  ;;  %v11294_v45 = vmul.f32 %v8090_v26, %v11203_v32 }
 0x7cc   : > { %v3197_v47 = vadd.f32 %v3196_v43, %v3195_v2  ;;  %v3257_v6 = vsel %vm1471_vm1, %v3102_v31, 0.0  ;;  %v3315_v58 = vadd.f32 %v10953_v29, %v3313_v50  ;;  %v3198_v7 = vsel %vm1471_vm1, %v3109_v20, 0.0  ;;  %v14245_v43 = vld [vmem:[#allocation20_spill] sm:$0xff] }
 0x7cd   : > { %v3258_v28 = vadd.f32 %v3257_v6, %v3256_v63  ;;  %v3316_v8 = vsel %vm1471_vm1, %v14244_v23, 0.0  ;;  %v3374_v30 = vadd.f32 %v10984_v9, %v3372_v61  ;;  %v3125_v21 = vmul.f32 %v8092_v55, %v11219_v22 }
 0x7ce   : > { %v3199_v24 = vadd.f32 %v3198_v7, %v3197_v47  ;;  %v3259_v27 = vsel %vm1471_vm1, %v3106_v19, 0.0  ;;  %v3317_v31 = vadd.f32 %v3316_v8, %v3315_v58  ;;  %v3200_v29 = vsel %vm1471_vm1, %v3113_v18, 0.0 }
 0x7cf   : > { %v3260_v16 = vadd.f32 %v3259_v27, %v3258_v28  ;;  %v3318_v26 = vsel %vm1471_vm1, %v11205_v46, 0.0  ;;  %v3376_v20 = vadd.f32 %v10989_v25, %v3374_v30  ;;  %v3126_v36 = vmul.f32 %v8093_v53, %v11219_v22  ;;  %v8095_v27 = vld [vmem:[%s14086_s5 + $0x6f8] sm:$0xff] }
 0x7d0   : > { %v3201_v48 = vadd.f32 %v3200_v29, %v3199_v24  ;;  %v3261_v42 = vsel %vm1471_vm1, %v3110_v34, 0.0  ;;  %v3319_v9 = vadd.f32 %v3318_v26, %v3317_v31  ;;  %v3202_v2 = vsel %vm1471_vm1, %v3117_v1, 0.0 }
 0x7d1   : > { %v3262_v57 = vadd.f32 %v3261_v42, %v3260_v16  ;;  %v3320_v19 = vsel %vm1471_vm1, %v11221_v17, 0.0  ;;  %v3378_v18 = vadd.f32 %v10997_v15, %v3376_v20  ;;  %v3263_v55 = vsel %vm1471_vm1, %v3114_v5, 0.0  ;;  %v8094_v17 = vld [vmem:[%s14086_s5 + $0x6f0] sm:$0xff] }
 0x7d2   : > { %v3203_v50 = vadd.f32 %v3202_v2, %v3201_v48  ;;  %v3321_v46 = vadd.f32 %v3320_v19, %v3319_v9  ;;  %v3379_v25 = vsel %vm1471_vm1, %v14245_v43, 0.0  ;;  %v3204_v63 = vsel %vm1471_vm1, %v3121_v41, 0.0 }
 0x7d3   : > { %v3264_v61 = vadd.f32 %v3263_v55, %v3262_v57  ;;  %v3322_v34 = vsel %vm1471_vm1, %v11239_v13, 0.0  ;;  %v3380_v1 = vadd.f32 %v3379_v25, %v3378_v18  ;;  %v3265_v15 = vsel %vm1471_vm1, %v3118_v11, 0.0  ;;  %v8087_v13 = vld [vmem:[%s14086_s5 + $0x6b8] sm:$0xff] }
 0x7d4   : > { %v3205_v47 = vadd.f32 %v3204_v63, %v3203_v50  ;;  %v3323_v6 = vadd.f32 %v3322_v34, %v3321_v46  ;;  %v3381_v5 = vsel %vm1471_vm1, %v11207_v51, 0.0  ;;  %v3206_v58 = vsel %vm1471_vm1, %v3125_v21, 0.0  ;;  %v8091_v51 = vld [vmem:[%s14086_s5 + $0x6d8] sm:$0xff]  ;;  %v14246_v34 = vld [vmem:[#allocation29_spill] sm:$0xff] }
 0x7d5   : > { %v3266_v53 = vadd.f32 %v3265_v15, %v3264_v61  ;;  %v3324_v41 = vsel %vm1471_vm1, %v11250_v14, 0.0  ;;  %v3382_v7 = vadd.f32 %v3381_v5, %v3380_v1  ;;  %v3267_v23 = vsel %vm1471_vm1, %v3122_v56, 0.0  ;;  %v8121_v61 = vld [vmem:[%s14086_s5 + $0x7c8] sm:$0xff] }
 0x7d6   : > { %v3207_v28 = vadd.f32 %v3206_v58, %v3205_v47  ;;  %v3325_v8 = vadd.f32 %v3324_v41, %v3323_v6  ;;  %v3383_v11 = vsel %vm1471_vm1, %v11230_v35, 0.0  ;;  %v3127_v30 = vmul.f32 %v8094_v17, %v11219_v22  ;;  %v14247_v47 = vld [vmem:[#allocation33_spill] sm:$0xff]  ;;  %v14248_v6 = vld [vmem:[#allocation18_spill] sm:$0xff]  ;;  %v14249_v41 = vld [vmem:[#allocation35_spill] sm:$0xff] }
 0x7d7   : > { %v3268_v21 = vadd.f32 %v3267_v23, %v3266_v53  ;;  %v3326_v14 = vsel %vm1471_vm1, %v11262_v52, 0.0  ;;  %v3384_v24 = vadd.f32 %v3383_v11, %v3382_v7  ;;  %v3269_v56 = vsel %vm1471_vm1, %v3126_v36, 0.0  ;;  %v8116_v36 = vld [vmem:[%s14086_s5 + $0x7a0] sm:$0xff]  ;;  %v8125_v53 = vld [vmem:[%s14086_s5 + $0x7e8] sm:$0xff]  ;;  %v8118_v23 = vld [vmem:[%s14086_s5 + $0x7b0] sm:$0xff] }
 0x7d8   : > { %v3327_v31 = vadd.f32 %v3326_v14, %v3325_v8  ;;  %v3385_v35 = vsel %vm1471_vm1, %v11241_v0, 0.0  ;;  %v3209_v29 = vadd.f32 %v11112_v62, %v3207_v28  ;;  %v3120_v16 = vmul.f32 %v8087_v13, %v11190_v40  ;;  %v14250_v8 = vld [vmem:[#allocation42_spill] sm:$0xff]  ;;  %v14251_v14 = vld [vmem:[#allocation41_spill] sm:$0xff] }
 0x7d9   : > { %v3270_v26 = vadd.f32 %v3269_v56, %v3268_v21  ;;  %v3328_v20 = vsel %vm1471_vm1, %v11278_v44, 0.0  ;;  %v3386_v52 = vadd.f32 %v3385_v35, %v3384_v24  ;;  %v3124_v48 = vmul.f32 %v8091_v51, %v11203_v32  ;;  %v8120_v32 = vld [vmem:[%s14086_s5 + $0x7c0] sm:$0xff] }
 0x7da   : > { %v3329_v42 = vadd.f32 %v3328_v20, %v3327_v31  ;;  %v3387_v9 = vsel %vm1471_vm1, %v11252_v59, 0.0  ;;  %v3211_v0 = vadd.f32 %v11115_v49, %v3209_v29  ;;  %v3128_v62 = vmul.f32 %v8095_v27, %v11219_v22  ;;  %v8124_v49 = vld [vmem:[%s14086_s5 + $0x7e0] sm:$0xff]  ;;  %v8122_v29 = vld [vmem:[%s14086_s5 + $0x7d0] sm:$0xff] }
 0x7db   : > { %v3272_v40 = vadd.f32 %v11122_v4, %v3270_v26  ;;  %v3330_v44 = vsel %vm1471_vm1, %v11294_v45, 0.0  ;;  %v3388_v2 = vadd.f32 %v3387_v9, %v3386_v52  ;;  %v3332_v59 = vsel %vm1471_vm1, %v3127_v30, 0.0  ;;  %v14252_v31 = vld [vmem:[#allocation40_spill] sm:$0xff]  ;;  %v8115_v26 = vld [vmem:[%s14086_s5 + $0x798] sm:$0xff] }
 0x7dc   : > { %v3331_v57 = vadd.f32 %v3330_v44, %v3329_v42  ;;  %v3389_v19 = vsel %vm1471_vm1, %v11264_v33, 0.0  ;;  %v3213_v4 = vadd.f32 %v11119_v10, %v3211_v0  ;;  %v3149_v45 = vmul.f32 %v8116_v36, %v11036_v38  ;;  %v14254_v36 = vld [vmem:[#allocation37_spill] sm:$0xff]  ;;  %v8126_v44 = vld [vmem:[%s14086_s5 + $0x7f0] sm:$0xff] }
 0x7dd   : > { %v3390_v22 = vadd.f32 %v3389_v19, %v3388_v2  ;;  %v3214_v18 = vsel %vm1471_vm1, %v11089_v37, 0.0  ;;  %v3274_v50 = vadd.f32 %v11127_v39, %v3272_v40  ;;  %v3391_v46 = vsel %vm1471_vm1, %v3120_v16, 0.0 }
 0x7de   : > { %v3333_v55 = vadd.f32 %v3332_v59, %v3331_v57  ;;  %v3153_v43 = vmul.f32 %v8120_v32, %v11039_v12  ;;  %v3215_v33 = vadd.f32 %v3214_v18, %v3213_v4  ;;  %v3157_v63 = vmul.f32 %v8124_v49, %v11042_v54  ;;  %v14255_v59 = vld [vmem:[#allocation32_spill] sm:$0xff]  ;;  %v8119_v49 = vld [vmem:[%s14086_s5 + $0x7b8] sm:$0xff]  ;;  %v14257_v18 = vld [vmem:[#allocation38_spill] sm:$0xff] }
 0x7df   : > { %v3392_v25 = vadd.f32 %v3391_v46, %v3390_v22  ;;  %v3216_v10 = vsel %vm1471_vm1, %v11099_v3, 0.0  ;;  %v3276_v37 = vadd.f32 %v11130_v60, %v3274_v50  ;;  %v3338_v39 = vsel %vm1471_vm1, %v14246_v34, 0.0  ;;  %v14256_v22 = vld [vmem:[#allocation17_spill] sm:$0xff]  ;;  %v14258_v34 = vld [vmem:[#allocation30_spill] sm:$0xff] }
 0x7e0   : > { %v3393_v1 = vsel %vm1471_vm1, %v3124_v48, 0.0  ;;  %v3217_v17 = vadd.f32 %v3216_v10, %v3215_v33  ;;  %v3335_v15 = vadd.f32 %v14247_v47, %v3333_v55  ;;  %v3397_v5 = vsel %vm1471_vm1, %v14248_v6, 0.0  ;;  %v14253_v48 = vld [vmem:[#allocation39_spill] sm:$0xff] }
 0x7e1   : > { %v3394_v58 = vadd.f32 %v3393_v1, %v3392_v25  ;;  %v3218_v3 = vsel %vm1471_vm1, %v3149_v45, 0.0  ;;  %v3278_v60 = vadd.f32 %v14249_v41, %v3276_v37  ;;  %v3395_v7 = vsel %vm1471_vm1, %v3128_v62, 0.0 }
 0x7e2   : > { %v3219_v13 = vadd.f32 %v3218_v3, %v3217_v17  ;;  %v3154_v28 = vmul.f32 %v8121_v61, %v11039_v12  ;;  %v3337_v11 = vadd.f32 %v14250_v8, %v3335_v15  ;;  %v3220_v30 = vsel %vm1471_vm1, %v3153_v43, 0.0  ;;  %v8127_v17 = vld [vmem:[%s14086_s5 + $0x7f8] sm:$0xff] }
 0x7e3   : > { %v3396_v51 = vadd.f32 %v3395_v7, %v3394_v58  ;;  %v3222_v21 = vsel %vm1471_vm1, %v3157_v63, 0.0  ;;  %v3280_v24 = vadd.f32 %v14251_v14, %v3278_v60  ;;  %v3158_v56 = vmul.f32 %v8125_v53, %v11042_v54  ;;  %v8123_v63 = vld [vmem:[%s14086_s5 + $0x7d8] sm:$0xff] }
 0x7e4   : > { %v3221_v27 = vadd.f32 %v3220_v30, %v3219_v13  ;;  %v3281_v35 = vsel %vm1471_vm1, %v14252_v31, 0.0  ;;  %v3339_v16 = vadd.f32 %v3338_v39, %v3337_v11  ;;  %v3151_v52 = vmul.f32 %v8118_v23, %v11036_v38 }
 0x7e5   : > { %v3282_v20 = vadd.f32 %v3281_v35, %v3280_v24  ;;  %v3340_v42 = vsel %vm1471_vm1, %v14253_v48, 0.0  ;;  %v3398_v9 = vadd.f32 %v3397_v5, %v3396_v51  ;;  %v3399_v0 = vsel %vm1471_vm1, %v14254_v36, 0.0  ;;  %v8136_v48 = vld [vmem:[%s14088_s7 + $0x20] sm:$0xff]  ;;  %v8149_v36 = vld [vmem:[%s14090_s9 + $0x28] sm:$0xff] }
 0x7e6   : > { %v3223_v62 = vadd.f32 %v3222_v21, %v3221_v27  ;;  %v3283_v40 = vsel %vm1471_vm1, %v3154_v28, 0.0  ;;  %v3341_v2 = vadd.f32 %v3340_v42, %v3339_v16  ;;  %v3155_v57 = vmul.f32 %v8122_v29, %v11039_v12  ;;  %v8148_v42 = vld [vmem:[%s14090_s9 + $0x20] sm:$0xff] }
 0x7e7   : > { %v3284_v32 = vadd.f32 %v3283_v40, %v3282_v20  ;;  %v3342_v19 = vsel %vm1471_vm1, %v14255_v59, 0.0  ;;  %v3400_v4 = vadd.f32 %v3399_v0, %v3398_v9  ;;  %v3148_v45 = vmul.f32 %v8115_v26, %v14256_v22  ;;  %v8138_v20 = vld [vmem:[%s14088_s7 + $0x30] sm:$0xff]  ;;  %v8137_v9 = vld [vmem:[%s14088_s7 + $0x28] sm:$0xff]  ;;  %v8160_v0 = vld [vmem:[%s14092_s11 + $0x20] sm:$0xff] }
 0x7e8   : > { %v3401_v50 = vsel %vm1471_vm1, %v14257_v18, 0.0  ;;  %8682 = vmatprep.mubr.msk.f32.mxu1 %vm1471_vm1, %v3223_v62  ;;  %v3285_v55 = vsel %vm1471_vm1, %v3158_v56, 0.0  ;;  %v3343_v46 = vadd.f32 %v3342_v19, %v3341_v2  ;;  %v3159_v33 = vmul.f32 %v8126_v44, %v11042_v54  ;;  %v8150_v62 = vld [vmem:[%s14090_s9 + $0x30] sm:$0xff]  ;;  %v8161_v40 = vld [vmem:[%s14092_s11 + $0x28] sm:$0xff]  ;;  %v8151_v44 = vld [vmem:[%s14090_s9 + $0x38] sm:$0xff] }
 0x7e9   : > { %v3286_v43 = vadd.f32 %v3285_v55, %v3284_v32  ;;  %v3344_v25 = vsel %vm1471_vm1, %v3151_v52, 0.0  ;;  %v3402_v10 = vadd.f32 %v3401_v50, %v3400_v4  ;;  %v3152_v37 = vmul.f32 %v8119_v49, %v11036_v38  ;;  %v8139_v52 = vld [vmem:[%s14088_s7 + $0x38] sm:$0xff]  ;;  %v8162_v2 = vld [vmem:[%s14092_s11 + $0x30] sm:$0xff] }
 0x7ea   : > { %v3345_v61 = vadd.f32 %v3344_v25, %v3343_v46  ;;  %v3403_v39 = vsel %vm1471_vm1, %v14258_v34, 0.0  ;;  %v3346_v1 = vsel %vm1471_vm1, %v3155_v57, 0.0  ;;  %v3156_v6 = vmul.f32 %v8123_v63, %v11039_v12  ;;  %v8163_v32 = vld [vmem:[%s14092_s11 + $0x38] sm:$0xff]  ;;  %v8871_v57 = vld [vmem:[%s14087_s6 + $0x10] sm:$0xff]  }
 0x7eb   : > { %8683 = vmatmul.mubr.msk.f32.vlgmr.msra.gmra.mxu1 %vm1471_vm1, %v3286_v43  ;;  %v3404_v47 = vadd.f32 %v3403_v39, %v3402_v10  ;;  %v3405_v5 = vsel %vm1471_vm1, %v3148_v45, 0.0  ;;  %v3348_v58 = vsel %vm1471_vm1, %v3159_v33, 0.0  ;;  %v3160_v53 = vmul.f32 %v8127_v17, %v11042_v54  ;;  %8692 = vmatprep.mubr.msk.bf16.mxu0 %vm1925_vm2, %v8871_v57 }
 0x7ec   : > { %v3347_v15 = vadd.f32 %v3346_v1, %v3345_v61  ;;  %v3407_v41 = vsel %vm1471_vm1, %v3152_v37, 0.0  ;;  %v3409_v7 = vsel %vm1471_vm1, %v3156_v6, 0.0 }
 0x7ed   : > { %v3406_v38 = vadd.f32 %v3405_v5, %v3404_v47  ;;  %v3411_v28 = vsel %vm1471_vm1, %v3160_v53, 0.0 }
 0x7ee   : > { %v3349_v3 = vadd.f32 %v3348_v58, %v3347_v15 }
 0x7ef   : > { %v3408_v60 = vadd.f32 %v3407_v41, %v3406_v38 }
 0x7f0   : > { %8685 = vmatprep.mubr.msk.f32.mxu1 %vm1471_vm1, %v3349_v3 }
 0x7f1   : > { %v3410_v13 = vadd.f32 %v3409_v7, %v3408_v60 }
 0x7f3   : > { %v3412_v23 = vadd.f32 %v3411_v28, %v3410_v13 }
 0x7f5   : > { %8686 = vmatmul.mubr.msk.f32.gmra.mxu1 %vm1471_vm1, %v3412_v23 }
 0x8ab   : > { %v11459_v12 = vpop.f32.mrf.mxu1 }
 0x8ac   : > { %v3513_v8 = vsel %vm693_vm0, %v11459_v12, 0.0  ;;  %v3523_v31 = vmul.f32 %v11459_v12, %v11459_v12 }
 0x8ad   : > { %3514 = vadd.xlane.f32.xlu0 %v3513_v8  ;;  %v11463_v54 = vpop.f32.mrf.mxu1 }
 0x8ae   : > { %v3510_v11 = vsel %vm693_vm0, %v11463_v54, 0.0  ;;  %v3522_v29 = vmul.f32 %v11463_v54, %v11463_v54  ;;  %v3529_v16 = vsel %vm693_vm0, %v3523_v31, 0.0 }
 0x8af   : > { %3511 = vadd.xlane.f32.xlu1 %v3510_v11 }
 0x8b0   : > { %v3526_v26 = vsel %vm693_vm0, %v3522_v29, 0.0 }
 0x8b5   : > { %v11467_v51 = vpop.f32.mrf.mxu1 }
 0x8b6   : > { %v3519_v30 = vsel %vm693_vm0, %v11467_v51, 0.0  ;;  %v3525_v21 = vmul.f32 %v11467_v51, %v11467_v51 }
 0x8b7   : > { %3520 = vadd.xlane.f32.xlu0 %v3519_v30  ;;  %v11473_v14 = vpop.f32.mrf.mxu1 }
 0x8b8   : > { %v3516_v24 = vsel %vm693_vm0, %v11473_v14, 0.0  ;;  %v3524_v27 = vmul.f32 %v11473_v14, %v11473_v14  ;;  %v3535_v56 = vsel %vm693_vm0, %v3525_v21, 0.0 }
 0x8b9   : > { %3517 = vadd.xlane.f32.xlu1 %v3516_v24 }
 0x8ba   : > { %v3532_v35 = vsel %vm693_vm0, %v3524_v27, 0.0 }
 0x8bb   : > { %3536 = vadd.xlane.f32.xlu0 %v3535_v56 }
 0x8bd   : > { %3533 = vadd.xlane.f32.xlu1 %v3532_v35 }
 0x8bf   : > { %3530 = vadd.xlane.f32.xlu0 %v3529_v16 }
 0x8c1   : > { %3527 = vadd.xlane.f32.xlu1 %v3526_v26  ;;  %v14259_v26 = vld [vmem:[#allocation22_spill] sm:$0xff] }
 0x8d2   : > { %3598 = vperm.xlu1 %8864, %v8138_v20  }
 0x8d5   : > { %3603 = vperm.xlu0 %8863, %v8139_v52   ;;  %v14262_v52 = vld [vmem:[#allocation16_spill] sm:$0xff] }
 0x8d6   : > { %3588 = vperm.xlu1 %8864, %v8136_v48  }
 0x8d9   : > { %3789 = vperm.xlu0 %8863, %v8148_v42   ;;  %v8874_v42 = vld [vmem:[%s14091_s10 + $0x18] sm:$0xff]  }
 0x8da   : > { %3593 = vperm.xlu1 %8864, %v8137_v9   ;;  %v9120_v9 = vld [vmem:[%s14083_s2] sm:$0xff] }
 0x8dd   : > { %3794 = vperm.xlu0 %8863, %v8149_v36   ;;  %v8875_v36 = vld [vmem:[%s14089_s8 + $0x10] sm:$0xff]  }
 0x8de   : > { %3886 = vperm.xlu1 %8864, %v8160_v0   ;;  %8700 = vmatprep.mubr.msk.bf16.mxu1 %vm1925_vm2, %v8875_v36 }
 0x8e1   : > { %3799 = vperm.xlu0 %8863, %v8150_v62  }
 0x8e2   : > { %3891 = vperm.xlu1 %8864, %v8161_v40  }
 0x8e5   : > { %3804 = vperm.xlu0 %8863, %v8151_v44  }
 0x8e6   : > { %3896 = vperm.xlu1 %8864, %v8162_v2  }
 0x8ea   : > { %3901 = vperm.xlu1 %8864, %v8163_v32  }
 0x936   : > { %v3515_v59 = vpop.xlane.xlu0 %3514 }
 0x937   : > { %v3539_v50 = vmul.f32 0.0625, %v3515_v59 }
 0x938   : > { %v3512_v19 = vpop.xlane.xlu1 %3511 }
 0x939   : > { %v3538_v43 = vmul.f32 0.0625, %v3512_v19  ;;  %v3547_v37 = vmul.f32 %v3539_v50, %v3539_v50  ;;  %v3559_v24 = vsub.f32 %v11459_v12, %v3539_v50  ;;  %v8873_v12 = vld [vmem:[%s14091_s10 + $0x10] sm:$0xff]  }
 0x93b   : > { %v3546_v17 = vmul.f32 %v3538_v43, %v3538_v43  ;;  %v3558_v27 = vsub.f32 %v11463_v54, %v3538_v43  ;;  %v14261_v54 = vld [vmem:[#allocation15_spill] sm:$0xff] }
 0x93c   : > { %v3877_v48 = vpack.c.bf16 %v14262_v52, %v14261_v54 }
 0x940   : > { %v3521_v49 = vpop.xlane.xlu0 %3520 }
 0x941   : > { %v3541_v4 = vmul.f32 0.0625, %v3521_v49 }
 0x942   : > { %v3518_v22 = vpop.xlane.xlu1 %3517 }
 0x943   : > { %v3540_v45 = vmul.f32 0.0625, %v3518_v22  ;;  %v3549_v55 = vmul.f32 %v3541_v4, %v3541_v4  ;;  %v3561_v28 = vsub.f32 %v11467_v51, %v3541_v4  ;;  %v14260_v51 = vld [vmem:[#allocation26_spill] sm:$0xff] }
 0x944   : > { %v3537_v18 = vpop.xlane.xlu0 %3536  ;;  %v3878_v20 = vpack.c.bf16 %v14260_v51, %v14259_v26 }
 0x945   : > { %v3545_v46 = vmul.f32 0.0625, %v3537_v18  ;;  %v3548_v25 = vmul.f32 %v3540_v45, %v3540_v45  ;;  %v3560_v23 = vsub.f32 %v11473_v14, %v3540_v45  ;;  %v8872_v14 = vld [vmem:[%s14087_s6 + $0x18] sm:$0xff]  }
 0x946   : > { %v3534_v33 = vpop.xlane.xlu1 %3533 }
 0x947   : > { %v3553_v63 = vsub.f32 %v3545_v46, %v3549_v55  ;;  %v3544_v10 = vmul.f32 0.0625, %v3534_v33 }
 0x948   : > { %v3531_v61 = vpop.xlane.xlu0 %3530 }
 0x949   : > { %v3557_v34 = vmax.f32 %v3553_v63, 0.0  ;;  %v3552_v39 = vsub.f32 %v3544_v10, %v3548_v25  ;;  %v3543_v1 = vmul.f32 0.0625, %v3531_v61 }
 0x94a   : > { %v3528_v47 = vpop.xlane.xlu1 %3527 }
 0x94b   : > { %v3565_v15 = vadd.f32 1e-05, %v3557_v34  ;;  %v3556_v6 = vmax.f32 %v3552_v39, 0.0  ;;  %v3551_v5 = vsub.f32 %v3543_v1, %v3547_v37  ;;  %v3542_v58 = vmul.f32 0.0625, %v3528_v47 }
 0x94d   : > { %8949 = vrsqrt.f32 %v3565_v15  ;;  %v3564_v38 = vadd.f32 1e-05, %v3556_v6  ;;  %v3555_v3 = vmax.f32 %v3551_v5, 0.0  ;;  %v3550_v53 = vsub.f32 %v3542_v58, %v3546_v17 }
 0x94e   : > { %v3599_v0 = vpop.permute.xlu1 %3598 }
 0x94f   : > { %8951 = vrsqrt.f32 %v3564_v38  ;;  %v3563_v41 = vadd.f32 1e-05, %v3555_v3  ;;  %v3554_v60 = vmax.f32 %v3550_v53, 0.0 }
 0x950   : > { %v3604_v19 = vpop.permute.xlu0 %3603 }
 0x951   : > { %8953 = vrsqrt.f32 %v3563_v41  ;;  %v3562_v7 = vadd.f32 1e-05, %v3554_v60 }
 0x952   : > { %v3589_v40 = vpop.permute.xlu1 %3588 }
 0x953   : > { %8955 = vrsqrt.f32 %v3562_v7 }
 0x956   : > { %v3594_v18 = vpop.permute.xlu1 %3593 }
 0x95a   : > { %v8950_v13 = vpop.eup %8949 }
 0x95b   : > { %v3573_v30 = vmul.f32 %v8950_v13, %v3561_v28 }
 0x95c   : > { %v8952_v8 = vpop.eup %8951 }
 0x95d   : > { %v3572_v11 = vmul.f32 %v8952_v8, %v3560_v23 }
 0x95e   : > { %v8954_v21 = vpop.eup %8953 }
 0x95f   : > { %v3580_v56 = vpack.c.bf16 %v3573_v30, %v3572_v11  ;;  %v3571_v29 = vmul.f32 %v8954_v21, %v3559_v24 }
 0x960   : > { %v8956_v31 = vpop.eup %8955 }
 0x961   : > { %8688 = vmatprep.subr.bf16.mxu0 %v3580_v56  ;;  %v3570_v35 = vmul.f32 %v8956_v31, %v3558_v27 }
 0x962   : > { %8689 = vmatpush3.bf16.msra.mxu0 %v3580_v56 }
 0x963   : > { %v3579_v16 = vpack.c.bf16 %v3571_v29, %v3570_v35 }
 0x965   : > { %8690 = vmatprep.subr.bf16.mxu0 %v3579_v16 }
 0x966   : > { %8691 = vmatpush3.bf16.msra.mxu0 %v3579_v16 }
 0x967   : > { %8704 = vmatprep.subr.bf16.mxu0 %v3878_v20 }
 0x969   : > { %8693 = vmatmul.mubr.msk.bf16.vlgmr.msra.gmra.mxu0 %vm1925_vm2, %v8872_v14 }
 0x96a   : > { %8705 = vmatpush3.bf16.msra.mxu0 %v3878_v20  ;;  %8708 = vmatprep.mubr.msk.bf16.mxu0 %vm1925_vm2, %v8873_v12 }
 0x96b   : > { %8706 = vmatprep.subr.bf16.mxu0 %v3877_v48 }
 0x96e   : > { %8707 = vmatpush3.bf16.msra.mxu0 %v3877_v48 }
 0x96f   : > { %8722 = vmatprep.subr.mxu0 %v9120_v9 }
 0x971   : > { %8709 = vmatmul.mubr.msk.bf16.vlgmr.msra.gmra.mxu0 %vm1925_vm2, %v8874_v42 }
 0x972   : > { %8723 = vmatpush3.msra.mxu0 %v9120_v9 }
 0xa29   : > { %v8694_v62 = vpop.f32.mrf.mxu0 }
 0xa2a   : > { %v11554_v44 = vadd.f32 %v8694_v62, %v3599_v0 }
 0xa2b   : > { %v3656_v2 = vpop.f32.mrf.mxu0 }
 0xa2c   : > { %v11557_v32 = vmul.f32 0.70710677, %v11554_v44  ;;  %v11559_v57 = vadd.f32 %v3656_v2, %v3589_v40 }
 0xa2d   : > { %v8695_v59 = vpop.f32.mrf.mxu0 }
 0xa2e   : > { %v3681_v49 = vand.u32 2147483647, %v11557_v32  ;;  %v11563_v4 = vmul.f32 0.70710677, %v11559_v57  ;;  %v11565_v22 = vadd.f32 %v8695_v59, %v3604_v19  ;;  %vm3757_vm11 = vcmp.lt.f32.partialorder %v11557_v32, 0.0 }
 0xa2f   : > { %v3659_v45 = vpop.f32.mrf.mxu0 }
 0xa30   : > { %v3685_v50 = vmul.f32 0.3275911, %v3681_v49  ;;  %v3679_v55 = vand.u32 2147483647, %v11563_v4  ;;  %v11569_v46 = vmul.f32 0.70710677, %v11565_v22  ;;  %v11571_v43 = vadd.f32 %v3659_v45, %v3594_v18 }
 0xa31   : > { %v3733_v47 = vsub.f32 0.0, %v3681_v49  ;;  %vm3755_vm12 = vcmp.lt.f32.partialorder %v11563_v4, 0.0  ;;  %v3671_v4 = vmul.f32 0.5, %v11559_v57  ;;  %v9122_v57 = vld [vmem:[%s14082_s1] sm:$0xff] }
 0xa32   : > { %v3689_v33 = vadd.f32 1.0, %v3685_v50  ;;  %v3683_v25 = vmul.f32 0.3275911, %v3679_v55  ;;  %v3682_v63 = vand.u32 2147483647, %v11569_v46  ;;  %v3731_v15 = vsub.f32 0.0, %v3679_v55 }
 0xa33   : > { %v11575_v10 = vmul.f32 0.70710677, %v11571_v43  ;;  %v3737_v6 = vmul.f32 %v3733_v47, %v3681_v49  ;;  %vm3758_vm13 = vcmp.lt.f32.partialorder %v11569_v46, 0.0 }
 0xa34   : > { %8957 = vrcp.f32 %v3689_v33  ;;  %v3687_v61 = vadd.f32 1.0, %v3683_v25  ;;  %v3686_v37 = vmul.f32 0.3275911, %v3682_v63  ;;  %v3734_v5 = vsub.f32 0.0, %v3682_v63 }
 0xa35   : > { %v3680_v34 = vand.u32 2147483647, %v11575_v10  ;;  %v3735_v38 = vmul.f32 %v3731_v15, %v3679_v55  ;;  %v3743_v53 = vmul.f32 1.442695, %v3737_v6  ;;  %vm3756_vm14 = vcmp.lt.f32.partialorder %v11575_v10, 0.0  ;;  %v9121_v10 = vld [vmem:[%s14082_s1 + $0x8] sm:$0xff] }
 0xa36   : > { %8959 = vrcp.f32 %v3687_v61  ;;  %v3690_v39 = vadd.f32 1.0, %v3686_v37  ;;  %v3738_v60 = vmul.f32 %v3734_v5, %v3682_v63 }
 0xa37   : > { %v3684_v1 = vmul.f32 0.3275911, %v3680_v34  ;;  %v3732_v41 = vsub.f32 0.0, %v3680_v34  ;;  %v3739_v23 = vmul.f32 1.442695, %v3735_v38 }
 0xa38   : > { %8961 = vrcp.f32 %v3690_v39  ;;  %v3745_v27 = vmul.f32 1.442695, %v3738_v60 }
 0xa39   : > { %v3688_v17 = vadd.f32 1.0, %v3684_v1  ;;  %v3736_v30 = vmul.f32 %v3732_v41, %v3680_v34 }
 0xa3b   : > { %8963 = vrcp.f32 %v3688_v17  ;;  %v3741_v51 = vmul.f32 1.442695, %v3736_v30  ;;  %v3674_v30 = vmul.f32 0.5, %v11565_v22  ;;  %v8876_v22 = vld [vmem:[%s14089_s8 + $0x18] sm:$0xff]  }
 0xa3c   : > { %8965 = vpow2.f32 %v3743_v53 }
 0xa3d   : > { %8967 = vpow2.f32 %v3739_v23 }
 0xa3e   : > { %8969 = vpow2.f32 %v3745_v27 }
 0xa3f   : > { %8971 = vpow2.f32 %v3741_v51  ;;  %v3887_v51 = vpop.permute.xlu1 %3886 }
 0xa41   : > { %v8958_v58 = vpop.eup %8957 }
 0xa42   : > { %v3697_v3 = vmul.f32 1.0614054, %v8958_v58 }
 0xa43   : > { %v8960_v7 = vpop.eup %8959 }
 0xa44   : > { %v3701_v13 = vadd.f32 -1.4531521, %v3697_v3  ;;  %v3695_v28 = vmul.f32 1.0614054, %v8960_v7 }
 0xa45   : > { %v8962_v8 = vpop.eup %8961 }
 0xa46   : > { %v3705_v11 = vmul.f32 %v8958_v58, %v3701_v13  ;;  %v3699_v21 = vadd.f32 -1.4531521, %v3695_v28  ;;  %v3698_v24 = vmul.f32 1.0614054, %v8962_v8 }
 0xa48   : > { %v3709_v56 = vadd.f32 1.4214138, %v3705_v11  ;;  %v8964_v31 = vpop.eup %8963  ;;  %v3703_v35 = vmul.f32 %v8960_v7, %v3699_v21  ;;  %v3702_v29 = vadd.f32 -1.4531521, %v3698_v24  ;;  %v3673_v11 = vmul.f32 0.5, %v11554_v44 }
 0xa49   : > { %v3696_v26 = vmul.f32 1.0614054, %v8964_v31  ;;  %v8966_v45 = vpop.eup %8965 }
 0xa4a   : > { %v3713_v16 = vmul.f32 %v8958_v58, %v3709_v56  ;;  %v3707_v20 = vadd.f32 1.4214138, %v3703_v35  ;;  %v3706_v14 = vmul.f32 %v8962_v8, %v3702_v29  ;;  %v8968_v61 = vpop.eup %8967  ;;  %v3672_v35 = vmul.f32 0.5, %v11571_v43  ;;  %v3790_v43 = vpop.permute.xlu0 %3789 }
 0xa4b   : > { %v3700_v54 = vadd.f32 -1.4531521, %v3696_v26  ;;  %v8970_v17 = vpop.eup %8969 }
 0xa4c   : > { %v3717_v12 = vadd.f32 -0.28449672, %v3713_v16  ;;  %v3711_v52 = vmul.f32 %v8960_v7, %v3707_v20  ;;  %v3710_v48 = vadd.f32 1.4214138, %v3706_v14  ;;  %v8972_v38 = vpop.eup %8971  ;;  %v3892_v14 = vpop.permute.xlu1 %3891 }
 0xa4d   : > { %v3704_v9 = vmul.f32 %v8964_v31, %v3700_v54 }
 0xa4e   : > { %v3721_v42 = vmul.f32 %v8958_v58, %v3717_v12  ;;  %v3715_v36 = vadd.f32 -0.28449672, %v3711_v52  ;;  %v3714_v0 = vmul.f32 %v8962_v8, %v3710_v48  ;;  %v3795_v20 = vpop.permute.xlu0 %3794  ;;  %v8710_v12 = vpop.f32.mrf.mxu0 }
 0xa4f   : > { %v3708_v40 = vadd.f32 1.4214138, %v3704_v9 }
 0xa50   : > { %v3725_v62 = vadd.f32 0.2548296, %v3721_v42  ;;  %v3719_v2 = vmul.f32 %v8960_v7, %v3715_v36  ;;  %v3718_v59 = vadd.f32 -0.28449672, %v3714_v0  ;;  %v3954_v54 = vpop.f32.mrf.mxu0  ;;  %v3897_v48 = vpop.permute.xlu1 %3896 }
 0xa51   : > { %v3712_v49 = vmul.f32 %v8964_v31, %v3708_v40  ;;  %v3963_v9 = vadd.f32 %v8710_v12, %v3897_v48  ;;  %v3955_v40 = vadd.f32 %v3954_v54, %v3887_v51 }
 0xa52   : > { %v3729_v19 = vmul.f32 %v8958_v58, %v3725_v62  ;;  %v3723_v18 = vadd.f32 0.2548296, %v3719_v2  ;;  %v3722_v50 = vmul.f32 %v8962_v8, %v3718_v59  ;;  %v3800_v52 = vpop.permute.xlu0 %3799  ;;  %v8711_v36 = vpop.f32.mrf.mxu0 }
 0xa53   : > { %v3716_v33 = vadd.f32 -0.28449672, %v3712_v49 }
 0xa54   : > { %v3749_v55 = vmul.f32 %v8966_v45, %v3729_v19  ;;  %v3727_v25 = vmul.f32 %v8960_v7, %v3723_v18  ;;  %v3726_v63 = vadd.f32 0.2548296, %v3722_v50  ;;  %v3902_v45 = vpop.permute.xlu1 %3901  ;;  %v3957_v18 = vpop.f32.mrf.mxu0 }
 0xa55   : > { %v3720_v34 = vmul.f32 %v8964_v31, %v3716_v33 }
 0xa56   : > { %v3753_v37 = vsub.f32 1.0, %v3749_v55  ;;  %v3747_v39 = vmul.f32 %v8968_v61, %v3727_v25  ;;  %v3730_v1 = vmul.f32 %v8962_v8, %v3726_v63  ;;  %v3805_v19 = vpop.permute.xlu0 %3804  ;;  %v3966_v25 = vadd.f32 %v8711_v36, %v3902_v45 }
 0xa57   : > { %v3724_v15 = vadd.f32 0.2548296, %v3720_v34  ;;  %v3958_v34 = vadd.f32 %v3957_v18, %v3892_v14 }
 0xa58   : > { %v3761_v47 = vsub.f32 0.0, %v3753_v37  ;;  %v3751_v6 = vsub.f32 1.0, %v3747_v39  ;;  %v3750_v5 = vmul.f32 %v8970_v17, %v3730_v1 }
 0xa59   : > { %v3728_v58 = vmul.f32 %v8964_v31, %v3724_v15 }
 0xa5a   : > { %v3765_v3 = vsel %vm3757_vm11, %v3761_v47, %v3753_v37  ;;  %v3759_v53 = vsub.f32 0.0, %v3751_v6  ;;  %v3754_v41 = vsub.f32 1.0, %v3750_v5 }
 0xa5b   : > { %v3748_v60 = vmul.f32 %v8972_v38, %v3728_v58  ;;  %v3769_v13 = vadd.f32 1.0, %v3765_v3 }
 0xa5c   : > { %v3762_v7 = vsub.f32 0.0, %v3754_v41  ;;  %v3763_v28 = vsel %vm3755_vm12, %v3759_v53, %v3751_v6 }
 0xa5d   : > { %v3752_v23 = vsub.f32 1.0, %v3748_v60  ;;  %v3767_v24 = vadd.f32 1.0, %v3763_v28  ;;  %v3773_v27 = vmul.f32 %v3769_v13, %v3673_v11 }
 0xa5e   : > { %v3766_v8 = vsel %vm3758_vm13, %v3762_v7, %v3754_v41 }
 0xa5f   : > { %v3770_v32 = vadd.f32 1.0, %v3766_v8  ;;  %v3760_v21 = vsub.f32 0.0, %v3752_v23  ;;  %v3771_v16 = vmul.f32 %v3767_v24, %v3671_v4 }
 0xa61   : > { %v3774_v56 = vmul.f32 %v3770_v32, %v3674_v30  ;;  %v3764_v31 = vsel %vm3756_vm14, %v3760_v21, %v3752_v23 }
 0xa62   : > { %v3768_v29 = vadd.f32 1.0, %v3764_v31 }
 0xa63   : > { %v3781_v46 = vpack.c.bf16 %v3774_v56, %v3773_v27 }
 0xa64   : > { %v3772_v26 = vmul.f32 %v3768_v29, %v3672_v35 }
 0xa65   : > { %8696 = vmatprep.subr.bf16.mxu1 %v3781_v46 }
 0xa66   : > { %8697 = vmatpush3.bf16.msra.mxu1 %v3781_v46  ;;  %v3780_v44 = vpack.c.bf16 %v3772_v26, %v3771_v16 }
 0xa68   : > { %8698 = vmatprep.subr.bf16.mxu1 %v3780_v44 }
 0xa6a   : > { %8699 = vmatpush3.bf16.msra.mxu1 %v3780_v44 }
 0xa6b   : > { %8712 = vmatprep.subr.mxu1 %v9121_v10 }
 0xa6d   : > { %8701 = vmatmul.mubr.msk.bf16.vlgmr.msra.gmra.mxu1 %vm1925_vm2, %v8876_v22 }
 0xa6e   : > { %8713 = vmatpush3.msra.mxu1 %v9121_v10 }
 0xa6f   : > { %8714 = vmatprep.subr.mxu1 %v9122_v57 }
 0xa70   : > { %8715 = vmatpush3.msra.mxu1 %v9122_v57 }
 0xb2d   : > { %v8702_v42 = vpop.f32.mrf.mxu1 }
 0xb2e   : > { %v3866_v0 = vadd.f32 %v8702_v42, %v3800_v52 }
 0xb2f   : > { %v3857_v62 = vpop.f32.mrf.mxu1 }
 0xb30   : > { %v11596_v2 = vadd.f32 %v3963_v9, %v3866_v0  ;;  %v3858_v59 = vadd.f32 %v3857_v62, %v3790_v43 }
 0xb31   : > { %v8703_v49 = vpop.f32.mrf.mxu1 }
 0xb32   : > { %v11599_v50 = vmul.f32 0.70710677, %v11596_v2  ;;  %v11601_v55 = vadd.f32 %v3955_v40, %v3858_v59  ;;  %v3869_v33 = vadd.f32 %v8703_v49, %v3805_v19 }
 0xb33   : > { %v3860_v63 = vpop.f32.mrf.mxu1 }
 0xb34   : > { %v3983_v61 = vand.u32 2147483647, %v11599_v50  ;;  %v11605_v37 = vmul.f32 0.70710677, %v11601_v55  ;;  %v11607_v39 = vadd.f32 %v3966_v25, %v3869_v33  ;;  %v3861_v1 = vadd.f32 %v3860_v63, %v3795_v20 }
 0xb35   : > { %vm4059_vm3 = vcmp.lt.f32.partialorder %v11599_v50, 0.0 }
 0xb36   : > { %v3987_v17 = vmul.f32 0.3275911, %v3983_v61  ;;  %v3981_v47 = vand.u32 2147483647, %v11605_v37  ;;  %v11611_v15 = vmul.f32 0.70710677, %v11607_v39  ;;  %v11613_v6 = vadd.f32 %v3958_v34, %v3861_v1 }
 0xb37   : > { %v4035_v23 = vsub.f32 0.0, %v3983_v61  ;;  %vm4057_vm15 = vcmp.lt.f32.partialorder %v11605_v37, 0.0 }
 0xb38   : > { %v3991_v5 = vadd.f32 1.0, %v3987_v17  ;;  %v3985_v58 = vmul.f32 0.3275911, %v3981_v47  ;;  %v3984_v38 = vand.u32 2147483647, %v11611_v15  ;;  %v4033_v8 = vsub.f32 0.0, %v3981_v47 }
 0xb39   : > { %v11617_v3 = vmul.f32 0.70710677, %v11613_v6  ;;  %v4039_v11 = vmul.f32 %v4035_v23, %v3983_v61  ;;  %vm4060_vm5 = vcmp.lt.f32.partialorder %v11611_v15, 0.0  ;;  %v3974_v50 = vmul.f32 0.5, %v11613_v6 }
 0xb3a   : > { %8973 = vrcp.f32 %v3991_v5  ;;  %v3989_v53 = vadd.f32 1.0, %v3985_v58  ;;  %v3988_v41 = vmul.f32 0.3275911, %v3984_v38  ;;  %v4036_v30 = vsub.f32 0.0, %v3984_v38 }
 0xb3b   : > { %v3982_v60 = vand.u32 2147483647, %v11617_v3  ;;  %v4037_v21 = vmul.f32 %v4033_v8, %v3981_v47  ;;  %v4045_v27 = vmul.f32 1.442695, %v4039_v11  ;;  %vm4058_vm4 = vcmp.lt.f32.partialorder %v11617_v3, 0.0 }
 0xb3c   : > { %8975 = vrcp.f32 %v3989_v53  ;;  %v3992_v7 = vadd.f32 1.0, %v3988_v41  ;;  %v4040_v31 = vmul.f32 %v4036_v30, %v3984_v38  ;;  %v3976_v6 = vmul.f32 0.5, %v11607_v39 }
 0xb3d   : > { %v3986_v13 = vmul.f32 0.3275911, %v3982_v60  ;;  %v4034_v56 = vsub.f32 0.0, %v3982_v60  ;;  %v4041_v46 = vmul.f32 1.442695, %v4037_v21 }
 0xb3e   : > { %8977 = vrcp.f32 %v3992_v7  ;;  %v4047_v57 = vmul.f32 1.442695, %v4040_v31 }
 0xb3f   : > { %v3990_v28 = vadd.f32 1.0, %v3986_v13  ;;  %v4038_v44 = vmul.f32 %v4034_v56, %v3982_v60 }
 0xb41   : > { %8979 = vrcp.f32 %v3990_v28  ;;  %v4043_v52 = vmul.f32 1.442695, %v4038_v44 }
 0xb42   : > { %8981 = vpow2.f32 %v4045_v27 }
 0xb43   : > { %8983 = vpow2.f32 %v4041_v46 }
 0xb44   : > { %8985 = vpow2.f32 %v4047_v57 }
 0xb45   : > { %8987 = vpow2.f32 %v4043_v52 }
 0xb47   : > { %v8974_v32 = vpop.eup %8973 }
 0xb48   : > { %v3999_v24 = vmul.f32 1.0614054, %v8974_v32 }
 0xb49   : > { %v8976_v4 = vpop.eup %8975 }
 0xb4a   : > { %v4003_v35 = vadd.f32 -1.4531521, %v3999_v24  ;;  %v3997_v29 = vmul.f32 1.0614054, %v8976_v4 }
 0xb4b   : > { %v8978_v16 = vpop.eup %8977 }
 0xb4c   : > { %v4007_v26 = vmul.f32 %v8974_v32, %v4003_v35  ;;  %v4001_v22 = vadd.f32 -1.4531521, %v3997_v29  ;;  %v4000_v10 = vmul.f32 1.0614054, %v8978_v16 }
 0xb4e   : > { %v4011_v43 = vadd.f32 1.4214138, %v4007_v26  ;;  %v8980_v51 = vpop.eup %8979  ;;  %v4005_v20 = vmul.f32 %v8976_v4, %v4001_v22  ;;  %v4004_v14 = vadd.f32 -1.4531521, %v4000_v10 }
 0xb4f   : > { %v3998_v54 = vmul.f32 1.0614054, %v8980_v51  ;;  %v8982_v34 = vpop.eup %8981 }
 0xb50   : > { %v4015_v12 = vmul.f32 %v8974_v32, %v4011_v43  ;;  %v4009_v48 = vadd.f32 1.4214138, %v4005_v20  ;;  %v4008_v42 = vmul.f32 %v8978_v16, %v4004_v14  ;;  %v8984_v53 = vpop.eup %8983 }
 0xb51   : > { %v4002_v36 = vadd.f32 -1.4531521, %v3998_v54  ;;  %v8986_v13 = vpop.eup %8985 }
 0xb52   : > { %v4019_v9 = vadd.f32 -0.28449672, %v4015_v12  ;;  %v4013_v0 = vmul.f32 %v8976_v4, %v4009_v48  ;;  %v4012_v62 = vadd.f32 1.4214138, %v4008_v42  ;;  %v8988_v21 = vpop.eup %8987 }
 0xb53   : > { %v4006_v59 = vmul.f32 %v8980_v51, %v4002_v36 }
 0xb54   : > { %v4023_v40 = vmul.f32 %v8974_v32, %v4019_v9  ;;  %v4017_v19 = vadd.f32 -0.28449672, %v4013_v0  ;;  %v4016_v49 = vmul.f32 %v8978_v16, %v4012_v62 }
 0xb55   : > { %v4010_v18 = vadd.f32 1.4214138, %v4006_v59 }
 0xb56   : > { %v4027_v45 = vadd.f32 0.2548296, %v4023_v40  ;;  %v4021_v33 = vmul.f32 %v8976_v4, %v4017_v19  ;;  %v4020_v25 = vadd.f32 -0.28449672, %v4016_v49 }
 0xb57   : > { %v4014_v61 = vmul.f32 %v8980_v51, %v4010_v18 }
 0xb58   : > { %v4031_v63 = vmul.f32 %v8974_v32, %v4027_v45  ;;  %v4025_v1 = vadd.f32 0.2548296, %v4021_v33  ;;  %v4024_v17 = vmul.f32 %v8978_v16, %v4020_v25 }
 0xb59   : > { %v4018_v5 = vadd.f32 -0.28449672, %v4014_v61 }
 0xb5a   : > { %v4051_v47 = vmul.f32 %v8982_v34, %v4031_v63  ;;  %v4029_v58 = vmul.f32 %v8976_v4, %v4025_v1  ;;  %v4028_v38 = vadd.f32 0.2548296, %v4024_v17  ;;  %v3973_v4 = vmul.f32 0.5, %v11601_v55 }
 0xb5b   : > { %v4022_v41 = vmul.f32 %v8980_v51, %v4018_v5 }
 0xb5c   : > { %v4049_v60 = vmul.f32 %v8984_v53, %v4029_v58  ;;  %v4032_v7 = vmul.f32 %v8978_v16, %v4028_v38  ;;  %v4055_v28 = vsub.f32 1.0, %v4051_v47 }
 0xb5d   : > { %v4026_v23 = vadd.f32 0.2548296, %v4022_v41 }
 0xb5e   : > { %v4053_v8 = vsub.f32 1.0, %v4049_v60  ;;  %v4052_v11 = vmul.f32 %v8986_v13, %v4032_v7  ;;  %v4063_v27 = vsub.f32 0.0, %v4055_v28 }
 0xb5f   : > { %v4030_v30 = vmul.f32 %v8980_v51, %v4026_v23  ;;  %v3975_v51 = vmul.f32 0.5, %v11596_v2 }
 0xb60   : > { %v4061_v32 = vsub.f32 0.0, %v4053_v8  ;;  %v4056_v24 = vsub.f32 1.0, %v4052_v11  ;;  %v4067_v16 = vsel %vm4059_vm3, %v4063_v27, %v4055_v28 }
 0xb61   : > { %v4050_v56 = vmul.f32 %v8988_v21, %v4030_v30  ;;  %v4071_v10 = vadd.f32 1.0, %v4067_v16 }
 0xb62   : > { %v4065_v31 = vsel %vm4057_vm15, %v4061_v32, %v4053_v8  ;;  %v4064_v46 = vsub.f32 0.0, %v4056_v24 }
 0xb63   : > { %v4069_v35 = vadd.f32 1.0, %v4065_v31  ;;  %v4054_v29 = vsub.f32 1.0, %v4050_v56  ;;  %v11636_v14 = vmul.f32 %v4071_v10, %v3975_v51 }
 0xb64   : > { %v4068_v57 = vsel %vm4060_vm5, %v4064_v46, %v4056_v24 }
 0xb65   : > { %v11623_v26 = vmul.f32 %v4069_v35, %v3973_v4  ;;  %v4062_v44 = vsub.f32 0.0, %v4054_v29  ;;  %v4072_v3 = vadd.f32 1.0, %v4068_v57  ;;  %14265 = vst [vmem:[#allocation31_spill] sm:$0xff] %v11636_v14  ;;  %v4083_v48 = vsel %vm693_vm0, %v11636_v14, 0.0 }
 0xb66   : > { %v4091_v42 = vmul.f32 %v11636_v14, %v11636_v14 }
 0xb67   : > { %14263 = vst [vmem:[#allocation36_spill] sm:$0xff] %v11623_v26  ;;  %v4066_v22 = vsel %vm4058_vm4, %v4062_v44, %v4054_v29  ;;  %v4077_v37 = vsel %vm693_vm0, %v11623_v26, 0.0  ;;  %v4089_v55 = vmul.f32 %v11623_v26, %v11623_v26  ;;  %v11643_v52 = vmul.f32 %v4072_v3, %v3976_v6 }
 0xb68   : > { %v4070_v43 = vadd.f32 1.0, %v4066_v22  ;;  %4078 = vadd.xlane.f32.xlu0 %v4077_v37  ;;  %v4099_v39 = vsel %vm693_vm0, %v4091_v42, 0.0 }
 0xb69   : > { %v4093_v15 = vsel %vm693_vm0, %v4089_v55, 0.0  ;;  %14266 = vst [vmem:[#allocation34_spill] sm:$0xff] %v11643_v52  ;;  %v4086_v9 = vsel %vm693_vm0, %v11643_v52, 0.0  ;;  %v4092_v36 = vmul.f32 %v11643_v52, %v11643_v52 }
 0xb6a   : > { %v11633_v20 = vmul.f32 %v4070_v43, %v3974_v50  ;;  %v14267_v43 = vld [vmem:[#allocation14_spill] sm:$0xff] }
 0xb6b   : > { %v4102_v0 = vsel %vm693_vm0, %v4092_v36, 0.0 }
 0xb6c   : > { %14264 = vst [vmem:[#allocation43_spill] sm:$0xff] %v11633_v20  ;;  %4094 = vadd.xlane.f32.xlu0 %v4093_v15  ;;  %v4080_v12 = vsel %vm693_vm0, %v11633_v20, 0.0  ;;  %v4090_v54 = vmul.f32 %v11633_v20, %v11633_v20 }
 0xb6d   : > { %4081 = vadd.xlane.f32.xlu1 %v4080_v12 }
 0xb6e   : > { %v4096_v2 = vsel %vm693_vm0, %v4090_v54, 0.0 }
 0xb70   : > { %4097 = vadd.xlane.f32.xlu0 %v4096_v2 }
 0xb71   : > { %4084 = vadd.xlane.f32.xlu1 %v4083_v48 }
 0xb74   : > { %4087 = vadd.xlane.f32.xlu0 %v4086_v9 }
 0xb75   : > { %4100 = vadd.xlane.f32.xlu1 %v4099_v39 }
 0xb78   : > { %4103 = vadd.xlane.f32.xlu0 %v4102_v0 }
 0xbf1   : > { %v4079_v62 = vpop.xlane.xlu0 %4078 }
 0xbf2   : > { %v4105_v40 = vmul.f32 0.0625, %v4079_v62  ;;  %v8204_v62 = vld [vmem:[%s14086_s5 + $0x900] sm:$0xff] }
 0xbf4   : > { %v4113_v19 = vmul.f32 %v4105_v40, %v4105_v40  ;;  %v4125_v56 = vsub.f32 %v11623_v26, %v4105_v40  ;;  %v8205_v40 = vld [vmem:[%s14086_s5 + $0x908] sm:$0xff] }
 0xbf5   : > { %v4095_v59 = vpop.xlane.xlu0 %4094 }
 0xbf6   : > { %v4109_v49 = vmul.f32 0.0625, %v4095_v59  ;;  %v4082_v45 = vpop.xlane.xlu1 %4081  ;;  %v8206_v59 = vld [vmem:[%s14086_s5 + $0x910] sm:$0xff] }
 0xbf7   : > { %v4106_v18 = vmul.f32 0.0625, %v4082_v45 }
 0xbf8   : > { %v4117_v33 = vsub.f32 %v4109_v49, %v4113_v19  ;;  %v14268_v19 = vld [vmem:[#allocation9_spill] sm:$0xff] }
 0xbf9   : > { %v4098_v25 = vpop.xlane.xlu0 %4097  ;;  %v4114_v61 = vmul.f32 %v4106_v18, %v4106_v18  ;;  %v4126_v35 = vsub.f32 %v11633_v20, %v4106_v18  ;;  %v8207_v18 = vld [vmem:[%s14086_s5 + $0x918] sm:$0xff] }
 0xbfa   : > { %v4121_v63 = vmax.f32 %v4117_v33, 0.0  ;;  %v4110_v34 = vmul.f32 0.0625, %v4098_v25  ;;  %v4085_v1 = vpop.xlane.xlu1 %4084  ;;  %v8208_v33 = vld [vmem:[%s14086_s5 + $0x920] sm:$0xff]  ;;  %v8209_v25 = vld [vmem:[%s14086_s5 + $0x928] sm:$0xff]  ;;  %v8183_v20 = vld [vmem:[%s14086_s5 + $0x858] sm:$0xff] }
 0xbfb   : > { %v4107_v17 = vmul.f32 0.0625, %v4085_v1  ;;  %v8211_v1 = vld [vmem:[%s14086_s5 + $0x938] sm:$0xff] }
 0xbfc   : > { %v4129_v47 = vadd.f32 1e-05, %v4121_v63  ;;  %v4118_v5 = vsub.f32 %v4110_v34, %v4114_v61  ;;  %v8210_v34 = vld [vmem:[%s14086_s5 + $0x930] sm:$0xff] }
 0xbfd   : > { %v4088_v58 = vpop.xlane.xlu0 %4087  ;;  %v4115_v60 = vmul.f32 %v4107_v17, %v4107_v17  ;;  %v4127_v16 = vsub.f32 %v11636_v14, %v4107_v17  ;;  %v8212_v17 = vld [vmem:[%s14086_s5 + $0x940] sm:$0xff] }
 0xbfe   : > { %8989 = vrsqrt.f32 %v4129_v47  ;;  %v4122_v38 = vmax.f32 %v4118_v5, 0.0  ;;  %v4108_v53 = vmul.f32 0.0625, %v4088_v58  ;;  %v4101_v41 = vpop.xlane.xlu1 %4100  ;;  %v8213_v5 = vld [vmem:[%s14086_s5 + $0x948] sm:$0xff]  ;;  %v8214_v58 = vld [vmem:[%s14086_s5 + $0x950] sm:$0xff] }
 0xbff   : > { %v4111_v7 = vmul.f32 0.0625, %v4101_v41 }
 0xc00   : > { %v4130_v13 = vadd.f32 1e-05, %v4122_v38  ;;  %v4116_v8 = vmul.f32 %v4108_v53, %v4108_v53  ;;  %v4128_v37 = vsub.f32 %v11643_v52, %v4108_v53  ;;  %v8215_v38 = vld [vmem:[%s14086_s5 + $0x958] sm:$0xff] }
 0xc01   : > { %v4119_v28 = vsub.f32 %v4111_v7, %v4115_v60  ;;  %v4104_v23 = vpop.xlane.xlu0 %4103 }
 0xc02   : > { %8991 = vrsqrt.f32 %v4130_v13  ;;  %v4112_v11 = vmul.f32 0.0625, %v4104_v23  ;;  %v8216_v13 = vld [vmem:[%s14086_s5 + $0x960] sm:$0xff]  ;;  %v8218_v23 = vld [vmem:[%s14086_s5 + $0x970] sm:$0xff] }
 0xc03   : > { %v4123_v30 = vmax.f32 %v4119_v28, 0.0  ;;  %v8217_v28 = vld [vmem:[%s14086_s5 + $0x968] sm:$0xff] }
 0xc04   : > { %v4120_v21 = vsub.f32 %v4112_v11, %v4116_v8 }
 0xc05   : > { %v4131_v32 = vadd.f32 1e-05, %v4123_v30 }
 0xc06   : > { %v4124_v24 = vmax.f32 %v4120_v21, 0.0 }
 0xc07   : > { %8993 = vrsqrt.f32 %v4131_v32  ;;  %v8219_v32 = vld [vmem:[%s14086_s5 + $0x978] sm:$0xff] }
 0xc08   : > { %v4132_v27 = vadd.f32 1e-05, %v4124_v24  ;;  %v8220_v24 = vld [vmem:[%s14086_s5 + $0x980] sm:$0xff] }
 0xc0a   : > { %8995 = vrsqrt.f32 %v4132_v27  ;;  %v8221_v27 = vld [vmem:[%s14086_s5 + $0x988] sm:$0xff] }
 0xc0b   : > { %v8990_v31 = vpop.eup %8989 }
 0xc0c   : > { %v4137_v4 = vmul.f32 %v8990_v31, %v4125_v56 }
 0xc0e   : > { %8716 = vmatprep.mubr.msk.f32.mxu1 %vm693_vm0, %v4137_v4 }
 0xc0f   : > { %v8992_v29 = vpop.eup %8991 }
 0xc10   : > { %v4138_v46 = vmul.f32 %v8992_v29, %v4126_v35  ;;  %v8222_v29 = vld [vmem:[%s14086_s5 + $0x990] sm:$0xff] }
 0xc12   : > { %8717 = vmatmul.mubr.msk.f32.vlgmr.msra.gmra.mxu1 %vm693_vm0, %v4138_v46  ;;  %v8223_v46 = vld [vmem:[%s14086_s5 + $0x998] sm:$0xff] }
 0xc14   : > { %v8994_v44 = vpop.eup %8993 }
 0xc15   : > { %v4139_v22 = vmul.f32 %v8994_v44, %v4127_v16  ;;  %v8224_v16 = vld [vmem:[%s14086_s5 + $0x9a0] sm:$0xff] }
 0xc17   : > { %v8996_v55 = vpop.eup %8995  ;;  %8719 = vmatprep.mubr.msk.f32.mxu1 %vm693_vm0, %v4139_v22 }
 0xc18   : > { %v4140_v10 = vmul.f32 %v8996_v55, %v4128_v37 }
 0xc1a   : > { %8720 = vmatmul.mubr.msk.f32.gmra.mxu1 %vm693_vm0, %v4140_v10  ;;  %v8225_v10 = vld [vmem:[%s14086_s5 + $0x9a8] sm:$0xff] }
 0xcd2   : > { %v8718_v57 = vpop.f32.mrf.mxu1 }
 0xcd3   : > { %v4291_v50 = vcombine.high %v8718_v57, %v8718_v57  ;;  %v4298_v51 = vrot.slane %v8718_v57, %v14267_v43  ;;  %v8226_v57 = vld [vmem:[%s14086_s5 + $0x9b0] sm:$0xff] }
 0xcd4   : > { %v4219_v6 = vpop.f32.mrf.mxu1 }
 0xcd5   : > { %v4305_v3 = vrot.slane %v4291_v50, %v14267_v43  ;;  %v4306_v15 = vcombine.high %v4298_v51, %v4298_v51  ;;  %v4314_v54 = vrot.slane %v4298_v51, %v14267_v43  ;;  %v4242_v9 = vcombine.high %v4219_v6, %v4219_v6  ;;  %v8227_v50 = vld [vmem:[%s14086_s5 + $0x9b8] sm:$0xff] }
 0xcd6   : > { %v11671_v39 = vrot.slane %v4219_v6, %v14267_v43  ;;  %v8229_v6 = vld [vmem:[%s14086_s5 + $0x9c8] sm:$0xff] }
 0xcd7   : > { %v4307_v12 = vcombine.high %v4305_v3, %v4305_v3  ;;  %v4328_v2 = vrot.slane %v4306_v15, %v14267_v43  ;;  %v4321_v48 = vrot.slane %v4305_v3, %v14267_v43  ;;  %v4336_v36 = vcombine.high %v4314_v54, %v4314_v54 }
 0xcd8   : > { %v4602_v49 = vrot.slane %v4314_v54, %v14268_v19  ;;  %v11703_v47 = vrot.slane %v4242_v9, %v14267_v43  ;;  %v4257_v60 = vcombine.high %v11671_v39, %v11671_v39  ;;  %v11720_v7 = vrot.slane %v11671_v39, %v14267_v43  ;;  %v8228_v54 = vld [vmem:[%s14086_s5 + $0x9c0] sm:$0xff]  ;;  %v8231_v39 = vld [vmem:[%s14086_s5 + $0x9d8] sm:$0xff] }
 0xcd9   : > { %v4335_v42 = vrot.slane %v4307_v12, %v14267_v43  ;;  %v4338_v0 = vcombine.high %v4328_v2, %v4328_v2  ;;  %v4337_v45 = vcombine.high %v4321_v48, %v4321_v48  ;;  %v4606_v63 = vrot.slane %v4328_v2, %v14268_v19  ;;  %v8230_v2 = vld [vmem:[%s14086_s5 + $0x9d0] sm:$0xff] }
 0xcda   : > { %v4610_v53 = vrot.slane %v4336_v36, %v14268_v19  ;;  %v4618_v41 = vrot.slane %v4321_v48, %v14268_v19  ;;  %v4759_v30 = vmul.f32 %v8204_v62, %v4602_v49  ;;  %v11733_v21 = vmul.f32 %v8205_v40, %v4602_v49  ;;  %v8233_v62 = vld [vmem:[%s14086_s5 + $0x9e8] sm:$0xff] }
 0xcdb   : > { %v4339_v61 = vcombine.high %v4335_v42, %v4335_v42  ;;  %v4614_v8 = vrot.slane %v4338_v0, %v14268_v19  ;;  %v4622_v11 = vrot.slane %v4335_v42, %v14268_v19  ;;  %v4626_v56 = vrot.slane %v4337_v45, %v14268_v19  ;;  %v8232_v0 = vld [vmem:[%s14086_s5 + $0x9e0] sm:$0xff] }
 0xcdc   : > { %v11745_v31 = vmul.f32 %v8206_v59, %v4602_v49  ;;  %v11747_v4 = vmul.f32 %v8207_v18, %v4602_v49  ;;  %v4763_v35 = vmul.f32 %v8208_v33, %v4606_v63  ;;  %v4764_v22 = vmul.f32 %v8209_v25, %v4606_v63  ;;  %v8234_v18 = vld [vmem:[%s14086_s5 + $0x9f0] sm:$0xff]  ;;  %v8235_v33 = vld [vmem:[%s14086_s5 + $0x9f8] sm:$0xff] }
 0xcdd   : > { %v4630_v44 = vrot.slane %v4339_v61, %v14268_v19  ;;  %v11759_v37 = vmul.f32 %v8210_v34, %v4606_v63  ;;  %v11761_v55 = vmul.f32 %v8211_v1, %v4606_v63  ;;  %v4767_v51 = vmul.f32 %v8212_v17, %v4610_v53 }
 0xcde   : > { %v4768_v3 = vmul.f32 %v8213_v5, %v4610_v53  ;;  %v11772_v15 = vmul.f32 %v8214_v58, %v4610_v53  ;;  %v11774_v12 = vmul.f32 %v8215_v38, %v4610_v53  ;;  %v4771_v48 = vmul.f32 %v8216_v13, %v4614_v8 }
 0xcdf   : > { %v4772_v42 = vmul.f32 %v8217_v28, %v4614_v8  ;;  %v11785_v9 = vmul.f32 %v8218_v23, %v4614_v8  ;;  %v11787_v36 = vmul.f32 %v8219_v32, %v4614_v8  ;;  %v4775_v40 = vmul.f32 %v8220_v24, %v4618_v41 }
 0xce0   : > { %v4776_v59 = vmul.f32 %v8221_v27, %v4618_v41  ;;  %v11798_v49 = vmul.f32 %v8222_v29, %v4618_v41  ;;  %v11800_v45 = vmul.f32 %v8223_v46, %v4618_v41  ;;  %v4779_v25 = vmul.f32 %v8224_v16, %v4622_v11 }
 0xce1   : > { %v4780_v63 = vmul.f32 %v8225_v10, %v4622_v11  ;;  %v11808_v61 = vmul.f32 %v8226_v57, %v4622_v11  ;;  %v4258_v34 = vcombine.high %v11703_v47, %v11703_v47  ;;  %v11812_v1 = vmul.f32 %v8227_v50, %v4622_v11  ;;  %v8172_v10 = vld [vmem:[%s14086_s5 + $0x800] sm:$0xff] }
 0xce2   : > { %v4783_v17 = vmul.f32 %v8228_v54, %v4626_v56  ;;  %v4784_v5 = vmul.f32 %v8229_v6, %v4626_v56  ;;  %v4279_v58 = vrot.slane %v4257_v60, %v14267_v43  ;;  %v11815_v38 = vmul.f32 %v8230_v2, %v4626_v56  ;;  %v11873_v6 = vpop.f32.mrf.mxu1 }
 0xce3   : > { %v11817_v53 = vmul.f32 %v8231_v39, %v4626_v56  ;;  %v11819_v41 = vmul.f32 %v8232_v0, %v4630_v44  ;;  %v11821_v13 = vmul.f32 %v8233_v62, %v4630_v44  ;;  %v11823_v28 = vmul.f32 %v8234_v18, %v4630_v44  ;;  %v8173_v0 = vld [vmem:[%s14086_s5 + $0x808] sm:$0xff] }
 0xce4   : > { %v11825_v23 = vmul.f32 %v8235_v33, %v4630_v44  ;;  %v4272_v8 = vrot.slane %v11703_v47, %v14267_v43  ;;  %v4287_v11 = vcombine.high %v11720_v7, %v11720_v7  ;;  %v11832_v60 = vsel %vm1471_vm1, %v4759_v30, 0.0  ;;  %v8177_v62 = vld [vmem:[%s14086_s5 + $0x828] sm:$0xff] }
 0xce5   : > { %14269 = vst [vmem:[#allocation13_spill] sm:$0xff] %v11823_v28  ;;  %v11835_v32 = vsel %vm1471_vm1, %v4763_v35, 0.0  ;;  %v11838_v24 = vsel %vm1471_vm1, %v4767_v51, 0.0  ;;  %v4286_v27 = vrot.slane %v4258_v34, %v14267_v43  ;;  %v11842_v56 = vsel %vm1471_vm1, %v4771_v48, 0.0  ;;  %v8184_v34 = vld [vmem:[%s14086_s5 + $0x860] sm:$0xff] }
 0xce6   : > { %14270 = vst [vmem:[#allocation12_spill] sm:$0xff] %v11825_v23  ;;  %v4289_v29 = vcombine.high %v4279_v58, %v4279_v58  ;;  %v4570_v47 = vrot.slane %v11720_v7, %v14268_v19  ;;  %v4574_v46 = vrot.slane %v4279_v58, %v14268_v19  ;;  %v11848_v30 = vsel %vm1471_vm1, %v4775_v40, 0.0  ;;  %v8176_v7 = vld [vmem:[%s14086_s5 + $0x820] sm:$0xff]  ;;  %v8181_v58 = vld [vmem:[%s14086_s5 + $0x848] sm:$0xff] }
 0xce7   : > { %14271 = vst [vmem:[#allocation11_spill] sm:$0xff] %v11848_v30  ;;  %v11851_v35 = vsel %vm1471_vm1, %v4779_v25, 0.0  ;;  %v11854_v16 = vsel %vm1471_vm1, %v4783_v17, 0.0  ;;  %v11858_v44 = vsel %vm1471_vm1, %v11733_v21, 0.0  ;;  %v11867_v57 = vsel %vm1471_vm1, %v4764_v22, 0.0  ;;  %v8180_v22 = vld [vmem:[%s14086_s5 + $0x840] sm:$0xff] }
 0xce8   : > { %14272 = vst [vmem:[#allocation10_spill] sm:$0xff] %v11851_v35  ;;  %14273 = vst [vmem:[#allocation23_spill] sm:$0xff] %v11854_v16  ;;  %v11870_v50 = vsel %vm1471_vm1, %v4768_v3, 0.0  ;;  %v4288_v51 = vcombine.high %v4272_v8, %v4272_v8  ;;  %v4578_v54 = vrot.slane %v4287_v11, %v14268_v19  ;;  %v11876_v21 = vsel %vm1471_vm1, %v4772_v42, 0.0  ;;  %v8174_v42 = vld [vmem:[%s14086_s5 + $0x810] sm:$0xff] }
 0xce9   : > { %v11879_v2 = vsel %vm1471_vm1, %v4776_v59, 0.0  ;;  %v11882_v48 = vsel %vm1471_vm1, %v4780_v63, 0.0  ;;  %v4290_v39 = vcombine.high %v4286_v27, %v4286_v27  ;;  %v11888_v3 = vsel %vm1471_vm1, %v4784_v5, 0.0  ;;  %v8175_v63 = vld [vmem:[%s14086_s5 + $0x818] sm:$0xff]  ;;  %v8182_v17 = vld [vmem:[%s14086_s5 + $0x850] sm:$0xff] }
 0xcea   : > { %14274 = vst [vmem:[#allocation21_spill] sm:$0xff] %v11879_v2  ;;  %14275 = vst [vmem:[#allocation27_spill] sm:$0xff] %v11882_v48  ;;  %v4582_v40 = vrot.slane %v4289_v29, %v14268_v19  ;;  %v4727_v59 = vmul.f32 %v8172_v10, %v4570_v47  ;;  %v4731_v18 = vmul.f32 %v8176_v7, %v4574_v46  ;;  %v11902_v33 = vsel %vm1471_vm1, %v11745_v31, 0.0  ;;  %v8178_v31 = vld [vmem:[%s14086_s5 + $0x830] sm:$0xff]  ;;  %v8188_v48 = vld [vmem:[%s14086_s5 + $0x880] sm:$0xff] }
 0xceb   : > { %14276 = vst [vmem:[#allocation24_spill] sm:$0xff] %v11888_v3  ;;  %v11906_v25 = vsel %vm1471_vm1, %v11759_v37, 0.0  ;;  %v11918_v5 = vrot.slane %v11873_v6, %v14267_v43  ;;  %v8179_v37 = vld [vmem:[%s14086_s5 + $0x838] sm:$0xff]  ;;  %v11930_v11 = vrot.slane %v4272_v8, %v14268_v19  ;;  %v11933_v29 = vrot.slane %v4286_v27, %v14268_v19  ;;  %v8185_v8 = vld [vmem:[%s14086_s5 + $0x868] sm:$0xff] }
 0xcec   : > { %v11936_v10 = vrot.slane %v4288_v51, %v14268_v19  ;;  %v4735_v7 = vmul.f32 %v8180_v22, %v4578_v54  ;;  %v11948_v26 = vrot.slane %v4290_v39, %v14268_v19  ;;  %v4728_v27 = vmul.f32 %v8173_v0, %v4570_v47  ;;  %v8186_v22 = vld [vmem:[%s14086_s5 + $0x870] sm:$0xff]  ;;  %v8189_v39 = vld [vmem:[%s14086_s5 + $0x888] sm:$0xff] }
 0xced   : > { %v4729_v52 = vmul.f32 %v8174_v42, %v4570_v47  ;;  %v4732_v51 = vmul.f32 %v8177_v62, %v4574_v46  ;;  %v4730_v14 = vmul.f32 %v8175_v63, %v4570_v47  ;;  %v4739_v23 = vmul.f32 %v8184_v34, %v4582_v40 }
 0xcee   : > { %v4855_v28 = vsel %vm1471_vm1, %v4727_v59, 0.0  ;;  %v4856_v3 = vsel %vm1471_vm1, %v4731_v18, 0.0  ;;  %v4733_v0 = vmul.f32 %v8178_v31, %v4574_v46  ;;  %v4734_v42 = vmul.f32 %v8179_v37, %v4574_v46  ;;  %v8187_v59 = vld [vmem:[%s14086_s5 + $0x878] sm:$0xff]  ;;  %v8190_v18 = vld [vmem:[%s14086_s5 + $0x890] sm:$0xff] }
 0xcef   : > { %v4736_v62 = vmul.f32 %v8181_v58, %v4578_v54  ;;  %v4857_v16 = vadd.f32 %v4856_v3, %v4855_v28  ;;  %v4737_v2 = vmul.f32 %v8182_v17, %v4578_v54  ;;  %v4738_v35 = vmul.f32 %v8183_v20, %v4578_v54  ;;  %v8192_v20 = vld [vmem:[%s14086_s5 + $0x8a0] sm:$0xff]  ;;  %v8193_v28 = vld [vmem:[%s14086_s5 + $0x8a8] sm:$0xff] }
 0xcf0   : > { %v4740_v47 = vmul.f32 %v8185_v8, %v4582_v40  ;;  %v4858_v63 = vsel %vm1471_vm1, %v4735_v7, 0.0  ;;  %v4741_v34 = vmul.f32 %v8186_v22, %v4582_v40  ;;  %v4918_v31 = vsel %vm1471_vm1, %v4728_v27, 0.0 }
 0xcf1   : > { %v4859_v30 = vadd.f32 %v4858_v63, %v4857_v16  ;;  %v4919_v46 = vsel %vm1471_vm1, %v4732_v51, 0.0  ;;  %v4743_v54 = vmul.f32 %v8188_v48, %v11930_v11  ;;  %v4744_v3 = vmul.f32 %v8189_v39, %v11930_v11  ;;  %v8194_v48 = vld [vmem:[%s14086_s5 + $0x8b0] sm:$0xff] }
 0xcf2   : > { %v4860_v17 = vsel %vm1471_vm1, %v4739_v23, 0.0  ;;  %v4920_v37 = vadd.f32 %v4919_v46, %v4918_v31  ;;  %v4921_v58 = vsel %vm1471_vm1, %v4736_v62, 0.0  ;;  %v4981_v7 = vsel %vm1471_vm1, %v4729_v52, 0.0  ;;  %v8191_v52 = vld [vmem:[%s14086_s5 + $0x898] sm:$0xff] }
 0xcf3   : > { %v4861_v16 = vadd.f32 %v4860_v17, %v4859_v30  ;;  %v4982_v8 = vsel %vm1471_vm1, %v4733_v0, 0.0  ;;  %v4742_v27 = vmul.f32 %v8187_v59, %v4582_v40  ;;  %v4745_v51 = vmul.f32 %v8190_v18, %v11930_v11  ;;  %v8196_v40 = vld [vmem:[%s14086_s5 + $0x8c0] sm:$0xff]  ;;  %v8198_v17 = vld [vmem:[%s14086_s5 + $0x8d0] sm:$0xff] }
 0xcf4   : > { %v4922_v22 = vadd.f32 %v4921_v58, %v4920_v37  ;;  %v4983_v63 = vadd.f32 %v4982_v8, %v4981_v7  ;;  %v4747_v39 = vmul.f32 %v8192_v20, %v11933_v29  ;;  %v4748_v23 = vmul.f32 %v8193_v28, %v11933_v29 }
 0xcf5   : > { %v4923_v30 = vsel %vm1471_vm1, %v4740_v47, 0.0  ;;  %v4984_v62 = vsel %vm1471_vm1, %v4737_v2, 0.0  ;;  %v4862_v0 = vsel %vm1471_vm1, %v4743_v54, 0.0  ;;  %v4925_v18 = vsel %vm1471_vm1, %v4744_v3, 0.0  ;;  %v8197_v47 = vld [vmem:[%s14086_s5 + $0x8c8] sm:$0xff] }
 0xcf6   : > { %v4924_v59 = vadd.f32 %v4923_v30, %v4922_v22  ;;  %v4985_v31 = vadd.f32 %v4984_v62, %v4983_v63  ;;  %v4863_v46 = vadd.f32 %v4862_v0, %v4861_v16  ;;  %v4986_v2 = vsel %vm1471_vm1, %v4741_v34, 0.0 }
 0xcf7   : > { %v5044_v20 = vsel %vm1471_vm1, %v4730_v14, 0.0  ;;  %v5045_v28 = vsel %vm1471_vm1, %v4734_v42, 0.0  ;;  %v4749_v54 = vmul.f32 %v8194_v48, %v11933_v29  ;;  %v4746_v7 = vmul.f32 %v8191_v52, %v11930_v11  ;;  %v8195_v14 = vld [vmem:[%s14086_s5 + $0x8b8] sm:$0xff]  ;;  %v8200_v11 = vld [vmem:[%s14086_s5 + $0x8e0] sm:$0xff]  ;;  %v8201_v52 = vld [vmem:[%s14086_s5 + $0x8e8] sm:$0xff] }
 0xcf8   : > { %v4926_v37 = vadd.f32 %v4925_v18, %v4924_v59  ;;  %v4987_v3 = vadd.f32 %v4986_v2, %v4985_v31  ;;  %v5046_v58 = vadd.f32 %v5045_v28, %v5044_v20  ;;  %v4751_v8 = vmul.f32 %v8196_v40, %v11936_v10 }
 0xcf9   : > { %v4988_v16 = vsel %vm1471_vm1, %v4745_v51, 0.0  ;;  %v5047_v34 = vsel %vm1471_vm1, %v4738_v35, 0.0  ;;  %v4752_v42 = vmul.f32 %v8197_v47, %v11936_v10  ;;  %v4864_v22 = vsel %vm1471_vm1, %v4747_v39, 0.0 }
 0xcfa   : > { %v4989_v63 = vadd.f32 %v4988_v16, %v4987_v3  ;;  %v5048_v48 = vadd.f32 %v5047_v34, %v5046_v58  ;;  %v4753_v30 = vmul.f32 %v8198_v17, %v11936_v10  ;;  %v4865_v62 = vadd.f32 %v4864_v22, %v4863_v46 }
 0xcfb   : > { %v4927_v51 = vsel %vm1471_vm1, %v4748_v23, 0.0  ;;  %v5049_v35 = vsel %vm1471_vm1, %v4742_v27, 0.0  ;;  %v4990_v39 = vsel %vm1471_vm1, %v4749_v54, 0.0  ;;  %v14277_v59 = vcombine.high %v11873_v6, %v11873_v6  ;;  %v8202_v27 = vld [vmem:[%s14086_s5 + $0x8f0] sm:$0xff]  ;;  %v8199_v6 = vld [vmem:[%s14086_s5 + $0x8d8] sm:$0xff] }
 0xcfc   : > { %v4928_v40 = vadd.f32 %v4927_v51, %v4926_v37  ;;  %v5050_v0 = vadd.f32 %v5049_v35, %v5048_v48  ;;  %v12033_v31 = vsel %vm1471_vm1, %v11772_v15, 0.0  ;;  %v4750_v23 = vmul.f32 %v8195_v14, %v11933_v29 }
 0xcfd   : > { %v4403_v18 = vrot.slane %v14277_v59, %v14267_v43  ;;  %v4991_v47 = vadd.f32 %v4990_v39, %v4989_v63  ;;  %v5051_v46 = vsel %vm1471_vm1, %v4746_v7, 0.0  ;;  %v12042_v2 = vsel %vm1471_vm1, %v11785_v9, 0.0  ;;  %v8203_v63 = vld [vmem:[%s14086_s5 + $0x8f8] sm:$0xff] }
 0xcfe   : > { %v4755_v15 = vmul.f32 %v8200_v11, %v11948_v26  ;;  %v4866_v20 = vsel %vm1471_vm1, %v4751_v8, 0.0  ;;  %v5052_v28 = vadd.f32 %v5051_v46, %v5050_v0  ;;  %v4756_v17 = vmul.f32 %v8201_v52, %v11948_v26 }
 0xcff   : > { %v4867_v54 = vadd.f32 %v4866_v20, %v4865_v62  ;;  %v4929_v29 = vsel %vm1471_vm1, %v4752_v42, 0.0  ;;  %v4404_v37 = vcombine.high %v11918_v5, %v11918_v5  ;;  %v4757_v9 = vmul.f32 %v8202_v27, %v11948_v26 }
 0xd00   : > { %v4930_v3 = vadd.f32 %v4929_v29, %v4928_v40  ;;  %v4992_v58 = vsel %vm1471_vm1, %v4753_v30, 0.0  ;;  %v4405_v7 = vcombine.high %v4403_v18, %v4403_v18  ;;  %v12057_v16 = vsel %vm1471_vm1, %v11798_v49, 0.0 }
 0xd01   : > { %v4754_v8 = vmul.f32 %v8199_v6, %v11936_v10  ;;  %v4993_v34 = vadd.f32 %v4992_v58, %v4991_v47  ;;  %v5053_v14 = vsel %vm1471_vm1, %v4750_v23, 0.0  ;;  %v12063_v42 = vsel %vm1471_vm1, %v11808_v61, 0.0  ;;  %v4229_v23 = vpop.f32.mrf.mxu1 }
 0xd02   : > { %v12067_v22 = vsel %vm1471_vm1, %v11815_v38, 0.0  ;;  %v4868_v49 = vsel %vm1471_vm1, %v4755_v15, 0.0  ;;  %v5054_v48 = vadd.f32 %v5053_v14, %v5052_v28  ;;  %v4931_v10 = vsel %vm1471_vm1, %v4756_v17, 0.0  ;;  %v8275_v14 = vld [vmem:[%s14086_s5 + $0xb38] sm:$0xff] }
 0xd03   : > { %v4869_v11 = vadd.f32 %v4868_v49, %v4867_v54  ;;  %v4412_v30 = vrot.slane %v11918_v5, %v14267_v43  ;;  %v4426_v61 = vrot.slane %v4404_v37, %v14267_v43  ;;  %v4932_v62 = vadd.f32 %v4931_v10, %v4930_v3  ;;  %v8271_v37 = vld [vmem:[%s14086_s5 + $0xb18] sm:$0xff]  ;;  %v8273_v3 = vld [vmem:[%s14086_s5 + $0xb28] sm:$0xff] }
 0xd04   : > { %v4994_v51 = vsel %vm1471_vm1, %v4757_v9, 0.0  ;;  %v4419_v38 = vrot.slane %v4403_v18, %v14267_v43  ;;  %v4433_v35 = vrot.slane %v4405_v7, %v14267_v43  ;;  %v5059_v52 = vsel %vm1471_vm1, %v11747_v4, 0.0  ;;  %v8272_v9 = vld [vmem:[%s14086_s5 + $0xb20] sm:$0xff]  ;;  %v8277_v10 = vld [vmem:[%s14086_s5 + $0xb48] sm:$0xff] }
 0xd05   : > { %v4758_v40 = vmul.f32 %v8203_v63, %v11948_v26  ;;  %v4995_v39 = vadd.f32 %v4994_v51, %v4993_v34  ;;  %v5055_v0 = vsel %vm1471_vm1, %v4754_v8, 0.0  ;;  %v12086_v5 = vsel %vm1471_vm1, %v11761_v55, 0.0  ;;  %v8274_v34 = vld [vmem:[%s14086_s5 + $0xb30] sm:$0xff]  ;;  %v8276_v63 = vld [vmem:[%s14086_s5 + $0xb40] sm:$0xff] }
 0xd06   : > { %v12090_v59 = vsel %vm1471_vm1, %v11774_v12, 0.0  ;;  %v12094_v18 = vsel %vm1471_vm1, %v11787_v36, 0.0  ;;  %v5056_v27 = vadd.f32 %v5055_v0, %v5054_v48  ;;  %v12098_v26 = vsel %vm1471_vm1, %v11800_v45, 0.0 }
 0xd07   : > { %v4871_v4 = vadd.f32 %v11832_v60, %v4869_v11  ;;  %v4434_v47 = vcombine.high %v4412_v30, %v4412_v30  ;;  %v4436_v46 = vcombine.high %v4426_v61, %v4426_v61  ;;  %v12103_v55 = vsel %vm1471_vm1, %v11812_v1, 0.0  ;;  %v8268_v1 = vld [vmem:[%s14086_s5 + $0xb00] sm:$0xff] }
 0xd08   : > { %v4934_v12 = vadd.f32 %v11858_v44, %v4932_v62  ;;  %v4435_v6 = vcombine.high %v4419_v38, %v4419_v38  ;;  %v4437_v15 = vcombine.high %v4433_v35, %v4433_v35  ;;  %v4997_v36 = vadd.f32 %v11902_v33, %v4995_v39  ;;  %v8269_v44 = vld [vmem:[%s14086_s5 + $0xb08] sm:$0xff]  ;;  %v8270_v33 = vld [vmem:[%s14086_s5 + $0xb10] sm:$0xff] }
 0xd09   : > { %v5057_v20 = vsel %vm1471_vm1, %v4758_v40, 0.0  ;;  %v4666_v28 = vrot.slane %v4412_v30, %v14268_v19  ;;  %v4340_v45 = vcombine.high %v4229_v23, %v4229_v23  ;;  %v12111_v60 = vsel %vm1471_vm1, %v11817_v53, 0.0  ;;  %v8278_v30 = vld [vmem:[%s14086_s5 + $0xb50] sm:$0xff]  ;;  %v8281_v40 = vld [vmem:[%s14086_s5 + $0xb68] sm:$0xff] }
 0xd0a   : > { %v5058_v17 = vadd.f32 %v5057_v20, %v5056_v27  ;;  %v4670_v54 = vrot.slane %v4426_v61, %v14268_v19  ;;  %v4347_v29 = vrot.slane %v4229_v23, %v14267_v43  ;;  %v4873_v53 = vadd.f32 %v11835_v32, %v4871_v4  ;;  %v8279_v61 = vld [vmem:[%s14086_s5 + $0xb58] sm:$0xff]  ;;  %v8282_v39 = vld [vmem:[%s14086_s5 + $0xb70] sm:$0xff]  ;;  %v8284_v4 = vld [vmem:[%s14086_s5 + $0xb80] sm:$0xff] }
 0xd0b   : > { %v4674_v58 = vrot.slane %v4434_v47, %v14268_v19  ;;  %v4678_v7 = vrot.slane %v4436_v46, %v14268_v19  ;;  %v12137_v8 = vrot.slane %v4419_v38, %v14268_v19  ;;  %v4936_v32 = vadd.f32 %v11867_v57, %v4934_v12 }
 0xd0c   : > { %v12150_v49 = vrot.slane %v4433_v35, %v14268_v19  ;;  %v12153_v48 = vrot.slane %v4435_v6, %v14268_v19  ;;  %v12156_v57 = vrot.slane %v4437_v15, %v14268_v19  ;;  %v12159_v11 = vadd.f32 %v11906_v25, %v4997_v36  ;;  %v8280_v25 = vld [vmem:[%s14086_s5 + $0xb60] sm:$0xff]  ;;  %v8285_v15 = vld [vmem:[%s14086_s5 + $0xb88] sm:$0xff]  ;;  %v8286_v36 = vld [vmem:[%s14086_s5 + $0xb90] sm:$0xff] }
 0xd0d   : > { %14278 = vst [vmem:[#allocation25_spill] sm:$0xff] %v12137_v8  ;;  %v4823_v62 = vmul.f32 %v8268_v1, %v4666_v28  ;;  %v4824_v51 = vmul.f32 %v8269_v44, %v4666_v28  ;;  %v4354_v38 = vrot.slane %v4340_v45, %v14267_v43  ;;  %v5060_v35 = vadd.f32 %v5059_v52, %v5058_v17  ;;  %v8283_v52 = vld [vmem:[%s14086_s5 + $0xb78] sm:$0xff]  ;;  %v8289_v1 = vld [vmem:[%s14086_s5 + $0xba8] sm:$0xff] }
 0xd0e   : > { %v4825_v0 = vmul.f32 %v8270_v33, %v4666_v28  ;;  %v12180_v27 = vmul.f32 %v8271_v37, %v4666_v28  ;;  %v4827_v23 = vmul.f32 %v8272_v9, %v4670_v54  ;;  %v4828_v47 = vmul.f32 %v8273_v3, %v4670_v54 }
 0xd0f   : > { %v4829_v46 = vmul.f32 %v8274_v34, %v4670_v54  ;;  %v12188_v12 = vmul.f32 %v8275_v14, %v4670_v54  ;;  %v4355_v6 = vcombine.high %v4347_v29, %v4347_v29  ;;  %v4831_v20 = vmul.f32 %v8276_v63, %v4674_v58 }
 0xd10   : > { %14279 = vst [vmem:[#allocation28_spill] sm:$0xff] %v12180_v27  ;;  %v4832_v28 = vmul.f32 %v8277_v10, %v4674_v58  ;;  %v12196_v45 = vmul.f32 %v8278_v30, %v4674_v58  ;;  %v12198_v17 = vmul.f32 %v8279_v61, %v4674_v58  ;;  %v12203_v44 = vmul.f32 %v8280_v25, %v4678_v7  ;;  %v14294_v27 = vld [vmem:[#allocation23_spill] sm:$0xff] }
 0xd11   : > { %14280 = vst [vmem:[#allocation19_spill] sm:$0xff] %v12188_v12  ;;  %v4836_v33 = vmul.f32 %v8281_v40, %v4678_v7  ;;  %v12205_v54 = vmul.f32 %v8282_v39, %v4678_v7  ;;  %v4356_v37 = vcombine.high %v4354_v38, %v4354_v38  ;;  %v12208_v9 = vadd.f32 %v12086_v5, %v5060_v35 }
 0xd12   : > { %14281 = vst [vmem:[#allocation20_spill] sm:$0xff] %v12196_v45  ;;  %14282 = vst [vmem:[#allocation29_spill] sm:$0xff] %v12198_v17  ;;  %v12210_v3 = vmul.f32 %v8283_v52, %v4678_v7  ;;  %v12213_v34 = vmul.f32 %v8284_v4, %v12137_v8  ;;  %v4363_v58 = vrot.slane %v4347_v29, %v14267_v43  ;;  %v12226_v5 = vsel %vm1471_vm1, %v4823_v62, 0.0  ;;  %v8248_v17 = vld [vmem:[%s14086_s5 + $0xa60] sm:$0xff] }
 0xd13   : > { %14283 = vst [vmem:[#allocation33_spill] sm:$0xff] %v12205_v54  ;;  %v4840_v14 = vmul.f32 %v8285_v15, %v12137_v8  ;;  %v12218_v63 = vmul.f32 %v8286_v36, %v12137_v8  ;;  %v4377_v10 = vrot.slane %v4355_v6, %v14267_v43  ;;  %v4875_v30 = vadd.f32 %v11838_v24, %v4873_v53  ;;  %v8237_v15 = vld [vmem:[%s14086_s5 + $0xa08] sm:$0xff]  ;;  %v8250_v8 = vld [vmem:[%s14086_s5 + $0xa70] sm:$0xff]  ;;  %v8260_v45 = vld [vmem:[%s14086_s5 + $0xac0] sm:$0xff] }
 0xd14   : > { %14284 = vst [vmem:[#allocation18_spill] sm:$0xff] %v12210_v3  ;;  %v12223_v61 = vmul.f32 %v8289_v1, %v12150_v49  ;;  %v12229_v7 = vsel %vm1471_vm1, %v4827_v23, 0.0  ;;  %v4370_v29 = vrot.slane %v4354_v38, %v14267_v43  ;;  %v12233_v35 = vsel %vm1471_vm1, %v4831_v20, 0.0  ;;  %v8247_v3 = vld [vmem:[%s14086_s5 + $0xa58] sm:$0xff]  ;;  %v8253_v54 = vld [vmem:[%s14086_s5 + $0xa88] sm:$0xff] }
 0xd15   : > { %14285 = vst [vmem:[#allocation35_spill] sm:$0xff] %v12218_v63  ;;  %v12236_v25 = vsel %vm1471_vm1, %v4824_v51, 0.0  ;;  %v4384_v40 = vrot.slane %v4356_v37, %v14267_v43  ;;  %v4938_v24 = vadd.f32 %v11870_v50, %v4936_v32  ;;  %v12241_v53 = vsel %vm1471_vm1, %v4828_v47, 0.0  ;;  %v8236_v50 = vld [vmem:[%s14086_s5 + $0xa00] sm:$0xff]  ;;  %v8241_v37 = vld [vmem:[%s14086_s5 + $0xa28] sm:$0xff]  ;;  %v14291_v43 = vld [vmem:[#allocation11_spill] sm:$0xff] }
 0xd16   : > { %14286 = vst [vmem:[#allocation42_spill] sm:$0xff] %v12223_v61  ;;  %v12244_v62 = vsel %vm1471_vm1, %v4832_v28, 0.0  ;;  %v4385_v39 = vcombine.high %v4363_v58, %v4363_v58  ;;  %v4634_v23 = vrot.slane %v4363_v58, %v14268_v19  ;;  %v12248_v38 = vsel %vm1471_vm1, %v4836_v33, 0.0  ;;  %v8238_v28 = vld [vmem:[%s14086_s5 + $0xa10] sm:$0xff]  ;;  %v8251_v63 = vld [vmem:[%s14086_s5 + $0xa78] sm:$0xff] }
 0xd17   : > { %14287 = vst [vmem:[#allocation41_spill] sm:$0xff] %v12248_v38  ;;  %v12251_v52 = vsel %vm1471_vm1, %v4840_v14, 0.0  ;;  %v4387_v51 = vcombine.high %v4377_v10, %v4377_v10  ;;  %v4877_v32 = vadd.f32 %v11842_v56, %v4875_v30  ;;  %v12258_v4 = vsel %vm1471_vm1, %v4825_v0, 0.0  ;;  %v8239_v56 = vld [vmem:[%s14086_s5 + $0xa18] sm:$0xff]  ;;  %v8240_v0 = vld [vmem:[%s14086_s5 + $0xa20] sm:$0xff]  ;;  %v8242_v58 = vld [vmem:[%s14086_s5 + $0xa30] sm:$0xff] }
 0xd18   : > { %14288 = vst [vmem:[#allocation40_spill] sm:$0xff] %v12251_v52  ;;  %14289 = vst [vmem:[#allocation39_spill] sm:$0xff] %v12258_v4  ;;  %v12261_v47 = vsel %vm1471_vm1, %v4829_v46, 0.0  ;;  %v4386_v6 = vcombine.high %v4370_v29, %v4370_v29  ;;  %v4638_v36 = vrot.slane %v4377_v10, %v14268_v19  ;;  %v4388_v20 = vcombine.high %v4384_v40, %v4384_v40  ;;  %v14293_v38 = vld [vmem:[#allocation21_spill] sm:$0xff] }
 0xd19   : > { %14290 = vst [vmem:[#allocation37_spill] sm:$0xff] %v12261_v47  ;;  %v4884_v46 = vsel %vm1471_vm1, %v11819_v41, 0.0  ;;  %v4940_v1 = vadd.f32 %v11876_v21, %v4938_v24  ;;  %v12281_v33 = vsel %vm1471_vm1, %v11821_v13, 0.0  ;;  %v4642_v14 = vrot.slane %v4385_v39, %v14268_v19  ;;  %v8243_v13 = vld [vmem:[%s14086_s5 + $0xa38] sm:$0xff]  ;;  %v8244_v21 = vld [vmem:[%s14086_s5 + $0xa40] sm:$0xff]  ;;  %v8245_v24 = vld [vmem:[%s14086_s5 + $0xa48] sm:$0xff] }
 0xd1a   : > { %v4650_v10 = vrot.slane %v4370_v29, %v14268_v19  ;;  %v4791_v30 = vmul.f32 %v8236_v50, %v4634_v23  ;;  %v5001_v41 = vadd.f32 %v12033_v31, %v12159_v11  ;;  %v4646_v39 = vrot.slane %v4387_v51, %v14268_v19  ;;  %v8246_v11 = vld [vmem:[%s14086_s5 + $0xa50] sm:$0xff] }
 0xd1b   : > { %v12304_v29 = vrot.slane %v4384_v40, %v14268_v19  ;;  %v4792_v50 = vmul.f32 %v8237_v15, %v4634_v23  ;;  %v4879_v31 = vadd.f32 %v14291_v43, %v4877_v32  ;;  %v12317_v51 = vrot.slane %v4386_v6, %v14268_v19  ;;  %v8249_v32 = vld [vmem:[%s14086_s5 + $0xa68] sm:$0xff] }
 0xd1c   : > { %v12319_v40 = vmul.f32 %v8238_v28, %v4634_v23  ;;  %v12321_v15 = vmul.f32 %v8239_v56, %v4634_v23  ;;  %v4795_v43 = vmul.f32 %v8240_v0, %v4638_v36  ;;  %v12333_v6 = vrot.slane %v4388_v20, %v14268_v19  ;;  %v14292_v23 = vld [vmem:[#allocation10_spill] sm:$0xff]  ;;  %v8252_v0 = vld [vmem:[%s14086_s5 + $0xa80] sm:$0xff] }
 0xd1d   : > { %v4796_v28 = vmul.f32 %v8241_v37, %v4638_v36  ;;  %v12335_v12 = vmul.f32 %v8242_v58, %v4638_v36  ;;  %v4881_v56 = vadd.f32 %v14292_v23, %v4879_v31  ;;  %v12344_v61 = vmul.f32 %v8243_v13, %v4638_v36  ;;  %v8254_v37 = vld [vmem:[%s14086_s5 + $0xa90] sm:$0xff]  ;;  %v8255_v58 = vld [vmem:[%s14086_s5 + $0xa98] sm:$0xff]  ;;  %v8256_v13 = vld [vmem:[%s14086_s5 + $0xaa0] sm:$0xff] }
 0xd1e   : > { %v4799_v52 = vmul.f32 %v8244_v21, %v4642_v14  ;;  %v4800_v47 = vmul.f32 %v8245_v24, %v4642_v14  ;;  %v4942_v20 = vadd.f32 %v14293_v38, %v4940_v1  ;;  %v12353_v31 = vmul.f32 %v8246_v11, %v4642_v14  ;;  %v8257_v38 = vld [vmem:[%s14086_s5 + $0xaa8] sm:$0xff]  ;;  %v14295_v11 = vld [vmem:[#allocation27_spill] sm:$0xff] }
 0xd1f   : > { %v12355_v23 = vmul.f32 %v8247_v3, %v4642_v14  ;;  %v4803_v19 = vmul.f32 %v8248_v17, %v4646_v39  ;;  %v4883_v36 = vadd.f32 %v14294_v27, %v4881_v56  ;;  %v4804_v1 = vmul.f32 %v8249_v32, %v4646_v39  ;;  %v8258_v17 = vld [vmem:[%s14086_s5 + $0xab0] sm:$0xff] }
 0xd20   : > { %v12364_v21 = vmul.f32 %v8250_v8, %v4646_v39  ;;  %v12366_v24 = vmul.f32 %v8251_v63, %v4646_v39  ;;  %v4944_v4 = vadd.f32 %v14295_v11, %v4942_v20  ;;  %v4807_v27 = vmul.f32 %v8252_v0, %v4650_v10  ;;  %v14296_v39 = vld [vmem:[#allocation24_spill] sm:$0xff]  ;;  %v8261_v0 = vld [vmem:[%s14086_s5 + $0xac8] sm:$0xff] }
 0xd21   : > { %v4808_v3 = vmul.f32 %v8253_v54, %v4650_v10  ;;  %v4885_v14 = vadd.f32 %v4884_v46, %v4883_v36  ;;  %v5003_v56 = vadd.f32 %v12042_v2, %v5001_v41  ;;  %v12376_v32 = vmul.f32 %v8254_v37, %v4650_v10  ;;  %v8264_v11 = vld [vmem:[%s14086_s5 + $0xae0] sm:$0xff] }
 0xd22   : > { %v12378_v8 = vmul.f32 %v8255_v58, %v4650_v10  ;;  %v4886_v63 = vsel %vm1471_vm1, %v4791_v30, 0.0  ;;  %v4946_v20 = vadd.f32 %v14296_v39, %v4944_v4  ;;  %v4811_v54 = vmul.f32 %v8256_v13, %v12304_v29  ;;  %v8262_v10 = vld [vmem:[%s14086_s5 + $0xad0] sm:$0xff]  ;;  %v14297_v39 = vld [vmem:[#allocation13_spill] sm:$0xff] }
 0xd23   : > { %v4812_v2 = vmul.f32 %v8257_v38, %v12304_v29  ;;  %v4887_v46 = vadd.f32 %v4886_v63, %v4885_v14  ;;  %v5005_v41 = vadd.f32 %v12057_v16, %v5003_v56  ;;  %v12392_v37 = vmul.f32 %v8258_v17, %v12304_v29 }
 0xd24   : > { %v4888_v4 = vsel %vm1471_vm1, %v4795_v43, 0.0  ;;  %v4948_v30 = vadd.f32 %v12281_v33, %v4946_v20  ;;  %v5064_v58 = vadd.f32 %v12090_v59, %v12208_v9  ;;  %v4815_v36 = vmul.f32 %v8260_v45, %v12317_v51 }
 0xd25   : > { %v4889_v13 = vadd.f32 %v4888_v4, %v4887_v46  ;;  %v4949_v38 = vsel %vm1471_vm1, %v4792_v50, 0.0  ;;  %v5007_v16 = vadd.f32 %v12063_v42, %v5005_v41  ;;  %v4816_v17 = vmul.f32 %v8261_v0, %v12317_v51  ;;  %v8265_v42 = vld [vmem:[%s14086_s5 + $0xae8] sm:$0xff] }
 0xd26   : > { %v4890_v43 = vsel %vm1471_vm1, %v4799_v52, 0.0  ;;  %v4950_v14 = vadd.f32 %v4949_v38, %v4948_v30  ;;  %v5066_v33 = vadd.f32 %v12094_v18, %v5064_v58  ;;  %v12408_v59 = vmul.f32 %v8262_v10, %v12317_v51 }
 0xd27   : > { %v4891_v45 = vadd.f32 %v4890_v43, %v4889_v13  ;;  %v4951_v9 = vsel %vm1471_vm1, %v4796_v28, 0.0  ;;  %v5009_v50 = vadd.f32 %v12067_v22, %v5007_v16  ;;  %v4892_v56 = vsel %vm1471_vm1, %v4803_v19, 0.0  ;;  %v14298_v43 = vld [vmem:[#allocation12_spill] sm:$0xff] }
 0xd28   : > { %v4952_v63 = vadd.f32 %v4951_v9, %v4950_v14  ;;  %v5010_v52 = vsel %vm1471_vm1, %v14297_v39, 0.0  ;;  %v5068_v18 = vadd.f32 %v12098_v26, %v5066_v33  ;;  %v4819_v20 = vmul.f32 %v8264_v11, %v12333_v6 }
 0xd29   : > { %v4893_v0 = vadd.f32 %v4892_v56, %v4891_v45  ;;  %v4953_v46 = vsel %vm1471_vm1, %v4800_v47, 0.0  ;;  %v5011_v28 = vadd.f32 %v5010_v52, %v5009_v50  ;;  %v4894_v22 = vsel %vm1471_vm1, %v4807_v27, 0.0 }
 0xd2a   : > { %v4954_v41 = vadd.f32 %v4953_v46, %v4952_v63  ;;  %v5012_v10 = vsel %vm1471_vm1, %v12319_v40, 0.0  ;;  %v5070_v19 = vadd.f32 %v12103_v55, %v5068_v18  ;;  %v4820_v4 = vmul.f32 %v8265_v42, %v12333_v6  ;;  %v8267_v46 = vld [vmem:[%s14086_s5 + $0xaf8] sm:$0xff] }
 0xd2b   : > { %v4895_v30 = vadd.f32 %v4894_v22, %v4893_v0  ;;  %v4955_v58 = vsel %vm1471_vm1, %v4804_v1, 0.0  ;;  %v5013_v26 = vadd.f32 %v5012_v10, %v5011_v28  ;;  %v4896_v13 = vsel %vm1471_vm1, %v4811_v54, 0.0 }
 0xd2c   : > { %v4956_v38 = vadd.f32 %v4955_v58, %v4954_v41  ;;  %v5014_v47 = vsel %vm1471_vm1, %v12335_v12, 0.0  ;;  %v5072_v27 = vadd.f32 %v12111_v60, %v5070_v19  ;;  %v4957_v11 = vsel %vm1471_vm1, %v4808_v3, 0.0  ;;  %v8266_v12 = vld [vmem:[%s14086_s5 + $0xaf0] sm:$0xff] }
 0xd2d   : > { %v4897_v16 = vadd.f32 %v4896_v13, %v4895_v30  ;;  %v5015_v40 = vadd.f32 %v5014_v47, %v5013_v26  ;;  %v5073_v55 = vsel %vm1471_vm1, %v14298_v43, 0.0  ;;  %v4898_v14 = vsel %vm1471_vm1, %v4815_v36, 0.0 }
 0xd2e   : > { %v4958_v33 = vadd.f32 %v4957_v11, %v4956_v38  ;;  %v5016_v1 = vsel %vm1471_vm1, %v12353_v31, 0.0  ;;  %v5074_v54 = vadd.f32 %v5073_v55, %v5072_v27  ;;  %v4959_v60 = vsel %vm1471_vm1, %v4812_v2, 0.0  ;;  %v8259_v31 = vld [vmem:[%s14086_s5 + $0xab8] sm:$0xff] }
 0xd2f   : > { %v4899_v45 = vadd.f32 %v4898_v14, %v4897_v16  ;;  %v5017_v9 = vadd.f32 %v5016_v1, %v5015_v40  ;;  %v5075_v3 = vsel %vm1471_vm1, %v12321_v15, 0.0  ;;  %v4900_v50 = vsel %vm1471_vm1, %v4819_v20, 0.0  ;;  %v8263_v15 = vld [vmem:[%s14086_s5 + $0xad8] sm:$0xff]  ;;  %v14299_v1 = vld [vmem:[#allocation20_spill] sm:$0xff] }
 0xd30   : > { %v4960_v42 = vadd.f32 %v4959_v60, %v4958_v33  ;;  %v5018_v36 = vsel %vm1471_vm1, %v12364_v21, 0.0  ;;  %v5076_v56 = vadd.f32 %v5075_v3, %v5074_v54  ;;  %v4961_v39 = vsel %vm1471_vm1, %v4816_v17, 0.0  ;;  %v8293_v33 = vld [vmem:[%s14086_s5 + $0xbc8] sm:$0xff] }
 0xd31   : > { %v4901_v63 = vadd.f32 %v4900_v50, %v4899_v45  ;;  %v5019_v52 = vadd.f32 %v5018_v36, %v5017_v9  ;;  %v5077_v2 = vsel %vm1471_vm1, %v12344_v61, 0.0  ;;  %v4821_v18 = vmul.f32 %v8266_v12, %v12333_v6  ;;  %v14300_v45 = vld [vmem:[#allocation39_spill] sm:$0xff]  ;;  %v14301_v9 = vld [vmem:[#allocation28_spill] sm:$0xff]  ;;  %v14302_v36 = vld [vmem:[#allocation41_spill] sm:$0xff] }
 0xd32   : > { %v4962_v20 = vadd.f32 %v4961_v39, %v4960_v42  ;;  %v5020_v21 = vsel %vm1471_vm1, %v12376_v32, 0.0  ;;  %v5078_v0 = vadd.f32 %v5077_v2, %v5076_v56  ;;  %v4963_v17 = vsel %vm1471_vm1, %v4820_v4, 0.0  ;;  %v8288_v4 = vld [vmem:[%s14086_s5 + $0xba0] sm:$0xff]  ;;  %v8297_v42 = vld [vmem:[%s14086_s5 + $0xbe8] sm:$0xff]  ;;  %v8290_v39 = vld [vmem:[%s14086_s5 + $0xbb0] sm:$0xff] }
 0xd33   : > { %v5021_v28 = vadd.f32 %v5020_v21, %v5019_v52  ;;  %v5079_v61 = vsel %vm1471_vm1, %v12355_v23, 0.0  ;;  %v4903_v22 = vadd.f32 %v12226_v5, %v4901_v63  ;;  %v4814_v41 = vmul.f32 %v8259_v31, %v12304_v29  ;;  %v14303_v52 = vld [vmem:[#allocation37_spill] sm:$0xff]  ;;  %v14304_v21 = vld [vmem:[#allocation40_spill] sm:$0xff] }
 0xd34   : > { %v4964_v10 = vadd.f32 %v4963_v17, %v4962_v20  ;;  %v5022_v19 = vsel %vm1471_vm1, %v12392_v37, 0.0  ;;  %v5080_v32 = vadd.f32 %v5079_v61, %v5078_v0  ;;  %v4818_v30 = vmul.f32 %v8263_v15, %v12317_v51  ;;  %v8292_v51 = vld [vmem:[%s14086_s5 + $0xbc0] sm:$0xff] }
 0xd35   : > { %v5023_v58 = vadd.f32 %v5022_v19, %v5021_v28  ;;  %v5081_v26 = vsel %vm1471_vm1, %v12366_v24, 0.0  ;;  %v4905_v23 = vadd.f32 %v12229_v7, %v4903_v22  ;;  %v4822_v5 = vmul.f32 %v8267_v46, %v12333_v6  ;;  %v8296_v7 = vld [vmem:[%s14086_s5 + $0xbe0] sm:$0xff]  ;;  %v14305_v28 = vld [vmem:[#allocation42_spill] sm:$0xff] }
 0xd36   : > { %v4966_v29 = vadd.f32 %v12236_v25, %v4964_v10  ;;  %v5024_v37 = vsel %vm1471_vm1, %v12408_v59, 0.0  ;;  %v5082_v13 = vadd.f32 %v5081_v26, %v5080_v32  ;;  %v5026_v24 = vsel %vm1471_vm1, %v4821_v18, 0.0  ;;  %v8294_v22 = vld [vmem:[%s14086_s5 + $0xbd0] sm:$0xff]  ;;  %v8287_v10 = vld [vmem:[%s14086_s5 + $0xb98] sm:$0xff] }
 0xd37   : > { %v5025_v38 = vadd.f32 %v5024_v37, %v5023_v58  ;;  %v5083_v47 = vsel %vm1471_vm1, %v12378_v8, 0.0  ;;  %v4907_v25 = vadd.f32 %v12233_v35, %v4905_v23  ;;  %v4843_v59 = vmul.f32 %v8288_v4, %v12150_v49  ;;  %v14307_v4 = vld [vmem:[#allocation19_spill] sm:$0xff]  ;;  %v8298_v37 = vld [vmem:[%s14086_s5 + $0xbf0] sm:$0xff] }
 0xd38   : > { %v5084_v6 = vadd.f32 %v5083_v47, %v5082_v13  ;;  %v4908_v27 = vsel %vm1471_vm1, %v12203_v44, 0.0  ;;  %v4968_v16 = vadd.f32 %v12241_v53, %v4966_v29  ;;  %v5085_v40 = vsel %vm1471_vm1, %v4814_v41, 0.0 }
 0xd39   : > { %v5027_v11 = vadd.f32 %v5026_v24, %v5025_v38  ;;  %v4847_v43 = vmul.f32 %v8292_v51, %v12153_v48  ;;  %v4909_v8 = vadd.f32 %v4908_v27, %v4907_v25  ;;  %v4851_v14 = vmul.f32 %v8296_v7, %v12156_v57  ;;  %v14308_v24 = vld [vmem:[#allocation35_spill] sm:$0xff]  ;;  %v14310_v27 = vld [vmem:[#allocation29_spill] sm:$0xff] }
 0xd3a   : > { %v5086_v55 = vadd.f32 %v5085_v40, %v5084_v6  ;;  %v4910_v35 = vsel %vm1471_vm1, %v12213_v34, 0.0  ;;  %v4970_v44 = vadd.f32 %v12244_v62, %v4968_v16  ;;  %v5032_v53 = vsel %vm1471_vm1, %v14299_v1, 0.0  ;;  %v8291_v7 = vld [vmem:[%s14086_s5 + $0xbb8] sm:$0xff]  ;;  %v14309_v6 = vld [vmem:[#allocation25_spill] sm:$0xff]  ;;  %v14311_v1 = vld [vmem:[#allocation18_spill] sm:$0xff] }
 0xd3b   : > { %v5087_v54 = vsel %vm1471_vm1, %v4818_v30, 0.0  ;;  %v4911_v12 = vadd.f32 %v4910_v35, %v4909_v8  ;;  %v5029_v60 = vadd.f32 %v14300_v45, %v5027_v11  ;;  %v5091_v3 = vsel %vm1471_vm1, %v14301_v9, 0.0  ;;  %v14306_v30 = vld [vmem:[#allocation33_spill] sm:$0xff] }
 0xd3c   : > { %v5088_v50 = vadd.f32 %v5087_v54, %v5086_v55  ;;  %v4912_v34 = vsel %vm1471_vm1, %v4843_v59, 0.0  ;;  %v4972_v62 = vadd.f32 %v14302_v36, %v4970_v44  ;;  %v5089_v56 = vsel %vm1471_vm1, %v4822_v5, 0.0 }
 0xd3d   : > { %v4913_v31 = vadd.f32 %v4912_v34, %v4911_v12  ;;  %v4848_v63 = vmul.f32 %v8293_v33, %v12153_v48  ;;  %v5031_v2 = vadd.f32 %v14303_v52, %v5029_v60  ;;  %v4914_v18 = vsel %vm1471_vm1, %v4847_v43, 0.0  ;;  %v8299_v12 = vld [vmem:[%s14086_s5 + $0xbf8] sm:$0xff] }
 0xd3e   : > { %v5090_v15 = vadd.f32 %v5089_v56, %v5088_v50  ;;  %v4916_v20 = vsel %vm1471_vm1, %v4851_v14, 0.0  ;;  %v4974_v0 = vadd.f32 %v14304_v21, %v4972_v62  ;;  %v4852_v17 = vmul.f32 %v8297_v42, %v12156_v57  ;;  %v8295_v14 = vld [vmem:[%s14086_s5 + $0xbd8] sm:$0xff] }
 0xd3f   : > { %v4915_v46 = vadd.f32 %v4914_v18, %v4913_v31  ;;  %v4975_v61 = vsel %vm1471_vm1, %v14305_v28, 0.0  ;;  %v5033_v41 = vadd.f32 %v5032_v53, %v5031_v2  ;;  %v4845_v32 = vmul.f32 %v8290_v39, %v12150_v49 }
 0xd40   : > { %v4976_v19 = vadd.f32 %v4975_v61, %v4974_v0  ;;  %v5034_v58 = vsel %vm1471_vm1, %v14306_v30, 0.0  ;;  %v5092_v26 = vadd.f32 %v5091_v3, %v5090_v15  ;;  %v5093_v23 = vsel %vm1471_vm1, %v14307_v4, 0.0  ;;  %v8308_v30 = vld [vmem:[%s14088_s7 + $0x40] sm:$0xff]  ;;  %v8321_v4 = vld [vmem:[%s14090_s9 + $0x48] sm:$0xff] }
 0xd41   : > { %v4917_v5 = vadd.f32 %v4916_v20, %v4915_v46  ;;  %v4977_v29 = vsel %vm1471_vm1, %v4848_v63, 0.0  ;;  %v5035_v13 = vadd.f32 %v5034_v58, %v5033_v41  ;;  %v4849_v38 = vmul.f32 %v8294_v22, %v12153_v48  ;;  %v8320_v58 = vld [vmem:[%s14090_s9 + $0x40] sm:$0xff] }
 0xd42   : > { %v4978_v51 = vadd.f32 %v4977_v29, %v4976_v19  ;;  %v5036_v47 = vsel %vm1471_vm1, %v14308_v24, 0.0  ;;  %v5094_v25 = vadd.f32 %v5093_v23, %v5092_v26  ;;  %v4842_v59 = vmul.f32 %v8287_v10, %v14309_v6  ;;  %v8310_v19 = vld [vmem:[%s14088_s7 + $0x50] sm:$0xff]  ;;  %v8309_v26 = vld [vmem:[%s14088_s7 + $0x48] sm:$0xff]  ;;  %v8332_v23 = vld [vmem:[%s14092_s11 + $0x40] sm:$0xff] }
 0xd43   : > { %v5095_v16 = vsel %vm1471_vm1, %v14310_v27, 0.0  ;;  %8724 = vmatprep.mubr.msk.f32.mxu0 %vm1471_vm1, %v4917_v5  ;;  %v4979_v11 = vsel %vm1471_vm1, %v4852_v17, 0.0  ;;  %v5037_v40 = vadd.f32 %v5036_v47, %v5035_v13  ;;  %v4853_v8 = vmul.f32 %v8298_v37, %v12156_v57  ;;  %v8322_v5 = vld [vmem:[%s14090_s9 + $0x50] sm:$0xff]  ;;  %v8333_v29 = vld [vmem:[%s14092_s11 + $0x48] sm:$0xff]  ;;  %v8323_v37 = vld [vmem:[%s14090_s9 + $0x58] sm:$0xff] }
 0xd44   : > { %v4980_v43 = vadd.f32 %v4979_v11, %v4978_v51  ;;  %v5038_v55 = vsel %vm1471_vm1, %v4845_v32, 0.0  ;;  %v5096_v35 = vadd.f32 %v5095_v16, %v5094_v25  ;;  %v4846_v44 = vmul.f32 %v8291_v7, %v12150_v49  ;;  %v8311_v32 = vld [vmem:[%s14088_s7 + $0x58] sm:$0xff]  ;;  %v8334_v13 = vld [vmem:[%s14092_s11 + $0x50] sm:$0xff] }
 0xd45   : > { %v5039_v33 = vadd.f32 %v5038_v55, %v5037_v40  ;;  %v5097_v53 = vsel %vm1471_vm1, %v14311_v1, 0.0  ;;  %v5040_v54 = vsel %vm1471_vm1, %v4849_v38, 0.0  ;;  %v4850_v9 = vmul.f32 %v8295_v14, %v12153_v48  ;;  %v8335_v51 = vld [vmem:[%s14092_s11 + $0x58] sm:$0xff]  ;;  %v8877_v38 = vld [vmem:[%s14087_s6 + $0x20] sm:$0xff]  }
 0xd46   : > { %8725 = vmatmul.mubr.msk.f32.vlgmr.msra.gmra.mxu0 %vm1471_vm1, %v4980_v43  ;;  %v5098_v45 = vadd.f32 %v5097_v53, %v5096_v35  ;;  %v5099_v3 = vsel %vm1471_vm1, %v4842_v59, 0.0  ;;  %v5042_v50 = vsel %vm1471_vm1, %v4853_v8, 0.0  ;;  %v4854_v42 = vmul.f32 %v8299_v12, %v12156_v57  ;;  %8734 = vmatprep.mubr.msk.bf16.mxu1 %vm1925_vm2, %v8877_v38 }
 0xd47   : > { %v5041_v60 = vadd.f32 %v5040_v54, %v5039_v33  ;;  %v5101_v36 = vsel %vm1471_vm1, %v4846_v44, 0.0  ;;  %v5103_v56 = vsel %vm1471_vm1, %v4850_v9, 0.0 }
 0xd48   : > { %v5100_v49 = vadd.f32 %v5099_v3, %v5098_v45  ;;  %v5105_v63 = vsel %vm1471_vm1, %v4854_v42, 0.0 }
 0xd49   : > { %v5043_v34 = vadd.f32 %v5042_v50, %v5041_v60 }
 0xd4a   : > { %v5102_v62 = vadd.f32 %v5101_v36, %v5100_v49 }
 0xd4b   : > { %8727 = vmatprep.mubr.msk.f32.mxu0 %vm1471_vm1, %v5043_v34 }
 0xd4c   : > { %v5104_v31 = vadd.f32 %v5103_v56, %v5102_v62 }
 0xd4e   : > { %v5106_v39 = vadd.f32 %v5105_v63, %v5104_v31 }
 0xd50   : > { %8728 = vmatmul.mubr.msk.f32.gmra.mxu0 %vm1471_vm1, %v5106_v39 }
 0xe06   : > { %v12573_v48 = vpop.f32.mrf.mxu0 }
 0xe07   : > { %v5207_v52 = vsel %vm693_vm0, %v12573_v48, 0.0  ;;  %v5217_v28 = vmul.f32 %v12573_v48, %v12573_v48 }
 0xe08   : > { %5208 = vadd.xlane.f32.xlu0 %v5207_v52  ;;  %v12577_v57 = vpop.f32.mrf.mxu0 }
 0xe09   : > { %v5204_v2 = vsel %vm693_vm0, %v12577_v57, 0.0  ;;  %v5216_v22 = vmul.f32 %v12577_v57, %v12577_v57  ;;  %v5223_v41 = vsel %vm693_vm0, %v5217_v28, 0.0 }
 0xe0a   : > { %5205 = vadd.xlane.f32.xlu1 %v5204_v2 }
 0xe0b   : > { %v5220_v10 = vsel %vm693_vm0, %v5216_v22, 0.0 }
 0xe10   : > { %v12581_v15 = vpop.f32.mrf.mxu0 }
 0xe11   : > { %v5213_v18 = vsel %vm693_vm0, %v12581_v15, 0.0  ;;  %v5219_v20 = vmul.f32 %v12581_v15, %v12581_v15 }
 0xe12   : > { %5214 = vadd.xlane.f32.xlu0 %v5213_v18  ;;  %v12587_v21 = vpop.f32.mrf.mxu0 }
 0xe13   : > { %v5210_v0 = vsel %vm693_vm0, %v12587_v21, 0.0  ;;  %v5218_v46 = vmul.f32 %v12587_v21, %v12587_v21  ;;  %v5229_v17 = vsel %vm693_vm0, %v5219_v20, 0.0 }
 0xe14   : > { %5211 = vadd.xlane.f32.xlu1 %v5210_v0 }
 0xe15   : > { %v5226_v61 = vsel %vm693_vm0, %v5218_v46, 0.0 }
 0xe16   : > { %5230 = vadd.xlane.f32.xlu0 %v5229_v17 }
 0xe18   : > { %5227 = vadd.xlane.f32.xlu1 %v5226_v61 }
 0xe1a   : > { %5224 = vadd.xlane.f32.xlu0 %v5223_v41 }
 0xe1c   : > { %5221 = vadd.xlane.f32.xlu1 %v5220_v10  ;;  %v14312_v10 = vld [vmem:[#allocation31_spill] sm:$0xff] }
 0xe2d   : > { %5292 = vperm.xlu1 %8864, %v8310_v19  }
 0xe30   : > { %5297 = vperm.xlu0 %8863, %v8311_v32   ;;  %v14315_v32 = vld [vmem:[#allocation43_spill] sm:$0xff] }
 0xe31   : > { %5282 = vperm.xlu1 %8864, %v8308_v30  }
 0xe34   : > { %5483 = vperm.xlu0 %8863, %v8320_v58   ;;  %v8880_v58 = vld [vmem:[%s14091_s10 + $0x28] sm:$0xff]  }
 0xe35   : > { %5287 = vperm.xlu1 %8864, %v8309_v26   ;;  %v9123_v26 = vld [vmem:[%s14083_s2] sm:$0xff] }
 0xe38   : > { %5488 = vperm.xlu0 %8863, %v8321_v4   ;;  %v8881_v4 = vld [vmem:[%s14089_s8 + $0x20] sm:$0xff]  }
 0xe39   : > { %5580 = vperm.xlu1 %8864, %v8332_v23   ;;  %8742 = vmatprep.mubr.msk.bf16.mxu0 %vm1925_vm2, %v8881_v4 }
 0xe3c   : > { %5493 = vperm.xlu0 %8863, %v8322_v5  }
 0xe3d   : > { %5585 = vperm.xlu1 %8864, %v8333_v29  }
 0xe40   : > { %5498 = vperm.xlu0 %8863, %v8323_v37  }
 0xe41   : > { %5590 = vperm.xlu1 %8864, %v8334_v13  }
 0xe45   : > { %5595 = vperm.xlu1 %8864, %v8335_v51  }
 0xe91   : > { %v5209_v24 = vpop.xlane.xlu0 %5208 }
 0xe92   : > { %v5233_v16 = vmul.f32 0.0625, %v5209_v24 }
 0xe93   : > { %v5206_v47 = vpop.xlane.xlu1 %5205 }
 0xe94   : > { %v5232_v43 = vmul.f32 0.0625, %v5206_v47  ;;  %v5241_v44 = vmul.f32 %v5233_v16, %v5233_v16  ;;  %v5253_v0 = vsub.f32 %v12573_v48, %v5233_v16  ;;  %v8879_v48 = vld [vmem:[%s14091_s10 + $0x20] sm:$0xff]  }
 0xe96   : > { %v5240_v12 = vmul.f32 %v5232_v43, %v5232_v43  ;;  %v5252_v46 = vsub.f32 %v12577_v57, %v5232_v43  ;;  %v14314_v57 = vld [vmem:[#allocation36_spill] sm:$0xff] }
 0xe97   : > { %v5571_v30 = vpack.c.bf16 %v14315_v32, %v14314_v57 }
 0xe9b   : > { %v5215_v7 = vpop.xlane.xlu0 %5214 }
 0xe9c   : > { %v5235_v25 = vmul.f32 0.0625, %v5215_v7 }
 0xe9d   : > { %v5212_v6 = vpop.xlane.xlu1 %5211 }
 0xe9e   : > { %v5234_v59 = vmul.f32 0.0625, %v5212_v6  ;;  %v5243_v11 = vmul.f32 %v5235_v25, %v5235_v25  ;;  %v5255_v63 = vsub.f32 %v12581_v15, %v5235_v25  ;;  %v14313_v15 = vld [vmem:[#allocation34_spill] sm:$0xff] }
 0xe9f   : > { %v5231_v27 = vpop.xlane.xlu0 %5230  ;;  %v5572_v19 = vpack.c.bf16 %v14313_v15, %v14312_v10 }
 0xea0   : > { %v5239_v40 = vmul.f32 0.0625, %v5231_v27  ;;  %v5242_v55 = vmul.f32 %v5234_v59, %v5234_v59  ;;  %v5254_v39 = vsub.f32 %v12587_v21, %v5234_v59  ;;  %v8878_v21 = vld [vmem:[%s14087_s6 + $0x28] sm:$0xff]  }
 0xea1   : > { %v5228_v8 = vpop.xlane.xlu1 %5227 }
 0xea2   : > { %v5247_v14 = vsub.f32 %v5239_v40, %v5243_v11  ;;  %v5238_v35 = vmul.f32 0.0625, %v5228_v8 }
 0xea3   : > { %v5225_v33 = vpop.xlane.xlu0 %5224 }
 0xea4   : > { %v5251_v1 = vmax.f32 %v5247_v14, 0.0  ;;  %v5246_v53 = vsub.f32 %v5238_v35, %v5242_v55  ;;  %v5237_v54 = vmul.f32 0.0625, %v5225_v33 }
 0xea5   : > { %v5222_v45 = vpop.xlane.xlu1 %5221 }
 0xea6   : > { %v5259_v60 = vadd.f32 1e-05, %v5251_v1  ;;  %v5250_v9 = vmax.f32 %v5246_v53, 0.0  ;;  %v5245_v3 = vsub.f32 %v5237_v54, %v5241_v44  ;;  %v5236_v50 = vmul.f32 0.0625, %v5222_v45 }
 0xea8   : > { %8997 = vrsqrt.f32 %v5259_v60  ;;  %v5258_v49 = vadd.f32 1e-05, %v5250_v9  ;;  %v5249_v34 = vmax.f32 %v5245_v3, 0.0  ;;  %v5244_v42 = vsub.f32 %v5236_v50, %v5240_v12 }
 0xea9   : > { %v5293_v23 = vpop.permute.xlu1 %5292 }
 0xeaa   : > { %8999 = vrsqrt.f32 %v5258_v49  ;;  %v5257_v36 = vadd.f32 1e-05, %v5249_v34  ;;  %v5248_v62 = vmax.f32 %v5244_v42, 0.0 }
 0xeab   : > { %v5298_v47 = vpop.permute.xlu0 %5297 }
 0xeac   : > { %9001 = vrsqrt.f32 %v5257_v36  ;;  %v5256_v56 = vadd.f32 1e-05, %v5248_v62 }
 0xead   : > { %v5283_v29 = vpop.permute.xlu1 %5282 }
 0xeae   : > { %9003 = vrsqrt.f32 %v5256_v56 }
 0xeb1   : > { %v5288_v27 = vpop.permute.xlu1 %5287 }
 0xeb5   : > { %v8998_v31 = vpop.eup %8997 }
 0xeb6   : > { %v5267_v18 = vmul.f32 %v8998_v31, %v5255_v63 }
 0xeb7   : > { %v9000_v52 = vpop.eup %8999 }
 0xeb8   : > { %v5266_v2 = vmul.f32 %v9000_v52, %v5254_v39 }
 0xeb9   : > { %v9002_v20 = vpop.eup %9001 }
 0xeba   : > { %v5274_v17 = vpack.c.bf16 %v5267_v18, %v5266_v2  ;;  %v5265_v22 = vmul.f32 %v9002_v20, %v5253_v0 }
 0xebb   : > { %v9004_v28 = vpop.eup %9003 }
 0xebc   : > { %8730 = vmatprep.subr.bf16.mxu1 %v5274_v17  ;;  %v5264_v61 = vmul.f32 %v9004_v28, %v5252_v46 }
 0xebd   : > { %8731 = vmatpush3.bf16.msra.mxu1 %v5274_v17 }
 0xebe   : > { %v5273_v41 = vpack.c.bf16 %v5265_v22, %v5264_v61 }
 0xec0   : > { %8732 = vmatprep.subr.bf16.mxu1 %v5273_v41 }
 0xec1   : > { %8733 = vmatpush3.bf16.msra.mxu1 %v5273_v41 }
 0xec2   : > { %8746 = vmatprep.subr.bf16.mxu1 %v5572_v19 }
 0xec4   : > { %8735 = vmatmul.mubr.msk.bf16.vlgmr.msra.gmra.mxu1 %vm1925_vm2, %v8878_v21 }
 0xec5   : > { %8747 = vmatpush3.bf16.msra.mxu1 %v5572_v19  ;;  %8750 = vmatprep.mubr.msk.bf16.mxu1 %vm1925_vm2, %v8879_v48 }
 0xec6   : > { %8748 = vmatprep.subr.bf16.mxu1 %v5571_v30 }
 0xec9   : > { %8749 = vmatpush3.bf16.msra.mxu1 %v5571_v30 }
 0xeca   : > { %8764 = vmatprep.subr.mxu1 %v9123_v26 }
 0xecc   : > { %8751 = vmatmul.mubr.msk.bf16.vlgmr.msra.gmra.mxu1 %vm1925_vm2, %v8880_v58 }
 0xecd   : > { %8765 = vmatpush3.msra.mxu1 %v9123_v26 }
 0xf84   : > { %v8736_v5 = vpop.f32.mrf.mxu1 }
 0xf85   : > { %v12668_v37 = vadd.f32 %v8736_v5, %v5293_v23 }
 0xf86   : > { %v5350_v13 = vpop.f32.mrf.mxu1 }
 0xf87   : > { %v12671_v51 = vmul.f32 0.70710677, %v12668_v37  ;;  %v12673_v38 = vadd.f32 %v5350_v13, %v5283_v29 }
 0xf88   : > { %v8737_v24 = vpop.f32.mrf.mxu1 }
 0xf89   : > { %v5375_v7 = vand.u32 2147483647, %v12671_v51  ;;  %v12677_v25 = vmul.f32 0.70710677, %v12673_v38  ;;  %v12679_v6 = vadd.f32 %v8737_v24, %v5298_v47  ;;  %vm5451_vm6 = vcmp.lt.f32.partialorder %v12671_v51, 0.0 }
 0xf8a   : > { %v5353_v59 = vpop.f32.mrf.mxu1 }
 0xf8b   : > { %v5379_v16 = vmul.f32 0.3275911, %v5375_v7  ;;  %v5373_v11 = vand.u32 2147483647, %v12677_v25  ;;  %v12683_v40 = vmul.f32 0.70710677, %v12679_v6  ;;  %v12685_v43 = vadd.f32 %v5353_v59, %v5288_v27 }
 0xf8c   : > { %v5427_v45 = vsub.f32 0.0, %v5375_v7  ;;  %vm5449_vm7 = vcmp.lt.f32.partialorder %v12677_v25, 0.0  ;;  %v5365_v25 = vmul.f32 0.5, %v12673_v38  ;;  %v9125_v38 = vld [vmem:[%s14082_s1] sm:$0xff] }
 0xf8d   : > { %v5383_v8 = vadd.f32 1.0, %v5379_v16  ;;  %v5377_v55 = vmul.f32 0.3275911, %v5373_v11  ;;  %v5376_v14 = vand.u32 2147483647, %v12683_v40  ;;  %v5425_v60 = vsub.f32 0.0, %v5373_v11 }
 0xf8e   : > { %v12689_v35 = vmul.f32 0.70710677, %v12685_v43  ;;  %v5431_v9 = vmul.f32 %v5427_v45, %v5375_v7  ;;  %vm5452_vm8 = vcmp.lt.f32.partialorder %v12683_v40, 0.0 }
 0xf8f   : > { %9005 = vrcp.f32 %v5383_v8  ;;  %v5381_v33 = vadd.f32 1.0, %v5377_v55  ;;  %v5380_v44 = vmul.f32 0.3275911, %v5376_v14  ;;  %v5428_v3 = vsub.f32 0.0, %v5376_v14 }
 0xf90   : > { %v5374_v1 = vand.u32 2147483647, %v12689_v35  ;;  %v5429_v49 = vmul.f32 %v5425_v60, %v5373_v11  ;;  %v5437_v42 = vmul.f32 1.442695, %v5431_v9  ;;  %vm5450_vm9 = vcmp.lt.f32.partialorder %v12689_v35, 0.0  ;;  %v9124_v35 = vld [vmem:[%s14082_s1 + $0x8] sm:$0xff] }
 0xf91   : > { %9007 = vrcp.f32 %v5381_v33  ;;  %v5384_v53 = vadd.f32 1.0, %v5380_v44  ;;  %v5432_v62 = vmul.f32 %v5428_v3, %v5376_v14 }
 0xf92   : > { %v5378_v54 = vmul.f32 0.3275911, %v5374_v1  ;;  %v5426_v36 = vsub.f32 0.0, %v5374_v1  ;;  %v5433_v39 = vmul.f32 1.442695, %v5429_v49 }
 0xf93   : > { %9009 = vrcp.f32 %v5384_v53  ;;  %v5439_v46 = vmul.f32 1.442695, %v5432_v62 }
 0xf94   : > { %v5382_v12 = vadd.f32 1.0, %v5378_v54  ;;  %v5430_v18 = vmul.f32 %v5426_v36, %v5374_v1 }
 0xf96   : > { %9011 = vrcp.f32 %v5382_v12  ;;  %v5435_v15 = vmul.f32 1.442695, %v5430_v18  ;;  %v5368_v18 = vmul.f32 0.5, %v12679_v6  ;;  %v8882_v6 = vld [vmem:[%s14089_s8 + $0x28] sm:$0xff]  }
 0xf97   : > { %9013 = vpow2.f32 %v5437_v42 }
 0xf98   : > { %9015 = vpow2.f32 %v5433_v39 }
 0xf99   : > { %9017 = vpow2.f32 %v5439_v46 }
 0xf9a   : > { %9019 = vpow2.f32 %v5435_v15  ;;  %v5581_v15 = vpop.permute.xlu1 %5580 }
 0xf9c   : > { %v9006_v50 = vpop.eup %9005 }
 0xf9d   : > { %v5391_v34 = vmul.f32 1.0614054, %v9006_v50 }
 0xf9e   : > { %v9008_v56 = vpop.eup %9007 }
 0xf9f   : > { %v5395_v31 = vadd.f32 -1.4531521, %v5391_v34  ;;  %v5389_v63 = vmul.f32 1.0614054, %v9008_v56 }
 0xfa0   : > { %v9010_v52 = vpop.eup %9009 }
 0xfa1   : > { %v5399_v2 = vmul.f32 %v9006_v50, %v5395_v31  ;;  %v5393_v20 = vadd.f32 -1.4531521, %v5389_v63  ;;  %v5392_v0 = vmul.f32 1.0614054, %v9010_v52 }
 0xfa3   : > { %v5403_v17 = vadd.f32 1.4214138, %v5399_v2  ;;  %v9012_v28 = vpop.eup %9011  ;;  %v5397_v61 = vmul.f32 %v9008_v56, %v5393_v20  ;;  %v5396_v22 = vadd.f32 -1.4531521, %v5392_v0  ;;  %v5367_v2 = vmul.f32 0.5, %v12668_v37 }
 0xfa4   : > { %v5390_v10 = vmul.f32 1.0614054, %v9012_v28  ;;  %v9014_v59 = vpop.eup %9013 }
 0xfa5   : > { %v5407_v41 = vmul.f32 %v9006_v50, %v5403_v17  ;;  %v5401_v19 = vadd.f32 1.4214138, %v5397_v61  ;;  %v5400_v21 = vmul.f32 %v9010_v52, %v5396_v22  ;;  %v9016_v33 = vpop.eup %9015  ;;  %v5366_v61 = vmul.f32 0.5, %v12685_v43  ;;  %v5484_v43 = vpop.permute.xlu0 %5483 }
 0xfa6   : > { %v5394_v57 = vadd.f32 -1.4531521, %v5390_v10  ;;  %v9018_v12 = vpop.eup %9017 }
 0xfa7   : > { %v5411_v48 = vadd.f32 -0.28449672, %v5407_v41  ;;  %v5405_v32 = vmul.f32 %v9008_v56, %v5401_v19  ;;  %v5404_v30 = vadd.f32 1.4214138, %v5400_v21  ;;  %v9020_v49 = vpop.eup %9019  ;;  %v5586_v21 = vpop.permute.xlu1 %5585 }
 0xfa8   : > { %v5398_v26 = vmul.f32 %v9012_v28, %v5394_v57 }
 0xfa9   : > { %v5415_v58 = vmul.f32 %v9006_v50, %v5411_v48  ;;  %v5409_v4 = vadd.f32 -0.28449672, %v5405_v32  ;;  %v5408_v23 = vmul.f32 %v9010_v52, %v5404_v30  ;;  %v5489_v19 = vpop.permute.xlu0 %5488  ;;  %v8752_v48 = vpop.f32.mrf.mxu1 }
 0xfaa   : > { %v5402_v29 = vadd.f32 1.4214138, %v5398_v26 }
 0xfab   : > { %v5419_v5 = vadd.f32 0.2548296, %v5415_v58  ;;  %v5413_v13 = vmul.f32 %v9008_v56, %v5409_v4  ;;  %v5412_v24 = vadd.f32 -0.28449672, %v5408_v23  ;;  %v5648_v57 = vpop.f32.mrf.mxu1  ;;  %v5591_v30 = vpop.permute.xlu1 %5590 }
 0xfac   : > { %v5406_v7 = vmul.f32 %v9012_v28, %v5402_v29  ;;  %v5657_v26 = vadd.f32 %v8752_v48, %v5591_v30  ;;  %v5649_v29 = vadd.f32 %v5648_v57, %v5581_v15 }
 0xfad   : > { %v5423_v47 = vmul.f32 %v9006_v50, %v5419_v5  ;;  %v5417_v27 = vadd.f32 0.2548296, %v5413_v13  ;;  %v5416_v16 = vmul.f32 %v9010_v52, %v5412_v24  ;;  %v5494_v32 = vpop.permute.xlu0 %5493  ;;  %v8753_v4 = vpop.f32.mrf.mxu1 }
 0xfae   : > { %v5410_v8 = vadd.f32 -0.28449672, %v5406_v7 }
 0xfaf   : > { %v5443_v11 = vmul.f32 %v9014_v59, %v5423_v47  ;;  %v5421_v55 = vmul.f32 %v9008_v56, %v5417_v27  ;;  %v5420_v14 = vadd.f32 0.2548296, %v5416_v16  ;;  %v5596_v59 = vpop.permute.xlu1 %5595  ;;  %v5651_v27 = vpop.f32.mrf.mxu1 }
 0xfb0   : > { %v5414_v1 = vmul.f32 %v9012_v28, %v5410_v8 }
 0xfb1   : > { %v5447_v44 = vsub.f32 1.0, %v5443_v11  ;;  %v5441_v53 = vmul.f32 %v9016_v33, %v5421_v55  ;;  %v5424_v54 = vmul.f32 %v9010_v52, %v5420_v14  ;;  %v5499_v47 = vpop.permute.xlu0 %5498  ;;  %v5660_v55 = vadd.f32 %v8753_v4, %v5596_v59 }
 0xfb2   : > { %v5418_v60 = vadd.f32 0.2548296, %v5414_v1  ;;  %v5652_v1 = vadd.f32 %v5651_v27, %v5586_v21 }
 0xfb3   : > { %v5455_v45 = vsub.f32 0.0, %v5447_v44  ;;  %v5445_v9 = vsub.f32 1.0, %v5441_v53  ;;  %v5444_v3 = vmul.f32 %v9018_v12, %v5424_v54 }
 0xfb4   : > { %v5422_v50 = vmul.f32 %v9012_v28, %v5418_v60 }
 0xfb5   : > { %v5459_v34 = vsel %vm5451_vm6, %v5455_v45, %v5447_v44  ;;  %v5453_v42 = vsub.f32 0.0, %v5445_v9  ;;  %v5448_v36 = vsub.f32 1.0, %v5444_v3 }
 0xfb6   : > { %v5442_v62 = vmul.f32 %v9020_v49, %v5422_v50  ;;  %v5463_v31 = vadd.f32 1.0, %v5459_v34 }
 0xfb7   : > { %v5456_v56 = vsub.f32 0.0, %v5448_v36  ;;  %v5457_v63 = vsel %vm5449_vm7, %v5453_v42, %v5445_v9  ;;  %vm9191_vm7 = vmmov 0  }
 0xfb8   : > { %v5446_v39 = vsub.f32 1.0, %v5442_v62  ;;  %v5461_v0 = vadd.f32 1.0, %v5457_v63  ;;  %v5467_v46 = vmul.f32 %v5463_v31, %v5367_v2 }
 0xfb9   : > { %v5460_v52 = vsel %vm5452_vm8, %v5456_v56, %v5448_v36 }
 0xfba   : > { %v5464_v51 = vadd.f32 1.0, %v5460_v52  ;;  %v5454_v20 = vsub.f32 0.0, %v5446_v39  ;;  %v5465_v41 = vmul.f32 %v5461_v0, %v5365_v25 }
 0xfbc   : > { %v5468_v17 = vmul.f32 %v5464_v51, %v5368_v18  ;;  %v5458_v28 = vsel %vm5450_vm9, %v5454_v20, %v5446_v39 }
 0xfbd   : > { %v5462_v22 = vadd.f32 1.0, %v5458_v28 }
 0xfbe   : > { %v5475_v40 = vpack.c.bf16 %v5468_v17, %v5467_v46 }
 0xfbf   : > { %v5466_v10 = vmul.f32 %v5462_v22, %v5366_v61 }
 0xfc0   : > { %8738 = vmatprep.subr.bf16.mxu0 %v5475_v40 }
 0xfc1   : > { %8739 = vmatpush3.bf16.msra.mxu0 %v5475_v40  ;;  %v5474_v37 = vpack.c.bf16 %v5466_v10, %v5465_v41 }
 0xfc3   : > { %8740 = vmatprep.subr.bf16.mxu0 %v5474_v37 }
 0xfc5   : > { %8741 = vmatpush3.bf16.msra.mxu0 %v5474_v37 }
 0xfc6   : > { %8754 = vmatprep.subr.mxu0 %v9124_v35 }
 0xfc8   : > { %8743 = vmatmul.mubr.msk.bf16.vlgmr.msra.gmra.mxu0 %vm1925_vm2, %v8882_v6 }
 0xfc9   : > { %8755 = vmatpush3.msra.mxu0 %v9124_v35 }
 0xfca   : > { %8756 = vmatprep.subr.mxu0 %v9125_v38 }
 0xfcb   : > { %8757 = vmatpush3.msra.mxu0 %v9125_v38 }
0x1088   : > { %v8744_v58 = vpop.f32.mrf.mxu0 }
0x1089   : > { %v5560_v23 = vadd.f32 %v8744_v58, %v5494_v32 }
0x108a   : > { %v5551_v5 = vpop.f32.mrf.mxu0 }
0x108b   : > { %v12710_v13 = vadd.f32 %v5657_v26, %v5560_v23  ;;  %v5552_v24 = vadd.f32 %v5551_v5, %v5484_v43 }
0x108c   : > { %v8745_v7 = vpop.f32.mrf.mxu0 }
0x108d   : > { %v12713_v16 = vmul.f32 0.70710677, %v12710_v13  ;;  %v12715_v11 = vadd.f32 %v5649_v29, %v5552_v24  ;;  %v5563_v8 = vadd.f32 %v8745_v7, %v5499_v47 }
0x108e   : > { %v5554_v14 = vpop.f32.mrf.mxu0 }
0x108f   : > { %v5677_v33 = vand.u32 2147483647, %v12713_v16  ;;  %v12719_v44 = vmul.f32 0.70710677, %v12715_v11  ;;  %v12721_v53 = vadd.f32 %v5660_v55, %v5563_v8  ;;  %v5555_v54 = vadd.f32 %v5554_v14, %v5489_v19 }
0x1090   : > { %vm5753_vm11 = vcmp.lt.f32.partialorder %v12713_v16, 0.0 }
0x1091   : > { %v5681_v12 = vmul.f32 0.3275911, %v5677_v33  ;;  %v5675_v45 = vand.u32 2147483647, %v12719_v44  ;;  %v12725_v60 = vmul.f32 0.70710677, %v12721_v53  ;;  %v12727_v9 = vadd.f32 %v5652_v1, %v5555_v54 }
0x1092   : > { %v5729_v39 = vsub.f32 0.0, %v5677_v33  ;;  %vm5751_vm10 = vcmp.lt.f32.partialorder %v12719_v44, 0.0 }
0x1093   : > { %v5685_v3 = vadd.f32 1.0, %v5681_v12  ;;  %v5679_v50 = vmul.f32 0.3275911, %v5675_v45  ;;  %v5678_v49 = vand.u32 2147483647, %v12725_v60  ;;  %v5727_v52 = vsub.f32 0.0, %v5675_v45 }
0x1094   : > { %v12731_v34 = vmul.f32 0.70710677, %v12727_v9  ;;  %v5733_v2 = vmul.f32 %v5729_v39, %v5677_v33  ;;  %vm5754_vm13 = vcmp.lt.f32.partialorder %v12725_v60, 0.0  ;;  %v5668_v16 = vmul.f32 0.5, %v12727_v9 }
0x1095   : > { %9021 = vrcp.f32 %v5685_v3  ;;  %v5683_v42 = vadd.f32 1.0, %v5679_v50  ;;  %v5682_v36 = vmul.f32 0.3275911, %v5678_v49  ;;  %v5730_v18 = vsub.f32 0.0, %v5678_v49 }
0x1096   : > { %v5676_v62 = vand.u32 2147483647, %v12731_v34  ;;  %v5731_v20 = vmul.f32 %v5727_v52, %v5675_v45  ;;  %v5739_v46 = vmul.f32 1.442695, %v5733_v2  ;;  %vm5752_vm12 = vcmp.lt.f32.partialorder %v12731_v34, 0.0 }
0x1097   : > { %9023 = vrcp.f32 %v5683_v42  ;;  %v5686_v56 = vadd.f32 1.0, %v5682_v36  ;;  %v5734_v28 = vmul.f32 %v5730_v18, %v5678_v49  ;;  %v5670_v9 = vmul.f32 0.5, %v12721_v53 }
0x1098   : > { %v5680_v31 = vmul.f32 0.3275911, %v5676_v62  ;;  %v5728_v17 = vsub.f32 0.0, %v5676_v62  ;;  %v5735_v40 = vmul.f32 1.442695, %v5731_v20 }
0x1099   : > { %9025 = vrcp.f32 %v5686_v56  ;;  %v5741_v38 = vmul.f32 1.442695, %v5734_v28 }
0x109a   : > { %v5684_v63 = vadd.f32 1.0, %v5680_v31  ;;  %v5732_v37 = vmul.f32 %v5728_v17, %v5676_v62 }
0x109c   : > { %9027 = vrcp.f32 %v5684_v63  ;;  %v5737_v32 = vmul.f32 1.442695, %v5732_v37 }
0x109d   : > { %9029 = vpow2.f32 %v5739_v46 }
0x109e   : > { %9031 = vpow2.f32 %v5735_v40 }
0x109f   : > { %9033 = vpow2.f32 %v5741_v38 }
0x10a0   : > { %9035 = vpow2.f32 %v5737_v32 }
0x10a2   : > { %v9022_v51 = vpop.eup %9021 }
0x10a3   : > { %v5693_v0 = vmul.f32 1.0614054, %v9022_v51 }
0x10a4   : > { %v9024_v25 = vpop.eup %9023 }
0x10a5   : > { %v5697_v61 = vadd.f32 -1.4531521, %v5693_v0  ;;  %v5691_v22 = vmul.f32 1.0614054, %v9024_v25 }
0x10a6   : > { %v9026_v41 = vpop.eup %9025 }
0x10a7   : > { %v5701_v10 = vmul.f32 %v9022_v51, %v5697_v61  ;;  %v5695_v6 = vadd.f32 -1.4531521, %v5691_v22  ;;  %v5694_v35 = vmul.f32 1.0614054, %v9026_v41 }
0x10a9   : > { %v5705_v43 = vadd.f32 1.4214138, %v5701_v10  ;;  %v9028_v15 = vpop.eup %9027  ;;  %v5699_v19 = vmul.f32 %v9024_v25, %v5695_v6  ;;  %v5698_v21 = vadd.f32 -1.4531521, %v5694_v35 }
0x10aa   : > { %v5692_v57 = vmul.f32 1.0614054, %v9028_v15  ;;  %v9030_v1 = vpop.eup %9029 }
0x10ab   : > { %v5709_v48 = vmul.f32 %v9022_v51, %v5705_v43  ;;  %v5703_v30 = vadd.f32 1.4214138, %v5699_v19  ;;  %v5702_v58 = vmul.f32 %v9026_v41, %v5698_v21  ;;  %v9032_v42 = vpop.eup %9031 }
0x10ac   : > { %v5696_v4 = vadd.f32 -1.4531521, %v5692_v57  ;;  %v9034_v31 = vpop.eup %9033 }
0x10ad   : > { %v5713_v26 = vadd.f32 -0.28449672, %v5709_v48  ;;  %v5707_v23 = vmul.f32 %v9024_v25, %v5703_v30  ;;  %v5706_v5 = vadd.f32 1.4214138, %v5702_v58  ;;  %v9036_v20 = vpop.eup %9035 }
0x10ae   : > { %v5700_v24 = vmul.f32 %v9028_v15, %v5696_v4 }
0x10af   : > { %v5717_v29 = vmul.f32 %v9022_v51, %v5713_v26  ;;  %v5711_v47 = vadd.f32 -0.28449672, %v5707_v23  ;;  %v5710_v7 = vmul.f32 %v9026_v41, %v5706_v5 }
0x10b0   : > { %v5704_v27 = vadd.f32 1.4214138, %v5700_v24 }
0x10b1   : > { %v5721_v59 = vadd.f32 0.2548296, %v5717_v29  ;;  %v5715_v8 = vmul.f32 %v9024_v25, %v5711_v47  ;;  %v5714_v55 = vadd.f32 -0.28449672, %v5710_v7 }
0x10b2   : > { %v5708_v33 = vmul.f32 %v9028_v15, %v5704_v27 }
0x10b3   : > { %v5725_v14 = vmul.f32 %v9022_v51, %v5721_v59  ;;  %v5719_v54 = vadd.f32 0.2548296, %v5715_v8  ;;  %v5718_v12 = vmul.f32 %v9026_v41, %v5714_v55 }
0x10b4   : > { %v5712_v3 = vadd.f32 -0.28449672, %v5708_v33 }
0x10b5   : > { %v5745_v45 = vmul.f32 %v9030_v1, %v5725_v14  ;;  %v5723_v50 = vmul.f32 %v9024_v25, %v5719_v54  ;;  %v5722_v49 = vadd.f32 0.2548296, %v5718_v12  ;;  %v5667_v25 = vmul.f32 0.5, %v12715_v11 }
0x10b6   : > { %v5716_v36 = vmul.f32 %v9028_v15, %v5712_v3 }
0x10b7   : > { %v5743_v62 = vmul.f32 %v9032_v42, %v5723_v50  ;;  %v5726_v56 = vmul.f32 %v9026_v41, %v5722_v49  ;;  %v5749_v63 = vsub.f32 1.0, %v5745_v45 }
0x10b8   : > { %v5720_v39 = vadd.f32 0.2548296, %v5716_v36 }
0x10b9   : > { %v5747_v52 = vsub.f32 1.0, %v5743_v62  ;;  %v5746_v2 = vmul.f32 %v9034_v31, %v5726_v56  ;;  %v5757_v46 = vsub.f32 0.0, %v5749_v63 }
0x10ba   : > { %v5724_v18 = vmul.f32 %v9028_v15, %v5720_v39  ;;  %v5669_v15 = vmul.f32 0.5, %v12710_v13 }
0x10bb   : > { %v5755_v51 = vsub.f32 0.0, %v5747_v52  ;;  %v5750_v0 = vsub.f32 1.0, %v5746_v2  ;;  %v5761_v41 = vsel %vm5753_vm11, %v5757_v46, %v5749_v63 }
0x10bc   : > { %v5744_v17 = vmul.f32 %v9036_v20, %v5724_v18  ;;  %v5765_v35 = vadd.f32 1.0, %v5761_v41 }
0x10bd   : > { %v5759_v28 = vsel %vm5751_vm10, %v5755_v51, %v5747_v52  ;;  %v5758_v40 = vsub.f32 0.0, %v5750_v0 }
0x10be   : > { %v5763_v61 = vadd.f32 1.0, %v5759_v28  ;;  %v5748_v22 = vsub.f32 1.0, %v5744_v17  ;;  %v12750_v21 = vmul.f32 %v5765_v35, %v5669_v15 }
0x10bf   : > { %v5762_v38 = vsel %vm5754_vm13, %v5758_v40, %v5750_v0 }
0x10c0   : > { %v12737_v10 = vmul.f32 %v5763_v61, %v5667_v25  ;;  %v5756_v37 = vsub.f32 0.0, %v5748_v22  ;;  %v5766_v34 = vadd.f32 1.0, %v5762_v38  ;;  %14318 = vst [vmem:[#allocation38_spill] sm:$0xff] %v12750_v21  ;;  %v5777_v30 = vsel %vm693_vm0, %v12750_v21, 0.0 }
0x10c1   : > { %v5785_v58 = vmul.f32 %v12750_v21, %v12750_v21 }
0x10c2   : > { %14316 = vst [vmem:[#allocation32_spill] sm:$0xff] %v12737_v10  ;;  %v5760_v6 = vsel %vm5752_vm12, %v5756_v37, %v5748_v22  ;;  %v5771_v44 = vsel %vm693_vm0, %v12737_v10, 0.0  ;;  %v5783_v11 = vmul.f32 %v12737_v10, %v12737_v10  ;;  %v12757_v32 = vmul.f32 %v5766_v34, %v5670_v9 }
0x10c3   : > { %v5764_v43 = vadd.f32 1.0, %v5760_v6  ;;  %5772 = vadd.xlane.f32.xlu0 %v5771_v44  ;;  %v5793_v53 = vsel %vm693_vm0, %v5785_v58, 0.0 }
0x10c4   : > { %v5787_v60 = vsel %vm693_vm0, %v5783_v11, 0.0  ;;  %14319 = vst [vmem:[#allocation30_spill] sm:$0xff] %v12757_v32  ;;  %v5780_v26 = vsel %vm693_vm0, %v12757_v32, 0.0  ;;  %v5786_v4 = vmul.f32 %v12757_v32, %v12757_v32 }
0x10c5   : > { %v12747_v19 = vmul.f32 %v5764_v43, %v5668_v16  ;;  %v14320_v43 = vld [vmem:[#allocation14_spill] sm:$0xff] }
0x10c6   : > { %v5796_v23 = vsel %vm693_vm0, %v5786_v4, 0.0 }
0x10c7   : > { %14317 = vst [vmem:[#allocation17_spill] sm:$0xff] %v12747_v19  ;;  %5788 = vadd.xlane.f32.xlu0 %v5787_v60  ;;  %v5774_v48 = vsel %vm693_vm0, %v12747_v19, 0.0  ;;  %v5784_v57 = vmul.f32 %v12747_v19, %v12747_v19 }
0x10c8   : > { %5775 = vadd.xlane.f32.xlu1 %v5774_v48 }
0x10c9   : > { %v5790_v13 = vsel %vm693_vm0, %v5784_v57, 0.0 }
0x10cb   : > { %5791 = vadd.xlane.f32.xlu0 %v5790_v13 }
0x10cc   : > { %5778 = vadd.xlane.f32.xlu1 %v5777_v30 }
0x10cf   : > { %5781 = vadd.xlane.f32.xlu0 %v5780_v26 }
0x10d0   : > { %5794 = vadd.xlane.f32.xlu1 %v5793_v53 }
0x10d3   : > { %5797 = vadd.xlane.f32.xlu0 %v5796_v23 }
0x114c   : > { %v5773_v5 = vpop.xlane.xlu0 %5772 }
0x114d   : > { %v5799_v29 = vmul.f32 0.0625, %v5773_v5  ;;  %v8376_v5 = vld [vmem:[%s14086_s5 + $0xd00] sm:$0xff] }
0x114f   : > { %v5807_v47 = vmul.f32 %v5799_v29, %v5799_v29  ;;  %v5819_v17 = vsub.f32 %v12737_v10, %v5799_v29  ;;  %v8377_v29 = vld [vmem:[%s14086_s5 + $0xd08] sm:$0xff] }
0x1150   : > { %v5789_v24 = vpop.xlane.xlu0 %5788 }
0x1151   : > { %v5803_v7 = vmul.f32 0.0625, %v5789_v24  ;;  %v5776_v59 = vpop.xlane.xlu1 %5775  ;;  %v8378_v24 = vld [vmem:[%s14086_s5 + $0xd10] sm:$0xff] }
0x1152   : > { %v5800_v27 = vmul.f32 0.0625, %v5776_v59 }
0x1153   : > { %v5811_v8 = vsub.f32 %v5803_v7, %v5807_v47  ;;  %v14321_v47 = vld [vmem:[#allocation9_spill] sm:$0xff] }
0x1154   : > { %v5792_v55 = vpop.xlane.xlu0 %5791  ;;  %v5808_v33 = vmul.f32 %v5800_v27, %v5800_v27  ;;  %v5820_v61 = vsub.f32 %v12747_v19, %v5800_v27  ;;  %v8379_v27 = vld [vmem:[%s14086_s5 + $0xd18] sm:$0xff] }
0x1155   : > { %v5815_v14 = vmax.f32 %v5811_v8, 0.0  ;;  %v5804_v1 = vmul.f32 0.0625, %v5792_v55  ;;  %v5779_v54 = vpop.xlane.xlu1 %5778  ;;  %v8380_v8 = vld [vmem:[%s14086_s5 + $0xd20] sm:$0xff]  ;;  %v8381_v55 = vld [vmem:[%s14086_s5 + $0xd28] sm:$0xff]  ;;  %v8355_v19 = vld [vmem:[%s14086_s5 + $0xc58] sm:$0xff] }
0x1156   : > { %v5801_v12 = vmul.f32 0.0625, %v5779_v54  ;;  %v8383_v54 = vld [vmem:[%s14086_s5 + $0xd38] sm:$0xff] }
0x1157   : > { %v5823_v45 = vadd.f32 1e-05, %v5815_v14  ;;  %v5812_v3 = vsub.f32 %v5804_v1, %v5808_v33  ;;  %v8382_v1 = vld [vmem:[%s14086_s5 + $0xd30] sm:$0xff] }
0x1158   : > { %v5782_v50 = vpop.xlane.xlu0 %5781  ;;  %v5809_v62 = vmul.f32 %v5801_v12, %v5801_v12  ;;  %v5821_v41 = vsub.f32 %v12750_v21, %v5801_v12  ;;  %v8384_v12 = vld [vmem:[%s14086_s5 + $0xd40] sm:$0xff] }
0x1159   : > { %9037 = vrsqrt.f32 %v5823_v45  ;;  %v5816_v49 = vmax.f32 %v5812_v3, 0.0  ;;  %v5802_v42 = vmul.f32 0.0625, %v5782_v50  ;;  %v5795_v36 = vpop.xlane.xlu1 %5794  ;;  %v8385_v3 = vld [vmem:[%s14086_s5 + $0xd48] sm:$0xff]  ;;  %v8386_v50 = vld [vmem:[%s14086_s5 + $0xd50] sm:$0xff] }
0x115a   : > { %v5805_v56 = vmul.f32 0.0625, %v5795_v36 }
0x115b   : > { %v5824_v31 = vadd.f32 1e-05, %v5816_v49  ;;  %v5810_v52 = vmul.f32 %v5802_v42, %v5802_v42  ;;  %v5822_v44 = vsub.f32 %v12757_v32, %v5802_v42  ;;  %v8387_v49 = vld [vmem:[%s14086_s5 + $0xd58] sm:$0xff] }
0x115c   : > { %v5813_v63 = vsub.f32 %v5805_v56, %v5809_v62  ;;  %v5798_v39 = vpop.xlane.xlu0 %5797 }
0x115d   : > { %9039 = vrsqrt.f32 %v5824_v31  ;;  %v5806_v2 = vmul.f32 0.0625, %v5798_v39  ;;  %v8388_v31 = vld [vmem:[%s14086_s5 + $0xd60] sm:$0xff]  ;;  %v8390_v39 = vld [vmem:[%s14086_s5 + $0xd70] sm:$0xff] }
0x115e   : > { %v5817_v18 = vmax.f32 %v5813_v63, 0.0  ;;  %v8389_v63 = vld [vmem:[%s14086_s5 + $0xd68] sm:$0xff] }
0x115f   : > { %v5814_v20 = vsub.f32 %v5806_v2, %v5810_v52 }
0x1160   : > { %v5825_v51 = vadd.f32 1e-05, %v5817_v18 }
0x1161   : > { %v5818_v0 = vmax.f32 %v5814_v20, 0.0 }
0x1162   : > { %9041 = vrsqrt.f32 %v5825_v51  ;;  %v8391_v51 = vld [vmem:[%s14086_s5 + $0xd78] sm:$0xff] }
0x1163   : > { %v5826_v46 = vadd.f32 1e-05, %v5818_v0  ;;  %v8392_v0 = vld [vmem:[%s14086_s5 + $0xd80] sm:$0xff] }
0x1165   : > { %9043 = vrsqrt.f32 %v5826_v46  ;;  %v8393_v46 = vld [vmem:[%s14086_s5 + $0xd88] sm:$0xff] }
0x1166   : > { %v9038_v28 = vpop.eup %9037 }
0x1167   : > { %v5831_v25 = vmul.f32 %v9038_v28, %v5819_v17 }
0x1169   : > { %8758 = vmatprep.mubr.msk.f32.mxu0 %vm693_vm0, %v5831_v25 }
0x116a   : > { %v9040_v22 = vpop.eup %9039 }
0x116b   : > { %v5832_v40 = vmul.f32 %v9040_v22, %v5820_v61  ;;  %v8394_v22 = vld [vmem:[%s14086_s5 + $0xd90] sm:$0xff] }
0x116d   : > { %8759 = vmatmul.mubr.msk.f32.vlgmr.msra.gmra.mxu0 %vm693_vm0, %v5832_v40  ;;  %v8395_v40 = vld [vmem:[%s14086_s5 + $0xd98] sm:$0xff] }
0x116f   : > { %v9042_v37 = vpop.eup %9041 }
0x1170   : > { %v5833_v6 = vmul.f32 %v9042_v37, %v5821_v41  ;;  %v8396_v41 = vld [vmem:[%s14086_s5 + $0xda0] sm:$0xff] }
0x1172   : > { %v9044_v11 = vpop.eup %9043  ;;  %8761 = vmatprep.mubr.msk.f32.mxu0 %vm693_vm0, %v5833_v6 }
0x1173   : > { %v5834_v35 = vmul.f32 %v9044_v11, %v5822_v44 }
0x1175   : > { %8762 = vmatmul.mubr.msk.f32.gmra.mxu0 %vm693_vm0, %v5834_v35  ;;  %v8397_v35 = vld [vmem:[%s14086_s5 + $0xda8] sm:$0xff] }
0x122d   : > { %v8760_v38 = vpop.f32.mrf.mxu0 }
0x122e   : > { %v5985_v16 = vcombine.high %v8760_v38, %v8760_v38  ;;  %v5992_v15 = vrot.slane %v8760_v38, %v14320_v43  ;;  %v8398_v38 = vld [vmem:[%s14086_s5 + $0xdb0] sm:$0xff] }
0x122f   : > { %v5913_v9 = vpop.f32.mrf.mxu0 }
0x1230   : > { %v5999_v34 = vrot.slane %v5985_v16, %v14320_v43  ;;  %v6000_v60 = vcombine.high %v5992_v15, %v5992_v15  ;;  %v6008_v57 = vrot.slane %v5992_v15, %v14320_v43  ;;  %v5936_v26 = vcombine.high %v5913_v9, %v5913_v9  ;;  %v8399_v16 = vld [vmem:[%s14086_s5 + $0xdb8] sm:$0xff] }
0x1231   : > { %v12785_v53 = vrot.slane %v5913_v9, %v14320_v43  ;;  %v8401_v9 = vld [vmem:[%s14086_s5 + $0xdc8] sm:$0xff] }
0x1232   : > { %v6001_v48 = vcombine.high %v5999_v34, %v5999_v34  ;;  %v6022_v13 = vrot.slane %v6000_v60, %v14320_v43  ;;  %v6015_v30 = vrot.slane %v5999_v34, %v14320_v43  ;;  %v6030_v4 = vcombine.high %v6008_v57, %v6008_v57 }
0x1233   : > { %v6296_v7 = vrot.slane %v6008_v57, %v14321_v47  ;;  %v12817_v45 = vrot.slane %v5936_v26, %v14320_v43  ;;  %v5951_v62 = vcombine.high %v12785_v53, %v12785_v53  ;;  %v12834_v56 = vrot.slane %v12785_v53, %v14320_v43  ;;  %v8400_v57 = vld [vmem:[%s14086_s5 + $0xdc0] sm:$0xff]  ;;  %v8403_v53 = vld [vmem:[%s14086_s5 + $0xdd8] sm:$0xff] }
0x1234   : > { %v6029_v58 = vrot.slane %v6001_v48, %v14320_v43  ;;  %v6032_v23 = vcombine.high %v6022_v13, %v6022_v13  ;;  %v6031_v59 = vcombine.high %v6015_v30, %v6015_v30  ;;  %v6300_v14 = vrot.slane %v6022_v13, %v14321_v47  ;;  %v8402_v13 = vld [vmem:[%s14086_s5 + $0xdd0] sm:$0xff] }
0x1235   : > { %v6304_v42 = vrot.slane %v6030_v4, %v14321_v47  ;;  %v6312_v36 = vrot.slane %v6015_v30, %v14321_v47  ;;  %v6453_v18 = vmul.f32 %v8376_v5, %v6296_v7  ;;  %v12847_v20 = vmul.f32 %v8377_v29, %v6296_v7  ;;  %v8405_v5 = vld [vmem:[%s14086_s5 + $0xde8] sm:$0xff] }
0x1236   : > { %v6033_v33 = vcombine.high %v6029_v58, %v6029_v58  ;;  %v6308_v52 = vrot.slane %v6032_v23, %v14321_v47  ;;  %v6316_v2 = vrot.slane %v6029_v58, %v14321_v47  ;;  %v6320_v17 = vrot.slane %v6031_v59, %v14321_v47  ;;  %v8404_v23 = vld [vmem:[%s14086_s5 + $0xde0] sm:$0xff] }
0x1237   : > { %v12859_v28 = vmul.f32 %v8378_v24, %v6296_v7  ;;  %v12861_v25 = vmul.f32 %v8379_v27, %v6296_v7  ;;  %v6457_v61 = vmul.f32 %v8380_v8, %v6300_v14  ;;  %v6458_v6 = vmul.f32 %v8381_v55, %v6300_v14  ;;  %v8406_v27 = vld [vmem:[%s14086_s5 + $0xdf0] sm:$0xff]  ;;  %v8407_v8 = vld [vmem:[%s14086_s5 + $0xdf8] sm:$0xff] }
0x1238   : > { %v6324_v37 = vrot.slane %v6033_v33, %v14321_v47  ;;  %v12873_v44 = vmul.f32 %v8382_v1, %v6300_v14  ;;  %v12875_v11 = vmul.f32 %v8383_v54, %v6300_v14  ;;  %v6461_v15 = vmul.f32 %v8384_v12, %v6304_v42 }
0x1239   : > { %v6462_v34 = vmul.f32 %v8385_v3, %v6304_v42  ;;  %v12886_v60 = vmul.f32 %v8386_v50, %v6304_v42  ;;  %v12888_v48 = vmul.f32 %v8387_v49, %v6304_v42  ;;  %v6465_v30 = vmul.f32 %v8388_v31, %v6308_v52 }
0x123a   : > { %v6466_v58 = vmul.f32 %v8389_v63, %v6308_v52  ;;  %v12899_v26 = vmul.f32 %v8390_v39, %v6308_v52  ;;  %v12901_v4 = vmul.f32 %v8391_v51, %v6308_v52  ;;  %v6469_v29 = vmul.f32 %v8392_v0, %v6312_v36 }
0x123b   : > { %v6470_v24 = vmul.f32 %v8393_v46, %v6312_v36  ;;  %v12912_v7 = vmul.f32 %v8394_v22, %v6312_v36  ;;  %v12914_v59 = vmul.f32 %v8395_v40, %v6312_v36  ;;  %v6473_v55 = vmul.f32 %v8396_v41, %v6316_v2 }
0x123c   : > { %v6474_v14 = vmul.f32 %v8397_v35, %v6316_v2  ;;  %v12922_v33 = vmul.f32 %v8398_v38, %v6316_v2  ;;  %v5952_v1 = vcombine.high %v12817_v45, %v12817_v45  ;;  %v12926_v54 = vmul.f32 %v8399_v16, %v6316_v2  ;;  %v8344_v35 = vld [vmem:[%s14086_s5 + $0xc00] sm:$0xff] }
0x123d   : > { %v6477_v12 = vmul.f32 %v8400_v57, %v6320_v17  ;;  %v6478_v3 = vmul.f32 %v8401_v9, %v6320_v17  ;;  %v5973_v50 = vrot.slane %v5951_v62, %v14320_v43  ;;  %v12929_v49 = vmul.f32 %v8402_v13, %v6320_v17  ;;  %v12987_v9 = vpop.f32.mrf.mxu0 }
0x123e   : > { %v12931_v42 = vmul.f32 %v8403_v53, %v6320_v17  ;;  %v12933_v36 = vmul.f32 %v8404_v23, %v6324_v37  ;;  %v12935_v31 = vmul.f32 %v8405_v5, %v6324_v37  ;;  %v12937_v63 = vmul.f32 %v8406_v27, %v6324_v37  ;;  %v8345_v23 = vld [vmem:[%s14086_s5 + $0xc08] sm:$0xff] }
0x123f   : > { %v12939_v39 = vmul.f32 %v8407_v8, %v6324_v37  ;;  %v5966_v52 = vrot.slane %v12817_v45, %v14320_v43  ;;  %v5981_v2 = vcombine.high %v12834_v56, %v12834_v56  ;;  %v12946_v62 = vsel %vm1471_vm1, %v6453_v18, 0.0  ;;  %v8349_v5 = vld [vmem:[%s14086_s5 + $0xc28] sm:$0xff] }
0x1240   : > { %14322 = vst [vmem:[#allocation22_spill] sm:$0xff] %v12937_v63  ;;  %v12949_v51 = vsel %vm1471_vm1, %v6457_v61, 0.0  ;;  %v12952_v0 = vsel %vm1471_vm1, %v6461_v15, 0.0  ;;  %v5980_v46 = vrot.slane %v5952_v1, %v14320_v43  ;;  %v12956_v17 = vsel %vm1471_vm1, %v6465_v30, 0.0  ;;  %v8356_v1 = vld [vmem:[%s14086_s5 + $0xc60] sm:$0xff] }
0x1241   : > { %14323 = vst [vmem:[#allocation26_spill] sm:$0xff] %v12939_v39  ;;  %v5983_v22 = vcombine.high %v5973_v50, %v5973_v50  ;;  %v6264_v45 = vrot.slane %v12834_v56, %v14321_v47  ;;  %v6268_v40 = vrot.slane %v5973_v50, %v14321_v47  ;;  %v12962_v18 = vsel %vm1471_vm1, %v6469_v29, 0.0  ;;  %v8348_v56 = vld [vmem:[%s14086_s5 + $0xc20] sm:$0xff]  ;;  %v8353_v50 = vld [vmem:[%s14086_s5 + $0xc48] sm:$0xff] }
0x1242   : > { %14324 = vst [vmem:[#allocation15_spill] sm:$0xff] %v12962_v18  ;;  %v12965_v61 = vsel %vm1471_vm1, %v6473_v55, 0.0  ;;  %v12968_v41 = vsel %vm1471_vm1, %v6477_v12, 0.0  ;;  %v12972_v37 = vsel %vm1471_vm1, %v12847_v20, 0.0  ;;  %v12981_v38 = vsel %vm1471_vm1, %v6458_v6, 0.0  ;;  %v8352_v6 = vld [vmem:[%s14086_s5 + $0xc40] sm:$0xff] }
0x1243   : > { %14325 = vst [vmem:[#allocation16_spill] sm:$0xff] %v12965_v61  ;;  %14326 = vst [vmem:[#allocation11_spill] sm:$0xff] %v12968_v41  ;;  %v12984_v16 = vsel %vm1471_vm1, %v6462_v34, 0.0  ;;  %v5982_v15 = vcombine.high %v5966_v52, %v5966_v52  ;;  %v6272_v57 = vrot.slane %v5981_v2, %v14321_v47  ;;  %v12990_v20 = vsel %vm1471_vm1, %v6466_v58, 0.0  ;;  %v8346_v58 = vld [vmem:[%s14086_s5 + $0xc10] sm:$0xff] }
0x1244   : > { %v12993_v13 = vsel %vm1471_vm1, %v6470_v24, 0.0  ;;  %v12996_v30 = vsel %vm1471_vm1, %v6474_v14, 0.0  ;;  %v5984_v53 = vcombine.high %v5980_v46, %v5980_v46  ;;  %v13002_v34 = vsel %vm1471_vm1, %v6478_v3, 0.0  ;;  %v8347_v14 = vld [vmem:[%s14086_s5 + $0xc18] sm:$0xff]  ;;  %v8354_v12 = vld [vmem:[%s14086_s5 + $0xc50] sm:$0xff] }
0x1245   : > { %14327 = vst [vmem:[#allocation10_spill] sm:$0xff] %v12993_v13  ;;  %14328 = vst [vmem:[#allocation21_spill] sm:$0xff] %v12996_v30  ;;  %v6276_v29 = vrot.slane %v5983_v22, %v14321_v47  ;;  %v6421_v24 = vmul.f32 %v8344_v35, %v6264_v45  ;;  %v6425_v27 = vmul.f32 %v8348_v56, %v6268_v40  ;;  %v13016_v8 = vsel %vm1471_vm1, %v12859_v28, 0.0  ;;  %v8350_v28 = vld [vmem:[%s14086_s5 + $0xc30] sm:$0xff]  ;;  %v8360_v30 = vld [vmem:[%s14086_s5 + $0xc80] sm:$0xff] }
0x1246   : > { %14329 = vst [vmem:[#allocation23_spill] sm:$0xff] %v13002_v34  ;;  %v13020_v55 = vsel %vm1471_vm1, %v12873_v44, 0.0  ;;  %v13032_v3 = vrot.slane %v12987_v9, %v14320_v43  ;;  %v8351_v44 = vld [vmem:[%s14086_s5 + $0xc38] sm:$0xff]  ;;  %v13044_v2 = vrot.slane %v5966_v52, %v14321_v47  ;;  %v13047_v22 = vrot.slane %v5980_v46, %v14321_v47  ;;  %v8357_v52 = vld [vmem:[%s14086_s5 + $0xc68] sm:$0xff] }
0x1247   : > { %v13050_v35 = vrot.slane %v5982_v15, %v14321_v47  ;;  %v6429_v56 = vmul.f32 %v8352_v6, %v6272_v57  ;;  %v13062_v10 = vrot.slane %v5984_v53, %v14321_v47  ;;  %v6422_v46 = vmul.f32 %v8345_v23, %v6264_v45  ;;  %v8358_v6 = vld [vmem:[%s14086_s5 + $0xc70] sm:$0xff]  ;;  %v8361_v53 = vld [vmem:[%s14086_s5 + $0xc88] sm:$0xff] }
0x1248   : > { %v6423_v32 = vmul.f32 %v8346_v58, %v6264_v45  ;;  %v6426_v15 = vmul.f32 %v8349_v5, %v6268_v40  ;;  %v6424_v21 = vmul.f32 %v8347_v14, %v6264_v45  ;;  %v6433_v39 = vmul.f32 %v8356_v1, %v6276_v29 }
0x1249   : > { %v6549_v63 = vsel %vm1471_vm1, %v6421_v24, 0.0  ;;  %v6550_v34 = vsel %vm1471_vm1, %v6425_v27, 0.0  ;;  %v6427_v23 = vmul.f32 %v8350_v28, %v6268_v40  ;;  %v6428_v58 = vmul.f32 %v8351_v44, %v6268_v40  ;;  %v8359_v24 = vld [vmem:[%s14086_s5 + $0xc78] sm:$0xff]  ;;  %v8362_v27 = vld [vmem:[%s14086_s5 + $0xc90] sm:$0xff] }
0x124a   : > { %v6430_v5 = vmul.f32 %v8353_v50, %v6272_v57  ;;  %v6551_v41 = vadd.f32 %v6550_v34, %v6549_v63  ;;  %v6431_v13 = vmul.f32 %v8354_v12, %v6272_v57  ;;  %v6432_v61 = vmul.f32 %v8355_v19, %v6272_v57  ;;  %v8364_v19 = vld [vmem:[%s14086_s5 + $0xca0] sm:$0xff]  ;;  %v8365_v63 = vld [vmem:[%s14086_s5 + $0xca8] sm:$0xff] }
0x124b   : > { %v6434_v45 = vmul.f32 %v8357_v52, %v6276_v29  ;;  %v6552_v14 = vsel %vm1471_vm1, %v6429_v56, 0.0  ;;  %v6435_v1 = vmul.f32 %v8358_v6, %v6276_v29  ;;  %v6612_v28 = vsel %vm1471_vm1, %v6422_v46, 0.0 }
0x124c   : > { %v6553_v18 = vadd.f32 %v6552_v14, %v6551_v41  ;;  %v6613_v40 = vsel %vm1471_vm1, %v6426_v15, 0.0  ;;  %v6437_v57 = vmul.f32 %v8360_v30, %v13044_v2  ;;  %v6438_v34 = vmul.f32 %v8361_v53, %v13044_v2  ;;  %v8366_v30 = vld [vmem:[%s14086_s5 + $0xcb0] sm:$0xff] }
0x124d   : > { %v6554_v12 = vsel %vm1471_vm1, %v6433_v39, 0.0  ;;  %v6614_v44 = vadd.f32 %v6613_v40, %v6612_v28  ;;  %v6615_v50 = vsel %vm1471_vm1, %v6430_v5, 0.0  ;;  %v6675_v56 = vsel %vm1471_vm1, %v6423_v32, 0.0  ;;  %v8363_v32 = vld [vmem:[%s14086_s5 + $0xc98] sm:$0xff] }
0x124e   : > { %v6555_v41 = vadd.f32 %v6554_v12, %v6553_v18  ;;  %v6676_v52 = vsel %vm1471_vm1, %v6427_v23, 0.0  ;;  %v6436_v46 = vmul.f32 %v8359_v24, %v6276_v29  ;;  %v6439_v15 = vmul.f32 %v8362_v27, %v13044_v2  ;;  %v8368_v29 = vld [vmem:[%s14086_s5 + $0xcc0] sm:$0xff]  ;;  %v8370_v12 = vld [vmem:[%s14086_s5 + $0xcd0] sm:$0xff] }
0x124f   : > { %v6616_v6 = vadd.f32 %v6615_v50, %v6614_v44  ;;  %v6677_v14 = vadd.f32 %v6676_v52, %v6675_v56  ;;  %v6441_v53 = vmul.f32 %v8364_v19, %v13047_v22  ;;  %v6442_v39 = vmul.f32 %v8365_v63, %v13047_v22 }
0x1250   : > { %v6617_v18 = vsel %vm1471_vm1, %v6434_v45, 0.0  ;;  %v6678_v5 = vsel %vm1471_vm1, %v6431_v13, 0.0  ;;  %v6556_v23 = vsel %vm1471_vm1, %v6437_v57, 0.0  ;;  %v6619_v27 = vsel %vm1471_vm1, %v6438_v34, 0.0  ;;  %v8369_v45 = vld [vmem:[%s14086_s5 + $0xcc8] sm:$0xff] }
0x1251   : > { %v6618_v24 = vadd.f32 %v6617_v18, %v6616_v6  ;;  %v6679_v28 = vadd.f32 %v6678_v5, %v6677_v14  ;;  %v6557_v40 = vadd.f32 %v6556_v23, %v6555_v41  ;;  %v6680_v13 = vsel %vm1471_vm1, %v6435_v1, 0.0 }
0x1252   : > { %v6738_v19 = vsel %vm1471_vm1, %v6424_v21, 0.0  ;;  %v6739_v63 = vsel %vm1471_vm1, %v6428_v58, 0.0  ;;  %v6443_v57 = vmul.f32 %v8366_v30, %v13047_v22  ;;  %v6440_v56 = vmul.f32 %v8363_v32, %v13044_v2  ;;  %v8367_v21 = vld [vmem:[%s14086_s5 + $0xcb8] sm:$0xff]  ;;  %v8372_v2 = vld [vmem:[%s14086_s5 + $0xce0] sm:$0xff]  ;;  %v8373_v32 = vld [vmem:[%s14086_s5 + $0xce8] sm:$0xff] }
0x1253   : > { %v6620_v44 = vadd.f32 %v6619_v27, %v6618_v24  ;;  %v6681_v34 = vadd.f32 %v6680_v13, %v6679_v28  ;;  %v6740_v50 = vadd.f32 %v6739_v63, %v6738_v19  ;;  %v6445_v52 = vmul.f32 %v8368_v29, %v13050_v35 }
0x1254   : > { %v6682_v41 = vsel %vm1471_vm1, %v6439_v15, 0.0  ;;  %v6741_v1 = vsel %vm1471_vm1, %v6432_v61, 0.0  ;;  %v6446_v58 = vmul.f32 %v8369_v45, %v13050_v35  ;;  %v6558_v6 = vsel %vm1471_vm1, %v6441_v53, 0.0 }
0x1255   : > { %v6683_v14 = vadd.f32 %v6682_v41, %v6681_v34  ;;  %v6742_v30 = vadd.f32 %v6741_v1, %v6740_v50  ;;  %v6447_v18 = vmul.f32 %v8370_v12, %v13050_v35  ;;  %v6559_v5 = vadd.f32 %v6558_v6, %v6557_v40 }
0x1256   : > { %v6621_v15 = vsel %vm1471_vm1, %v6442_v39, 0.0  ;;  %v6743_v61 = vsel %vm1471_vm1, %v6436_v46, 0.0  ;;  %v6684_v53 = vsel %vm1471_vm1, %v6443_v57, 0.0  ;;  %v14330_v24 = vcombine.high %v12987_v9, %v12987_v9  ;;  %v8374_v46 = vld [vmem:[%s14086_s5 + $0xcf0] sm:$0xff]  ;;  %v8371_v9 = vld [vmem:[%s14086_s5 + $0xcd8] sm:$0xff] }
0x1257   : > { %v6622_v29 = vadd.f32 %v6621_v15, %v6620_v44  ;;  %v6744_v23 = vadd.f32 %v6743_v61, %v6742_v30  ;;  %v13147_v28 = vsel %vm1471_vm1, %v12886_v60, 0.0  ;;  %v6444_v39 = vmul.f32 %v8367_v21, %v13047_v22 }
0x1258   : > { %v6097_v27 = vrot.slane %v14330_v24, %v14320_v43  ;;  %v6685_v45 = vadd.f32 %v6684_v53, %v6683_v14  ;;  %v6745_v40 = vsel %vm1471_vm1, %v6440_v56, 0.0  ;;  %v13156_v13 = vsel %vm1471_vm1, %v12899_v26, 0.0  ;;  %v8375_v14 = vld [vmem:[%s14086_s5 + $0xcf8] sm:$0xff] }
0x1259   : > { %v6449_v60 = vmul.f32 %v8372_v2, %v13062_v10  ;;  %v6560_v19 = vsel %vm1471_vm1, %v6445_v52, 0.0  ;;  %v6746_v63 = vadd.f32 %v6745_v40, %v6744_v23  ;;  %v6450_v12 = vmul.f32 %v8373_v32, %v13062_v10 }
0x125a   : > { %v6561_v57 = vadd.f32 %v6560_v19, %v6559_v5  ;;  %v6623_v22 = vsel %vm1471_vm1, %v6446_v58, 0.0  ;;  %v6098_v44 = vcombine.high %v13032_v3, %v13032_v3  ;;  %v6451_v26 = vmul.f32 %v8374_v46, %v13062_v10 }
0x125b   : > { %v6624_v34 = vadd.f32 %v6623_v22, %v6622_v29  ;;  %v6686_v50 = vsel %vm1471_vm1, %v6447_v18, 0.0  ;;  %v6099_v56 = vcombine.high %v6097_v27, %v6097_v27  ;;  %v13171_v41 = vsel %vm1471_vm1, %v12912_v7, 0.0 }
0x125c   : > { %v6448_v52 = vmul.f32 %v8371_v9, %v13050_v35  ;;  %v6687_v1 = vadd.f32 %v6686_v50, %v6685_v45  ;;  %v6747_v21 = vsel %vm1471_vm1, %v6444_v39, 0.0  ;;  %v13177_v58 = vsel %vm1471_vm1, %v12922_v33, 0.0  ;;  %v5923_v39 = vpop.f32.mrf.mxu0 }
0x125d   : > { %v13181_v6 = vsel %vm1471_vm1, %v12929_v49, 0.0  ;;  %v6562_v7 = vsel %vm1471_vm1, %v6449_v60, 0.0  ;;  %v6748_v30 = vadd.f32 %v6747_v21, %v6746_v63  ;;  %v6625_v35 = vsel %vm1471_vm1, %v6450_v12, 0.0  ;;  %v8447_v21 = vld [vmem:[%s14086_s5 + $0xf38] sm:$0xff] }
0x125e   : > { %v6563_v2 = vadd.f32 %v6562_v7, %v6561_v57  ;;  %v6106_v18 = vrot.slane %v13032_v3, %v14320_v43  ;;  %v6120_v33 = vrot.slane %v6098_v44, %v14320_v43  ;;  %v6626_v5 = vadd.f32 %v6625_v35, %v6624_v34  ;;  %v8443_v44 = vld [vmem:[%s14086_s5 + $0xf18] sm:$0xff]  ;;  %v8445_v34 = vld [vmem:[%s14086_s5 + $0xf28] sm:$0xff] }
0x125f   : > { %v6688_v15 = vsel %vm1471_vm1, %v6451_v26, 0.0  ;;  %v6113_v49 = vrot.slane %v6097_v27, %v14320_v43  ;;  %v6127_v61 = vrot.slane %v6099_v56, %v14320_v43  ;;  %v6753_v32 = vsel %vm1471_vm1, %v12861_v25, 0.0  ;;  %v8444_v26 = vld [vmem:[%s14086_s5 + $0xf20] sm:$0xff]  ;;  %v8449_v35 = vld [vmem:[%s14086_s5 + $0xf48] sm:$0xff] }
0x1260   : > { %v6452_v29 = vmul.f32 %v8375_v14, %v13062_v10  ;;  %v6689_v53 = vadd.f32 %v6688_v15, %v6687_v1  ;;  %v6749_v23 = vsel %vm1471_vm1, %v6448_v52, 0.0  ;;  %v13200_v3 = vsel %vm1471_vm1, %v12875_v11, 0.0  ;;  %v8446_v1 = vld [vmem:[%s14086_s5 + $0xf30] sm:$0xff]  ;;  %v8448_v14 = vld [vmem:[%s14086_s5 + $0xf40] sm:$0xff] }
0x1261   : > { %v13204_v24 = vsel %vm1471_vm1, %v12888_v48, 0.0  ;;  %v13208_v27 = vsel %vm1471_vm1, %v12901_v4, 0.0  ;;  %v6750_v46 = vadd.f32 %v6749_v23, %v6748_v30  ;;  %v13212_v10 = vsel %vm1471_vm1, %v12914_v59, 0.0 }
0x1262   : > { %v6565_v25 = vadd.f32 %v12946_v62, %v6563_v2  ;;  %v6128_v45 = vcombine.high %v6106_v18, %v6106_v18  ;;  %v6130_v40 = vcombine.high %v6120_v33, %v6120_v33  ;;  %v13217_v11 = vsel %vm1471_vm1, %v12926_v54, 0.0  ;;  %v8440_v54 = vld [vmem:[%s14086_s5 + $0xf00] sm:$0xff] }
0x1263   : > { %v6628_v48 = vadd.f32 %v12972_v37, %v6626_v5  ;;  %v6129_v9 = vcombine.high %v6113_v49, %v6113_v49  ;;  %v6131_v60 = vcombine.high %v6127_v61, %v6127_v61  ;;  %v6691_v4 = vadd.f32 %v13016_v8, %v6689_v53  ;;  %v8441_v37 = vld [vmem:[%s14086_s5 + $0xf08] sm:$0xff]  ;;  %v8442_v8 = vld [vmem:[%s14086_s5 + $0xf10] sm:$0xff] }
0x1264   : > { %v6751_v19 = vsel %vm1471_vm1, %v6452_v29, 0.0  ;;  %v6360_v63 = vrot.slane %v6106_v18, %v14321_v47  ;;  %v6034_v59 = vcombine.high %v5923_v39, %v5923_v39  ;;  %v13225_v62 = vsel %vm1471_vm1, %v12931_v42, 0.0  ;;  %v8450_v18 = vld [vmem:[%s14086_s5 + $0xf50] sm:$0xff]  ;;  %v8453_v29 = vld [vmem:[%s14086_s5 + $0xf68] sm:$0xff] }
0x1265   : > { %v6752_v12 = vadd.f32 %v6751_v19, %v6750_v46  ;;  %v6364_v57 = vrot.slane %v6120_v33, %v14321_v47  ;;  %v6041_v22 = vrot.slane %v5923_v39, %v14320_v43  ;;  %v6567_v42 = vadd.f32 %v12949_v51, %v6565_v25  ;;  %v8451_v33 = vld [vmem:[%s14086_s5 + $0xf58] sm:$0xff]  ;;  %v8454_v53 = vld [vmem:[%s14086_s5 + $0xf70] sm:$0xff]  ;;  %v8456_v25 = vld [vmem:[%s14086_s5 + $0xf80] sm:$0xff] }
0x1266   : > { %v6368_v50 = vrot.slane %v6128_v45, %v14321_v47  ;;  %v6372_v56 = vrot.slane %v6130_v40, %v14321_v47  ;;  %v13251_v52 = vrot.slane %v6113_v49, %v14321_v47  ;;  %v6630_v51 = vadd.f32 %v12981_v38, %v6628_v48 }
0x1267   : > { %v13264_v7 = vrot.slane %v6127_v61, %v14321_v47  ;;  %v13267_v30 = vrot.slane %v6129_v9, %v14321_v47  ;;  %v13270_v38 = vrot.slane %v6131_v60, %v14321_v47  ;;  %v13273_v2 = vadd.f32 %v13020_v55, %v6691_v4  ;;  %v8452_v55 = vld [vmem:[%s14086_s5 + $0xf60] sm:$0xff]  ;;  %v8457_v60 = vld [vmem:[%s14086_s5 + $0xf88] sm:$0xff]  ;;  %v8458_v4 = vld [vmem:[%s14086_s5 + $0xf90] sm:$0xff] }
0x1268   : > { %14331 = vst [vmem:[#allocation27_spill] sm:$0xff] %v13251_v52  ;;  %v6517_v5 = vmul.f32 %v8440_v54, %v6360_v63  ;;  %v6518_v15 = vmul.f32 %v8441_v37, %v6360_v63  ;;  %v6048_v49 = vrot.slane %v6034_v59, %v14320_v43  ;;  %v6754_v61 = vadd.f32 %v6753_v32, %v6752_v12  ;;  %v8455_v32 = vld [vmem:[%s14086_s5 + $0xf78] sm:$0xff]  ;;  %v8461_v54 = vld [vmem:[%s14086_s5 + $0xfa8] sm:$0xff] }
0x1269   : > { %v6519_v23 = vmul.f32 %v8442_v8, %v6360_v63  ;;  %v13294_v46 = vmul.f32 %v8443_v44, %v6360_v63  ;;  %v6521_v39 = vmul.f32 %v8444_v26, %v6364_v57  ;;  %v6522_v45 = vmul.f32 %v8445_v34, %v6364_v57 }
0x126a   : > { %v6523_v40 = vmul.f32 %v8446_v1, %v6364_v57  ;;  %v13302_v48 = vmul.f32 %v8447_v21, %v6364_v57  ;;  %v6049_v9 = vcombine.high %v6041_v22, %v6041_v22  ;;  %v6525_v19 = vmul.f32 %v8448_v14, %v6368_v50 }
0x126b   : > { %14332 = vst [vmem:[#allocation24_spill] sm:$0xff] %v13294_v46  ;;  %v6526_v63 = vmul.f32 %v8449_v35, %v6368_v50  ;;  %v13310_v59 = vmul.f32 %v8450_v18, %v6368_v50  ;;  %v13312_v12 = vmul.f32 %v8451_v33, %v6368_v50  ;;  %v13317_v37 = vmul.f32 %v8452_v55, %v6372_v56  ;;  %v14347_v46 = vld [vmem:[#allocation11_spill] sm:$0xff] }
0x126c   : > { %14333 = vst [vmem:[#allocation13_spill] sm:$0xff] %v13302_v48  ;;  %v6530_v8 = vmul.f32 %v8453_v29, %v6372_v56  ;;  %v13319_v57 = vmul.f32 %v8454_v53, %v6372_v56  ;;  %v6050_v44 = vcombine.high %v6048_v49, %v6048_v49  ;;  %v13322_v26 = vadd.f32 %v13200_v3, %v6754_v61 }
0x126d   : > { %14334 = vst [vmem:[#allocation12_spill] sm:$0xff] %v13310_v59  ;;  %14335 = vst [vmem:[#allocation20_spill] sm:$0xff] %v13312_v12  ;;  %v13324_v34 = vmul.f32 %v8455_v32, %v6372_v56  ;;  %v13327_v1 = vmul.f32 %v8456_v25, %v13251_v52  ;;  %v6057_v50 = vrot.slane %v6041_v22, %v14320_v43  ;;  %v13340_v3 = vsel %vm1471_vm1, %v6517_v5, 0.0  ;;  %v8420_v12 = vld [vmem:[%s14086_s5 + $0xe60] sm:$0xff] }
0x126e   : > { %14336 = vst [vmem:[#allocation39_spill] sm:$0xff] %v13319_v57  ;;  %v6534_v21 = vmul.f32 %v8457_v60, %v13251_v52  ;;  %v13332_v14 = vmul.f32 %v8458_v4, %v13251_v52  ;;  %v6071_v35 = vrot.slane %v6049_v9, %v14320_v43  ;;  %v6569_v18 = vadd.f32 %v12952_v0, %v6567_v42  ;;  %v8409_v9 = vld [vmem:[%s14086_s5 + $0xe08] sm:$0xff]  ;;  %v8422_v52 = vld [vmem:[%s14086_s5 + $0xe70] sm:$0xff]  ;;  %v8432_v59 = vld [vmem:[%s14086_s5 + $0xec0] sm:$0xff] }
0x126f   : > { %14337 = vst [vmem:[#allocation28_spill] sm:$0xff] %v13324_v34  ;;  %v13337_v33 = vmul.f32 %v8461_v54, %v13264_v7  ;;  %v13343_v56 = vsel %vm1471_vm1, %v6521_v39, 0.0  ;;  %v6064_v22 = vrot.slane %v6048_v49, %v14320_v43  ;;  %v13347_v61 = vsel %vm1471_vm1, %v6525_v19, 0.0  ;;  %v8410_v19 = vld [vmem:[%s14086_s5 + $0xe10] sm:$0xff]  ;;  %v8419_v34 = vld [vmem:[%s14086_s5 + $0xe58] sm:$0xff]  ;;  %v8425_v57 = vld [vmem:[%s14086_s5 + $0xe88] sm:$0xff] }
0x1270   : > { %14338 = vst [vmem:[#allocation41_spill] sm:$0xff] %v13332_v14  ;;  %v13350_v55 = vsel %vm1471_vm1, %v6518_v15, 0.0  ;;  %v6078_v29 = vrot.slane %v6050_v44, %v14320_v43  ;;  %v6632_v0 = vadd.f32 %v12984_v16, %v6630_v51  ;;  %v13355_v42 = vsel %vm1471_vm1, %v6522_v45, 0.0  ;;  %v8408_v43 = vld [vmem:[%s14086_s5 + $0xe00] sm:$0xff]  ;;  %v8414_v44 = vld [vmem:[%s14086_s5 + $0xe30] sm:$0xff]  ;;  %v8423_v14 = vld [vmem:[%s14086_s5 + $0xe78] sm:$0xff] }
0x1271   : > { %14339 = vst [vmem:[#allocation37_spill] sm:$0xff] %v13337_v33  ;;  %v13358_v5 = vsel %vm1471_vm1, %v6526_v63, 0.0  ;;  %v6079_v53 = vcombine.high %v6057_v50, %v6057_v50  ;;  %v6328_v39 = vrot.slane %v6057_v50, %v14321_v47  ;;  %v13362_v49 = vsel %vm1471_vm1, %v6530_v8, 0.0  ;;  %v8413_v8 = vld [vmem:[%s14086_s5 + $0xe28] sm:$0xff] }
0x1272   : > { %14340 = vst [vmem:[#allocation40_spill] sm:$0xff] %v13362_v49  ;;  %v13365_v32 = vsel %vm1471_vm1, %v6534_v21, 0.0  ;;  %v6081_v15 = vcombine.high %v6071_v35, %v6071_v35  ;;  %v6571_v16 = vadd.f32 %v12956_v17, %v6569_v18  ;;  %v13372_v51 = vsel %vm1471_vm1, %v6519_v23, 0.0  ;;  %v8411_v17 = vld [vmem:[%s14086_s5 + $0xe18] sm:$0xff]  ;;  %v8412_v23 = vld [vmem:[%s14086_s5 + $0xe20] sm:$0xff]  ;;  %v8417_v18 = vld [vmem:[%s14086_s5 + $0xe48] sm:$0xff] }
0x1273   : > { %14341 = vst [vmem:[#allocation42_spill] sm:$0xff] %v13365_v32  ;;  %14342 = vst [vmem:[#allocation33_spill] sm:$0xff] %v13372_v51  ;;  %v13375_v25 = vsel %vm1471_vm1, %v6523_v40, 0.0  ;;  %v6080_v45 = vcombine.high %v6064_v22, %v6064_v22  ;;  %v6332_v60 = vrot.slane %v6071_v35, %v14321_v47  ;;  %v6082_v4 = vcombine.high %v6078_v29, %v6078_v29  ;;  %v14346_v49 = vld [vmem:[#allocation10_spill] sm:$0xff] }
0x1274   : > { %14343 = vst [vmem:[#allocation19_spill] sm:$0xff] %v13375_v25  ;;  %v6578_v40 = vsel %vm1471_vm1, %v12933_v36, 0.0  ;;  %v6634_v63 = vadd.f32 %v12990_v20, %v6632_v0  ;;  %v13395_v54 = vsel %vm1471_vm1, %v12935_v31, 0.0  ;;  %v6336_v50 = vrot.slane %v6079_v53, %v14321_v47  ;;  %v8415_v31 = vld [vmem:[%s14086_s5 + $0xe38] sm:$0xff]  ;;  %v8416_v20 = vld [vmem:[%s14086_s5 + $0xe40] sm:$0xff] }
0x1275   : > { %v6344_v21 = vrot.slane %v6064_v22, %v14321_v47  ;;  %v6485_v35 = vmul.f32 %v8408_v43, %v6328_v39  ;;  %v6695_v36 = vadd.f32 %v13147_v28, %v13273_v2  ;;  %v6340_v0 = vrot.slane %v6081_v15, %v14321_v47  ;;  %v14344_v43 = vld [vmem:[#allocation15_spill] sm:$0xff]  ;;  %v8418_v2 = vld [vmem:[%s14086_s5 + $0xe50] sm:$0xff] }
0x1276   : > { %v13418_v22 = vrot.slane %v6078_v29, %v14321_v47  ;;  %v6486_v53 = vmul.f32 %v8409_v9, %v6328_v39  ;;  %v6573_v28 = vadd.f32 %v14344_v43, %v6571_v16  ;;  %v13431_v15 = vrot.slane %v6080_v45, %v14321_v47  ;;  %v8421_v43 = vld [vmem:[%s14086_s5 + $0xe68] sm:$0xff] }
0x1277   : > { %v13433_v29 = vmul.f32 %v8410_v19, %v6328_v39  ;;  %v13435_v9 = vmul.f32 %v8411_v17, %v6328_v39  ;;  %v6489_v16 = vmul.f32 %v8412_v23, %v6332_v60  ;;  %v13447_v45 = vrot.slane %v6082_v4, %v14321_v47  ;;  %v14345_v39 = vld [vmem:[#allocation16_spill] sm:$0xff]  ;;  %v8426_v4 = vld [vmem:[%s14086_s5 + $0xe90] sm:$0xff] }
0x1278   : > { %v6490_v19 = vmul.f32 %v8413_v8, %v6332_v60  ;;  %v13449_v48 = vmul.f32 %v8414_v44, %v6332_v60  ;;  %v6575_v17 = vadd.f32 %v14345_v39, %v6573_v28  ;;  %v8424_v23 = vld [vmem:[%s14086_s5 + $0xe80] sm:$0xff]  ;;  %v13458_v33 = vmul.f32 %v8415_v31, %v6332_v60  ;;  %v8427_v8 = vld [vmem:[%s14086_s5 + $0xe98] sm:$0xff] }
0x1279   : > { %v6493_v32 = vmul.f32 %v8416_v20, %v6336_v50  ;;  %v6494_v25 = vmul.f32 %v8417_v18, %v6336_v50  ;;  %v6636_v47 = vadd.f32 %v14346_v49, %v6634_v63  ;;  %v13467_v44 = vmul.f32 %v8418_v2, %v6336_v50  ;;  %v8428_v31 = vld [vmem:[%s14086_s5 + $0xea0] sm:$0xff]  ;;  %v8429_v49 = vld [vmem:[%s14086_s5 + $0xea8] sm:$0xff] }
0x127a   : > { %v13469_v28 = vmul.f32 %v8419_v34, %v6336_v50  ;;  %v6497_v39 = vmul.f32 %v8420_v12, %v6340_v0  ;;  %v6577_v60 = vadd.f32 %v14347_v46, %v6575_v17  ;;  %v6498_v63 = vmul.f32 %v8421_v43, %v6340_v0  ;;  %v14348_v2 = vld [vmem:[#allocation21_spill] sm:$0xff]  ;;  %v8430_v12 = vld [vmem:[%s14086_s5 + $0xeb0] sm:$0xff] }
0x127b   : > { %v13478_v20 = vmul.f32 %v8422_v52, %v6340_v0  ;;  %v13480_v18 = vmul.f32 %v8423_v14, %v6340_v0  ;;  %v6638_v51 = vadd.f32 %v14348_v2, %v6636_v47  ;;  %v6501_v46 = vmul.f32 %v8424_v23, %v6344_v21  ;;  %v14349_v0 = vld [vmem:[#allocation23_spill] sm:$0xff]  ;;  %v8433_v23 = vld [vmem:[%s14086_s5 + $0xec8] sm:$0xff]  ;;  %v8436_v2 = vld [vmem:[%s14086_s5 + $0xee0] sm:$0xff] }
0x127c   : > { %v6502_v34 = vmul.f32 %v8425_v57, %v6344_v21  ;;  %v6579_v50 = vadd.f32 %v6578_v40, %v6577_v60  ;;  %v6697_v17 = vadd.f32 %v13156_v13, %v6695_v36  ;;  %v13490_v43 = vmul.f32 %v8426_v4, %v6344_v21 }
0x127d   : > { %v13492_v52 = vmul.f32 %v8427_v8, %v6344_v21  ;;  %v6580_v14 = vsel %vm1471_vm1, %v6485_v35, 0.0  ;;  %v6640_v47 = vadd.f32 %v14349_v0, %v6638_v51  ;;  %v6505_v57 = vmul.f32 %v8428_v31, %v13418_v22  ;;  %v8434_v21 = vld [vmem:[%s14086_s5 + $0xed0] sm:$0xff] }
0x127e   : > { %v6506_v13 = vmul.f32 %v8429_v49, %v13418_v22  ;;  %v6581_v40 = vadd.f32 %v6580_v14, %v6579_v50  ;;  %v6699_v36 = vadd.f32 %v13171_v41, %v6697_v17  ;;  %v13506_v4 = vmul.f32 %v8430_v12, %v13418_v22  ;;  %v14350_v0 = vld [vmem:[#allocation22_spill] sm:$0xff] }
0x127f   : > { %v6582_v51 = vsel %vm1471_vm1, %v6489_v16, 0.0  ;;  %v6642_v35 = vadd.f32 %v13395_v54, %v6640_v47  ;;  %v6758_v8 = vadd.f32 %v13204_v24, %v13322_v26  ;;  %v6509_v60 = vmul.f32 %v8432_v59, %v13431_v15 }
0x1280   : > { %v6583_v31 = vadd.f32 %v6582_v51, %v6581_v40  ;;  %v6643_v49 = vsel %vm1471_vm1, %v6486_v53, 0.0  ;;  %v6701_v41 = vadd.f32 %v13177_v58, %v6699_v36  ;;  %v6510_v12 = vmul.f32 %v8433_v23, %v13431_v15  ;;  %v8437_v58 = vld [vmem:[%s14086_s5 + $0xee8] sm:$0xff] }
0x1281   : > { %v6584_v16 = vsel %vm1471_vm1, %v6493_v32, 0.0  ;;  %v6644_v50 = vadd.f32 %v6643_v49, %v6642_v35  ;;  %v6760_v54 = vadd.f32 %v13208_v27, %v6758_v8  ;;  %v13522_v24 = vmul.f32 %v8434_v21, %v13431_v15 }
0x1282   : > { %v6585_v59 = vadd.f32 %v6584_v16, %v6583_v31  ;;  %v6645_v26 = vsel %vm1471_vm1, %v6490_v19, 0.0  ;;  %v6703_v53 = vadd.f32 %v13181_v6, %v6701_v41  ;;  %v6586_v17 = vsel %vm1471_vm1, %v6497_v39, 0.0  ;;  %v14351_v16 = vld [vmem:[#allocation26_spill] sm:$0xff] }
0x1283   : > { %v6646_v14 = vadd.f32 %v6645_v26, %v6644_v50  ;;  %v6704_v32 = vsel %vm1471_vm1, %v14350_v0, 0.0  ;;  %v6762_v27 = vadd.f32 %v13212_v10, %v6760_v54  ;;  %v6513_v47 = vmul.f32 %v8436_v2, %v13447_v45 }
0x1284   : > { %v6587_v23 = vadd.f32 %v6586_v17, %v6585_v59  ;;  %v6647_v40 = vsel %vm1471_vm1, %v6494_v25, 0.0  ;;  %v6705_v19 = vadd.f32 %v6704_v32, %v6703_v53  ;;  %v6588_v6 = vsel %vm1471_vm1, %v6501_v46, 0.0 }
0x1285   : > { %v6648_v36 = vadd.f32 %v6647_v40, %v6646_v14  ;;  %v6706_v21 = vsel %vm1471_vm1, %v13433_v29, 0.0  ;;  %v6764_v39 = vadd.f32 %v13217_v11, %v6762_v27  ;;  %v6514_v51 = vmul.f32 %v8437_v58, %v13447_v45  ;;  %v8439_v40 = vld [vmem:[%s14086_s5 + $0xef8] sm:$0xff] }
0x1286   : > { %v6589_v35 = vadd.f32 %v6588_v6, %v6587_v23  ;;  %v6649_v8 = vsel %vm1471_vm1, %v6498_v63, 0.0  ;;  %v6707_v10 = vadd.f32 %v6706_v21, %v6705_v19  ;;  %v6590_v31 = vsel %vm1471_vm1, %v6505_v57, 0.0 }
0x1287   : > { %v6650_v49 = vadd.f32 %v6649_v8, %v6648_v36  ;;  %v6708_v25 = vsel %vm1471_vm1, %v13449_v48, 0.0  ;;  %v6766_v46 = vadd.f32 %v13225_v62, %v6764_v39  ;;  %v6651_v2 = vsel %vm1471_vm1, %v6502_v34, 0.0  ;;  %v8438_v48 = vld [vmem:[%s14086_s5 + $0xef0] sm:$0xff] }
0x1288   : > { %v6591_v41 = vadd.f32 %v6590_v31, %v6589_v35  ;;  %v6709_v29 = vadd.f32 %v6708_v25, %v6707_v10  ;;  %v6767_v11 = vsel %vm1471_vm1, %v14351_v16, 0.0  ;;  %v6592_v50 = vsel %vm1471_vm1, %v6509_v60, 0.0 }
0x1289   : > { %v6652_v54 = vadd.f32 %v6651_v2, %v6650_v49  ;;  %v6710_v63 = vsel %vm1471_vm1, %v13467_v44, 0.0  ;;  %v6768_v57 = vadd.f32 %v6767_v11, %v6766_v46  ;;  %v6653_v62 = vsel %vm1471_vm1, %v6506_v13, 0.0  ;;  %v8431_v44 = vld [vmem:[%s14086_s5 + $0xeb8] sm:$0xff] }
0x128a   : > { %v6593_v59 = vadd.f32 %v6592_v50, %v6591_v41  ;;  %v6711_v26 = vadd.f32 %v6710_v63, %v6709_v29  ;;  %v6769_v34 = vsel %vm1471_vm1, %v13435_v9, 0.0  ;;  %v6594_v53 = vsel %vm1471_vm1, %v6513_v47, 0.0  ;;  %v8435_v9 = vld [vmem:[%s14086_s5 + $0xed8] sm:$0xff]  ;;  %v14352_v63 = vld [vmem:[#allocation12_spill] sm:$0xff] }
0x128b   : > { %v6654_v58 = vadd.f32 %v6653_v62, %v6652_v54  ;;  %v6712_v60 = vsel %vm1471_vm1, %v13478_v20, 0.0  ;;  %v6770_v17 = vadd.f32 %v6769_v34, %v6768_v57  ;;  %v6655_v0 = vsel %vm1471_vm1, %v6510_v12, 0.0  ;;  %v8465_v54 = vld [vmem:[%s14086_s5 + $0xfc8] sm:$0xff] }
0x128c   : > { %v6595_v14 = vadd.f32 %v6594_v53, %v6593_v59  ;;  %v6713_v32 = vadd.f32 %v6712_v60, %v6711_v26  ;;  %v6771_v13 = vsel %vm1471_vm1, %v13458_v33, 0.0  ;;  %v6515_v27 = vmul.f32 %v8438_v48, %v13447_v45  ;;  %v14353_v59 = vld [vmem:[#allocation33_spill] sm:$0xff]  ;;  %v14354_v26 = vld [vmem:[#allocation24_spill] sm:$0xff] }
0x128d   : > { %v6656_v47 = vadd.f32 %v6655_v0, %v6654_v58  ;;  %v6714_v20 = vsel %vm1471_vm1, %v13490_v43, 0.0  ;;  %v6772_v23 = vadd.f32 %v6771_v13, %v6770_v17  ;;  %v6657_v12 = vsel %vm1471_vm1, %v6514_v51, 0.0  ;;  %v8460_v51 = vld [vmem:[%s14086_s5 + $0xfa0] sm:$0xff]  ;;  %v8469_v58 = vld [vmem:[%s14086_s5 + $0xfe8] sm:$0xff]  ;;  %v8462_v0 = vld [vmem:[%s14086_s5 + $0xfb0] sm:$0xff] }
0x128e   : > { %v6715_v19 = vadd.f32 %v6714_v20, %v6713_v32  ;;  %v6773_v33 = vsel %vm1471_vm1, %v13469_v28, 0.0  ;;  %v6597_v6 = vadd.f32 %v13340_v3, %v6595_v14  ;;  %v6508_v36 = vmul.f32 %v8431_v44, %v13418_v22  ;;  %v14355_v60 = vld [vmem:[#allocation40_spill] sm:$0xff]  ;;  %v14356_v32 = vld [vmem:[#allocation19_spill] sm:$0xff]  ;;  %v14357_v20 = vld [vmem:[#allocation42_spill] sm:$0xff] }
0x128f   : > { %v6658_v21 = vadd.f32 %v6657_v12, %v6656_v47  ;;  %v6716_v39 = vsel %vm1471_vm1, %v13506_v4, 0.0  ;;  %v6774_v43 = vadd.f32 %v6773_v33, %v6772_v23  ;;  %v6512_v35 = vmul.f32 %v8435_v9, %v13431_v15  ;;  %v8464_v15 = vld [vmem:[%s14086_s5 + $0xfc0] sm:$0xff] }
0x1290   : > { %v6717_v8 = vadd.f32 %v6716_v39, %v6715_v19  ;;  %v6775_v10 = vsel %vm1471_vm1, %v13480_v18, 0.0  ;;  %v6599_v28 = vadd.f32 %v13343_v56, %v6597_v6  ;;  %v6516_v3 = vmul.f32 %v8439_v40, %v13447_v45  ;;  %v8468_v56 = vld [vmem:[%s14086_s5 + $0xfe0] sm:$0xff]  ;;  %v14358_v19 = vld [vmem:[#allocation37_spill] sm:$0xff]  ;;  %v8466_v6 = vld [vmem:[%s14086_s5 + $0xfd0] sm:$0xff] }
0x1291   : > { %v6660_v22 = vadd.f32 %v13350_v55, %v6658_v21  ;;  %v6718_v4 = vsel %vm1471_vm1, %v13522_v24, 0.0  ;;  %v6776_v31 = vadd.f32 %v6775_v10, %v6774_v43  ;;  %v6720_v18 = vsel %vm1471_vm1, %v6515_v27, 0.0  ;;  %v8459_v21 = vld [vmem:[%s14086_s5 + $0xf98] sm:$0xff] }
0x1292   : > { %v6719_v49 = vadd.f32 %v6718_v4, %v6717_v8  ;;  %v6777_v25 = vsel %vm1471_vm1, %v13492_v52, 0.0  ;;  %v6601_v55 = vadd.f32 %v13347_v61, %v6599_v28  ;;  %v6537_v24 = vmul.f32 %v8460_v51, %v13264_v7  ;;  %v14360_v51 = vld [vmem:[#allocation13_spill] sm:$0xff]  ;;  %v8470_v4 = vld [vmem:[%s14086_s5 + $0xff0] sm:$0xff] }
0x1293   : > { %v6778_v45 = vadd.f32 %v6777_v25, %v6776_v31  ;;  %v6602_v46 = vsel %vm1471_vm1, %v13317_v37, 0.0  ;;  %v6662_v41 = vadd.f32 %v13355_v42, %v6660_v22  ;;  %v6779_v29 = vsel %vm1471_vm1, %v6508_v36, 0.0 }
0x1294   : > { %v6721_v2 = vadd.f32 %v6720_v18, %v6719_v49  ;;  %v6541_v16 = vmul.f32 %v8464_v15, %v13267_v30  ;;  %v6603_v52 = vadd.f32 %v6602_v46, %v6601_v55  ;;  %v6545_v50 = vmul.f32 %v8468_v56, %v13270_v38  ;;  %v14361_v18 = vld [vmem:[#allocation41_spill] sm:$0xff]  ;;  %v8463_v56 = vld [vmem:[%s14086_s5 + $0xfb8] sm:$0xff]  ;;  %v14363_v46 = vld [vmem:[#allocation20_spill] sm:$0xff] }
0x1295   : > { %v6780_v11 = vadd.f32 %v6779_v29, %v6778_v45  ;;  %v6604_v61 = vsel %vm1471_vm1, %v13327_v1, 0.0  ;;  %v6664_v37 = vadd.f32 %v13358_v5, %v6662_v41  ;;  %v6726_v42 = vsel %vm1471_vm1, %v14352_v63, 0.0  ;;  %v14362_v45 = vld [vmem:[#allocation27_spill] sm:$0xff]  ;;  %v14364_v63 = vld [vmem:[#allocation28_spill] sm:$0xff] }
0x1296   : > { %v6781_v57 = vsel %vm1471_vm1, %v6512_v35, 0.0  ;;  %v6605_v48 = vadd.f32 %v6604_v61, %v6603_v52  ;;  %v6723_v62 = vadd.f32 %v14353_v59, %v6721_v2  ;;  %v6785_v34 = vsel %vm1471_vm1, %v14354_v26, 0.0  ;;  %v14359_v35 = vld [vmem:[#allocation39_spill] sm:$0xff] }
0x1297   : > { %v6782_v53 = vadd.f32 %v6781_v57, %v6780_v11  ;;  %v6606_v1 = vsel %vm1471_vm1, %v6537_v24, 0.0  ;;  %v6666_v5 = vadd.f32 %v14355_v60, %v6664_v37  ;;  %v6783_v17 = vsel %vm1471_vm1, %v6516_v3, 0.0 }
0x1298   : > { %v6607_v44 = vadd.f32 %v6606_v1, %v6605_v48  ;;  %v6542_v14 = vmul.f32 %v8465_v54, %v13267_v30  ;;  %v6725_v13 = vadd.f32 %v14356_v32, %v6723_v62  ;;  %v6608_v27 = vsel %vm1471_vm1, %v6541_v16, 0.0  ;;  %v8471_v48 = vld [vmem:[%s14086_s5 + $0xff8] sm:$0xff] }
0x1299   : > { %v6784_v9 = vadd.f32 %v6783_v17, %v6782_v53  ;;  %v6610_v47 = vsel %vm1471_vm1, %v6545_v50, 0.0  ;;  %v6668_v23 = vadd.f32 %v14357_v20, %v6666_v5  ;;  %v6546_v12 = vmul.f32 %v8469_v58, %v13270_v38  ;;  %v8467_v50 = vld [vmem:[%s14086_s5 + $0xfd8] sm:$0xff] }
0x129a   : > { %v6609_v40 = vadd.f32 %v6608_v27, %v6607_v44  ;;  %v6669_v33 = vsel %vm1471_vm1, %v14358_v19, 0.0  ;;  %v6727_v36 = vadd.f32 %v6726_v42, %v6725_v13  ;;  %v6539_v43 = vmul.f32 %v8462_v0, %v13264_v7 }
0x129b   : > { %v6670_v39 = vadd.f32 %v6669_v33, %v6668_v23  ;;  %v6728_v8 = vsel %vm1471_vm1, %v14359_v35, 0.0  ;;  %v6786_v10 = vadd.f32 %v6785_v34, %v6784_v9  ;;  %v6787_v28 = vsel %vm1471_vm1, %v14360_v51, 0.0  ;;  %v8480_v35 = vld [vmem:[%s14088_s7 + $0x60] sm:$0xff]  ;;  %v8506_v51 = vld [vmem:[%s14092_s11 + $0x70] sm:$0xff] }
0x129c   : > { %v6611_v3 = vadd.f32 %v6610_v47, %v6609_v40  ;;  %v6671_v22 = vsel %vm1471_vm1, %v6542_v14, 0.0  ;;  %v6729_v31 = vadd.f32 %v6728_v8, %v6727_v36  ;;  %v6543_v49 = vmul.f32 %v8466_v6, %v13267_v30  ;;  %v8494_v8 = vld [vmem:[%s14090_s9 + $0x70] sm:$0xff] }
0x129d   : > { %v6672_v15 = vadd.f32 %v6671_v22, %v6670_v39  ;;  %v6730_v25 = vsel %vm1471_vm1, %v14361_v18, 0.0  ;;  %v6788_v55 = vadd.f32 %v6787_v28, %v6786_v10  ;;  %v6536_v24 = vmul.f32 %v8459_v21, %v14362_v45  ;;  %v8482_v39 = vld [vmem:[%s14088_s7 + $0x70] sm:$0xff]  ;;  %v8481_v10 = vld [vmem:[%s14088_s7 + $0x68] sm:$0xff]  ;;  %v8495_v28 = vld [vmem:[%s14090_s9 + $0x78] sm:$0xff] }
0x129e   : > { %v6789_v41 = vsel %vm1471_vm1, %v14363_v46, 0.0  ;;  %8766 = vmatprep.mubr.msk.f32.mxu1 %vm1471_vm1, %v6611_v3  ;;  %v6673_v2 = vsel %vm1471_vm1, %v6546_v12, 0.0  ;;  %v6731_v29 = vadd.f32 %v6730_v25, %v6729_v31  ;;  %v6547_v52 = vmul.f32 %v8470_v4, %v13270_v38  ;;  %v8492_v3 = vld [vmem:[%s14090_s9 + $0x60] sm:$0xff]  ;;  %v8507_v22 = vld [vmem:[%s14092_s11 + $0x78] sm:$0xff]  ;;  %v8493_v31 = vld [vmem:[%s14090_s9 + $0x68] sm:$0xff] }
0x129f   : > { %v6674_v16 = vadd.f32 %v6673_v2, %v6672_v15  ;;  %v6732_v11 = vsel %vm1471_vm1, %v6539_v43, 0.0  ;;  %v6790_v61 = vadd.f32 %v6789_v41, %v6788_v55  ;;  %v6540_v37 = vmul.f32 %v8463_v56, %v13264_v7  ;;  %v8483_v43 = vld [vmem:[%s14088_s7 + $0x78] sm:$0xff]  ;;  %v8504_v4 = vld [vmem:[%s14092_s11 + $0x60] sm:$0xff]  ;;  %v7481_v15 = vld [vmem:[%s14094_s13 + $0x30] sm:$0xff] }
0x12a0   : > { %v6733_v54 = vadd.f32 %v6732_v11, %v6731_v29  ;;  %v6791_v42 = vsel %vm1471_vm1, %v14364_v63, 0.0  ;;  %v6734_v57 = vsel %vm1471_vm1, %v6543_v49, 0.0  ;;  %v6544_v26 = vmul.f32 %v8467_v50, %v13267_v30  ;;  %v8505_v49 = vld [vmem:[%s14092_s11 + $0x68] sm:$0xff]  ;;  %v8883_v18 = vld [vmem:[%s14087_s6 + $0x30] sm:$0xff]   ;;  %v7479_v25 = vld [vmem:[%s14094_s13 + $0x20] sm:$0xff] }
0x12a1   : > { %8767 = vmatmul.mubr.msk.f32.vlgmr.msra.gmra.mxu1 %vm1471_vm1, %v6674_v16  ;;  %v6792_v59 = vadd.f32 %v6791_v42, %v6790_v61  ;;  %v6793_v34 = vsel %vm1471_vm1, %v6536_v24, 0.0  ;;  %v6736_v53 = vsel %vm1471_vm1, %v6547_v52, 0.0  ;;  %v6548_v58 = vmul.f32 %v8471_v48, %v13270_v38  ;;  %8776 = vmatprep.mubr.msk.bf16.mxu0 %vm1925_vm2, %v8883_v18  ;;  %v7482_v56 = vld [vmem:[%s14094_s13 + $0x38] sm:$0xff]  ;;  %v7477_v55 = vld [vmem:[%s14094_s13 + $0x10] sm:$0xff]  ;;  %v7480_v45 = vld [vmem:[%s14094_s13 + $0x28] sm:$0xff] }
0x12a2   : > { %v6735_v62 = vadd.f32 %v6734_v57, %v6733_v54  ;;  %v6795_v60 = vsel %vm1471_vm1, %v6540_v37, 0.0  ;;  %v6797_v17 = vsel %vm1471_vm1, %v6544_v26, 0.0  ;;  %v7475_v24 = vld [vmem:[%s14094_s13] sm:$0xff]  ;;  %v7478_v46 = vld [vmem:[%s14094_s13 + $0x18] sm:$0xff]  ;;  %v7476_v2 = vld [vmem:[%s14094_s13 + $0x8] sm:$0xff] }
0x12a3   : > { %v6794_v7 = vadd.f32 %v6793_v34, %v6792_v59  ;;  %v6799_v14 = vsel %vm1471_vm1, %v6548_v58, 0.0  ;;  %v7833_v41 = vld [vmem:[%s14096_s15] sm:$0xf]  ;;  %v8887_v18 = vld [vmem:[%s14089_s8 + $0x30] sm:$0xff]  }
0x12a4   : > { %v6737_v1 = vadd.f32 %v6736_v53, %v6735_v62 }
0x12a5   : > { %v6796_v5 = vadd.f32 %v6795_v60, %v6794_v7 }
0x12a6   : > { %8769 = vmatprep.mubr.msk.f32.mxu1 %vm1471_vm1, %v6737_v1 }
0x12a7   : > { %v6798_v44 = vadd.f32 %v6797_v17, %v6796_v5 }
0x12a9   : > { %v6800_v0 = vadd.f32 %v6799_v14, %v6798_v44 }
0x12ab   : > { %8770 = vmatmul.mubr.msk.f32.gmra.mxu1 %vm1471_vm1, %v6800_v0 }
0x12ac   : > { %8784 = vmatprep.mubr.msk.bf16.mxu1 %vm1925_vm2, %v8887_v18 }
0x1361   : > { %v13687_v30 = vpop.f32.mrf.mxu1 }
0x1362   : > { %v6901_v32 = vsel %vm693_vm0, %v13687_v30, 0.0  ;;  %v6911_v12 = vmul.f32 %v13687_v30, %v13687_v30 }
0x1363   : > { %6902 = vadd.xlane.f32.xlu0 %v6901_v32  ;;  %v13691_v38 = vpop.f32.mrf.mxu1 }
0x1364   : > { %v6898_v13 = vsel %vm693_vm0, %v13691_v38, 0.0  ;;  %v6910_v33 = vmul.f32 %v13691_v38, %v13691_v38  ;;  %v6917_v36 = vsel %vm693_vm0, %v6911_v12, 0.0 }
0x1365   : > { %6899 = vadd.xlane.f32.xlu1 %v6898_v13 }
0x1366   : > { %v6914_v21 = vsel %vm693_vm0, %v6910_v33, 0.0 }
0x136b   : > { %v13695_v9 = vpop.f32.mrf.mxu1 }
0x136c   : > { %v6913_v27 = vmul.f32 %v13695_v9, %v13695_v9  ;;  %v6907_v47 = vsel %vm693_vm0, %v13695_v9, 0.0 }
0x136d   : > { %6908 = vadd.xlane.f32.xlu0 %v6907_v47  ;;  %v13701_v20 = vpop.f32.mrf.mxu1 }
0x136e   : > { %v6912_v23 = vmul.f32 %v13701_v20, %v13701_v20  ;;  %v6904_v40 = vsel %vm693_vm0, %v13701_v20, 0.0  ;;  %v6923_v19 = vsel %vm693_vm0, %v6913_v27, 0.0 }
0x136f   : > { %6905 = vadd.xlane.f32.xlu1 %v6904_v40 }
0x1370   : > { %v6920_v6 = vsel %vm693_vm0, %v6912_v23, 0.0 }
0x1371   : > { %6924 = vadd.xlane.f32.xlu0 %v6923_v19 }
0x1373   : > { %6921 = vadd.xlane.f32.xlu1 %v6920_v6 }
0x1375   : > { %6918 = vadd.xlane.f32.xlu0 %v6917_v36 }
0x1377   : > { %6915 = vadd.xlane.f32.xlu1 %v6914_v21 }
0x1388   : > { %6986 = vperm.xlu1 %8864, %v8482_v39  }
0x138b   : > { %6991 = vperm.xlu0 %8863, %v8483_v43  }
0x138c   : > { %6976 = vperm.xlu1 %8864, %v8480_v35  }
0x138f   : > { %7187 = vperm.xlu0 %8863, %v8494_v8  }
0x1390   : > { %6981 = vperm.xlu1 %8864, %v8481_v10  }
0x1393   : > { %7284 = vperm.xlu0 %8863, %v8506_v51  }
0x1394   : > { %7192 = vperm.xlu1 %8864, %v8495_v28  }
0x1397   : > { %7177 = vperm.xlu0 %8863, %v8492_v3  }
0x1398   : > { %7289 = vperm.xlu1 %8864, %v8507_v22   ;;  %v14365_v22 = vld [vmem:[#allocation38_spill] sm:$0xff] }
0x139b   : > { %7274 = vperm.xlu0 %8863, %v8504_v4  }
0x139c   : > { %7182 = vperm.xlu1 %8864, %v8493_v31   ;;  %v14368_v31 = vld [vmem:[#allocation17_spill] sm:$0xff] }
0x139f   : > { %7515 = vperm.xlu0 %8863, %v7481_v15  }
0x13a0   : > { %7279 = vperm.xlu1 %8864, %v8505_v49   ;;  %v8886_v49 = vld [vmem:[%s14091_s10 + $0x38] sm:$0xff]  }
0x13a3   : > { %7505 = vperm.xlu0 %8863, %v7479_v25  }
0x13a4   : > { %7520 = vperm.xlu1 %8864, %v7482_v56  }
0x13a7   : > { %7495 = vperm.xlu0 %8863, %v7477_v55  }
0x13a8   : > { %7510 = vperm.xlu1 %8864, %v7480_v45  }
0x13ab   : > { %7485 = vperm.xlu0 %8863, %v7475_v24  }
0x13ac   : > { %7500 = vperm.xlu1 %8864, %v7478_v46  }
0x13af   : > { %7836 = vperm.xlu0 %8863, %v7833_v41  }
0x13b0   : > { %7490 = vperm.xlu1 %8864, %v7476_v2  }
0x13ec   : > { %v6903_v29 = vpop.xlane.xlu0 %6902 }
0x13ed   : > { %v6927_v37 = vmul.f32 0.0625, %v6903_v29 }
0x13ee   : > { %v6900_v16 = vpop.xlane.xlu1 %6899 }
0x13ef   : > { %v6926_v57 = vmul.f32 0.0625, %v6900_v16  ;;  %v6935_v53 = vmul.f32 %v6927_v37, %v6927_v37  ;;  %v6947_v43 = vsub.f32 %v13687_v30, %v6927_v37  ;;  %v8885_v30 = vld [vmem:[%s14091_s10 + $0x30] sm:$0xff]  }
0x13f1   : > { %v6934_v60 = vmul.f32 %v6926_v57, %v6926_v57  ;;  %v6946_v35 = vsub.f32 %v13691_v38, %v6926_v57  ;;  %v14367_v38 = vld [vmem:[#allocation32_spill] sm:$0xff] }
0x13f2   : > { %v7265_v15 = vpack.c.bf16 %v14368_v31, %v14367_v38 }
0x13f6   : > { %v6909_v52 = vpop.xlane.xlu0 %6908 }
0x13f7   : > { %v6929_v11 = vmul.f32 0.0625, %v6909_v52 }
0x13f8   : > { %v6906_v50 = vpop.xlane.xlu1 %6905 }
0x13f9   : > { %v6928_v61 = vmul.f32 0.0625, %v6906_v50  ;;  %v6937_v63 = vmul.f32 %v6929_v11, %v6929_v11  ;;  %v6949_v19 = vsub.f32 %v13695_v9, %v6929_v11  ;;  %v14366_v9 = vld [vmem:[#allocation30_spill] sm:$0xff] }
0x13fa   : > { %v6925_v54 = vpop.xlane.xlu0 %6924  ;;  %v7266_v4 = vpack.c.bf16 %v14366_v9, %v14365_v22 }
0x13fb   : > { %v6933_v42 = vmul.f32 0.0625, %v6925_v54  ;;  %v6936_v59 = vmul.f32 %v6928_v61, %v6928_v61  ;;  %v6948_v33 = vsub.f32 %v13701_v20, %v6928_v61  ;;  %v8884_v20 = vld [vmem:[%s14087_s6 + $0x38] sm:$0xff]  }
0x13fc   : > { %v6922_v48 = vpop.xlane.xlu1 %6921 }
0x13fd   : > { %v6941_v62 = vsub.f32 %v6933_v42, %v6937_v63  ;;  %v6932_v26 = vmul.f32 0.0625, %v6922_v48 }
0x13fe   : > { %v6919_v34 = vpop.xlane.xlu0 %6918 }
0x13ff   : > { %v6945_v7 = vmax.f32 %v6941_v62, 0.0  ;;  %v6940_v1 = vsub.f32 %v6932_v26, %v6936_v59  ;;  %v6931_v58 = vmul.f32 0.0625, %v6919_v34 }
0x1400   : > { %v6916_v5 = vpop.xlane.xlu1 %6915 }
0x1401   : > { %v6953_v17 = vadd.f32 1e-05, %v6945_v7  ;;  %v6944_v44 = vmax.f32 %v6940_v1, 0.0  ;;  %v6939_v14 = vsub.f32 %v6931_v58, %v6935_v53  ;;  %v6930_v0 = vmul.f32 0.0625, %v6916_v5 }
0x1403   : > { %9045 = vrsqrt.f32 %v6953_v17  ;;  %v6952_v32 = vadd.f32 1e-05, %v6944_v44  ;;  %v6943_v13 = vmax.f32 %v6939_v14, 0.0  ;;  %v6938_v27 = vsub.f32 %v6930_v0, %v6934_v60 }
0x1404   : > { %v6987_v25 = vpop.permute.xlu1 %6986 }
0x1405   : > { %9047 = vrsqrt.f32 %v6952_v32  ;;  %v6951_v47 = vadd.f32 1e-05, %v6943_v13  ;;  %v6942_v23 = vmax.f32 %v6938_v27, 0.0 }
0x1406   : > { %v6992_v29 = vpop.permute.xlu0 %6991 }
0x1407   : > { %9049 = vrsqrt.f32 %v6951_v47  ;;  %v6950_v40 = vadd.f32 1e-05, %v6942_v23 }
0x1408   : > { %v6977_v55 = vpop.permute.xlu1 %6976 }
0x1409   : > { %9051 = vrsqrt.f32 %v6950_v40 }
0x140c   : > { %v6982_v61 = vpop.permute.xlu1 %6981 }
0x1410   : > { %v9046_v12 = vpop.eup %9045 }
0x1411   : > { %v6961_v21 = vmul.f32 %v9046_v12, %v6949_v19 }
0x1412   : > { %v9048_v6 = vpop.eup %9047 }
0x1413   : > { %v6960_v36 = vmul.f32 %v9048_v6, %v6948_v33 }
0x1414   : > { %v9050_v39 = vpop.eup %9049 }
0x1415   : > { %v6968_v8 = vpack.c.bf16 %v6961_v21, %v6960_v36  ;;  %v6959_v28 = vmul.f32 %v9050_v39, %v6947_v43 }
0x1416   : > { %v9052_v10 = vpop.eup %9051 }
0x1417   : > { %8772 = vmatprep.subr.bf16.mxu0 %v6968_v8  ;;  %v6958_v51 = vmul.f32 %v9052_v10, %v6946_v35 }
0x1418   : > { %8773 = vmatpush3.bf16.msra.mxu0 %v6968_v8 }
0x1419   : > { %v6967_v3 = vpack.c.bf16 %v6959_v28, %v6958_v51 }
0x141b   : > { %8774 = vmatprep.subr.bf16.mxu0 %v6967_v3 }
0x141c   : > { %8775 = vmatpush3.bf16.msra.mxu0 %v6967_v3 }
0x141d   : > { %8788 = vmatprep.subr.bf16.mxu0 %v7266_v4 }
0x141f   : > { %8777 = vmatmul.mubr.msk.bf16.vlgmr.msra.gmra.mxu0 %vm1925_vm2, %v8884_v20 }
0x1420   : > { %8789 = vmatpush3.bf16.msra.mxu0 %v7266_v4  ;;  %8792 = vmatprep.mubr.msk.bf16.mxu0 %vm1925_vm2, %v8885_v30 }
0x1421   : > { %8790 = vmatprep.subr.bf16.mxu0 %v7265_v15 }
0x1424   : > { %8791 = vmatpush3.bf16.msra.mxu0 %v7265_v15 }
0x1427   : > { %8793 = vmatmul.mubr.msk.bf16.vlgmr.msra.gmra.mxu0 %vm1925_vm2, %v8886_v49 }
0x14df   : > { %v8778_v56 = vpop.f32.mrf.mxu0 }
0x14e0   : > { %v13806_v45 = vadd.f32 %v8778_v56, %v6987_v25 }
0x14e1   : > { %v7044_v24 = vpop.f32.mrf.mxu0 }
0x14e2   : > { %v13809_v46 = vmul.f32 0.70710677, %v13806_v45  ;;  %v13811_v41 = vadd.f32 %v7044_v24, %v6977_v55 }
0x14e3   : > { %v8779_v2 = vpop.f32.mrf.mxu0 }
0x14e4   : > { %v7069_v16 = vand.u32 2147483647, %v13809_v46  ;;  %v13815_v52 = vmul.f32 0.70710677, %v13811_v41  ;;  %v13817_v11 = vadd.f32 %v8779_v2, %v6992_v29  ;;  %vm7145_vm0 = vcmp.lt.f32.partialorder %v13809_v46, 0.0 }
0x14e5   : > { %v7047_v50 = vpop.f32.mrf.mxu0 }
0x14e6   : > { %v7073_v54 = vmul.f32 0.3275911, %v7069_v16  ;;  %v7067_v37 = vand.u32 2147483647, %v13815_v52  ;;  %v13821_v63 = vmul.f32 0.70710677, %v13817_v11  ;;  %v13823_v42 = vadd.f32 %v7047_v50, %v6982_v61 }
0x14e7   : > { %v7121_v60 = vsub.f32 0.0, %v7069_v16  ;;  %vm7143_vm1 = vcmp.lt.f32.partialorder %v13815_v52, 0.0  ;;  %v7059_v52 = vmul.f32 0.5, %v13811_v41  ;;  %v8889_v41 = vld [vmem:[%s14093_s12] sm:$0xff]  }
0x14e8   : > { %v7077_v57 = vadd.f32 1.0, %v7073_v54  ;;  %v7071_v48 = vmul.f32 0.3275911, %v7067_v37  ;;  %v7070_v59 = vand.u32 2147483647, %v13821_v63  ;;  %v7119_v5 = vsub.f32 0.0, %v7067_v37 }
0x14e9   : > { %v13827_v62 = vmul.f32 0.70710677, %v13823_v42  ;;  %v7125_v17 = vmul.f32 %v7121_v60, %v7069_v16  ;;  %vm7146_vm14 = vcmp.lt.f32.partialorder %v13821_v63, 0.0 }
0x14ea   : > { %9053 = vrcp.f32 %v7077_v57  ;;  %v7075_v26 = vadd.f32 1.0, %v7071_v48  ;;  %v7074_v34 = vmul.f32 0.3275911, %v7070_v59  ;;  %v7122_v44 = vsub.f32 0.0, %v7070_v59 }
0x14eb   : > { %v7068_v53 = vand.u32 2147483647, %v13827_v62  ;;  %v7123_v0 = vmul.f32 %v7119_v5, %v7067_v37  ;;  %v7131_v13 = vmul.f32 1.442695, %v7125_v17  ;;  %vm7144_vm15 = vcmp.lt.f32.partialorder %v13827_v62, 0.0  ;;  %v7193_v62 = vpop.permute.xlu1 %7192 }
0x14ec   : > { %9055 = vrcp.f32 %v7075_v26  ;;  %v7078_v7 = vadd.f32 1.0, %v7074_v34  ;;  %v7126_v47 = vmul.f32 %v7122_v44, %v7070_v59 }
0x14ed   : > { %v7072_v1 = vmul.f32 0.3275911, %v7068_v53  ;;  %v7120_v27 = vsub.f32 0.0, %v7068_v53  ;;  %v7127_v19 = vmul.f32 1.442695, %v7123_v0 }
0x14ee   : > { %9057 = vrcp.f32 %v7078_v7  ;;  %v7133_v43 = vmul.f32 1.442695, %v7126_v47 }
0x14ef   : > { %v7076_v58 = vadd.f32 1.0, %v7072_v1  ;;  %v7124_v36 = vmul.f32 %v7120_v27, %v7068_v53 }
0x14f1   : > { %9059 = vrcp.f32 %v7076_v58  ;;  %v7129_v22 = vmul.f32 1.442695, %v7124_v36  ;;  %v7062_v36 = vmul.f32 0.5, %v13817_v11  ;;  %v8888_v11 = vld [vmem:[%s14089_s8 + $0x38] sm:$0xff]  }
0x14f2   : > { %9061 = vpow2.f32 %v7131_v13 }
0x14f3   : > { %9063 = vpow2.f32 %v7127_v19 }
0x14f4   : > { %9065 = vpow2.f32 %v7133_v43 }
0x14f5   : > { %9067 = vpow2.f32 %v7129_v22 }
0x14f7   : > { %v9054_v14 = vpop.eup %9053 }
0x14f8   : > { %v7085_v32 = vmul.f32 1.0614054, %v9054_v14 }
0x14f9   : > { %v9056_v23 = vpop.eup %9055 }
0x14fa   : > { %v7089_v40 = vadd.f32 -1.4531521, %v7085_v32  ;;  %v7083_v12 = vmul.f32 1.0614054, %v9056_v23 }
0x14fb   : > { %v9058_v33 = vpop.eup %9057 }
0x14fc   : > { %v7093_v6 = vmul.f32 %v9054_v14, %v7089_v40  ;;  %v7087_v21 = vadd.f32 -1.4531521, %v7083_v12  ;;  %v7086_v39 = vmul.f32 1.0614054, %v9058_v33 }
0x14fe   : > { %v7097_v35 = vadd.f32 1.4214138, %v7093_v6  ;;  %v9060_v8 = vpop.eup %9059  ;;  %v7091_v10 = vmul.f32 %v9056_v23, %v7087_v21  ;;  %v7090_v51 = vadd.f32 -1.4531521, %v7086_v39  ;;  %v7061_v6 = vmul.f32 0.5, %v13806_v45 }
0x14ff   : > { %v7084_v3 = vmul.f32 1.0614054, %v9060_v8  ;;  %v9062_v50 = vpop.eup %9061 }
0x1500   : > { %v7101_v28 = vmul.f32 %v9054_v14, %v7097_v35  ;;  %v7095_v9 = vadd.f32 1.4214138, %v7091_v10  ;;  %v7094_v4 = vmul.f32 %v9058_v33, %v7090_v51  ;;  %v9064_v26 = vpop.eup %9063  ;;  %v7060_v10 = vmul.f32 0.5, %v13823_v42  ;;  %v7188_v42 = vpop.permute.xlu0 %7187 }
0x1501   : > { %v7088_v30 = vadd.f32 -1.4531521, %v7084_v3  ;;  %v9066_v58 = vpop.eup %9065 }
0x1502   : > { %v7105_v20 = vadd.f32 -0.28449672, %v7101_v28  ;;  %v7099_v38 = vmul.f32 %v9056_v23, %v7095_v9  ;;  %v7098_v31 = vadd.f32 1.4214138, %v7094_v4  ;;  %v9068_v0 = vpop.eup %9067  ;;  %v8794_v9 = vpop.f32.mrf.mxu0 }
0x1503   : > { %v7092_v49 = vmul.f32 %v9060_v8, %v7088_v30  ;;  %v7290_v4 = vpop.permute.xlu1 %7289 }
0x1504   : > { %v7109_v15 = vmul.f32 %v9054_v14, %v7105_v20  ;;  %v7103_v18 = vadd.f32 -0.28449672, %v7099_v38  ;;  %v7102_v25 = vmul.f32 %v9058_v33, %v7098_v31  ;;  %v7285_v22 = vpop.permute.xlu0 %7284  ;;  %v7342_v30 = vpop.f32.mrf.mxu0 }
0x1505   : > { %v7096_v55 = vadd.f32 1.4214138, %v7092_v49 }
0x1506   : > { %v7113_v56 = vadd.f32 0.2548296, %v7109_v15  ;;  %v7107_v24 = vmul.f32 %v9056_v23, %v7103_v18  ;;  %v7106_v2 = vadd.f32 -0.28449672, %v7102_v25  ;;  %v7351_v15 = vadd.f32 %v8794_v9, %v7285_v22  ;;  %v8795_v49 = vpop.f32.mrf.mxu0 }
0x1507   : > { %v7100_v16 = vmul.f32 %v9060_v8, %v7096_v55  ;;  %v7183_v31 = vpop.permute.xlu1 %7182 }
0x1508   : > { %v7117_v29 = vmul.f32 %v9054_v14, %v7113_v56  ;;  %v7111_v61 = vadd.f32 0.2548296, %v7107_v24  ;;  %v7110_v54 = vmul.f32 %v9058_v33, %v7106_v2  ;;  %v7178_v20 = vpop.permute.xlu0 %7177 }
0x1509   : > { %v7104_v57 = vadd.f32 -0.28449672, %v7100_v16  ;;  %v7345_v16 = vpop.f32.mrf.mxu0 }
0x150a   : > { %v7137_v37 = vmul.f32 %v9062_v50, %v7117_v29  ;;  %v7115_v48 = vmul.f32 %v9056_v23, %v7111_v61  ;;  %v7114_v59 = vadd.f32 0.2548296, %v7110_v54 }
0x150b   : > { %v7108_v53 = vmul.f32 %v9060_v8, %v7104_v57 }
0x150c   : > { %v7141_v34 = vsub.f32 1.0, %v7137_v37  ;;  %v7135_v7 = vmul.f32 %v9064_v26, %v7115_v48  ;;  %v7118_v1 = vmul.f32 %v9058_v33, %v7114_v59  ;;  %v7275_v25 = vpop.permute.xlu0 %7274  ;;  %v7354_v37 = vadd.f32 %v8795_v49, %v7290_v4  ;;  %v7280_v48 = vpop.permute.xlu1 %7279 }
0x150d   : > { %v7112_v5 = vadd.f32 0.2548296, %v7108_v53  ;;  %v7343_v55 = vadd.f32 %v7342_v30, %v7275_v25 }
0x150e   : > { %v7149_v60 = vsub.f32 0.0, %v7141_v34  ;;  %v7139_v17 = vsub.f32 1.0, %v7135_v7  ;;  %v7138_v44 = vmul.f32 %v9066_v58, %v7118_v1 }
0x150f   : > { %v7116_v14 = vmul.f32 %v9060_v8, %v7112_v5 }
0x1510   : > { %v7153_v32 = vsel %vm7145_vm0, %v7149_v60, %v7141_v34  ;;  %v7147_v13 = vsub.f32 0.0, %v7139_v17  ;;  %v7142_v27 = vsub.f32 1.0, %v7138_v44  ;;  %v7346_v34 = vadd.f32 %v7345_v16, %v7280_v48 }
0x1511   : > { %v7136_v47 = vmul.f32 %v9068_v0, %v7116_v14  ;;  %v7157_v40 = vadd.f32 1.0, %v7153_v32 }
0x1512   : > { %v7150_v23 = vsub.f32 0.0, %v7142_v27  ;;  %v7151_v12 = vsel %vm7143_vm1, %v7147_v13, %v7139_v17  ;;  %vm7839_vm1 = vcmask 523264  }
0x1513   : > { %v7140_v19 = vsub.f32 1.0, %v7136_v47  ;;  %v7155_v39 = vadd.f32 1.0, %v7151_v12  ;;  %v7161_v43 = vmul.f32 %v7157_v40, %v7061_v6 }
0x1514   : > { %v7154_v33 = vsel %vm7146_vm14, %v7150_v23, %v7142_v27  ;;  %vm7883_vm14 = vcmask 125952  }
0x1515   : > { %v7158_v46 = vadd.f32 1.0, %v7154_v33  ;;  %v7148_v21 = vsub.f32 0.0, %v7140_v19  ;;  %v7159_v28 = vmul.f32 %v7155_v39, %v7059_v52 }
0x1517   : > { %v7162_v35 = vmul.f32 %v7158_v46, %v7062_v36  ;;  %v7152_v8 = vsel %vm7144_vm15, %v7148_v21, %v7140_v19 }
0x1518   : > { %v7156_v51 = vadd.f32 1.0, %v7152_v8 }
0x1519   : > { %v7169_v63 = vpack.c.bf16 %v7162_v35, %v7161_v43 }
0x151a   : > { %v7160_v3 = vmul.f32 %v7156_v51, %v7060_v10 }
0x151b   : > { %8780 = vmatprep.subr.bf16.mxu1 %v7169_v63 }
0x151c   : > { %8781 = vmatpush3.bf16.msra.mxu1 %v7169_v63  ;;  %v7168_v45 = vpack.c.bf16 %v7160_v3, %v7159_v28 }
0x151e   : > { %8782 = vmatprep.subr.bf16.mxu1 %v7168_v45 }
0x1520   : > { %8783 = vmatpush3.bf16.msra.mxu1 %v7168_v45 }
0x1523   : > { %8785 = vmatmul.mubr.msk.bf16.vlgmr.msra.gmra.mxu1 %vm1925_vm2, %v8888_v11 }
0x1524   : > { %8800 = vmatprep.mubr.msk.bf16.mxu1 %vm1925_vm2, %v8889_v41 }
0x15e3   : > { %v8786_v38 = vpop.f32.mrf.mxu1 }
0x15e4   : > { %v7254_v18 = vadd.f32 %v8786_v38, %v7188_v42 }
0x15e5   : > { %v7245_v56 = vpop.f32.mrf.mxu1 }
0x15e6   : > { %v13846_v24 = vadd.f32 %v7351_v15, %v7254_v18  ;;  %v7246_v2 = vadd.f32 %v7245_v56, %v7178_v20 }
0x15e7   : > { %v8787_v29 = vpop.f32.mrf.mxu1 }
0x15e8   : > { %v13849_v50 = vmul.f32 0.70710677, %v13846_v24  ;;  %v13851_v61 = vadd.f32 %v7343_v55, %v7246_v2  ;;  %v7257_v54 = vadd.f32 %v8787_v29, %v7193_v62 }
0x15e9   : > { %v7248_v57 = vpop.f32.mrf.mxu1 }
0x15ea   : > { %v7371_v59 = vand.u32 2147483647, %v13849_v50  ;;  %v13855_v26 = vmul.f32 0.70710677, %v13851_v61  ;;  %v13857_v53 = vadd.f32 %v7354_v37, %v7257_v54  ;;  %v7249_v7 = vadd.f32 %v7248_v57, %v7183_v31 }
0x15eb   : > { %vm7447_vm3 = vcmp.lt.f32.partialorder %v13849_v50, 0.0 }
0x15ec   : > { %v7375_v1 = vmul.f32 0.3275911, %v7371_v59  ;;  %v7369_v58 = vand.u32 2147483647, %v13855_v26  ;;  %v13861_v60 = vmul.f32 0.70710677, %v13857_v53  ;;  %v13863_v5 = vadd.f32 %v7346_v34, %v7249_v7 }
0x15ed   : > { %v7423_v12 = vsub.f32 0.0, %v7371_v59  ;;  %vm7445_vm4 = vcmp.lt.f32.partialorder %v13855_v26, 0.0  ;;  %v7361_v26 = vmul.f32 0.5, %v13851_v61  ;;  %v8892_v61 = vld [vmem:[%s14093_s12 + $0x18] sm:$0xff]  }
0x15ee   : > { %v7379_v17 = vadd.f32 1.0, %v7375_v1  ;;  %v7373_v44 = vmul.f32 0.3275911, %v7369_v58  ;;  %v7372_v14 = vand.u32 2147483647, %v13861_v60  ;;  %v7421_v19 = vsub.f32 0.0, %v7369_v58 }
0x15ef   : > { %v13867_v0 = vmul.f32 0.70710677, %v13863_v5  ;;  %v7427_v33 = vmul.f32 %v7423_v12, %v7371_v59  ;;  %vm7448_vm5 = vcmp.lt.f32.partialorder %v13861_v60, 0.0  ;;  %v7362_v60 = vmul.f32 0.5, %v13863_v5 }
0x15f0   : > { %9069 = vrcp.f32 %v7379_v17  ;;  %v7377_v32 = vadd.f32 1.0, %v7373_v44  ;;  %v7376_v13 = vmul.f32 0.3275911, %v7372_v14  ;;  %v7424_v6 = vsub.f32 0.0, %v7372_v14 }
0x15f1   : > { %v7370_v27 = vand.u32 2147483647, %v13867_v0  ;;  %v7425_v46 = vmul.f32 %v7421_v19, %v7369_v58  ;;  %v7433_v21 = vmul.f32 1.442695, %v7427_v33  ;;  %vm7446_vm6 = vcmp.lt.f32.partialorder %v13867_v0, 0.0  ;;  %v8891_v0 = vld [vmem:[%s14093_s12 + $0x10] sm:$0xff]  }
0x15f2   : > { %9071 = vrcp.f32 %v7377_v32  ;;  %v7380_v47 = vadd.f32 1.0, %v7376_v13  ;;  %v7428_v35 = vmul.f32 %v7424_v6, %v7372_v14  ;;  %v9190_v5 = vmov 0.0  }
0x15f3   : > { %v7374_v23 = vmul.f32 0.3275911, %v7370_v27  ;;  %v7422_v39 = vsub.f32 0.0, %v7370_v27  ;;  %v7429_v10 = vmul.f32 1.442695, %v7425_v46  ;;  %8808 = vmatprep.subr.bf16.mxu0 %v9190_v5  ;;  %8816 = vmatprep.mubr.msk.bf16.mxu0 %vm9191_vm7, %v9190_v5 }
0x15f4   : > { %9073 = vrcp.f32 %v7380_v47  ;;  %v7435_v45 = vmul.f32 1.442695, %v7428_v35 }
0x15f5   : > { %v7378_v40 = vadd.f32 1.0, %v7374_v23  ;;  %v7426_v28 = vmul.f32 %v7422_v39, %v7370_v27 }
0x15f7   : > { %9075 = vrcp.f32 %v7378_v40  ;;  %v7431_v4 = vmul.f32 1.442695, %v7426_v28  ;;  %v7363_v28 = vmul.f32 0.5, %v13846_v24 }
0x15f8   : > { %9077 = vpow2.f32 %v7433_v21 }
0x15f9   : > { %9079 = vpow2.f32 %v7429_v10 }
0x15fa   : > { %9081 = vpow2.f32 %v7435_v45 }
0x15fb   : > { %9083 = vpow2.f32 %v7431_v4 }
0x15fd   : > { %v9070_v36 = vpop.eup %9069 }
0x15fe   : > { %v7387_v43 = vmul.f32 1.0614054, %v9070_v36 }
0x15ff   : > { %v9072_v8 = vpop.eup %9071 }
0x1600   : > { %v7391_v52 = vadd.f32 -1.4531521, %v7387_v43  ;;  %v7385_v51 = vmul.f32 1.0614054, %v9072_v8 }
0x1601   : > { %v9074_v63 = vpop.eup %9073 }
0x1602   : > { %v7395_v3 = vmul.f32 %v9070_v36, %v7391_v52  ;;  %v7388_v11 = vmul.f32 1.0614054, %v9074_v63  ;;  %v7389_v41 = vadd.f32 -1.4531521, %v7385_v51 }
0x1604   : > { %v7399_v42 = vadd.f32 1.4214138, %v7395_v3  ;;  %v9076_v62 = vpop.eup %9075  ;;  %v7392_v22 = vadd.f32 -1.4531521, %v7388_v11  ;;  %v7393_v9 = vmul.f32 %v9072_v8, %v7389_v41  ;;  %v7364_v3 = vmul.f32 0.5, %v13857_v53  ;;  %v8890_v53 = vld [vmem:[%s14093_s12 + $0x8] sm:$0xff]  }
0x1605   : > { %v7386_v30 = vmul.f32 1.0614054, %v9076_v62  ;;  %v9078_v34 = vpop.eup %9077 }
0x1606   : > { %v7403_v20 = vmul.f32 %v9070_v36, %v7399_v42  ;;  %v7396_v38 = vmul.f32 %v9074_v63, %v7392_v22  ;;  %v7397_v31 = vadd.f32 1.4214138, %v7393_v9  ;;  %v9080_v32 = vpop.eup %9079 }
0x1607   : > { %v7390_v49 = vadd.f32 -1.4531521, %v7386_v30  ;;  %v9082_v40 = vpop.eup %9081  ;;  %v7516_v30 = vpop.permute.xlu0 %7515 }
0x1608   : > { %v7407_v15 = vadd.f32 -0.28449672, %v7403_v20  ;;  %v7400_v18 = vadd.f32 1.4214138, %v7396_v38  ;;  %v7401_v25 = vmul.f32 %v9072_v8, %v7397_v31  ;;  %v9084_v46 = vpop.eup %9083  ;;  %v7521_v38 = vpop.permute.xlu1 %7520 }
0x1609   : > { %v7394_v55 = vmul.f32 %v9076_v62, %v7390_v49 }
0x160a   : > { %v7411_v56 = vmul.f32 %v9070_v36, %v7407_v15  ;;  %v7404_v2 = vmul.f32 %v9074_v63, %v7400_v18  ;;  %v7405_v29 = vadd.f32 -0.28449672, %v7401_v25 }
0x160b   : > { %v7398_v54 = vadd.f32 1.4214138, %v7394_v55  ;;  %v7506_v31 = vpop.permute.xlu0 %7505 }
0x160c   : > { %v7415_v16 = vadd.f32 0.2548296, %v7411_v56  ;;  %v7408_v37 = vadd.f32 -0.28449672, %v7404_v2  ;;  %v7409_v57 = vmul.f32 %v9072_v8, %v7405_v29  ;;  %v7511_v15 = vpop.permute.xlu1 %7510 }
0x160d   : > { %v7402_v59 = vmul.f32 %v9076_v62, %v7398_v54 }
0x160e   : > { %v7419_v48 = vmul.f32 %v9070_v36, %v7415_v16  ;;  %v7412_v7 = vmul.f32 %v9074_v63, %v7408_v37  ;;  %v7413_v1 = vadd.f32 0.2548296, %v7409_v57 }
0x160f   : > { %v7406_v17 = vadd.f32 -0.28449672, %v7402_v59  ;;  %v7496_v49 = vpop.permute.xlu0 %7495 }
0x1610   : > { %v7439_v58 = vmul.f32 %v9078_v34, %v7419_v48  ;;  %v7416_v44 = vadd.f32 0.2548296, %v7412_v7  ;;  %v7417_v14 = vmul.f32 %v9072_v8, %v7413_v1  ;;  %v7501_v25 = vpop.permute.xlu1 %7500 }
0x1611   : > { %v7410_v27 = vmul.f32 %v9076_v62, %v7406_v17 }
0x1612   : > { %v7443_v13 = vsub.f32 1.0, %v7439_v58  ;;  %v7420_v47 = vmul.f32 %v9074_v63, %v7416_v44  ;;  %v7437_v23 = vmul.f32 %v9080_v32, %v7417_v14 }
0x1613   : > { %v7414_v19 = vadd.f32 0.2548296, %v7410_v27  ;;  %v7486_v55 = vpop.permute.xlu0 %7485 }
0x1614   : > { %v7451_v12 = vsub.f32 0.0, %v7443_v13  ;;  %v7440_v33 = vmul.f32 %v9082_v40, %v7420_v47  ;;  %v7441_v6 = vsub.f32 1.0, %v7437_v23  ;;  %v7491_v34 = vpop.permute.xlu1 %7490 }
0x1615   : > { %v7418_v36 = vmul.f32 %v9076_v62, %v7414_v19 }
0x1616   : > { %v7444_v21 = vsub.f32 1.0, %v7440_v33  ;;  %v7455_v39 = vsel %vm7447_vm3, %v7451_v12, %v7443_v13  ;;  %v7449_v43 = vsub.f32 0.0, %v7441_v6 }
0x1617   : > { %v7438_v35 = vmul.f32 %v9084_v46, %v7418_v36  ;;  %v7459_v52 = vadd.f32 1.0, %v7455_v39 }
0x1618   : > { %v7452_v8 = vsub.f32 0.0, %v7444_v21  ;;  %v7453_v51 = vsel %vm7445_vm4, %v7449_v43, %v7441_v6 }
0x1619   : > { %v7442_v10 = vsub.f32 1.0, %v7438_v35  ;;  %v7457_v11 = vadd.f32 1.0, %v7453_v51  ;;  %v7463_v41 = vmul.f32 %v7459_v52, %v7363_v28 }
0x161a   : > { %v7456_v63 = vsel %vm7448_vm5, %v7452_v8, %v7444_v21 }
0x161b   : > { %v7460_v50 = vadd.f32 1.0, %v7456_v63  ;;  %v7450_v45 = vsub.f32 0.0, %v7442_v10  ;;  %v7461_v4 = vmul.f32 %v7457_v11, %v7361_v26 }
0x161d   : > { %v7464_v42 = vmul.f32 %v7460_v50, %v7364_v3  ;;  %v7454_v62 = vsel %vm7446_vm6, %v7450_v45, %v7442_v10 }
0x161e   : > { %v7458_v22 = vadd.f32 1.0, %v7454_v62 }
0x161f   : > { %v7474_v9 = vpack.c.bf16 %v7464_v42, %v7463_v41 }
0x1620   : > { %v7462_v20 = vmul.f32 %v7458_v22, %v7362_v60 }
0x1621   : > { %8796 = vmatprep.subr.bf16.mxu1 %v7474_v9 }
0x1622   : > { %8797 = vmatpush3.bf16.msra.mxu1 %v7474_v9  ;;  %v7473_v24 = vpack.c.bf16 %v7462_v20, %v7461_v4 }
0x1624   : > { %8798 = vmatprep.subr.bf16.mxu1 %v7473_v24 }
0x1626   : > { %8799 = vmatpush3.bf16.msra.mxu1 %v7473_v24 }
0x1629   : > { %8801 = vmatmul.mubr.msk.bf16.vlgmr.msra.gmra.mxu1 %vm1925_vm2, %v8890_v53 }
0x162a   : > { %8804 = vmatprep.mubr.msk.bf16.mxu1 %vm1925_vm2, %v8891_v0 }
0x1631   : > { %8805 = vmatmul.mubr.msk.bf16.gmra.mxu1 %vm1925_vm2, %v8892_v61 }
0x16e9   : > { %v8802_v18 = vpop.f32.mrf.mxu1 }
0x16ea   : > { %v13892_v56 = vadd.f32 %v8802_v18, %v7496_v49 }
0x16eb   : > { %v7589_v2 = vpop.f32.mrf.mxu1 }
0x16ec   : > { %v13895_v29 = vmul.f32 0.70710677, %v13892_v56  ;;  %v13897_v16 = vadd.f32 %v7589_v2, %v7486_v55 }
0x16ed   : > { %v8803_v54 = vpop.f32.mrf.mxu1 }
0x16ee   : > { %v7638_v37 = vand.u32 2147483647, %v13895_v29  ;;  %v13901_v57 = vmul.f32 0.70710677, %v13897_v16  ;;  %v13903_v48 = vadd.f32 %v8803_v54, %v7501_v25  ;;  %vm7790_vm11 = vcmp.lt.f32.partialorder %v13895_v29, 0.0 }
0x16ef   : > { %v7592_v59 = vpop.f32.mrf.mxu1 }
0x16f0   : > { %v7646_v7 = vmul.f32 0.3275911, %v7638_v37  ;;  %v13906_v1 = vand.u32 2147483647, %v13901_v57  ;;  %v13909_v58 = vmul.f32 0.70710677, %v13903_v48  ;;  %v13911_v17 = vadd.f32 %v7592_v59, %v7491_v34 }
0x16f1   : > { %v8806_v44 = vpop.f32.mrf.mxu1  ;;  %v7742_v4 = vsub.f32 0.0, %v7638_v37  ;;  %vm7788_vm0 = vcmp.lt.f32.partialorder %v13901_v57, 0.0 }
0x16f2   : > { %v7654_v14 = vadd.f32 1.0, %v7646_v7  ;;  %v7644_v32 = vmul.f32 0.3275911, %v13906_v1  ;;  %v7639_v13 = vand.u32 2147483647, %v13909_v58  ;;  %v13921_v33 = vadd.f32 %v8806_v44, %v7516_v30 }
0x16f3   : > { %v13916_v27 = vmul.f32 0.70710677, %v13911_v17  ;;  %v7605_v47 = vpop.f32.mrf.mxu1  ;;  %vm7791_vm8 = vcmp.lt.f32.partialorder %v13909_v58, 0.0  ;;  %v7621_v57 = vmul.f32 0.5, %v13911_v17 }
0x16f4   : > { %9085 = vrcp.f32 %v7654_v14  ;;  %v7652_v23 = vadd.f32 1.0, %v7644_v32  ;;  %v7647_v40 = vmul.f32 0.3275911, %v7639_v13  ;;  %v13923_v6 = vadd.f32 %v7605_v47, %v7506_v31 }
0x16f5   : > { %v13919_v12 = vand.u32 2147483647, %v13916_v27  ;;  %v8807_v19 = vpop.f32.mrf.mxu1  ;;  %v13927_v21 = vmul.f32 0.70710677, %v13921_v33  ;;  %v7743_v31 = vsub.f32 0.0, %v7639_v13  ;;  %vm7789_vm12 = vcmp.lt.f32.partialorder %v13916_v27, 0.0 }
0x16f6   : > { %9087 = vrcp.f32 %v7652_v23  ;;  %v7655_v36 = vadd.f32 1.0, %v7647_v40  ;;  %v13931_v8 = vmul.f32 0.70710677, %v13923_v6  ;;  %v13933_v52 = vadd.f32 %v8807_v19, %v7521_v38 }
0x16f7   : > { %v7645_v46 = vmul.f32 0.3275911, %v13919_v12  ;;  %v7608_v43 = vpop.f32.mrf.mxu1  ;;  %v7642_v35 = vand.u32 2147483647, %v13927_v21  ;;  %v7751_v7 = vmul.f32 %v7743_v31, %v7639_v13  ;;  %v7741_v32 = vsub.f32 0.0, %v13919_v12 }
0x16f8   : > { %9089 = vrcp.f32 %v7655_v36  ;;  %v13935_v51 = vadd.f32 %v7608_v43, %v7511_v15  ;;  %v7640_v63 = vand.u32 2147483647, %v13931_v8  ;;  %v13939_v28 = vmul.f32 0.70710677, %v13933_v52 }
0x16f9   : > { %v7653_v39 = vadd.f32 1.0, %v7645_v46  ;;  %v7650_v10 = vmul.f32 0.3275911, %v7642_v35  ;;  %v7746_v61 = vsub.f32 0.0, %v7642_v35  ;;  %v7750_v15 = vmul.f32 %v7742_v4, %v7638_v37 }
0x16fa   : > { %v7648_v50 = vmul.f32 0.3275911, %v7640_v63  ;;  %v7643_v45 = vand.u32 2147483647, %v13939_v28  ;;  %v13943_v11 = vmul.f32 0.70710677, %v13935_v51 }
0x16fb   : > { %9091 = vrcp.f32 %v7653_v39  ;;  %v7658_v3 = vadd.f32 1.0, %v7650_v10  ;;  %v7744_v55 = vsub.f32 0.0, %v7640_v63  ;;  %v7754_v59 = vmul.f32 %v7746_v61, %v7642_v35 }
0x16fc   : > { %v7656_v42 = vadd.f32 1.0, %v7648_v50  ;;  %v7651_v62 = vmul.f32 0.3275911, %v7643_v45  ;;  %v13949_v60 = vand.u32 2147483647, %v13943_v11  ;;  %v7747_v19 = vsub.f32 0.0, %v7643_v45 }
0x16fd   : > { %9093 = vrcp.f32 %v7658_v3  ;;  %v7760_v44 = vmul.f32 1.442695, %v7750_v15  ;;  %v7752_v40 = vmul.f32 %v7744_v55, %v7640_v63  ;;  %v7768_v43 = vmul.f32 1.442695, %v7754_v59 }
0x16fe   : > { %9095 = vrcp.f32 %v7656_v42  ;;  %v7659_v22 = vadd.f32 1.0, %v7651_v62  ;;  %v7649_v20 = vmul.f32 0.3275911, %v13949_v60  ;;  %v7740_v35 = vsub.f32 0.0, %v13906_v1 }
0x16ff   : > { %v7762_v10 = vmul.f32 1.442695, %v7751_v7  ;;  %v7749_v42 = vmul.f32 %v7741_v32, %v13919_v12  ;;  %v7755_v4 = vmul.f32 %v7747_v19, %v7643_v45  ;;  %vm7794_vm2 = vcmp.lt.f32.partialorder %v13927_v21, 0.0 }
0x1700   : > { %9097 = vrcp.f32 %v7659_v22  ;;  %v7657_v30 = vadd.f32 1.0, %v7649_v20  ;;  %v7764_v22 = vmul.f32 1.442695, %v7752_v40  ;;  %vm7795_vm9 = vcmp.lt.f32.partialorder %v13939_v28, 0.0 }
0x1701   : > { %v13945_v41 = vpop.eup %9085  ;;  %v7758_v15 = vmul.f32 1.442695, %v7749_v42  ;;  %vm7792_vm10 = vcmp.lt.f32.partialorder %v13931_v8, 0.0  ;;  %vm7793_vm13 = vcmp.lt.f32.partialorder %v13943_v11, 0.0  ;;  %v7625_v58 = vmul.f32 0.5, %v13935_v51 }
0x1702   : > { %v7670_v26 = vmul.f32 1.0614054, %v13945_v41  ;;  %9099 = vrcp.f32 %v7657_v30  ;;  %v7748_v30 = vmul.f32 %v7740_v35, %v13906_v1  ;;  %v7623_v27 = vmul.f32 0.5, %v13903_v48 }
0x1703   : > { %v13951_v9 = vpop.eup %9087  ;;  %9101 = vpow2.f32 %v7760_v44  ;;  %v7620_v48 = vmul.f32 0.5, %v13897_v16  ;;  %v7837_v16 = vpop.permute.xlu0 %7836 }
0x1704   : > { %v7678_v24 = vadd.f32 -1.4531521, %v7670_v26  ;;  %v7668_v0 = vmul.f32 1.0614054, %v13951_v9  ;;  %9103 = vpow2.f32 %v7768_v43  ;;  %v7756_v44 = vmul.f32 1.442695, %v7748_v30 }
0x1705   : > { %v13954_v53 = vpop.eup %9089  ;;  %9105 = vpow2.f32 %v7762_v10 }
0x1706   : > { %v7671_v38 = vmul.f32 1.0614054, %v13954_v53  ;;  %v7686_v18 = vmul.f32 %v13945_v41, %v7678_v24  ;;  %v7676_v2 = vadd.f32 -1.4531521, %v7668_v0  ;;  %v7745_v0 = vsub.f32 0.0, %v13949_v60 }
0x1707   : > { %9107 = vpow2.f32 %v7764_v22 }
0x1708   : > { %v13958_v49 = vpop.eup %9091  ;;  %v7679_v25 = vadd.f32 -1.4531521, %v7671_v38  ;;  %v7694_v37 = vadd.f32 1.4214138, %v7686_v18  ;;  %v7684_v36 = vmul.f32 %v13951_v9, %v7676_v2  ;;  %v7753_v7 = vmul.f32 %v7745_v0, %v13949_v60 }
0x1709   : > { %v7669_v54 = vmul.f32 1.0614054, %v13958_v49  ;;  %9109 = vpow2.f32 %v7758_v15 }
0x170a   : > { %v7687_v34 = vmul.f32 %v13954_v53, %v7679_v25  ;;  %v13964_v47 = vpop.eup %9093  ;;  %v7702_v62 = vmul.f32 %v13945_v41, %v7694_v37  ;;  %v7692_v20 = vadd.f32 1.4214138, %v7684_v36 }
0x170b   : > { %v7677_v14 = vadd.f32 -1.4531521, %v7669_v54  ;;  %v7674_v39 = vmul.f32 1.0614054, %v13964_v47  ;;  %v13971_v3 = vpop.eup %9095  ;;  %v7770_v54 = vmul.f32 1.442695, %v7755_v4 }
0x170c   : > { %v7695_v23 = vadd.f32 1.4214138, %v7687_v34  ;;  %v7672_v26 = vmul.f32 1.0614054, %v13971_v3  ;;  %v7710_v55 = vadd.f32 -0.28449672, %v7702_v62  ;;  %v7700_v59 = vmul.f32 %v13951_v9, %v7692_v20 }
0x170d   : > { %v7685_v46 = vmul.f32 %v13958_v49, %v7677_v14  ;;  %v7682_v63 = vadd.f32 -1.4531521, %v7674_v39  ;;  %v13978_v61 = vpop.eup %9097  ;;  %9111 = vpow2.f32 %v7770_v54 }
0x170e   : > { %v7703_v13 = vmul.f32 %v13954_v53, %v7695_v23  ;;  %v7680_v12 = vadd.f32 -1.4531521, %v7672_v26  ;;  %v7675_v25 = vmul.f32 1.0614054, %v13978_v61  ;;  %v7718_v36 = vmul.f32 %v13945_v41, %v7710_v55 }
0x170f   : > { %v7693_v50 = vadd.f32 1.4214138, %v7685_v46  ;;  %v7690_v24 = vmul.f32 %v13964_v47, %v7682_v63  ;;  %v13983_v45 = vpop.eup %9099  ;;  %v7708_v43 = vadd.f32 -0.28449672, %v7700_v59  ;;  %9113 = vpow2.f32 %v7756_v44 }
0x1710   : > { %v7711_v38 = vadd.f32 -0.28449672, %v7703_v13  ;;  %v7688_v2 = vmul.f32 %v13971_v3, %v7680_v12  ;;  %v7683_v34 = vadd.f32 -1.4531521, %v7675_v25  ;;  %v7673_v37 = vmul.f32 1.0614054, %v13983_v45  ;;  %v9102_v22 = vpop.eup %9101 }
0x1711   : > { %v7701_v31 = vmul.f32 %v13958_v49, %v7693_v50  ;;  %v7698_v18 = vadd.f32 1.4214138, %v7690_v24  ;;  %v7766_v13 = vmul.f32 1.442695, %v7753_v7  ;;  %v7726_v4 = vadd.f32 0.2548296, %v7718_v36 }
0x1712   : > { %v7719_v14 = vmul.f32 %v13954_v53, %v7711_v38  ;;  %v7696_v32 = vadd.f32 1.4214138, %v7688_v2  ;;  %v7691_v19 = vmul.f32 %v13978_v61, %v7683_v34  ;;  %v7681_v39 = vadd.f32 -1.4531521, %v7673_v37  ;;  %v9104_v38 = vpop.eup %9103 }
0x1713   : > { %v7706_v1 = vmul.f32 %v13964_v47, %v7698_v18  ;;  %v7709_v23 = vadd.f32 -0.28449672, %v7701_v31  ;;  %v7716_v24 = vmul.f32 %v13951_v9, %v7708_v43  ;;  %9115 = vpow2.f32 %v7766_v13  ;;  %v9106_v18 = vpop.eup %9105 }
0x1714   : > { %v7704_v46 = vmul.f32 %v13971_v3, %v7696_v32  ;;  %v7699_v35 = vadd.f32 1.4214138, %v7691_v19  ;;  %v7727_v10 = vadd.f32 0.2548296, %v7719_v14  ;;  %v7689_v26 = vmul.f32 %v13983_v45, %v7681_v39  ;;  %v9108_v34 = vpop.eup %9107 }
0x1715   : > { %v7714_v40 = vadd.f32 -0.28449672, %v7706_v1  ;;  %v7717_v42 = vmul.f32 %v13958_v49, %v7709_v23  ;;  %v7734_v2 = vmul.f32 %v13945_v41, %v7726_v4 }
0x1716   : > { %v7712_v50 = vadd.f32 -0.28449672, %v7704_v46  ;;  %v7707_v62 = vmul.f32 %v13978_v61, %v7699_v35  ;;  %v7735_v12 = vmul.f32 %v13954_v53, %v7727_v10  ;;  %v7697_v15 = vadd.f32 1.4214138, %v7689_v26  ;;  %v9110_v23 = vpop.eup %9109 }
0x1717   : > { %v7722_v60 = vmul.f32 %v13964_v47, %v7714_v40  ;;  %v7725_v25 = vadd.f32 0.2548296, %v7717_v42  ;;  %v7774_v40 = vmul.f32 %v9102_v22, %v7734_v2 }
0x1718   : > { %v7720_v20 = vmul.f32 %v13971_v3, %v7712_v50  ;;  %v7715_v30 = vadd.f32 -0.28449672, %v7707_v62  ;;  %v7705_v1 = vmul.f32 %v13983_v45, %v7697_v15  ;;  %v7775_v44 = vmul.f32 %v9106_v18, %v7735_v12 }
0x1719   : > { %v7730_v63 = vadd.f32 0.2548296, %v7722_v60  ;;  %v7733_v37 = vmul.f32 %v13958_v49, %v7725_v25  ;;  %v7782_v50 = vsub.f32 1.0, %v7774_v40 }
0x171a   : > { %v7728_v31 = vadd.f32 0.2548296, %v7720_v20  ;;  %v7723_v59 = vmul.f32 %v13978_v61, %v7715_v30  ;;  %v7713_v53 = vadd.f32 -0.28449672, %v7705_v1  ;;  %v9112_v36 = vpop.eup %9111  ;;  %v7783_v43 = vsub.f32 1.0, %v7775_v44 }
0x171b   : > { %v7738_v0 = vmul.f32 %v13964_v47, %v7730_v63  ;;  %v7724_v47 = vadd.f32 0.2548296, %v7716_v24  ;;  %v7773_v13 = vmul.f32 %v9110_v23, %v7733_v37  ;;  %v7627_v30 = vmul.f32 0.5, %v13933_v52 }
0x171c   : > { %v7736_v54 = vmul.f32 %v13971_v3, %v7728_v31  ;;  %v7731_v32 = vadd.f32 0.2548296, %v7723_v59  ;;  %v7721_v3 = vmul.f32 %v13983_v45, %v7713_v53  ;;  %v9114_v35 = vpop.eup %9113  ;;  %v7799_v22 = vsub.f32 0.0, %v7783_v43 }
0x171d   : > { %v7778_v55 = vmul.f32 %v9104_v38, %v7738_v0  ;;  %v7732_v46 = vmul.f32 %v13951_v9, %v7724_v47  ;;  %v7626_v9 = vmul.f32 0.5, %v13921_v33  ;;  %v7781_v20 = vsub.f32 1.0, %v7773_v13 }
0x171e   : > { %v7776_v14 = vmul.f32 %v9108_v34, %v7736_v54  ;;  %v7739_v41 = vmul.f32 %v13978_v61, %v7731_v32  ;;  %v7729_v10 = vadd.f32 0.2548296, %v7721_v3  ;;  %v7798_v0 = vsub.f32 0.0, %v7782_v50  ;;  %v7828_v3 = vld [vmem:[%s14095_s14] sm:$0x3] }
0x171f   : > { %v7786_v7 = vsub.f32 1.0, %v7778_v55  ;;  %v7772_v63 = vmul.f32 %v9114_v35, %v7732_v46  ;;  %v7807_v18 = vsel %vm7791_vm8, %v7799_v22, %v7783_v43  ;;  %v7797_v33 = vsub.f32 0.0, %v7781_v20 }
0x1720   : > { %v7784_v39 = vsub.f32 1.0, %v7776_v14  ;;  %v7779_v60 = vmul.f32 %v9112_v36, %v7739_v41  ;;  %v7737_v61 = vmul.f32 %v13983_v45, %v7729_v10  ;;  %v9116_v26 = vpop.eup %9115  ;;  %v7806_v8 = vsel %vm7790_vm11, %v7798_v0, %v7782_v50 }
0x1721   : > { %v7802_v19 = vsub.f32 0.0, %v7786_v7  ;;  %v7780_v12 = vsub.f32 1.0, %v7772_v63  ;;  %v7815_v1 = vadd.f32 1.0, %v7807_v18  ;;  %v7624_v34 = vmul.f32 0.5, %v13923_v6 }
0x1722   : > { %v7787_v42 = vsub.f32 1.0, %v7779_v60  ;;  %v7800_v62 = vsub.f32 0.0, %v7784_v39  ;;  %v7777_v21 = vmul.f32 %v9116_v26, %v7737_v61  ;;  %v7814_v29 = vadd.f32 1.0, %v7806_v8 }
0x1723   : > { %v7810_v49 = vsel %vm7794_vm2, %v7802_v19, %v7786_v7  ;;  %v7796_v52 = vsub.f32 0.0, %v7780_v12  ;;  %v7805_v7 = vsel %vm7789_vm12, %v7797_v33, %v7781_v20  ;;  %v7622_v32 = vmul.f32 0.5, %v13892_v56 }
0x1724   : > { %v7803_v4 = vsub.f32 0.0, %v7787_v42  ;;  %v7818_v24 = vadd.f32 1.0, %v7810_v49  ;;  %v7808_v45 = vsel %vm7792_vm10, %v7800_v62, %v7784_v39  ;;  %v7785_v15 = vsub.f32 1.0, %v7777_v21 }
0x1725   : > { %v7816_v28 = vadd.f32 1.0, %v7808_v45  ;;  %v7804_v11 = vsel %vm7788_vm0, %v7796_v52, %v7780_v12  ;;  %v7823_v53 = vmul.f32 %v7815_v1, %v7623_v27  ;;  %v7813_v37 = vadd.f32 1.0, %v7805_v7 }
0x1726   : > { %v7811_v38 = vsel %vm7795_vm9, %v7803_v4, %v7787_v42  ;;  %v7826_v25 = vmul.f32 %v7818_v24, %v7626_v9  ;;  %v7801_v2 = vsub.f32 0.0, %v7785_v15  ;;  %v7822_v23 = vmul.f32 %v7814_v29, %v7622_v32 }
0x1727   : > { %v7819_v31 = vadd.f32 1.0, %v7811_v38  ;;  %v7824_v44 = vmul.f32 %v7816_v28, %v7624_v34  ;;  %v7812_v51 = vadd.f32 1.0, %v7804_v11  ;;  %v7821_v19 = vmul.f32 %v7813_v37, %v7621_v57 }
0x1728   : > { %v7809_v59 = vsel %vm7793_vm13, %v7801_v2, %v7785_v15  ;;  %v7830_v40 = vpack.c.bf16 %v7823_v53, %v7822_v23 }
0x1729   : > { %v7827_v55 = vmul.f32 %v7819_v31, %v7627_v30  ;;  %v7817_v47 = vadd.f32 1.0, %v7809_v59  ;;  %v7820_v41 = vmul.f32 %v7812_v51, %v7620_v48 }
0x172b   : > { %v7832_v54 = vpack.c.bf16 %v7827_v55, %v7826_v25  ;;  %v7825_v14 = vmul.f32 %v7817_v47, %v7625_v58  ;;  %v7829_v56 = vpack.c.bf16 %v7821_v19, %v7820_v41 }
0x172d   : > { %8809 = vmatpush3.bf16.msra.mxu0 %v7832_v54  ;;  %v7831_v6 = vpack.c.bf16 %v7825_v14, %v7824_v44 }
0x172e   : > { %8810 = vmatprep.subr.bf16.mxu0 %v9190_v5 }
0x1731   : > { %8811 = vmatpush3.bf16.msra.mxu0 %v7831_v6 }
0x1732   : > { %8812 = vmatprep.subr.bf16.mxu0 %v9190_v5 }
0x1735   : > { %8813 = vmatpush3.bf16.msra.mxu0 %v7830_v40 }
0x1736   : > { %8814 = vmatprep.subr.bf16.mxu0 %v9190_v5 }
0x1739   : > { %8815 = vmatpush3.bf16.msra.mxu0 %v7829_v56 }
0x173c   : > { %8817 = vmatmul.mubr.msk.bf16.vlgmr.msra.gmra.mxu0 %vm7839_vm1, %v7828_v3 }
0x17fc   : > { %v7877_v17 = vpop.f32.mrf.mxu0 }
0x17fd   : > { %v7878_v36 = vadd.f32 %v7877_v17, %v7837_v16 }
0x17fe   : > { %v8818_v5 = vpop.f32.mrf.mxu0 }
0x17ff   : > { %7884 = vst.msk [vmem:[%s512_s19] sm:$0xf] %vm7883_vm14, %v7878_v36 }
0x1800   : > { %v7880_v46 = vpop.f32.mrf.mxu0 }
0x1801   : > { %9139 = shalt.err (!%p9136_p3)
}
0x1802   : > { %s9140_s18 = scalar_lea.hbm %s14040_s17, 64  ;;  %s9144_s26 = scalar_lea.hbm %s14097_s16, 128 }
0x1803   : > { %p9141_p4 = scmp.ne.s32.totalorder %s14040_s17, %s9140_s18  ;;  %p9145_p9 = scmp.lt.s32.totalorder %s14040_s17, %s14097_s16 }
0x1804   : > { %p9146_p10 = scmp.lt.s32.totalorder %s9144_s26, %s9140_s18 }
0x1805   : > { %p9142_p7 = pnand %p9141_p4, %p9316_p5 }
0x1806   : > { %p9147_p11 = por %p9146_p10, %p9145_p9 }
0x1807   : > { %p9143_p8 = pneg %p9142_p7 }
0x1809   : > { %p9148_p12 = pnand %p9147_p11, %p9143_p8 }
0x180b   : > { %9151 = shalt.err (!%p9148_p12)
}
0x180c   : > { %8820 = dma.vmem_to_hbm [thread:$0]  (%p9316_p5), %s14042_s20, 64, %s14040_s17, %s7886_s25   ;;  %v8819_v39 = vpop.f32.mrf.mxu0 }
0x180d PF: > { %p8826_p13 = scmp.ge.s32.totalorder %s9186_s24, 2  ;;  %s7911_s29 = sand.u32 1, %s9174_s21  }
0x180e   : > { %s7912_s30 = scalar_lea.sflag [#allocation3], %s7911_s29 }
0x180f   : > { %p8823_p0 = pnand %p8826_p13, %p9320_p6 }
0x1811   : > { %p8824_p1 = pneg %p8823_p0 }
0x1813   : > { %9169 = dma.done.wait (%p8824_p1), %s7912_s30, 64  }
0x1814   : > { %9171 = vsyncadd (%p8824_p1), %s7912_s30, 4294967232  ;;  %s14370_s24 = sld [smem:[#allocation6_spill]]  ;;  %s14373_s21 = smov %s9178_s22 }
0x1815   : > { %s14371_s18 = sld [smem:[#allocation5_spill]] }
0x1816   : > { %s14372_s23 = sld [smem:[#allocation7_spill]] }
0x181a   : > { %p26_p2 = scmp.ge.s32.totalorder %s14370_s24, 4  }
0x181b   : > { %s14374_s22 = smov %s14371_s18 }
0x181c   :  { %28 = sbr.rel (!%p26_p2) target bundleno = 6 (0x6), region = 143 }
0x1821   :  { %7917 = vsyncpa [#allocation3], 1 }
0x1822   :  { %7919 = vsyncpa [#allocation3 + $0x1], 1 }

</bundles_post_ra>
